<compile_context>
chip_gen: v5e
topology: v5e:2x2
jax: 0.10.0
libtpu: 0.0.40
codegen_flags: <defaults>
</compile_context>

<pallas_src>
import numpy as np
import jax
import jax.numpy as jnp
from jax.experimental import pallas as pl
from jax.experimental.pallas import tpu as pltpu

H_GRU = 256
LIN1_OUT = 512
FEAT = 32 * 7 * 7   # 1568


def _round_up(x, m):
    return ((x + m - 1) // m) * m


# ----------------------------- Pallas kernels ------------------------------

def _conv_gemm_kernel(p_ref, w_ref, b_ref, o_ref):
    """relu(patches @ w + b): bf16 operands, f32 accumulation, bf16 out."""
    acc = jnp.dot(p_ref[...], w_ref[...], preferred_element_type=jnp.float32)
    acc = jnp.maximum(acc + b_ref[...], 0.0)
    o_ref[...] = acc.astype(o_ref.dtype)


def conv_gemm_relu(patches, w, b, *, tm_max=1024):
    """patches: (Mp, Kp) bf16, w: (Kp, Cout) bf16, b: (1, Cout) f32 -> (Mp, Cout) bf16."""
    M, K = patches.shape
    K2, Cout = w.shape
    assert K == K2
    tm = M if M <= tm_max else tm_max         # single block at small batch,
    nblk = pl.cdiv(M, tm)                     # M-tiled + parallel for big batch
    return pl.pallas_call(
        _conv_gemm_kernel,
        out_shape=jax.ShapeDtypeStruct((M, Cout), jnp.bfloat16),
        grid=(nblk,),
        in_specs=[pl.BlockSpec((tm, K), lambda i: (i, 0)),
                  pl.BlockSpec((K, Cout), lambda i: (0, 0)),
                  pl.BlockSpec((1, Cout), lambda i: (0, 0))],
        out_specs=pl.BlockSpec((tm, Cout), lambda i: (i, 0)),
        compiler_params=pltpu.CompilerParams(
            dimension_semantics=("parallel",),
            # let XLA fuse the im2col patch-build fusion into the patches
            # operand (no separate HBM materialization of the patch matrix)
            allow_input_fusion=[True, False, False]),
    )(patches, w, b)


def _head_kernel(x_ref, h_ref, m_ref, w1_ref, b1_ref,
                 wih_ref, whh_ref, bih_ref, bhh_ref,
                 wc_ref, bc_ref, val_ref, hid_ref):
    """Fused linear1(+ReLU) -> GRUCell (two direct GEMMs) -> critic (VPU)."""
    H = H_GRU
    # linear1 + ReLU (f32 accumulation)
    x1 = jnp.dot(x_ref[...], w1_ref[...], preferred_element_type=jnp.float32)
    x1 = jnp.maximum(x1 + b1_ref[...], 0.0)
    # masked previous hidden state (states * masks), kept in f32 for the blend
    h = h_ref[...] * m_ref[...]
    # GRUCell: gi = x1 @ W_ih^T, gh = h @ W_hh^T, gates combined in f32.
    # bf16 operands / f32 accumulation => bf16-level tolerance vs f32 PyTorch.
    gi = jnp.dot(x1.astype(jnp.bfloat16), wih_ref[...],
                 preferred_element_type=jnp.float32) + bih_ref[...]
    gh = jnp.dot(h.astype(jnp.bfloat16), whh_ref[...],
                 preferred_element_type=jnp.float32) + bhh_ref[...]
    r = jax.nn.sigmoid(gi[:, 0 * H:1 * H] + gh[:, 0 * H:1 * H])
    z = jax.nn.sigmoid(gi[:, 1 * H:2 * H] + gh[:, 1 * H:2 * H])
    n = jnp.tanh(gi[:, 2 * H:3 * H] + r * gh[:, 2 * H:3 * H])
    h_new = (1.0 - z) * n + z * h
    hid_ref[...] = h_new.astype(hid_ref.dtype)
    # critic head on the VPU (mul) + XLU (row reduce): no MXU pass, overlaps
    # with the surrounding gate math for free.
    val_ref[...] = (jnp.sum(h_new * wc_ref[...], axis=-1, keepdims=True)
                    + bc_ref[...]).astype(val_ref.dtype)


def fused_head(x, states, masks, params, *, tn_max=256):
    """x: (Nb, 1568) bf16 (NHWC-flattened conv3 output) -> (value, hidden) f32."""
    Nb, Din = x.shape
    H = H_GRU
    tn = Nb if Nb <= tn_max else tn_max       # batch-gridded for big rollouts
    nblk = pl.cdiv(Nb, tn)
    return pl.pallas_call(
        _head_kernel,
        out_shape=(jax.ShapeDtypeStruct((Nb, 1), jnp.float32),
                   jax.ShapeDtypeStruct((Nb, H), jnp.float32)),
        grid=(nblk,),
        in_specs=[pl.BlockSpec((tn, Din), lambda i: (i, 0)),
                  pl.BlockSpec((tn, H), lambda i: (i, 0)),
                  pl.BlockSpec((tn, 1), lambda i: (i, 0)),
                  # weights: constant block index -> stay VMEM-resident
                  pl.BlockSpec((Din, LIN1_OUT), lambda i: (0, 0)),
                  pl.BlockSpec((1, LIN1_OUT), lambda i: (0, 0)),
                  pl.BlockSpec((LIN1_OUT, 3 * H), lambda i: (0, 0)),
                  pl.BlockSpec((H, 3 * H), lambda i: (0, 0)),
                  pl.BlockSpec((1, 3 * H), lambda i: (0, 0)),
                  pl.BlockSpec((1, 3 * H), lambda i: (0, 0)),
                  pl.BlockSpec((1, H), lambda i: (0, 0)),
                  pl.BlockSpec((1, 1), lambda i: (0, 0))],
        out_specs=(pl.BlockSpec((tn, 1), lambda i: (i, 0)),
                   pl.BlockSpec((tn, H), lambda i: (i, 0))),
        compiler_params=pltpu.CompilerParams(
            dimension_semantics=("parallel",)),
    )(x, states, masks,
      params["linear1_w"], params["linear1_b"],
      params["gru_w_ih"], params["gru_w_hh"],
      params["gru_b_ih"], params["gru_b_hh"],
      params["critic_w"], params["critic_b"])


# ------------------------------ glue (host) --------------------------------

def _im2col_nhwc(x, kh, kw, sh, sw, *, row_align=16, k_align=128):
    """x: (N,H,W,C) bf16 -> (Mp, Kp) patches, columns ordered (i, j, c)."""
    N, H, W, C = x.shape
    oh = (H - kh) // sh + 1
    ow = (W - kw) // sw + 1
    cols = []
    for i in range(kh):
        for j in range(kw):
            cols.append(x[:, i:i + sh * oh:sh, j:j + sw * ow:sw, :])
    p = jnp.stack(cols, axis=3).reshape(N * oh * ow, kh * kw * C)
    M, K = N * oh * ow, kh * kw * C
    Mp, Kp = _round_up(M, row_align), _round_up(K, k_align)
    if (Mp, Kp) != (M, K):
        p = jnp.pad(p, ((0, Mp - M), (0, Kp - K)))
    return p, oh, ow, M


def _im2col_nchw(x, kh, kw, sh, sw, *, row_align=16, k_align=128):
    """x: (N,C,H,W) bf16 -> (Mp, Kp) patches, columns ordered (c, i, j).
    No separate NCHW->NHWC transpose; the permutation lives in this fusion
    (and in conv1_w's row order)."""
    N, C, H, W = x.shape
    oh = (H - kh) // sh + 1
    ow = (W - kw) // sw + 1
    cols = []
    for i in range(kh):
        for j in range(kw):
            cols.append(x[:, :, i:i + sh * oh:sh, j:j + sw * ow:sw])  # (N,C,oh,ow)
    p = jnp.stack(cols, axis=2)                       # (N, C, kh*kw, oh, ow)
    p = p.transpose(0, 3, 4, 1, 2).reshape(N * oh * ow, C * kh * kw)
    M, K = N * oh * ow, C * kh * kw
    Mp, Kp = _round_up(M, row_align), _round_up(K, k_align)
    if (Mp, Kp) != (M, K):
        p = jnp.pad(p, ((0, Mp - M), (0, Kp - K)))
    return p, oh, ow, M


def conv2d_relu_nchw(x_nchw, w_km, b, kh, kw, stride):
    patches, oh, ow, M = _im2col_nchw(x_nchw, kh, kw, stride, stride)
    y = conv_gemm_relu(patches, w_km, b)
    return y[:M].reshape(x_nchw.shape[0], oh, ow, -1)      # NHWC out


def conv2d_relu_nhwc(x_nhwc, w_km, b, kh, kw, stride):
    patches, oh, ow, M = _im2col_nhwc(x_nhwc, kh, kw, stride, stride)
    y = conv_gemm_relu(patches, w_km, b)
    return y[:M].reshape(x_nhwc.shape[0], oh, ow, -1)      # NHWC out


def _orthogonal(key, shape, gain=1.0):
    rows = shape[0]
    cols = int(np.prod(shape[1:]))
    flat = jax.random.normal(key, (rows, cols), dtype=jnp.float32)
    if rows < cols:
        flat = flat.T
    q, r = jnp.linalg.qr(flat)
    q = q * jnp.sign(jnp.diag(r))
    if rows < cols:
        q = q.T
    return (gain * q).reshape(shape).astype(jnp.float32)


def init_params(num_inputs):
    """All per-step weight transforms are done HERE, once."""
    keys = jax.random.split(jax.random.PRNGKey(42), 7)
    g = float(np.sqrt(2.0))  # nn.init.calculate_gain('relu')

    def pad_rows(w, k_align=128):
        K = w.shape[0]
        Kp = _round_up(K, k_align)
        return jnp.pad(w, ((0, Kp - K), (0, 0))) if Kp != K else w

    def conv_pack_nhwc(w_oihw, scale=1.0):
        # OIHW -> (KH*KW*Cin, Cout), row order (i, j, c) matching _im2col_nhwc.
        co, ci, kh, kw = w_oihw.shape
        w = jnp.transpose(w_oihw, (2, 3, 1, 0)).reshape(kh * kw * ci, co)
        return pad_rows(w * scale).astype(jnp.bfloat16)

    def conv_pack_nchw(w_oihw, scale=1.0):
        # OIHW -> (Cin*KH*KW, Cout), row order (c, i, j) matching _im2col_nchw.
        co, ci, kh, kw = w_oihw.shape
        w = jnp.transpose(w_oihw, (1, 2, 3, 0)).reshape(ci * kh * kw, co)
        return pad_rows(w * scale).astype(jnp.bfloat16)

    p = {}
    p["conv1_w"] = conv_pack_nchw(_orthogonal(keys[0], (32, num_inputs, 8, 8), g),
                                  scale=1.0 / 255.0)     # fold `inputs / 255` here
    p["conv1_b"] = jnp.zeros((1, 32), jnp.float32)
    p["conv2_w"] = conv_pack_nhwc(_orthogonal(keys[1], (64, 32, 4, 4), g))
    p["conv2_b"] = jnp.zeros((1, 64), jnp.float32)
    p["conv3_w"] = conv_pack_nhwc(_orthogonal(keys[2], (32, 64, 3, 3), g))  # K 576->640
    p["conv3_b"] = jnp.zeros((1, 32), jnp.float32)

    # linear1: PyTorch weight (512, 32*7*7) expects NCHW-flattened features.
    # Fold the NHWC->NCHW flatten permutation into the row order and transpose.
    lw = _orthogonal(keys[3], (LIN1_OUT, FEAT), g)
    lw = lw.reshape(LIN1_OUT, 32, 7, 7).transpose(0, 2, 3, 1).reshape(LIN1_OUT, FEAT)
    p["linear1_w"] = lw.T.astype(jnp.bfloat16)            # (1568, 512), rows = (y, x, c)
    p["linear1_b"] = jnp.zeros((1, LIN1_OUT), jnp.float32)

    # GRU: plain transposed weights (no zero-padded stacking), columns [r|z|n].
    H = H_GRU
    w_ih = _orthogonal(keys[4], (3 * H, LIN1_OUT))
    w_hh = _orthogonal(keys[5], (3 * H, H))
    p["gru_w_ih"] = w_ih.T.astype(jnp.bfloat16)            # (512, 768)
    p["gru_w_hh"] = w_hh.T.astype(jnp.bfloat16)            # (256, 768)
    p["gru_b_ih"] = jnp.zeros((1, 3 * H), jnp.float32)
    p["gru_b_hh"] = jnp.zeros((1, 3 * H), jnp.float32)

    p["critic_w"] = _orthogonal(keys[6], (1, H)).astype(jnp.float32)  # (1, 256) row
    p["critic_b"] = jnp.zeros((1, 1), jnp.float32)
    return p


def cnn_policy_forward(params, inputs_nchw, states, masks):
    """Matches CNNPolicy.forward for act_func='relu', use_gru=True,
    inputs.size(0) == states.size(0) (single-step 'act' path)."""
    # TODO(synk): maxout / lwta activations and the multi-step GRU unroll path
    # (inputs.size(0) != states.size(0)) are not implemented.
    assert inputs_nchw.shape[0] == states.shape[0], (
        "multi-step GRU unroll path (inputs.size(0) != states.size(0)) not implemented")
    x = inputs_nchw.astype(jnp.bfloat16)                                 # stays NCHW
    x = conv2d_relu_nchw(x, params["conv1_w"], params["conv1_b"], 8, 8, 4)  # (N,20,20,32)
    x = conv2d_relu_nhwc(x, params["conv2_w"], params["conv2_b"], 4, 4, 2)  # (N, 9, 9,64)
    x = conv2d_relu_nhwc(x, params["conv3_w"], params["conv3_b"], 3, 3, 1)  # (N, 7, 7,32)
    N = x.shape[0]
    # NHWC flatten (free, contiguous); the NCHW permutation lives in linear1_w rows.
    x = x.reshape(N, FEAT)
    value, hidden = fused_head(x, states, masks, params)
    return value, hidden, hidden


if __name__ == "__main__":
    key = jax.random.PRNGKey(0)
    k1, k2 = jax.random.split(key)
    # 84x84 input is what the conv stack (8/4, 4/2, 3/1 -> 7x7) implies.
    N, C, H, W = 2, 4, 84, 84
    inputs = jax.random.uniform(k1, (N, C, H, W), jnp.float32, 0.0, 255.0)
    states = jax.random.normal(k2, (N, 256), jnp.float32)
    masks = jnp.ones((N, 1), jnp.float32)

    params = init_params(C)
    value, x, new_states = jax.jit(cnn_policy_forward)(params, inputs, states, masks)
    jax.block_until_ready((value, x, new_states))

    assert value.shape == (N, 1)
    assert x.shape == (N, 256)
    assert new_states.shape == (N, 256)
    assert bool(jnp.all(jnp.isfinite(value))) and bool(jnp.all(jnp.isfinite(x)))
    print("KERNEL_OK")
</pallas_src>

<mosaic_0001>
module attributes {stable_mosaic.version = 11 : i64} {
  func.func @_conv_gemm_kernel(%arg0: i32, %arg1: memref<800x256xbf16, #tpu.memory_space<vmem>>, %arg2: memref<256x32xbf16, #tpu.memory_space<vmem>>, %arg3: memref<1x32xf32, #tpu.memory_space<vmem>>, %arg4: memref<800x32xbf16, #tpu.memory_space<vmem>>) attributes {dimension_semantics = [#tpu.dimension_semantics<parallel>], iteration_bounds = array<i64: 1>, scalar_prefetch = 0 : i64, scratch_operands = 0 : i64, tpu.core_type = #tpu.core_type<tc>, window_params = [{transform_indices = @transform_0, window_bounds = array<i64: 800, 256>}, {pipeline_mode = #tpu.pipeline_mode<synchronous>, transform_indices = @transform_1, window_bounds = array<i64: 256, 32>}, {pipeline_mode = #tpu.pipeline_mode<synchronous>, transform_indices = @transform_2, window_bounds = array<i64: 1, 32>}, {transform_indices = @transform_3, window_bounds = array<i64: 800, 32>}]} {
    %c0 = arith.constant 0 : index
    %c0_0 = arith.constant 0 : index
    %0 = vector.load %arg1[%c0, %c0_0] : memref<800x256xbf16, #tpu.memory_space<vmem>>, vector<800x256xbf16>
    %c0_1 = arith.constant 0 : index
    %c0_2 = arith.constant 0 : index
    %1 = vector.load %arg2[%c0_1, %c0_2] : memref<256x32xbf16, #tpu.memory_space<vmem>>, vector<256x32xbf16>
    %cst = arith.constant dense<0.000000e+00> : vector<800x32xf32>
    %2 = tpu.matmul %0, %1, %cst {dimension_numbers = #tpu.dot_dimension_numbers<[1], [0], [0], [1], [0, 0, 1, 1], [], []>} : vector<800x256xbf16>, vector<256x32xbf16>, vector<800x32xf32> -> vector<800x32xf32>
    %c0_3 = arith.constant 0 : index
    %c0_4 = arith.constant 0 : index
    %3 = vector.load %arg3[%c0_3, %c0_4] : memref<1x32xf32, #tpu.memory_space<vmem>>, vector<1x32xf32>
    %4 = vector.broadcast %3 : vector<1x32xf32> to vector<800x32xf32>
    %5 = arith.addf %2, %4 : vector<800x32xf32>
    %cst_5 = arith.constant 0.000000e+00 : f32
    %6 = vector.broadcast %cst_5 : f32 to vector<800x32xf32>
    %7 = arith.maximumf %5, %6 : vector<800x32xf32>
    %8 = arith.truncf %7 : vector<800x32xf32> to vector<800x32xbf16>
    %c0_6 = arith.constant 0 : index
    %c0_7 = arith.constant 0 : index
    %9 = vector.load %arg4[%c0_6, %c0_7] : memref<800x32xbf16, #tpu.memory_space<vmem>>, vector<800x32xbf16>
    tpu.vector_store %arg4[%c0_6, %c0_7], %8 {strides = array<i32>} : memref<800x32xbf16, #tpu.memory_space<vmem>>, vector<800x32xbf16>,
    return
  }
  func.func @transform_0(%arg0: i32) -> (i32, i32) {
    %c0_i32 = arith.constant 0 : i32
    %c0_i32_0 = arith.constant 0 : i32
    return %arg0, %c0_i32 : i32, i32
  }
  func.func @transform_1(%arg0: i32) -> (i32, i32) {
    %c0_i32 = arith.constant 0 : i32
    %c0_i32_0 = arith.constant 0 : i32
    %c0_i32_1 = arith.constant 0 : i32
    return %c0_i32, %c0_i32_0 : i32, i32
  }
  func.func @transform_2(%arg0: i32) -> (i32, i32) {
    %c0_i32 = arith.constant 0 : i32
    %c0_i32_0 = arith.constant 0 : i32
    %c0_i32_1 = arith.constant 0 : i32
    return %c0_i32, %c0_i32_0 : i32, i32
  }
  func.func @transform_3(%arg0: i32) -> (i32, i32) {
    %c0_i32 = arith.constant 0 : i32
    %c0_i32_0 = arith.constant 0 : i32
    return %arg0, %c0_i32 : i32, i32
  }
}

module attributes {stable_mosaic.version = 11 : i64} {
  func.func @_conv_gemm_kernel(%arg0: i32, %arg1: memref<176x512xbf16, #tpu.memory_space<vmem>>, %arg2: memref<512x64xbf16, #tpu.memory_space<vmem>>, %arg3: memref<1x64xf32, #tpu.memory_space<vmem>>, %arg4: memref<176x64xbf16, #tpu.memory_space<vmem>>) attributes {dimension_semantics = [#tpu.dimension_semantics<parallel>], iteration_bounds = array<i64: 1>, scalar_prefetch = 0 : i64, scratch_operands = 0 : i64, tpu.core_type = #tpu.core_type<tc>, window_params = [{transform_indices = @transform_0, window_bounds = array<i64: 176, 512>}, {pipeline_mode = #tpu.pipeline_mode<synchronous>, transform_indices = @transform_1, window_bounds = array<i64: 512, 64>}, {pipeline_mode = #tpu.pipeline_mode<synchronous>, transform_indices = @transform_2, window_bounds = array<i64: 1, 64>}, {transform_indices = @transform_3, window_bounds = array<i64: 176, 64>}]} {
    %c0 = arith.constant 0 : index
    %c0_0 = arith.constant 0 : index
    %0 = vector.load %arg1[%c0, %c0_0] : memref<176x512xbf16, #tpu.memory_space<vmem>>, vector<176x512xbf16>
    %c0_1 = arith.constant 0 : index
    %c0_2 = arith.constant 0 : index
    %1 = vector.load %arg2[%c0_1, %c0_2] : memref<512x64xbf16, #tpu.memory_space<vmem>>, vector<512x64xbf16>
    %cst = arith.constant dense<0.000000e+00> : vector<176x64xf32>
    %2 = tpu.matmul %0, %1, %cst {dimension_numbers = #tpu.dot_dimension_numbers<[1], [0], [0], [1], [0, 0, 1, 1], [], []>} : vector<176x512xbf16>, vector<512x64xbf16>, vector<176x64xf32> -> vector<176x64xf32>
    %c0_3 = arith.constant 0 : index
    %c0_4 = arith.constant 0 : index
    %3 = vector.load %arg3[%c0_3, %c0_4] : memref<1x64xf32, #tpu.memory_space<vmem>>, vector<1x64xf32>
    %4 = vector.broadcast %3 : vector<1x64xf32> to vector<176x64xf32>
    %5 = arith.addf %2, %4 : vector<176x64xf32>
    %cst_5 = arith.constant 0.000000e+00 : f32
    %6 = vector.broadcast %cst_5 : f32 to vector<176x64xf32>
    %7 = arith.maximumf %5, %6 : vector<176x64xf32>
    %8 = arith.truncf %7 : vector<176x64xf32> to vector<176x64xbf16>
    %c0_6 = arith.constant 0 : index
    %c0_7 = arith.constant 0 : index
    %9 = vector.load %arg4[%c0_6, %c0_7] : memref<176x64xbf16, #tpu.memory_space<vmem>>, vector<176x64xbf16>
    tpu.vector_store %arg4[%c0_6, %c0_7], %8 {strides = array<i32>} : memref<176x64xbf16, #tpu.memory_space<vmem>>, vector<176x64xbf16>,
    return
  }
  func.func @transform_0(%arg0: i32) -> (i32, i32) {
    %c0_i32 = arith.constant 0 : i32
    %c0_i32_0 = arith.constant 0 : i32
    return %arg0, %c0_i32 : i32, i32
  }
  func.func @transform_1(%arg0: i32) -> (i32, i32) {
    %c0_i32 = arith.constant 0 : i32
    %c0_i32_0 = arith.constant 0 : i32
    %c0_i32_1 = arith.constant 0 : i32
    return %c0_i32, %c0_i32_0 : i32, i32
  }
  func.func @transform_2(%arg0: i32) -> (i32, i32) {
    %c0_i32 = arith.constant 0 : i32
    %c0_i32_0 = arith.constant 0 : i32
    %c0_i32_1 = arith.constant 0 : i32
    return %c0_i32, %c0_i32_0 : i32, i32
  }
  func.func @transform_3(%arg0: i32) -> (i32, i32) {
    %c0_i32 = arith.constant 0 : i32
    %c0_i32_0 = arith.constant 0 : i32
    return %arg0, %c0_i32 : i32, i32
  }
}

module attributes {stable_mosaic.version = 11 : i64} {
  func.func @_conv_gemm_kernel(%arg0: i32, %arg1: memref<112x640xbf16, #tpu.memory_space<vmem>>, %arg2: memref<640x32xbf16, #tpu.memory_space<vmem>>, %arg3: memref<1x32xf32, #tpu.memory_space<vmem>>, %arg4: memref<112x32xbf16, #tpu.memory_space<vmem>>) attributes {dimension_semantics = [#tpu.dimension_semantics<parallel>], iteration_bounds = array<i64: 1>, scalar_prefetch = 0 : i64, scratch_operands = 0 : i64, tpu.core_type = #tpu.core_type<tc>, window_params = [{transform_indices = @transform_0, window_bounds = array<i64: 112, 640>}, {pipeline_mode = #tpu.pipeline_mode<synchronous>, transform_indices = @transform_1, window_bounds = array<i64: 640, 32>}, {pipeline_mode = #tpu.pipeline_mode<synchronous>, transform_indices = @transform_2, window_bounds = array<i64: 1, 32>}, {transform_indices = @transform_3, window_bounds = array<i64: 112, 32>}]} {
    %c0 = arith.constant 0 : index
    %c0_0 = arith.constant 0 : index
    %0 = vector.load %arg1[%c0, %c0_0] : memref<112x640xbf16, #tpu.memory_space<vmem>>, vector<112x640xbf16>
    %c0_1 = arith.constant 0 : index
    %c0_2 = arith.constant 0 : index
    %1 = vector.load %arg2[%c0_1, %c0_2] : memref<640x32xbf16, #tpu.memory_space<vmem>>, vector<640x32xbf16>
    %cst = arith.constant dense<0.000000e+00> : vector<112x32xf32>
    %2 = tpu.matmul %0, %1, %cst {dimension_numbers = #tpu.dot_dimension_numbers<[1], [0], [0], [1], [0, 0, 1, 1], [], []>} : vector<112x640xbf16>, vector<640x32xbf16>, vector<112x32xf32> -> vector<112x32xf32>
    %c0_3 = arith.constant 0 : index
    %c0_4 = arith.constant 0 : index
    %3 = vector.load %arg3[%c0_3, %c0_4] : memref<1x32xf32, #tpu.memory_space<vmem>>, vector<1x32xf32>
    %4 = vector.broadcast %3 : vector<1x32xf32> to vector<112x32xf32>
    %5 = arith.addf %2, %4 : vector<112x32xf32>
    %cst_5 = arith.constant 0.000000e+00 : f32
    %6 = vector.broadcast %cst_5 : f32 to vector<112x32xf32>
    %7 = arith.maximumf %5, %6 : vector<112x32xf32>
    %8 = arith.truncf %7 : vector<112x32xf32> to vector<112x32xbf16>
    %c0_6 = arith.constant 0 : index
    %c0_7 = arith.constant 0 : index
    %9 = vector.load %arg4[%c0_6, %c0_7] : memref<112x32xbf16, #tpu.memory_space<vmem>>, vector<112x32xbf16>
    tpu.vector_store %arg4[%c0_6, %c0_7], %8 {strides = array<i32>} : memref<112x32xbf16, #tpu.memory_space<vmem>>, vector<112x32xbf16>,
    return
  }
  func.func @transform_0(%arg0: i32) -> (i32, i32) {
    %c0_i32 = arith.constant 0 : i32
    %c0_i32_0 = arith.constant 0 : i32
    return %arg0, %c0_i32 : i32, i32
  }
  func.func @transform_1(%arg0: i32) -> (i32, i32) {
    %c0_i32 = arith.constant 0 : i32
    %c0_i32_0 = arith.constant 0 : i32
    %c0_i32_1 = arith.constant 0 : i32
    return %c0_i32, %c0_i32_0 : i32, i32
  }
  func.func @transform_2(%arg0: i32) -> (i32, i32) {
    %c0_i32 = arith.constant 0 : i32
    %c0_i32_0 = arith.constant 0 : i32
    %c0_i32_1 = arith.constant 0 : i32
    return %c0_i32, %c0_i32_0 : i32, i32
  }
  func.func @transform_3(%arg0: i32) -> (i32, i32) {
    %c0_i32 = arith.constant 0 : i32
    %c0_i32_0 = arith.constant 0 : i32
    return %arg0, %c0_i32 : i32, i32
  }
}

module attributes {stable_mosaic.version = 11 : i64} {
  func.func @_head_kernel(%arg0: i32, %arg1: memref<2x1568xbf16, #tpu.memory_space<vmem>>, %arg2: memref<2x256xf32, #tpu.memory_space<vmem>>, %arg3: memref<2x1xf32, #tpu.memory_space<vmem>>, %arg4: memref<1568x512xbf16, #tpu.memory_space<vmem>>, %arg5: memref<1x512xf32, #tpu.memory_space<vmem>>, %arg6: memref<512x768xbf16, #tpu.memory_space<vmem>>, %arg7: memref<256x768xbf16, #tpu.memory_space<vmem>>, %arg8: memref<1x768xf32, #tpu.memory_space<vmem>>, %arg9: memref<1x768xf32, #tpu.memory_space<vmem>>, %arg10: memref<1x256xf32, #tpu.memory_space<vmem>>, %arg11: memref<1x1xf32, #tpu.memory_space<vmem>>, %arg12: memref<2x1xf32, #tpu.memory_space<vmem>>, %arg13: memref<2x256xf32, #tpu.memory_space<vmem>>) attributes {dimension_semantics = [#tpu.dimension_semantics<parallel>], iteration_bounds = array<i64: 1>, scalar_prefetch = 0 : i64, scratch_operands = 0 : i64, tpu.core_type = #tpu.core_type<tc>, window_params = [{transform_indices = @transform_0, window_bounds = array<i64: 2, 1568>}, {transform_indices = @transform_1, window_bounds = array<i64: 2, 256>}, {transform_indices = @transform_2, window_bounds = array<i64: 2, 1>}, {pipeline_mode = #tpu.pipeline_mode<synchronous>, transform_indices = @transform_3, window_bounds = array<i64: 1568, 512>}, {pipeline_mode = #tpu.pipeline_mode<synchronous>, transform_indices = @transform_4, window_bounds = array<i64: 1, 512>}, {pipeline_mode = #tpu.pipeline_mode<synchronous>, transform_indices = @transform_5, window_bounds = array<i64: 512, 768>}, {pipeline_mode = #tpu.pipeline_mode<synchronous>, transform_indices = @transform_6, window_bounds = array<i64: 256, 768>}, {pipeline_mode = #tpu.pipeline_mode<synchronous>, transform_indices = @transform_7, window_bounds = array<i64: 1, 768>}, {pipeline_mode = #tpu.pipeline_mode<synchronous>, transform_indices = @transform_8, window_bounds = array<i64: 1, 768>}, {pipeline_mode = #tpu.pipeline_mode<synchronous>, transform_indices = @transform_9, window_bounds = array<i64: 1, 256>}, {pipeline_mode = #tpu.pipeline_mode<synchronous>, transform_indices = @transform_10, window_bounds = array<i64: 1, 1>}, {transform_indices = @transform_11, window_bounds = array<i64: 2, 1>}, {transform_indices = @transform_12, window_bounds = array<i64: 2, 256>}]} {
    %c0 = arith.constant 0 : index
    %c0_0 = arith.constant 0 : index
    %0 = vector.load %arg1[%c0, %c0_0] : memref<2x1568xbf16, #tpu.memory_space<vmem>>, vector<2x1568xbf16>
    %c0_1 = arith.constant 0 : index
    %c0_2 = arith.constant 0 : index
    %1 = vector.load %arg4[%c0_1, %c0_2] : memref<1568x512xbf16, #tpu.memory_space<vmem>>, vector<1568x512xbf16>
    %cst = arith.constant dense<0.000000e+00> : vector<2x512xf32>
    %2 = tpu.matmul %0, %1, %cst {dimension_numbers = #tpu.dot_dimension_numbers<[1], [0], [0], [1], [0, 0, 1, 1], [], []>} : vector<2x1568xbf16>, vector<1568x512xbf16>, vector<2x512xf32> -> vector<2x512xf32>
    %c0_3 = arith.constant 0 : index
    %c0_4 = arith.constant 0 : index
    %3 = vector.load %arg5[%c0_3, %c0_4] : memref<1x512xf32, #tpu.memory_space<vmem>>, vector<1x512xf32>
    %4 = vector.broadcast %3 : vector<1x512xf32> to vector<2x512xf32>
    %5 = arith.addf %2, %4 : vector<2x512xf32>
    %cst_5 = arith.constant 0.000000e+00 : f32
    %6 = vector.broadcast %cst_5 : f32 to vector<2x512xf32>
    %7 = arith.maximumf %5, %6 : vector<2x512xf32>
    %c0_6 = arith.constant 0 : index
    %c0_7 = arith.constant 0 : index
    %8 = vector.load %arg2[%c0_6, %c0_7] : memref<2x256xf32, #tpu.memory_space<vmem>>, vector<2x256xf32>
    %c0_8 = arith.constant 0 : index
    %c0_9 = arith.constant 0 : index
    %9 = vector.load %arg3[%c0_8, %c0_9] : memref<2x1xf32, #tpu.memory_space<vmem>>, vector<2x1xf32>
    %10 = vector.broadcast %9 : vector<2x1xf32> to vector<2x256xf32>
    %11 = arith.mulf %8, %10 : vector<2x256xf32>
    %12 = arith.truncf %7 : vector<2x512xf32> to vector<2x512xbf16>
    %c0_10 = arith.constant 0 : index
    %c0_11 = arith.constant 0 : index
    %13 = vector.load %arg6[%c0_10, %c0_11] : memref<512x768xbf16, #tpu.memory_space<vmem>>, vector<512x768xbf16>
    %cst_12 = arith.constant dense<0.000000e+00> : vector<2x768xf32>
    %14 = tpu.matmul %12, %13, %cst_12 {dimension_numbers = #tpu.dot_dimension_numbers<[1], [0], [0], [1], [0, 0, 1, 1], [], []>} : vector<2x512xbf16>, vector<512x768xbf16>, vector<2x768xf32> -> vector<2x768xf32>
    %c0_13 = arith.constant 0 : index
    %c0_14 = arith.constant 0 : index
    %15 = vector.load %arg8[%c0_13, %c0_14] : memref<1x768xf32, #tpu.memory_space<vmem>>, vector<1x768xf32>
    %16 = vector.broadcast %15 : vector<1x768xf32> to vector<2x768xf32>
    %17 = arith.addf %14, %16 : vector<2x768xf32>
    %18 = arith.truncf %11 : vector<2x256xf32> to vector<2x256xbf16>
    %c0_15 = arith.constant 0 : index
    %c0_16 = arith.constant 0 : index
    %19 = vector.load %arg7[%c0_15, %c0_16] : memref<256x768xbf16, #tpu.memory_space<vmem>>, vector<256x768xbf16>
    %cst_17 = arith.constant dense<0.000000e+00> : vector<2x768xf32>
    %20 = tpu.matmul %18, %19, %cst_17 {dimension_numbers = #tpu.dot_dimension_numbers<[1], [0], [0], [1], [0, 0, 1, 1], [], []>} : vector<2x256xbf16>, vector<256x768xbf16>, vector<2x768xf32> -> vector<2x768xf32>
    %c0_18 = arith.constant 0 : index
    %c0_19 = arith.constant 0 : index
    %21 = vector.load %arg9[%c0_18, %c0_19] : memref<1x768xf32, #tpu.memory_space<vmem>>, vector<1x768xf32>
    %22 = vector.broadcast %21 : vector<1x768xf32> to vector<2x768xf32>
    %23 = arith.addf %20, %22 : vector<2x768xf32>
    %24 = vector.extract_strided_slice %17 {offsets = [0, 0], sizes = [2, 256], strides = [1, 1]} : vector<2x768xf32> to vector<2x256xf32>
    %25 = vector.extract_strided_slice %23 {offsets = [0, 0], sizes = [2, 256], strides = [1, 1]} : vector<2x768xf32> to vector<2x256xf32>
    %26 = arith.addf %24, %25 : vector<2x256xf32>
    %27 = arith.negf %26 : vector<2x256xf32>
    %28 = math.exp %27 : vector<2x256xf32>
    %cst_20 = arith.constant 1.000000e+00 : f32
    %29 = vector.broadcast %cst_20 : f32 to vector<2x256xf32>
    %30 = arith.addf %29, %28 : vector<2x256xf32>
    %31 = arith.divf %29, %30 : vector<2x256xf32>
    %32 = vector.extract_strided_slice %17 {offsets = [0, 256], sizes = [2, 256], strides = [1, 1]} : vector<2x768xf32> to vector<2x256xf32>
    %33 = vector.extract_strided_slice %23 {offsets = [0, 256], sizes = [2, 256], strides = [1, 1]} : vector<2x768xf32> to vector<2x256xf32>
    %34 = arith.addf %32, %33 : vector<2x256xf32>
    %35 = arith.negf %34 : vector<2x256xf32>
    %36 = math.exp %35 : vector<2x256xf32>
    %cst_21 = arith.constant 1.000000e+00 : f32
    %37 = vector.broadcast %cst_21 : f32 to vector<2x256xf32>
    %38 = arith.addf %37, %36 : vector<2x256xf32>
    %39 = arith.divf %37, %38 : vector<2x256xf32>
    %40 = vector.extract_strided_slice %17 {offsets = [0, 512], sizes = [2, 256], strides = [1, 1]} : vector<2x768xf32> to vector<2x256xf32>
    %41 = vector.extract_strided_slice %23 {offsets = [0, 512], sizes = [2, 256], strides = [1, 1]} : vector<2x768xf32> to vector<2x256xf32>
    %42 = arith.mulf %31, %41 : vector<2x256xf32>
    %43 = arith.addf %40, %42 : vector<2x256xf32>
    %44 = math.tanh %43 : vector<2x256xf32>
    %cst_22 = arith.constant 1.000000e+00 : f32
    %45 = vector.broadcast %cst_22 : f32 to vector<2x256xf32>
    %46 = arith.subf %45, %39 : vector<2x256xf32>
    %47 = arith.mulf %46, %44 : vector<2x256xf32>
    %48 = arith.mulf %39, %11 : vector<2x256xf32>
    %49 = arith.addf %47, %48 : vector<2x256xf32>
    %c0_23 = arith.constant 0 : index
    %c0_24 = arith.constant 0 : index
    %50 = vector.load %arg13[%c0_23, %c0_24] : memref<2x256xf32, #tpu.memory_space<vmem>>, vector<2x256xf32>
    tpu.vector_store %arg13[%c0_23, %c0_24], %49 {strides = array<i32>} : memref<2x256xf32, #tpu.memory_space<vmem>>, vector<2x256xf32>,
    %c0_25 = arith.constant 0 : index
    %c0_26 = arith.constant 0 : index
    %51 = vector.load %arg10[%c0_25, %c0_26] : memref<1x256xf32, #tpu.memory_space<vmem>>, vector<1x256xf32>
    %52 = vector.broadcast %51 : vector<1x256xf32> to vector<2x256xf32>
    %53 = arith.mulf %49, %52 : vector<2x256xf32>
    %cst_27 = arith.constant dense<0.000000e+00> : vector<2xf32>
    %54 = vector.multi_reduction <add>, %53, %cst_27 [1] : vector<2x256xf32> to vector<2xf32>
    %55 = vector.shape_cast %54 : vector<2xf32> to vector<2x1xf32>
    %c0_28 = arith.constant 0 : index
    %c0_29 = arith.constant 0 : index
    %56 = vector.load %arg11[%c0_28, %c0_29] : memref<1x1xf32, #tpu.memory_space<vmem>>, vector<1x1xf32>
    %57 = vector.broadcast %56 : vector<1x1xf32> to vector<2x1xf32>
    %58 = arith.addf %55, %57 : vector<2x1xf32>
    %c0_30 = arith.constant 0 : index
    %c0_31 = arith.constant 0 : index
    %59 = vector.load %arg12[%c0_30, %c0_31] : memref<2x1xf32, #tpu.memory_space<vmem>>, vector<2x1xf32>
    tpu.vector_store %arg12[%c0_30, %c0_31], %58 {strides = array<i32>} : memref<2x1xf32, #tpu.memory_space<vmem>>, vector<2x1xf32>,
    return
  }
  func.func @transform_0(%arg0: i32) -> (i32, i32) {
    %c0_i32 = arith.constant 0 : i32
    %c0_i32_0 = arith.constant 0 : i32
    return %arg0, %c0_i32 : i32, i32
  }
  func.func @transform_1(%arg0: i32) -> (i32, i32) {
    %c0_i32 = arith.constant 0 : i32
    %c0_i32_0 = arith.constant 0 : i32
    return %arg0, %c0_i32 : i32, i32
  }
  func.func @transform_2(%arg0: i32) -> (i32, i32) {
    %c0_i32 = arith.constant 0 : i32
    %c0_i32_0 = arith.constant 0 : i32
    return %arg0, %c0_i32 : i32, i32
  }
  func.func @transform_3(%arg0: i32) -> (i32, i32) {
    %c0_i32 = arith.constant 0 : i32
    %c0_i32_0 = arith.constant 0 : i32
    %c0_i32_1 = arith.constant 0 : i32
    return %c0_i32, %c0_i32_0 : i32, i32
  }
  func.func @transform_4(%arg0: i32) -> (i32, i32) {
    %c0_i32 = arith.constant 0 : i32
    %c0_i32_0 = arith.constant 0 : i32
    %c0_i32_1 = arith.constant 0 : i32
    return %c0_i32, %c0_i32_0 : i32, i32
  }
  func.func @transform_5(%arg0: i32) -> (i32, i32) {
    %c0_i32 = arith.constant 0 : i32
    %c0_i32_0 = arith.constant 0 : i32
    %c0_i32_1 = arith.constant 0 : i32
    return %c0_i32, %c0_i32_0 : i32, i32
  }
  func.func @transform_6(%arg0: i32) -> (i32, i32) {
    %c0_i32 = arith.constant 0 : i32
    %c0_i32_0 = arith.constant 0 : i32
    %c0_i32_1 = arith.constant 0 : i32
    return %c0_i32, %c0_i32_0 : i32, i32
  }
  func.func @transform_7(%arg0: i32) -> (i32, i32) {
    %c0_i32 = arith.constant 0 : i32
    %c0_i32_0 = arith.constant 0 : i32
    %c0_i32_1 = arith.constant 0 : i32
    return %c0_i32, %c0_i32_0 : i32, i32
  }
  func.func @transform_8(%arg0: i32) -> (i32, i32) {
    %c0_i32 = arith.constant 0 : i32
    %c0_i32_0 = arith.constant 0 : i32
    %c0_i32_1 = arith.constant 0 : i32
    return %c0_i32, %c0_i32_0 : i32, i32
  }
  func.func @transform_9(%arg0: i32) -> (i32, i32) {
    %c0_i32 = arith.constant 0 : i32
    %c0_i32_0 = arith.constant 0 : i32
    %c0_i32_1 = arith.constant 0 : i32
    return %c0_i32, %c0_i32_0 : i32, i32
  }
  func.func @transform_10(%arg0: i32) -> (i32, i32) {
    %c0_i32 = arith.constant 0 : i32
    %c0_i32_0 = arith.constant 0 : i32
    %c0_i32_1 = arith.constant 0 : i32
    return %c0_i32, %c0_i32_0 : i32, i32
  }
  func.func @transform_11(%arg0: i32) -> (i32, i32) {
    %c0_i32 = arith.constant 0 : i32
    %c0_i32_0 = arith.constant 0 : i32
    return %arg0, %c0_i32 : i32, i32
  }
  func.func @transform_12(%arg0: i32) -> (i32, i32) {
    %c0_i32 = arith.constant 0 : i32
    %c0_i32_0 = arith.constant 0 : i32
    return %arg0, %c0_i32 : i32, i32
  }
}

</mosaic_0001>

<bundles_post_ra>
// kernel: cnn_policy_forward.6
= control target key start
LH: loop header
LB: loop body
LE: loop exit
PB: predicated region body
PF: predicated region fallthrough
CT: control target
= control target key end

     0   :  { %vm1464_vm0 = vcmask 257024   ;;  %s3345_s1 = inlined_call_operand.vmem [shape: bf16[256,32], index: 1, kind: input, shape index: {}]   ;;  %s3346_s2 = inlined_call_operand.vmem [shape: f32[1,32], index: 2, kind: input, shape index: {}]   ;;  %s3347_s0 = inlined_call_operand.vmem [shape: bf16[800,256], index: 0, kind: input, shape index: {}]   ;;  %s3348_s3 = inlined_call_operand.vmem [shape: bf16[800,32], index: 3, kind: output, shape index: {}]  }
   0x1   :  { %v2140_v0 = vld [vmem:[%s3345_s1 + $0x38] sm:$0xff]  ;;  %v2139_v2 = vld [vmem:[%s3345_s1 + $0x30] sm:$0xff]  ;;  %v2138_v4 = vld [vmem:[%s3345_s1 + $0x28] sm:$0xff] }
   0x2   :  { %v2148_v1 = vld [vmem:[%s3345_s1 + $0x78] sm:$0xff]  ;;  %746 = vmatpush.bf16.msra.mxu0 %v2140_v0  ;;  %2149 = vmatpush.bf16.msra.mxu2 %v2140_v0  ;;  %v2147_v3 = vld [vmem:[%s3345_s1 + $0x70] sm:$0xff]  ;;  %v2146_v5 = vld [vmem:[%s3345_s1 + $0x68] sm:$0xff] }
   0x3   :  { %1005 = vmatpush.bf16.msra.mxu1 %v2148_v1  ;;  %2157 = vmatpush.bf16.msra.mxu3 %v2148_v1  ;;  %v2137_v6 = vld [vmem:[%s3345_s1 + $0x20] sm:$0xff]  ;;  %v2136_v8 = vld [vmem:[%s3345_s1 + $0x18] sm:$0xff]  ;;  %v2135_v10 = vld [vmem:[%s3345_s1 + $0x10] sm:$0xff] }
   0x4   :  { %v2145_v7 = vld [vmem:[%s3345_s1 + $0x60] sm:$0xff]  ;;  %v2144_v9 = vld [vmem:[%s3345_s1 + $0x58] sm:$0xff]  ;;  %v2143_v11 = vld [vmem:[%s3345_s1 + $0x50] sm:$0xff] }
   0x5   :  { %v2134_v12 = vld [vmem:[%s3345_s1 + $0x8] sm:$0xff]  ;;  %v2133_v14 = vld [vmem:[%s3345_s1] sm:$0xff]  ;;  %v1771_v18 = vld [vmem:[%s3347_s0 + $0x190] sm:$0xf] }
   0x6   :  { %747 = vmatpush.bf16.msra.mxu0 %v2139_v2  ;;  %2150 = vmatpush.bf16.msra.mxu2 %v2139_v2  ;;  %v2142_v13 = vld [vmem:[%s3345_s1 + $0x48] sm:$0xff]  ;;  %v2141_v15 = vld [vmem:[%s3345_s1 + $0x40] sm:$0xff]  ;;  %v2084_v19 = vld [vmem:[%s3347_s0 + $0x194] sm:$0xf0] }
   0x7   :  { %1006 = vmatpush.bf16.msra.mxu1 %v2147_v3  ;;  %2158 = vmatpush.bf16.msra.mxu3 %v2147_v3  ;;  %v1571_v16 = vld [vmem:[%s3347_s0] sm:$0xf]  ;;  %v2034_v17 = vld [vmem:[%s3347_s0 + $0x4] sm:$0xf0]  ;;  %v2033_v20 = vld [vmem:[%s3347_s0 + $0x4] sm:$0xf]  ;;  %v1772_v25 = vor.u32 %v2084_v19, %v1771_v18 }
   0x8   :  { %v1573_v21 = vld [vmem:[%s3347_s0 + $0x8] sm:$0xf0]  ;;  %v2083_v22 = vld [vmem:[%s3347_s0 + $0x194] sm:$0xf]  ;;  %v1773_v23 = vld [vmem:[%s3347_s0 + $0x198] sm:$0xf0]  ;;  %v1572_v24 = vor.u32 %v2034_v17, %v1571_v16 }
   0x9   :  { %v1576_v26 = vor.u32 %v2033_v20, %v1573_v21  ;;  %v1776_v27 = vor.u32 %v2083_v22, %v1773_v23  ;;  %v1579_v28 = vld [vmem:[%s3347_s0 + $0x10] sm:$0xf]  ;;  %v2036_v29 = vld [vmem:[%s3347_s0 + $0x14] sm:$0xf0]  ;;  %v1779_v30 = vld [vmem:[%s3347_s0 + $0x1a0] sm:$0xf] }
   0xa   :  { %748 = vmatpush.bf16.msra.mxu0 %v2138_v4  ;;  %2151 = vmatpush.bf16.msra.mxu2 %v2138_v4  ;;  %v2086_v31 = vld [vmem:[%s3347_s0 + $0x1a4] sm:$0xf0]  ;;  %v2035_v32 = vld [vmem:[%s3347_s0 + $0x14] sm:$0xf]  ;;  %v1581_v33 = vld [vmem:[%s3347_s0 + $0x18] sm:$0xf0]  ;;  %v1580_v36 = vor.u32 %v2036_v29, %v1579_v28 }
   0xb   :  { %1007 = vmatpush.bf16.msra.mxu1 %v2146_v5  ;;  %2159 = vmatpush.bf16.msra.mxu3 %v2146_v5  ;;  %v2085_v34 = vld [vmem:[%s3347_s0 + $0x1a4] sm:$0xf]  ;;  %v1781_v35 = vld [vmem:[%s3347_s0 + $0x1a8] sm:$0xf0]  ;;  %v1780_v37 = vor.u32 %v2086_v31, %v1779_v30  ;;  %v1584_v38 = vor.u32 %v2035_v32, %v1581_v33  ;;  %v1587_v40 = vld [vmem:[%s3347_s0 + $0x20] sm:$0xf] }
   0xc   :  { %v1784_v39 = vor.u32 %v2085_v34, %v1781_v35  ;;  %v2038_v41 = vld [vmem:[%s3347_s0 + $0x24] sm:$0xf0]  ;;  %v1787_v42 = vld [vmem:[%s3347_s0 + $0x1b0] sm:$0xf]  ;;  %v2088_v43 = vld [vmem:[%s3347_s0 + $0x1b4] sm:$0xf0] }
   0xd   :  { %v2037_v44 = vld [vmem:[%s3347_s0 + $0x24] sm:$0xf]  ;;  %v1589_v45 = vld [vmem:[%s3347_s0 + $0x28] sm:$0xf0]  ;;  %v2087_v46 = vld [vmem:[%s3347_s0 + $0x1b4] sm:$0xf]  ;;  %v1588_v48 = vor.u32 %v2038_v41, %v1587_v40  ;;  %v1788_v49 = vor.u32 %v2088_v43, %v1787_v42 }
   0xe   :  { %749 = vmatpush.bf16.msra.mxu0 %v2137_v6  ;;  %2152 = vmatpush.bf16.msra.mxu2 %v2137_v6  ;;  %v1789_v47 = vld [vmem:[%s3347_s0 + $0x1b8] sm:$0xf0]  ;;  %v1592_v50 = vor.u32 %v2037_v44, %v1589_v45  ;;  %v1595_v52 = vld [vmem:[%s3347_s0 + $0x30] sm:$0xf]  ;;  %v2040_v53 = vld [vmem:[%s3347_s0 + $0x34] sm:$0xf0] }
   0xf   :  { %1008 = vmatpush.bf16.msra.mxu1 %v2145_v7  ;;  %2160 = vmatpush.bf16.msra.mxu3 %v2145_v7  ;;  %v1792_v51 = vor.u32 %v2087_v46, %v1789_v47  ;;  %v1795_v54 = vld [vmem:[%s3347_s0 + $0x1c0] sm:$0xf]  ;;  %v2090_v55 = vld [vmem:[%s3347_s0 + $0x1c4] sm:$0xf0]  ;;  %v2039_v56 = vld [vmem:[%s3347_s0 + $0x34] sm:$0xf]  ;;  %v1596_v60 = vor.u32 %v2040_v53, %v1595_v52 }
  0x10   :  { %v1597_v57 = vld [vmem:[%s3347_s0 + $0x38] sm:$0xf0]  ;;  %v2089_v58 = vld [vmem:[%s3347_s0 + $0x1c4] sm:$0xf]  ;;  %v1797_v59 = vld [vmem:[%s3347_s0 + $0x1c8] sm:$0xf0]  ;;  %v1796_v61 = vor.u32 %v2090_v55, %v1795_v54 }
  0x11   :  { %v1600_v62 = vor.u32 %v2039_v56, %v1597_v57  ;;  %v1800_v63 = vor.u32 %v2089_v58, %v1797_v59  ;;  %v1603_v0 = vld [vmem:[%s3347_s0 + $0x40] sm:$0xf]  ;;  %v2042_v1 = vld [vmem:[%s3347_s0 + $0x44] sm:$0xf0]  ;;  %v1803_v2 = vld [vmem:[%s3347_s0 + $0x1d0] sm:$0xf] }
  0x12   :  { %750 = vmatpush.bf16.msra.mxu0 %v2136_v8  ;;  %2153 = vmatpush.bf16.msra.mxu2 %v2136_v8  ;;  %v2092_v3 = vld [vmem:[%s3347_s0 + $0x1d4] sm:$0xf0]  ;;  %v2041_v4 = vld [vmem:[%s3347_s0 + $0x44] sm:$0xf]  ;;  %v1605_v5 = vld [vmem:[%s3347_s0 + $0x48] sm:$0xf0]  ;;  %v1604_v8 = vor.u32 %v2042_v1, %v1603_v0 }
  0x13   :  { %1009 = vmatpush.bf16.msra.mxu1 %v2144_v9  ;;  %2161 = vmatpush.bf16.msra.mxu3 %v2144_v9  ;;  %v2091_v6 = vld [vmem:[%s3347_s0 + $0x1d4] sm:$0xf]  ;;  %v1805_v7 = vld [vmem:[%s3347_s0 + $0x1d8] sm:$0xf0]  ;;  %v1804_v9 = vor.u32 %v2092_v3, %v1803_v2  ;;  %v2093_v18 = vld [vmem:[%s3347_s0 + $0x1e4] sm:$0xf] }
  0x14   :  { %v2043_v16 = vld [vmem:[%s3347_s0 + $0x54] sm:$0xf]  ;;  %v1613_v17 = vld [vmem:[%s3347_s0 + $0x58] sm:$0xf0]  ;;  %v1813_v19 = vld [vmem:[%s3347_s0 + $0x1e8] sm:$0xf0] }
  0x15   :  { %v1616_v22 = vor.u32 %v2043_v16, %v1613_v17  ;;  %v1816_v23 = vor.u32 %v2093_v18, %v1813_v19  ;;  %v2045_v28 = vld [vmem:[%s3347_s0 + $0x64] sm:$0xf]  ;;  %v1621_v29 = vld [vmem:[%s3347_s0 + $0x68] sm:$0xf0]  ;;  %v2095_v30 = vld [vmem:[%s3347_s0 + $0x1f4] sm:$0xf] }
  0x16   :  { %751 = vmatpush.bf16.msra.mxu0 %v2135_v10  ;;  %2154 = vmatpush.bf16.msra.mxu2 %v2135_v10  ;;  %v1608_v10 = vor.u32 %v2041_v4, %v1605_v5  ;;  %v1821_v31 = vld [vmem:[%s3347_s0 + $0x1f8] sm:$0xf0]  ;;  %v1624_v34 = vor.u32 %v2045_v28, %v1621_v29  ;;  %v2047_v40 = vld [vmem:[%s3347_s0 + $0x74] sm:$0xf]  ;;  %v2097_v42 = vld [vmem:[%s3347_s0 + $0x204] sm:$0xf] }
  0x17   :  { %1010 = vmatpush.bf16.msra.mxu1 %v2143_v11  ;;  %2162 = vmatpush.bf16.msra.mxu3 %v2143_v11  ;;  %v1808_v11 = vor.u32 %v2091_v6, %v1805_v7  ;;  %v1824_v35 = vor.u32 %v2095_v30, %v1821_v31  ;;  %v1629_v41 = vld [vmem:[%s3347_s0 + $0x78] sm:$0xf0]  ;;  %v1829_v43 = vld [vmem:[%s3347_s0 + $0x208] sm:$0xf0]  ;;  %v2100_v52 = vld [vmem:[%s3347_s0 + $0x214] sm:$0xf0] }
  0x18   :  { %v1632_v46 = vor.u32 %v2047_v40, %v1629_v41  ;;  %v1832_v47 = vor.u32 %v2097_v42, %v1829_v43  ;;  %v2049_v53 = vld [vmem:[%s3347_s0 + $0x84] sm:$0xf]  ;;  %v1637_v54 = vld [vmem:[%s3347_s0 + $0x88] sm:$0xf0]  ;;  %v2099_v55 = vld [vmem:[%s3347_s0 + $0x214] sm:$0xf] }
  0x19   :  { %v1837_v56 = vld [vmem:[%s3347_s0 + $0x218] sm:$0xf0]  ;;  %v2051_v16 = vld [vmem:[%s3347_s0 + $0x94] sm:$0xf] }
  0x1a   :  { %752 = vmatpush.bf16.msra.mxu0 %v2134_v12  ;;  %2155 = vmatpush.bf16.msra.mxu2 %v2134_v12  ;;  %v1611_v12 = vld [vmem:[%s3347_s0 + $0x50] sm:$0xf]  ;;  %v1645_v17 = vld [vmem:[%s3347_s0 + $0x98] sm:$0xf0] }
  0x1b   :  { %1011 = vmatpush.bf16.msra.mxu1 %v2142_v13  ;;  %2163 = vmatpush.bf16.msra.mxu3 %v2142_v13  ;;  %v2044_v13 = vld [vmem:[%s3347_s0 + $0x54] sm:$0xf0]  ;;  %v1648_v29 = vor.u32 %v2051_v16, %v1645_v17 }
  0x1c   :  { %v1612_v20 = vor.u32 %v2044_v13, %v1611_v12  ;;  %v2052_v13 = vld [vmem:[%s3347_s0 + $0x94] sm:$0xf0] }
  0x1e   :  { %753 = vmatpush.bf16.msra.mxu0 %v2133_v14  ;;  %2156 = vmatpush.bf16.msra.mxu2 %v2133_v14  ;;  %v1811_v14 = vld [vmem:[%s3347_s0 + $0x1e0] sm:$0xf] }
  0x1f   :  { %1012 = vmatpush.bf16.msra.mxu1 %v2141_v15  ;;  %2164 = vmatpush.bf16.msra.mxu3 %v2141_v15  ;;  %v2094_v15 = vld [vmem:[%s3347_s0 + $0x1e4] sm:$0xf0] }
  0x20   :  { %v1812_v21 = vor.u32 %v2094_v15, %v1811_v14  ;;  %v1843_v14 = vld [vmem:[%s3347_s0 + $0x220] sm:$0xf]  ;;  %v2102_v15 = vld [vmem:[%s3347_s0 + $0x224] sm:$0xf0] }
  0x21   :  { %754 = vmatmul.bf16.vlgmr.msra.gmra.mxu0 %v1572_v24  ;;  %879 = vmatmul.bf16.vlgmr.msra.gmra.mxu2 %v1772_v25  ;;  %v1619_v24 = vld [vmem:[%s3347_s0 + $0x60] sm:$0xf]  ;;  %v2046_v25 = vld [vmem:[%s3347_s0 + $0x64] sm:$0xf0] }
  0x22   :  { %1013 = vmatmul.bf16.vlgmr.msra.gmra.mxu1 %v1576_v26  ;;  %1138 = vmatmul.bf16.vlgmr.msra.gmra.mxu3 %v1776_v27  ;;  %v1819_v26 = vld [vmem:[%s3347_s0 + $0x1f0] sm:$0xf]  ;;  %v2096_v27 = vld [vmem:[%s3347_s0 + $0x1f4] sm:$0xf0]  ;;  %v1620_v32 = vor.u32 %v2046_v25, %v1619_v24 }
  0x23   :  { %v1820_v33 = vor.u32 %v2096_v27, %v1819_v26  ;;  %v1844_v27 = vor.u32 %v2102_v15, %v1843_v14 }
  0x31   :  { %759 = vmatmul.bf16.gmra.mxu0 %v1580_v36  ;;  %884 = vmatmul.bf16.gmra.mxu2 %v1780_v37  ;;  %v1627_v36 = vld [vmem:[%s3347_s0 + $0x70] sm:$0xf]  ;;  %v2048_v37 = vld [vmem:[%s3347_s0 + $0x74] sm:$0xf0] }
  0x32   :  { %1018 = vmatmul.bf16.gmra.mxu1 %v1584_v38  ;;  %1143 = vmatmul.bf16.gmra.mxu3 %v1784_v39  ;;  %v1827_v38 = vld [vmem:[%s3347_s0 + $0x200] sm:$0xf]  ;;  %v2098_v39 = vld [vmem:[%s3347_s0 + $0x204] sm:$0xf0]  ;;  %v1628_v44 = vor.u32 %v2048_v37, %v1627_v36 }
  0x33   :  { %v1828_v45 = vor.u32 %v2098_v39, %v1827_v38 }
  0x41   :  { %764 = vmatmul.bf16.gmra.mxu0 %v1588_v48  ;;  %889 = vmatmul.bf16.gmra.mxu2 %v1788_v49  ;;  %v2430_v48 = vld [vmem:[%s3346_s2] ss:$0 sm:$0xff] }
  0x42   :  { %1023 = vmatmul.bf16.gmra.mxu1 %v1592_v50  ;;  %1148 = vmatmul.bf16.gmra.mxu3 %v1792_v51  ;;  %v1635_v49 = vld [vmem:[%s3347_s0 + $0x80] sm:$0xf]  ;;  %v2050_v50 = vld [vmem:[%s3347_s0 + $0x84] sm:$0xf0]  ;;  %v1835_v51 = vld [vmem:[%s3347_s0 + $0x210] sm:$0xf] }
  0x43   :  { %v1636_v57 = vor.u32 %v2050_v50, %v1635_v49  ;;  %v1836_v58 = vor.u32 %v2100_v52, %v1835_v51  ;;  %v2054_v50 = vld [vmem:[%s3347_s0 + $0xa4] sm:$0xf0]  ;;  %v1851_v51 = vld [vmem:[%s3347_s0 + $0x230] sm:$0xf]  ;;  %v2104_v52 = vld [vmem:[%s3347_s0 + $0x234] sm:$0xf0] }
  0x51   :  { %769 = vmatmul.bf16.gmra.mxu0 %v1596_v60  ;;  %894 = vmatmul.bf16.gmra.mxu2 %v1796_v61  ;;  %v1640_v60 = vor.u32 %v2049_v53, %v1637_v54  ;;  %v1840_v61 = vor.u32 %v2099_v55, %v1837_v56  ;;  %v2053_v53 = vld [vmem:[%s3347_s0 + $0xa4] sm:$0xf]  ;;  %v1653_v54 = vld [vmem:[%s3347_s0 + $0xa8] sm:$0xf0] }
  0x52   :  { %1028 = vmatmul.bf16.gmra.mxu1 %v1600_v62  ;;  %1153 = vmatmul.bf16.gmra.mxu3 %v1800_v63 }
  0x61   :  { %774 = vmatmul.bf16.gmra.mxu0 %v1604_v8  ;;  %899 = vmatmul.bf16.gmra.mxu2 %v1804_v9 }
  0x62   :  { %1033 = vmatmul.bf16.gmra.mxu1 %v1608_v10  ;;  %1158 = vmatmul.bf16.gmra.mxu3 %v1808_v11  ;;  %v1643_v10 = vld [vmem:[%s3347_s0 + $0x90] sm:$0xf] }
  0x63   :  { %v1644_v26 = vor.u32 %v2052_v13, %v1643_v10 }
  0x71   :  { %779 = vmatmul.bf16.gmra.mxu0 %v1612_v20  ;;  %904 = vmatmul.bf16.gmra.mxu2 %v1812_v21  ;;  %v2101_v20 = vld [vmem:[%s3347_s0 + $0x224] sm:$0xf]  ;;  %v1845_v21 = vld [vmem:[%s3347_s0 + $0x228] sm:$0xf0] }
  0x72   :  { %1038 = vmatmul.bf16.gmra.mxu1 %v1616_v22  ;;  %1163 = vmatmul.bf16.gmra.mxu3 %v1816_v23  ;;  %v1848_v30 = vor.u32 %v2101_v20, %v1845_v21 }
  0x81   :  { %784 = vmatmul.bf16.gmra.mxu0 %v1620_v32  ;;  %909 = vmatmul.bf16.gmra.mxu2 %v1820_v33 }
  0x82   :  { %1043 = vmatmul.bf16.gmra.mxu1 %v1624_v34  ;;  %1168 = vmatmul.bf16.gmra.mxu3 %v1824_v35 }
  0x91   :  { %789 = vmatmul.bf16.gmra.mxu0 %v1628_v44  ;;  %914 = vmatmul.bf16.gmra.mxu2 %v1828_v45 }
  0x92   :  { %1048 = vmatmul.bf16.gmra.mxu1 %v1632_v46  ;;  %1173 = vmatmul.bf16.gmra.mxu3 %v1832_v47  ;;  %v1651_v46 = vld [vmem:[%s3347_s0 + $0xa0] sm:$0xf] }
  0x9e   :  { %v755_v59 = vpop.f32.mrf.mxu0 }
  0x9f   :  { %v756_v62 = vadd.f32 %v2430_v48, %v755_v59  ;;  %v1014_v63 = vpop.f32.mrf.mxu1 }
  0xa1   :  { %v1015_v0 = vadd.f32 %v1014_v63, %v756_v62  ;;  %794 = vmatmul.bf16.gmra.mxu0 %v1636_v57  ;;  %919 = vmatmul.bf16.gmra.mxu2 %v1836_v58  ;;  %v2103_v57 = vld [vmem:[%s3347_s0 + $0x234] sm:$0xf]  ;;  %v1853_v58 = vld [vmem:[%s3347_s0 + $0x238] sm:$0xf0]  ;;  %v1652_v63 = vor.u32 %v2054_v50, %v1651_v46 }
  0xa2   :  { %1053 = vmatmul.bf16.gmra.mxu1 %v1640_v60  ;;  %1178 = vmatmul.bf16.gmra.mxu3 %v1840_v61 }
  0xa3   :  { %v1264_v1 = vmax.f32 %v1015_v0, 0.0  ;;  %v1852_v0 = vor.u32 %v2104_v52, %v1851_v51 }
  0xa4   :  { %v880_v2 = vpop.f32.mrf.mxu2 }
  0xa5   :  { %v1364_v3 = vpack.c.bf16 %v1264_v1, %v1264_v1  ;;  %v881_v4 = vadd.f32 %v2430_v48, %v880_v2  ;;  %v1139_v5 = vpop.f32.mrf.mxu3  ;;  %v1656_v2 = vor.u32 %v2053_v53, %v1653_v54 }
  0xa6   :  { %v757_v6 = vpop.f32.mrf.mxu0 }
  0xa7   :  { %1465 = vst.msk [vmem:[%s3348_s3] sm:$0xf] %vm1464_vm0, %v1364_v3  ;;  %v1140_v7 = vadd.f32 %v1139_v5, %v881_v4  ;;  %v758_v8 = vadd.f32 %v2430_v48, %v757_v6  ;;  %v1016_v9 = vpop.f32.mrf.mxu1  ;;  %v1856_v3 = vor.u32 %v2103_v57, %v1853_v58 }
  0xa9   :  { %v1314_v11 = vmax.f32 %v1140_v7, 0.0  ;;  %v1017_v12 = vadd.f32 %v1016_v9, %v758_v8 }
  0xab   :  { %v1414_v18 = vpack.c.bf16 %v1314_v11, %v1314_v11  ;;  %v1265_v19 = vmax.f32 %v1017_v12, 0.0 }
  0xac   :  { %v882_v22 = vpop.f32.mrf.mxu2 }
  0xad   :  { %1515 = vst.msk [vmem:[%s3348_s3 + $0xc8] sm:$0xf] %vm1464_vm0, %v1414_v18  ;;  %v1365_v23 = vpack.c.bf16 %v1265_v19, %v1265_v19  ;;  %v883_v24 = vadd.f32 %v2430_v48, %v882_v22  ;;  %v1141_v25 = vpop.f32.mrf.mxu3  ;;  %v1659_v19 = vld [vmem:[%s3347_s0 + $0xb0] sm:$0xf]  ;;  %v2056_v22 = vld [vmem:[%s3347_s0 + $0xb4] sm:$0xf0] }
  0xae   :  { %v760_v28 = vpop.f32.mrf.mxu0 }
  0xaf   :  { %1466 = vst.msk [vmem:[%s3348_s3 + $0x4] sm:$0xf] %vm1464_vm0, %v1365_v23  ;;  %v1142_v31 = vadd.f32 %v1141_v25, %v883_v24  ;;  %v761_v32 = vadd.f32 %v2430_v48, %v760_v28  ;;  %v1019_v33 = vpop.f32.mrf.mxu1  ;;  %v1859_v23 = vld [vmem:[%s3347_s0 + $0x240] sm:$0xf]  ;;  %v2106_v24 = vld [vmem:[%s3347_s0 + $0x244] sm:$0xf0] }
  0xb0   :  { %v2055_v25 = vld [vmem:[%s3347_s0 + $0xb4] sm:$0xf] }
  0xb1   :  { %v1315_v34 = vmax.f32 %v1142_v31, 0.0  ;;  %v1020_v35 = vadd.f32 %v1019_v33, %v761_v32  ;;  %799 = vmatmul.bf16.gmra.mxu0 %v1644_v26  ;;  %924 = vmatmul.bf16.gmra.mxu2 %v1844_v27  ;;  %v1661_v26 = vld [vmem:[%s3347_s0 + $0xb8] sm:$0xf0] }
  0xb2   :  { %1058 = vmatmul.bf16.gmra.mxu1 %v1648_v29  ;;  %1183 = vmatmul.bf16.gmra.mxu3 %v1848_v30  ;;  %v2105_v29 = vld [vmem:[%s3347_s0 + $0x244] sm:$0xf]  ;;  %v1861_v30 = vld [vmem:[%s3347_s0 + $0x248] sm:$0xf0] }
  0xb3   :  { %v1415_v36 = vpack.c.bf16 %v1315_v34, %v1315_v34  ;;  %v1266_v37 = vmax.f32 %v1020_v35, 0.0  ;;  %v1660_v35 = vor.u32 %v2056_v22, %v1659_v19 }
  0xb4   :  { %v885_v38 = vpop.f32.mrf.mxu2 }
  0xb5   :  { %1516 = vst.msk [vmem:[%s3348_s3 + $0xcc] sm:$0xf] %vm1464_vm0, %v1415_v36  ;;  %v1366_v39 = vpack.c.bf16 %v1266_v37, %v1266_v37  ;;  %v886_v40 = vadd.f32 %v2430_v48, %v885_v38  ;;  %v1144_v41 = vpop.f32.mrf.mxu3  ;;  %v1860_v36 = vor.u32 %v2106_v24, %v1859_v23  ;;  %v1664_v38 = vor.u32 %v2055_v25, %v1661_v26 }
  0xb6   :  { %v762_v42 = vpop.f32.mrf.mxu0 }
  0xb7   :  { %1467 = vst.msk [vmem:[%s3348_s3 + $0x8] sm:$0xf] %vm1464_vm0, %v1366_v39  ;;  %v1145_v43 = vadd.f32 %v1144_v41, %v886_v40  ;;  %v763_v44 = vadd.f32 %v2430_v48, %v762_v42  ;;  %v1021_v45 = vpop.f32.mrf.mxu1  ;;  %v1864_v39 = vor.u32 %v2105_v29, %v1861_v30 }
  0xb9   :  { %v1316_v47 = vmax.f32 %v1145_v43, 0.0  ;;  %v1022_v49 = vadd.f32 %v1021_v45, %v763_v44 }
  0xbb   :  { %v1416_v55 = vpack.c.bf16 %v1316_v47, %v1316_v47  ;;  %v1267_v56 = vmax.f32 %v1022_v49, 0.0 }
  0xbc   :  { %v887_v59 = vpop.f32.mrf.mxu2 }
  0xbd   :  { %1517 = vst.msk [vmem:[%s3348_s3 + $0xd0] sm:$0xf] %vm1464_vm0, %v1416_v55  ;;  %v1367_v60 = vpack.c.bf16 %v1267_v56, %v1267_v56  ;;  %v888_v61 = vadd.f32 %v2430_v48, %v887_v59  ;;  %v1146_v62 = vpop.f32.mrf.mxu3  ;;  %v1667_v56 = vld [vmem:[%s3347_s0 + $0xc0] sm:$0xf]  ;;  %v2058_v59 = vld [vmem:[%s3347_s0 + $0xc4] sm:$0xf0] }
  0xbe   :  { %v765_v1 = vpop.f32.mrf.mxu0 }
  0xbf   :  { %1468 = vst.msk [vmem:[%s3348_s3 + $0xc] sm:$0xf] %vm1464_vm0, %v1367_v60  ;;  %v1147_v4 = vadd.f32 %v1146_v62, %v888_v61  ;;  %v766_v5 = vadd.f32 %v2430_v48, %v765_v1  ;;  %v1024_v6 = vpop.f32.mrf.mxu1  ;;  %v1867_v60 = vld [vmem:[%s3347_s0 + $0x250] sm:$0xf]  ;;  %v2108_v61 = vld [vmem:[%s3347_s0 + $0x254] sm:$0xf0] }
  0xc0   :  { %v2057_v62 = vld [vmem:[%s3347_s0 + $0xc4] sm:$0xf] }
  0xc1   :  { %v1317_v7 = vmax.f32 %v1147_v4, 0.0  ;;  %v1025_v8 = vadd.f32 %v1024_v6, %v766_v5  ;;  %804 = vmatmul.bf16.gmra.mxu0 %v1652_v63  ;;  %929 = vmatmul.bf16.gmra.mxu2 %v1852_v0  ;;  %v1669_v63 = vld [vmem:[%s3347_s0 + $0xc8] sm:$0xf0] }
  0xc2   :  { %1063 = vmatmul.bf16.gmra.mxu1 %v1656_v2  ;;  %1188 = vmatmul.bf16.gmra.mxu3 %v1856_v3  ;;  %v2107_v2 = vld [vmem:[%s3347_s0 + $0x254] sm:$0xf]  ;;  %v1869_v3 = vld [vmem:[%s3347_s0 + $0x258] sm:$0xf0] }
  0xc3   :  { %v1417_v9 = vpack.c.bf16 %v1317_v7, %v1317_v7  ;;  %v1268_v10 = vmax.f32 %v1025_v8, 0.0  ;;  %v1668_v8 = vor.u32 %v2058_v59, %v1667_v56 }
  0xc4   :  { %v890_v11 = vpop.f32.mrf.mxu2 }
  0xc5   :  { %1518 = vst.msk [vmem:[%s3348_s3 + $0xd4] sm:$0xf] %vm1464_vm0, %v1417_v9  ;;  %v1368_v12 = vpack.c.bf16 %v1268_v10, %v1268_v10  ;;  %v891_v13 = vadd.f32 %v2430_v48, %v890_v11  ;;  %v1149_v14 = vpop.f32.mrf.mxu3  ;;  %v1868_v9 = vor.u32 %v2108_v61, %v1867_v60  ;;  %v1672_v11 = vor.u32 %v2057_v62, %v1669_v63 }
  0xc6   :  { %v767_v15 = vpop.f32.mrf.mxu0 }
  0xc7   :  { %1469 = vst.msk [vmem:[%s3348_s3 + $0x10] sm:$0xf] %vm1464_vm0, %v1368_v12  ;;  %v1150_v16 = vadd.f32 %v1149_v14, %v891_v13  ;;  %v768_v17 = vadd.f32 %v2430_v48, %v767_v15  ;;  %v1026_v18 = vpop.f32.mrf.mxu1  ;;  %v1872_v12 = vor.u32 %v2107_v2, %v1869_v3 }
  0xc9   :  { %v1318_v20 = vmax.f32 %v1150_v16, 0.0  ;;  %v1027_v21 = vadd.f32 %v1026_v18, %v768_v17 }
  0xcb   :  { %v1418_v27 = vpack.c.bf16 %v1318_v20, %v1318_v20  ;;  %v1269_v28 = vmax.f32 %v1027_v21, 0.0 }
  0xcc   :  { %v892_v31 = vpop.f32.mrf.mxu2 }
  0xcd   :  { %1519 = vst.msk [vmem:[%s3348_s3 + $0xd8] sm:$0xf] %vm1464_vm0, %v1418_v27  ;;  %v1369_v32 = vpack.c.bf16 %v1269_v28, %v1269_v28  ;;  %v893_v33 = vadd.f32 %v2430_v48, %v892_v31  ;;  %v1151_v34 = vpop.f32.mrf.mxu3  ;;  %v1675_v28 = vld [vmem:[%s3347_s0 + $0xd0] sm:$0xf]  ;;  %v2060_v31 = vld [vmem:[%s3347_s0 + $0xd4] sm:$0xf0] }
  0xce   :  { %v770_v37 = vpop.f32.mrf.mxu0 }
  0xcf   :  { %1470 = vst.msk [vmem:[%s3348_s3 + $0x14] sm:$0xf] %vm1464_vm0, %v1369_v32  ;;  %v1152_v40 = vadd.f32 %v1151_v34, %v893_v33  ;;  %v771_v41 = vadd.f32 %v2430_v48, %v770_v37  ;;  %v1029_v42 = vpop.f32.mrf.mxu1  ;;  %v1875_v32 = vld [vmem:[%s3347_s0 + $0x260] sm:$0xf]  ;;  %v2110_v33 = vld [vmem:[%s3347_s0 + $0x264] sm:$0xf0] }
  0xd0   :  { %v2059_v34 = vld [vmem:[%s3347_s0 + $0xd4] sm:$0xf] }
  0xd1   :  { %v1319_v43 = vmax.f32 %v1152_v40, 0.0  ;;  %v1030_v44 = vadd.f32 %v1029_v42, %v771_v41  ;;  %809 = vmatmul.bf16.gmra.mxu0 %v1660_v35  ;;  %934 = vmatmul.bf16.gmra.mxu2 %v1860_v36  ;;  %v1677_v35 = vld [vmem:[%s3347_s0 + $0xd8] sm:$0xf0] }
  0xd2   :  { %1068 = vmatmul.bf16.gmra.mxu1 %v1664_v38  ;;  %1193 = vmatmul.bf16.gmra.mxu3 %v1864_v39  ;;  %v2109_v38 = vld [vmem:[%s3347_s0 + $0x264] sm:$0xf]  ;;  %v1877_v39 = vld [vmem:[%s3347_s0 + $0x268] sm:$0xf0] }
  0xd3   :  { %v1419_v45 = vpack.c.bf16 %v1319_v43, %v1319_v43  ;;  %v1270_v46 = vmax.f32 %v1030_v44, 0.0  ;;  %v1676_v44 = vor.u32 %v2060_v31, %v1675_v28 }
  0xd4   :  { %v895_v47 = vpop.f32.mrf.mxu2 }
  0xd5   :  { %1520 = vst.msk [vmem:[%s3348_s3 + $0xdc] sm:$0xf] %vm1464_vm0, %v1419_v45  ;;  %v1370_v49 = vpack.c.bf16 %v1270_v46, %v1270_v46  ;;  %v896_v50 = vadd.f32 %v2430_v48, %v895_v47  ;;  %v1154_v51 = vpop.f32.mrf.mxu3  ;;  %v1876_v45 = vor.u32 %v2110_v33, %v1875_v32  ;;  %v1680_v47 = vor.u32 %v2059_v34, %v1677_v35 }
  0xd6   :  { %v772_v52 = vpop.f32.mrf.mxu0 }
  0xd7   :  { %1471 = vst.msk [vmem:[%s3348_s3 + $0x18] sm:$0xf] %vm1464_vm0, %v1370_v49  ;;  %v1155_v53 = vadd.f32 %v1154_v51, %v896_v50  ;;  %v773_v54 = vadd.f32 %v2430_v48, %v772_v52  ;;  %v1031_v55 = vpop.f32.mrf.mxu1  ;;  %v1880_v49 = vor.u32 %v2109_v38, %v1877_v39 }
  0xd9   :  { %v1320_v57 = vmax.f32 %v1155_v53, 0.0  ;;  %v1032_v58 = vadd.f32 %v1031_v55, %v773_v54 }
  0xdb   :  { %v1420_v0 = vpack.c.bf16 %v1320_v57, %v1320_v57  ;;  %v1271_v1 = vmax.f32 %v1032_v58, 0.0 }
  0xdc   :  { %v897_v4 = vpop.f32.mrf.mxu2 }
  0xdd   :  { %1521 = vst.msk [vmem:[%s3348_s3 + $0xe0] sm:$0xf] %vm1464_vm0, %v1420_v0  ;;  %v1371_v5 = vpack.c.bf16 %v1271_v1, %v1271_v1  ;;  %v898_v6 = vadd.f32 %v2430_v48, %v897_v4  ;;  %v1156_v7 = vpop.f32.mrf.mxu3  ;;  %v1683_v1 = vld [vmem:[%s3347_s0 + $0xe0] sm:$0xf]  ;;  %v2062_v4 = vld [vmem:[%s3347_s0 + $0xe4] sm:$0xf0] }
  0xde   :  { %v775_v10 = vpop.f32.mrf.mxu0 }
  0xdf   :  { %1472 = vst.msk [vmem:[%s3348_s3 + $0x1c] sm:$0xf] %vm1464_vm0, %v1371_v5  ;;  %v1157_v13 = vadd.f32 %v1156_v7, %v898_v6  ;;  %v776_v14 = vadd.f32 %v2430_v48, %v775_v10  ;;  %v1034_v15 = vpop.f32.mrf.mxu1  ;;  %v1883_v5 = vld [vmem:[%s3347_s0 + $0x270] sm:$0xf]  ;;  %v2112_v6 = vld [vmem:[%s3347_s0 + $0x274] sm:$0xf0] }
  0xe0   :  { %v2061_v7 = vld [vmem:[%s3347_s0 + $0xe4] sm:$0xf] }
  0xe1   :  { %v1321_v16 = vmax.f32 %v1157_v13, 0.0  ;;  %v1035_v17 = vadd.f32 %v1034_v15, %v776_v14  ;;  %814 = vmatmul.bf16.gmra.mxu0 %v1668_v8  ;;  %939 = vmatmul.bf16.gmra.mxu2 %v1868_v9  ;;  %v1685_v8 = vld [vmem:[%s3347_s0 + $0xe8] sm:$0xf0] }
  0xe2   :  { %1073 = vmatmul.bf16.gmra.mxu1 %v1672_v11  ;;  %1198 = vmatmul.bf16.gmra.mxu3 %v1872_v12  ;;  %v2111_v11 = vld [vmem:[%s3347_s0 + $0x274] sm:$0xf]  ;;  %v1885_v12 = vld [vmem:[%s3347_s0 + $0x278] sm:$0xf0] }
  0xe3   :  { %v1421_v18 = vpack.c.bf16 %v1321_v16, %v1321_v16  ;;  %v1272_v19 = vmax.f32 %v1035_v17, 0.0  ;;  %v1684_v17 = vor.u32 %v2062_v4, %v1683_v1 }
  0xe4   :  { %v900_v20 = vpop.f32.mrf.mxu2 }
  0xe5   :  { %1522 = vst.msk [vmem:[%s3348_s3 + $0xe4] sm:$0xf] %vm1464_vm0, %v1421_v18  ;;  %v1372_v21 = vpack.c.bf16 %v1272_v19, %v1272_v19  ;;  %v901_v22 = vadd.f32 %v2430_v48, %v900_v20  ;;  %v1159_v23 = vpop.f32.mrf.mxu3  ;;  %v1884_v18 = vor.u32 %v2112_v6, %v1883_v5  ;;  %v1688_v20 = vor.u32 %v2061_v7, %v1685_v8 }
  0xe6   :  { %v777_v24 = vpop.f32.mrf.mxu0 }
  0xe7   :  { %1473 = vst.msk [vmem:[%s3348_s3 + $0x20] sm:$0xf] %vm1464_vm0, %v1372_v21  ;;  %v1160_v25 = vadd.f32 %v1159_v23, %v901_v22  ;;  %v778_v26 = vadd.f32 %v2430_v48, %v777_v24  ;;  %v1036_v27 = vpop.f32.mrf.mxu1  ;;  %v1888_v21 = vor.u32 %v2111_v11, %v1885_v12 }
  0xe9   :  { %v1322_v29 = vmax.f32 %v1160_v25, 0.0  ;;  %v1037_v30 = vadd.f32 %v1036_v27, %v778_v26 }
  0xeb   :  { %v1422_v36 = vpack.c.bf16 %v1322_v29, %v1322_v29  ;;  %v1273_v37 = vmax.f32 %v1037_v30, 0.0 }
  0xec   :  { %v902_v40 = vpop.f32.mrf.mxu2 }
  0xed   :  { %1523 = vst.msk [vmem:[%s3348_s3 + $0xe8] sm:$0xf] %vm1464_vm0, %v1422_v36  ;;  %v1373_v41 = vpack.c.bf16 %v1273_v37, %v1273_v37  ;;  %v903_v42 = vadd.f32 %v2430_v48, %v902_v40  ;;  %v1161_v43 = vpop.f32.mrf.mxu3  ;;  %v1691_v37 = vld [vmem:[%s3347_s0 + $0xf0] sm:$0xf]  ;;  %v2064_v40 = vld [vmem:[%s3347_s0 + $0xf4] sm:$0xf0] }
  0xee   :  { %v780_v46 = vpop.f32.mrf.mxu0 }
  0xef   :  { %1474 = vst.msk [vmem:[%s3348_s3 + $0x24] sm:$0xf] %vm1464_vm0, %v1373_v41  ;;  %v1162_v50 = vadd.f32 %v1161_v43, %v903_v42  ;;  %v781_v51 = vadd.f32 %v2430_v48, %v780_v46  ;;  %v1039_v52 = vpop.f32.mrf.mxu1  ;;  %v1891_v41 = vld [vmem:[%s3347_s0 + $0x280] sm:$0xf]  ;;  %v2114_v42 = vld [vmem:[%s3347_s0 + $0x284] sm:$0xf0] }
  0xf0   :  { %v2063_v43 = vld [vmem:[%s3347_s0 + $0xf4] sm:$0xf] }
  0xf1   :  { %v1323_v53 = vmax.f32 %v1162_v50, 0.0  ;;  %v1040_v54 = vadd.f32 %v1039_v52, %v781_v51  ;;  %819 = vmatmul.bf16.gmra.mxu0 %v1676_v44  ;;  %944 = vmatmul.bf16.gmra.mxu2 %v1876_v45  ;;  %v1693_v44 = vld [vmem:[%s3347_s0 + $0xf8] sm:$0xf0] }
  0xf2   :  { %1078 = vmatmul.bf16.gmra.mxu1 %v1680_v47  ;;  %1203 = vmatmul.bf16.gmra.mxu3 %v1880_v49  ;;  %v2113_v47 = vld [vmem:[%s3347_s0 + $0x284] sm:$0xf]  ;;  %v1893_v49 = vld [vmem:[%s3347_s0 + $0x288] sm:$0xf0] }
  0xf3   :  { %v1423_v55 = vpack.c.bf16 %v1323_v53, %v1323_v53  ;;  %v1274_v56 = vmax.f32 %v1040_v54, 0.0  ;;  %v1692_v54 = vor.u32 %v2064_v40, %v1691_v37 }
  0xf4   :  { %v905_v57 = vpop.f32.mrf.mxu2 }
  0xf5   :  { %1524 = vst.msk [vmem:[%s3348_s3 + $0xec] sm:$0xf] %vm1464_vm0, %v1423_v55  ;;  %v1374_v58 = vpack.c.bf16 %v1274_v56, %v1274_v56  ;;  %v906_v59 = vadd.f32 %v2430_v48, %v905_v57  ;;  %v1164_v60 = vpop.f32.mrf.mxu3  ;;  %v1892_v55 = vor.u32 %v2114_v42, %v1891_v41  ;;  %v1696_v57 = vor.u32 %v2063_v43, %v1693_v44 }
  0xf6   :  { %v782_v61 = vpop.f32.mrf.mxu0 }
  0xf7   :  { %1475 = vst.msk [vmem:[%s3348_s3 + $0x28] sm:$0xf] %vm1464_vm0, %v1374_v58  ;;  %v1165_v62 = vadd.f32 %v1164_v60, %v906_v59  ;;  %v783_v63 = vadd.f32 %v2430_v48, %v782_v61  ;;  %v1041_v0 = vpop.f32.mrf.mxu1  ;;  %v1896_v58 = vor.u32 %v2113_v47, %v1893_v49 }
  0xf9   :  { %v1324_v2 = vmax.f32 %v1165_v62, 0.0  ;;  %v1042_v3 = vadd.f32 %v1041_v0, %v783_v63 }
  0xfb   :  { %v1424_v9 = vpack.c.bf16 %v1324_v2, %v1324_v2  ;;  %v1275_v10 = vmax.f32 %v1042_v3, 0.0 }
  0xfc   :  { %v907_v13 = vpop.f32.mrf.mxu2 }
  0xfd   :  { %1525 = vst.msk [vmem:[%s3348_s3 + $0xf0] sm:$0xf] %vm1464_vm0, %v1424_v9  ;;  %v1375_v14 = vpack.c.bf16 %v1275_v10, %v1275_v10  ;;  %v908_v15 = vadd.f32 %v2430_v48, %v907_v13  ;;  %v1166_v16 = vpop.f32.mrf.mxu3  ;;  %v1699_v10 = vld [vmem:[%s3347_s0 + $0x100] sm:$0xf]  ;;  %v2066_v13 = vld [vmem:[%s3347_s0 + $0x104] sm:$0xf0] }
  0xfe   :  { %v785_v19 = vpop.f32.mrf.mxu0 }
  0xff   :  { %1476 = vst.msk [vmem:[%s3348_s3 + $0x2c] sm:$0xf] %vm1464_vm0, %v1375_v14  ;;  %v1167_v22 = vadd.f32 %v1166_v16, %v908_v15  ;;  %v786_v23 = vadd.f32 %v2430_v48, %v785_v19  ;;  %v1044_v24 = vpop.f32.mrf.mxu1  ;;  %v1899_v14 = vld [vmem:[%s3347_s0 + $0x290] sm:$0xf]  ;;  %v2116_v15 = vld [vmem:[%s3347_s0 + $0x294] sm:$0xf0] }
 0x100   :  { %v2065_v16 = vld [vmem:[%s3347_s0 + $0x104] sm:$0xf] }
 0x101   :  { %v1325_v25 = vmax.f32 %v1167_v22, 0.0  ;;  %v1045_v26 = vadd.f32 %v1044_v24, %v786_v23  ;;  %824 = vmatmul.bf16.gmra.mxu0 %v1684_v17  ;;  %949 = vmatmul.bf16.gmra.mxu2 %v1884_v18  ;;  %v1701_v17 = vld [vmem:[%s3347_s0 + $0x108] sm:$0xf0] }
 0x102   :  { %1083 = vmatmul.bf16.gmra.mxu1 %v1688_v20  ;;  %1208 = vmatmul.bf16.gmra.mxu3 %v1888_v21  ;;  %v2115_v20 = vld [vmem:[%s3347_s0 + $0x294] sm:$0xf]  ;;  %v1901_v21 = vld [vmem:[%s3347_s0 + $0x298] sm:$0xf0] }
 0x103   :  { %v1425_v27 = vpack.c.bf16 %v1325_v25, %v1325_v25  ;;  %v1276_v28 = vmax.f32 %v1045_v26, 0.0  ;;  %v1700_v26 = vor.u32 %v2066_v13, %v1699_v10 }
 0x104   :  { %v910_v29 = vpop.f32.mrf.mxu2 }
 0x105   :  { %1526 = vst.msk [vmem:[%s3348_s3 + $0xf4] sm:$0xf] %vm1464_vm0, %v1425_v27  ;;  %v1376_v30 = vpack.c.bf16 %v1276_v28, %v1276_v28  ;;  %v911_v31 = vadd.f32 %v2430_v48, %v910_v29  ;;  %v1169_v32 = vpop.f32.mrf.mxu3  ;;  %v1900_v27 = vor.u32 %v2116_v15, %v1899_v14  ;;  %v1704_v29 = vor.u32 %v2065_v16, %v1701_v17 }
 0x106   :  { %v787_v33 = vpop.f32.mrf.mxu0 }
 0x107   :  { %1477 = vst.msk [vmem:[%s3348_s3 + $0x30] sm:$0xf] %vm1464_vm0, %v1376_v30  ;;  %v1170_v34 = vadd.f32 %v1169_v32, %v911_v31  ;;  %v788_v35 = vadd.f32 %v2430_v48, %v787_v33  ;;  %v1046_v36 = vpop.f32.mrf.mxu1  ;;  %v1904_v30 = vor.u32 %v2115_v20, %v1901_v21 }
 0x109   :  { %v1326_v38 = vmax.f32 %v1170_v34, 0.0  ;;  %v1047_v39 = vadd.f32 %v1046_v36, %v788_v35 }
 0x10b   :  { %v1426_v45 = vpack.c.bf16 %v1326_v38, %v1326_v38  ;;  %v1277_v46 = vmax.f32 %v1047_v39, 0.0 }
 0x10c   :  { %v912_v50 = vpop.f32.mrf.mxu2 }
 0x10d   :  { %1527 = vst.msk [vmem:[%s3348_s3 + $0xf8] sm:$0xf] %vm1464_vm0, %v1426_v45  ;;  %v1377_v51 = vpack.c.bf16 %v1277_v46, %v1277_v46  ;;  %v913_v52 = vadd.f32 %v2430_v48, %v912_v50  ;;  %v1171_v53 = vpop.f32.mrf.mxu3  ;;  %v1707_v46 = vld [vmem:[%s3347_s0 + $0x110] sm:$0xf]  ;;  %v2068_v50 = vld [vmem:[%s3347_s0 + $0x114] sm:$0xf0] }
 0x10e   :  { %v790_v56 = vpop.f32.mrf.mxu0 }
 0x10f   :  { %1478 = vst.msk [vmem:[%s3348_s3 + $0x34] sm:$0xf] %vm1464_vm0, %v1377_v51  ;;  %v1172_v59 = vadd.f32 %v1171_v53, %v913_v52  ;;  %v791_v60 = vadd.f32 %v2430_v48, %v790_v56  ;;  %v1049_v61 = vpop.f32.mrf.mxu1  ;;  %v1907_v51 = vld [vmem:[%s3347_s0 + $0x2a0] sm:$0xf]  ;;  %v2118_v52 = vld [vmem:[%s3347_s0 + $0x2a4] sm:$0xf0] }
 0x110   :  { %v2067_v53 = vld [vmem:[%s3347_s0 + $0x114] sm:$0xf] }
 0x111   :  { %v1327_v62 = vmax.f32 %v1172_v59, 0.0  ;;  %v1050_v63 = vadd.f32 %v1049_v61, %v791_v60  ;;  %829 = vmatmul.bf16.gmra.mxu0 %v1692_v54  ;;  %954 = vmatmul.bf16.gmra.mxu2 %v1892_v55  ;;  %v1709_v54 = vld [vmem:[%s3347_s0 + $0x118] sm:$0xf0] }
 0x112   :  { %1088 = vmatmul.bf16.gmra.mxu1 %v1696_v57  ;;  %1213 = vmatmul.bf16.gmra.mxu3 %v1896_v58  ;;  %v2117_v57 = vld [vmem:[%s3347_s0 + $0x2a4] sm:$0xf]  ;;  %v1909_v58 = vld [vmem:[%s3347_s0 + $0x2a8] sm:$0xf0] }
 0x113   :  { %v1427_v0 = vpack.c.bf16 %v1327_v62, %v1327_v62  ;;  %v1278_v1 = vmax.f32 %v1050_v63, 0.0  ;;  %v1708_v63 = vor.u32 %v2068_v50, %v1707_v46 }
 0x114   :  { %v915_v2 = vpop.f32.mrf.mxu2 }
 0x115   :  { %1528 = vst.msk [vmem:[%s3348_s3 + $0xfc] sm:$0xf] %vm1464_vm0, %v1427_v0  ;;  %v1378_v3 = vpack.c.bf16 %v1278_v1, %v1278_v1  ;;  %v916_v4 = vadd.f32 %v2430_v48, %v915_v2  ;;  %v1174_v5 = vpop.f32.mrf.mxu3  ;;  %v1908_v0 = vor.u32 %v2118_v52, %v1907_v51  ;;  %v1712_v2 = vor.u32 %v2067_v53, %v1709_v54 }
 0x116   :  { %v792_v6 = vpop.f32.mrf.mxu0 }
 0x117   :  { %1479 = vst.msk [vmem:[%s3348_s3 + $0x38] sm:$0xf] %vm1464_vm0, %v1378_v3  ;;  %v1175_v7 = vadd.f32 %v1174_v5, %v916_v4  ;;  %v793_v8 = vadd.f32 %v2430_v48, %v792_v6  ;;  %v1051_v9 = vpop.f32.mrf.mxu1  ;;  %v1912_v3 = vor.u32 %v2117_v57, %v1909_v58 }
 0x119   :  { %v1328_v11 = vmax.f32 %v1175_v7, 0.0  ;;  %v1052_v12 = vadd.f32 %v1051_v9, %v793_v8 }
 0x11b   :  { %v1428_v18 = vpack.c.bf16 %v1328_v11, %v1328_v11  ;;  %v1279_v19 = vmax.f32 %v1052_v12, 0.0 }
 0x11c   :  { %v917_v22 = vpop.f32.mrf.mxu2 }
 0x11d   :  { %1529 = vst.msk [vmem:[%s3348_s3 + $0x100] sm:$0xf] %vm1464_vm0, %v1428_v18  ;;  %v1379_v23 = vpack.c.bf16 %v1279_v19, %v1279_v19  ;;  %v918_v24 = vadd.f32 %v2430_v48, %v917_v22  ;;  %v1176_v25 = vpop.f32.mrf.mxu3  ;;  %v1715_v19 = vld [vmem:[%s3347_s0 + $0x120] sm:$0xf]  ;;  %v2070_v22 = vld [vmem:[%s3347_s0 + $0x124] sm:$0xf0] }
 0x11e   :  { %v795_v28 = vpop.f32.mrf.mxu0 }
 0x11f   :  { %1480 = vst.msk [vmem:[%s3348_s3 + $0x3c] sm:$0xf] %vm1464_vm0, %v1379_v23  ;;  %v1177_v31 = vadd.f32 %v1176_v25, %v918_v24  ;;  %v796_v32 = vadd.f32 %v2430_v48, %v795_v28  ;;  %v1054_v33 = vpop.f32.mrf.mxu1  ;;  %v1915_v23 = vld [vmem:[%s3347_s0 + $0x2b0] sm:$0xf]  ;;  %v2120_v24 = vld [vmem:[%s3347_s0 + $0x2b4] sm:$0xf0] }
 0x120   :  { %v2069_v25 = vld [vmem:[%s3347_s0 + $0x124] sm:$0xf] }
 0x121   :  { %v1329_v34 = vmax.f32 %v1177_v31, 0.0  ;;  %v1055_v35 = vadd.f32 %v1054_v33, %v796_v32  ;;  %834 = vmatmul.bf16.gmra.mxu0 %v1700_v26  ;;  %959 = vmatmul.bf16.gmra.mxu2 %v1900_v27  ;;  %v1717_v26 = vld [vmem:[%s3347_s0 + $0x128] sm:$0xf0] }
 0x122   :  { %1093 = vmatmul.bf16.gmra.mxu1 %v1704_v29  ;;  %1218 = vmatmul.bf16.gmra.mxu3 %v1904_v30  ;;  %v2119_v29 = vld [vmem:[%s3347_s0 + $0x2b4] sm:$0xf]  ;;  %v1917_v30 = vld [vmem:[%s3347_s0 + $0x2b8] sm:$0xf0] }
 0x123   :  { %v1429_v36 = vpack.c.bf16 %v1329_v34, %v1329_v34  ;;  %v1280_v37 = vmax.f32 %v1055_v35, 0.0  ;;  %v1716_v35 = vor.u32 %v2070_v22, %v1715_v19 }
 0x124   :  { %v920_v38 = vpop.f32.mrf.mxu2 }
 0x125   :  { %1530 = vst.msk [vmem:[%s3348_s3 + $0x104] sm:$0xf] %vm1464_vm0, %v1429_v36  ;;  %v1380_v39 = vpack.c.bf16 %v1280_v37, %v1280_v37  ;;  %v921_v40 = vadd.f32 %v2430_v48, %v920_v38  ;;  %v1179_v41 = vpop.f32.mrf.mxu3  ;;  %v1916_v36 = vor.u32 %v2120_v24, %v1915_v23  ;;  %v1720_v38 = vor.u32 %v2069_v25, %v1717_v26  ;;  %v2949_v26 = vld [vmem:[%s3346_s2] ss:$0 sm:$0xff] }
 0x126   :  { %v797_v42 = vpop.f32.mrf.mxu0 }
 0x127   :  { %1481 = vst.msk [vmem:[%s3348_s3 + $0x40] sm:$0xf] %vm1464_vm0, %v1380_v39  ;;  %v1180_v43 = vadd.f32 %v1179_v41, %v921_v40  ;;  %v798_v44 = vadd.f32 %v2430_v48, %v797_v42  ;;  %v1056_v45 = vpop.f32.mrf.mxu1  ;;  %v1920_v39 = vor.u32 %v2119_v29, %v1917_v30 }
 0x129   :  { %v1330_v47 = vmax.f32 %v1180_v43, 0.0  ;;  %v1057_v49 = vadd.f32 %v1056_v45, %v798_v44 }
 0x12b   :  { %v1430_v55 = vpack.c.bf16 %v1330_v47, %v1330_v47  ;;  %v1281_v56 = vmax.f32 %v1057_v49, 0.0 }
 0x12c   :  { %v922_v59 = vpop.f32.mrf.mxu2 }
 0x12d   :  { %1531 = vst.msk [vmem:[%s3348_s3 + $0x108] sm:$0xf] %vm1464_vm0, %v1430_v55  ;;  %v1381_v60 = vpack.c.bf16 %v1281_v56, %v1281_v56  ;;  %v923_v61 = vadd.f32 %v2430_v48, %v922_v59  ;;  %v1181_v62 = vpop.f32.mrf.mxu3  ;;  %v1723_v56 = vld [vmem:[%s3347_s0 + $0x130] sm:$0xf]  ;;  %v2072_v59 = vld [vmem:[%s3347_s0 + $0x134] sm:$0xf0] }
 0x12e   :  { %v800_v1 = vpop.f32.mrf.mxu0 }
 0x12f   :  { %1482 = vst.msk [vmem:[%s3348_s3 + $0x44] sm:$0xf] %vm1464_vm0, %v1381_v60  ;;  %v1182_v4 = vadd.f32 %v1181_v62, %v923_v61  ;;  %v801_v5 = vadd.f32 %v2430_v48, %v800_v1  ;;  %v1059_v6 = vpop.f32.mrf.mxu1  ;;  %v1923_v60 = vld [vmem:[%s3347_s0 + $0x2c0] sm:$0xf]  ;;  %v2122_v61 = vld [vmem:[%s3347_s0 + $0x2c4] sm:$0xf0] }
 0x130   :  { %v2071_v62 = vld [vmem:[%s3347_s0 + $0x134] sm:$0xf] }
 0x131   :  { %v1331_v7 = vmax.f32 %v1182_v4, 0.0  ;;  %v1060_v8 = vadd.f32 %v1059_v6, %v801_v5  ;;  %839 = vmatmul.bf16.gmra.mxu0 %v1708_v63  ;;  %964 = vmatmul.bf16.gmra.mxu2 %v1908_v0  ;;  %v1725_v63 = vld [vmem:[%s3347_s0 + $0x138] sm:$0xf0] }
 0x132   :  { %1098 = vmatmul.bf16.gmra.mxu1 %v1712_v2  ;;  %1223 = vmatmul.bf16.gmra.mxu3 %v1912_v3  ;;  %v2121_v2 = vld [vmem:[%s3347_s0 + $0x2c4] sm:$0xf]  ;;  %v1925_v3 = vld [vmem:[%s3347_s0 + $0x2c8] sm:$0xf0] }
 0x133   :  { %v1431_v9 = vpack.c.bf16 %v1331_v7, %v1331_v7  ;;  %v1282_v10 = vmax.f32 %v1060_v8, 0.0  ;;  %v1724_v8 = vor.u32 %v2072_v59, %v1723_v56 }
 0x134   :  { %v925_v11 = vpop.f32.mrf.mxu2 }
 0x135   :  { %1532 = vst.msk [vmem:[%s3348_s3 + $0x10c] sm:$0xf] %vm1464_vm0, %v1431_v9  ;;  %v1382_v12 = vpack.c.bf16 %v1282_v10, %v1282_v10  ;;  %v926_v13 = vadd.f32 %v2430_v48, %v925_v11  ;;  %v1184_v14 = vpop.f32.mrf.mxu3  ;;  %v1924_v9 = vor.u32 %v2122_v61, %v1923_v60  ;;  %v1728_v11 = vor.u32 %v2071_v62, %v1725_v63 }
 0x136   :  { %v802_v15 = vpop.f32.mrf.mxu0 }
 0x137   :  { %1483 = vst.msk [vmem:[%s3348_s3 + $0x48] sm:$0xf] %vm1464_vm0, %v1382_v12  ;;  %v1185_v16 = vadd.f32 %v1184_v14, %v926_v13  ;;  %v803_v17 = vadd.f32 %v2430_v48, %v802_v15  ;;  %v1061_v18 = vpop.f32.mrf.mxu1  ;;  %v1928_v12 = vor.u32 %v2121_v2, %v1925_v3 }
 0x139   :  { %v1332_v20 = vmax.f32 %v1185_v16, 0.0  ;;  %v1062_v21 = vadd.f32 %v1061_v18, %v803_v17 }
 0x13b   :  { %v1432_v27 = vpack.c.bf16 %v1332_v20, %v1332_v20  ;;  %v1283_v28 = vmax.f32 %v1062_v21, 0.0 }
 0x13c   :  { %v927_v31 = vpop.f32.mrf.mxu2 }
 0x13d   :  { %1533 = vst.msk [vmem:[%s3348_s3 + $0x110] sm:$0xf] %vm1464_vm0, %v1432_v27  ;;  %v1383_v32 = vpack.c.bf16 %v1283_v28, %v1283_v28  ;;  %v928_v33 = vadd.f32 %v2430_v48, %v927_v31  ;;  %v1186_v34 = vpop.f32.mrf.mxu3  ;;  %v2074_v31 = vld [vmem:[%s3347_s0 + $0x144] sm:$0xf0] }
 0x13e   :  { %v805_v37 = vpop.f32.mrf.mxu0 }
 0x13f   :  { %1484 = vst.msk [vmem:[%s3348_s3 + $0x4c] sm:$0xf] %vm1464_vm0, %v1383_v32  ;;  %v1187_v40 = vadd.f32 %v1186_v34, %v928_v33  ;;  %v806_v41 = vadd.f32 %v2430_v48, %v805_v37  ;;  %v1064_v42 = vpop.f32.mrf.mxu1  ;;  %v1931_v32 = vld [vmem:[%s3347_s0 + $0x2d0] sm:$0xf]  ;;  %v2124_v33 = vld [vmem:[%s3347_s0 + $0x2d4] sm:$0xf0] }
 0x140   :  { %v2073_v34 = vld [vmem:[%s3347_s0 + $0x144] sm:$0xf] }
 0x141   :  { %v1333_v43 = vmax.f32 %v1187_v40, 0.0  ;;  %v1065_v44 = vadd.f32 %v1064_v42, %v806_v41  ;;  %844 = vmatmul.bf16.gmra.mxu0 %v1716_v35  ;;  %969 = vmatmul.bf16.gmra.mxu2 %v1916_v36  ;;  %v1733_v35 = vld [vmem:[%s3347_s0 + $0x148] sm:$0xf0] }
 0x142   :  { %1103 = vmatmul.bf16.gmra.mxu1 %v1720_v38  ;;  %1228 = vmatmul.bf16.gmra.mxu3 %v1920_v39  ;;  %v2123_v38 = vld [vmem:[%s3347_s0 + $0x2d4] sm:$0xf]  ;;  %v1933_v39 = vld [vmem:[%s3347_s0 + $0x2d8] sm:$0xf0] }
 0x143   :  { %v1433_v45 = vpack.c.bf16 %v1333_v43, %v1333_v43  ;;  %v1284_v46 = vmax.f32 %v1065_v44, 0.0 }
 0x144   :  { %v930_v47 = vpop.f32.mrf.mxu2 }
 0x145   :  { %1534 = vst.msk [vmem:[%s3348_s3 + $0x114] sm:$0xf] %vm1464_vm0, %v1433_v45  ;;  %v1384_v49 = vpack.c.bf16 %v1284_v46, %v1284_v46  ;;  %v931_v50 = vadd.f32 %v2430_v48, %v930_v47  ;;  %v1189_v51 = vpop.f32.mrf.mxu3  ;;  %v1932_v45 = vor.u32 %v2124_v33, %v1931_v32  ;;  %v1736_v47 = vor.u32 %v2073_v34, %v1733_v35 }
 0x146   :  { %v807_v52 = vpop.f32.mrf.mxu0 }
 0x147   :  { %1485 = vst.msk [vmem:[%s3348_s3 + $0x50] sm:$0xf] %vm1464_vm0, %v1384_v49  ;;  %v1190_v53 = vadd.f32 %v1189_v51, %v931_v50  ;;  %v808_v54 = vadd.f32 %v2430_v48, %v807_v52  ;;  %v1066_v55 = vpop.f32.mrf.mxu1  ;;  %v1936_v49 = vor.u32 %v2123_v38, %v1933_v39 }
 0x149   :  { %v1334_v57 = vmax.f32 %v1190_v53, 0.0  ;;  %v1067_v58 = vadd.f32 %v1066_v55, %v808_v54 }
 0x14b   :  { %v1434_v0 = vpack.c.bf16 %v1334_v57, %v1334_v57  ;;  %v1285_v1 = vmax.f32 %v1067_v58, 0.0 }
 0x14c   :  { %v932_v4 = vpop.f32.mrf.mxu2 }
 0x14d   :  { %1535 = vst.msk [vmem:[%s3348_s3 + $0x118] sm:$0xf] %vm1464_vm0, %v1434_v0  ;;  %v1385_v5 = vpack.c.bf16 %v1285_v1, %v1285_v1  ;;  %v933_v6 = vadd.f32 %v2430_v48, %v932_v4  ;;  %v1191_v7 = vpop.f32.mrf.mxu3  ;;  %v1739_v1 = vld [vmem:[%s3347_s0 + $0x150] sm:$0xf]  ;;  %v2076_v4 = vld [vmem:[%s3347_s0 + $0x154] sm:$0xf0] }
 0x14e   :  { %v810_v10 = vpop.f32.mrf.mxu0 }
 0x14f   :  { %1486 = vst.msk [vmem:[%s3348_s3 + $0x54] sm:$0xf] %vm1464_vm0, %v1385_v5  ;;  %v1192_v13 = vadd.f32 %v1191_v7, %v933_v6  ;;  %v811_v14 = vadd.f32 %v2430_v48, %v810_v10  ;;  %v1069_v15 = vpop.f32.mrf.mxu1  ;;  %v1939_v5 = vld [vmem:[%s3347_s0 + $0x2e0] sm:$0xf]  ;;  %v2126_v6 = vld [vmem:[%s3347_s0 + $0x2e4] sm:$0xf0] }
 0x150   :  { %v2075_v7 = vld [vmem:[%s3347_s0 + $0x154] sm:$0xf] }
 0x151   :  { %v1335_v16 = vmax.f32 %v1192_v13, 0.0  ;;  %v1070_v17 = vadd.f32 %v1069_v15, %v811_v14  ;;  %849 = vmatmul.bf16.gmra.mxu0 %v1724_v8  ;;  %974 = vmatmul.bf16.gmra.mxu2 %v1924_v9  ;;  %v1741_v8 = vld [vmem:[%s3347_s0 + $0x158] sm:$0xf0] }
 0x152   :  { %1108 = vmatmul.bf16.gmra.mxu1 %v1728_v11  ;;  %1233 = vmatmul.bf16.gmra.mxu3 %v1928_v12  ;;  %v2125_v11 = vld [vmem:[%s3347_s0 + $0x2e4] sm:$0xf]  ;;  %v1941_v12 = vld [vmem:[%s3347_s0 + $0x2e8] sm:$0xf0] }
 0x153   :  { %v1435_v18 = vpack.c.bf16 %v1335_v16, %v1335_v16  ;;  %v1286_v19 = vmax.f32 %v1070_v17, 0.0  ;;  %v1740_v17 = vor.u32 %v2076_v4, %v1739_v1 }
 0x154   :  { %v935_v20 = vpop.f32.mrf.mxu2 }
 0x155   :  { %1536 = vst.msk [vmem:[%s3348_s3 + $0x11c] sm:$0xf] %vm1464_vm0, %v1435_v18  ;;  %v1386_v21 = vpack.c.bf16 %v1286_v19, %v1286_v19  ;;  %v936_v22 = vadd.f32 %v2430_v48, %v935_v20  ;;  %v1194_v23 = vpop.f32.mrf.mxu3  ;;  %v1731_v48 = vld [vmem:[%s3347_s0 + $0x140] sm:$0xf]  ;;  %v1940_v18 = vor.u32 %v2126_v6, %v1939_v5  ;;  %v1744_v20 = vor.u32 %v2075_v7, %v1741_v8 }
 0x156   :  { %v812_v24 = vpop.f32.mrf.mxu0  ;;  %v1732_v44 = vor.u32 %v2074_v31, %v1731_v48 }
 0x157   :  { %1487 = vst.msk [vmem:[%s3348_s3 + $0x58] sm:$0xf] %vm1464_vm0, %v1386_v21  ;;  %v1195_v25 = vadd.f32 %v1194_v23, %v936_v22  ;;  %v813_v27 = vadd.f32 %v2949_v26, %v812_v24  ;;  %v1071_v28 = vpop.f32.mrf.mxu1  ;;  %v1944_v21 = vor.u32 %v2125_v11, %v1941_v12 }
 0x159   :  { %v1336_v29 = vmax.f32 %v1195_v25, 0.0  ;;  %v1072_v30 = vadd.f32 %v1071_v28, %v813_v27 }
 0x15b   :  { %v1436_v36 = vpack.c.bf16 %v1336_v29, %v1336_v29  ;;  %v1287_v37 = vmax.f32 %v1072_v30, 0.0 }
 0x15c   :  { %v937_v40 = vpop.f32.mrf.mxu2 }
 0x15d   :  { %1537 = vst.msk [vmem:[%s3348_s3 + $0x120] sm:$0xf] %vm1464_vm0, %v1436_v36  ;;  %v1387_v41 = vpack.c.bf16 %v1287_v37, %v1287_v37  ;;  %v938_v42 = vadd.f32 %v2949_v26, %v937_v40  ;;  %v1196_v43 = vpop.f32.mrf.mxu3  ;;  %v1747_v37 = vld [vmem:[%s3347_s0 + $0x160] sm:$0xf]  ;;  %v2078_v40 = vld [vmem:[%s3347_s0 + $0x164] sm:$0xf0] }
 0x15e   :  { %v815_v46 = vpop.f32.mrf.mxu0 }
 0x15f   :  { %1488 = vst.msk [vmem:[%s3348_s3 + $0x5c] sm:$0xf] %vm1464_vm0, %v1387_v41  ;;  %v1197_v50 = vadd.f32 %v1196_v43, %v938_v42  ;;  %v816_v51 = vadd.f32 %v2949_v26, %v815_v46  ;;  %v1074_v52 = vpop.f32.mrf.mxu1  ;;  %v1947_v41 = vld [vmem:[%s3347_s0 + $0x2f0] sm:$0xf]  ;;  %v2128_v42 = vld [vmem:[%s3347_s0 + $0x2f4] sm:$0xf0] }
 0x160   :  { %v2077_v43 = vld [vmem:[%s3347_s0 + $0x164] sm:$0xf] }
 0x161   :  { %v1337_v53 = vmax.f32 %v1197_v50, 0.0  ;;  %v1075_v54 = vadd.f32 %v1074_v52, %v816_v51  ;;  %854 = vmatmul.bf16.gmra.mxu0 %v1732_v44  ;;  %979 = vmatmul.bf16.gmra.mxu2 %v1932_v45  ;;  %v1749_v44 = vld [vmem:[%s3347_s0 + $0x168] sm:$0xf0] }
 0x162   :  { %1113 = vmatmul.bf16.gmra.mxu1 %v1736_v47  ;;  %1238 = vmatmul.bf16.gmra.mxu3 %v1936_v49  ;;  %v2127_v47 = vld [vmem:[%s3347_s0 + $0x2f4] sm:$0xf]  ;;  %v1949_v49 = vld [vmem:[%s3347_s0 + $0x2f8] sm:$0xf0] }
 0x163   :  { %v1437_v55 = vpack.c.bf16 %v1337_v53, %v1337_v53  ;;  %v1288_v56 = vmax.f32 %v1075_v54, 0.0  ;;  %v1748_v54 = vor.u32 %v2078_v40, %v1747_v37 }
 0x164   :  { %v940_v57 = vpop.f32.mrf.mxu2 }
 0x165   :  { %1538 = vst.msk [vmem:[%s3348_s3 + $0x124] sm:$0xf] %vm1464_vm0, %v1437_v55  ;;  %v1388_v58 = vpack.c.bf16 %v1288_v56, %v1288_v56  ;;  %v941_v59 = vadd.f32 %v2949_v26, %v940_v57  ;;  %v1199_v60 = vpop.f32.mrf.mxu3  ;;  %v1948_v55 = vor.u32 %v2128_v42, %v1947_v41  ;;  %v1752_v57 = vor.u32 %v2077_v43, %v1749_v44 }
 0x166   :  { %v817_v61 = vpop.f32.mrf.mxu0 }
 0x167   :  { %1489 = vst.msk [vmem:[%s3348_s3 + $0x60] sm:$0xf] %vm1464_vm0, %v1388_v58  ;;  %v1200_v62 = vadd.f32 %v1199_v60, %v941_v59  ;;  %v818_v63 = vadd.f32 %v2949_v26, %v817_v61  ;;  %v1076_v0 = vpop.f32.mrf.mxu1  ;;  %v1952_v58 = vor.u32 %v2127_v47, %v1949_v49 }
 0x169   :  { %v1338_v2 = vmax.f32 %v1200_v62, 0.0  ;;  %v1077_v3 = vadd.f32 %v1076_v0, %v818_v63 }
 0x16b   :  { %v1438_v9 = vpack.c.bf16 %v1338_v2, %v1338_v2  ;;  %v1289_v10 = vmax.f32 %v1077_v3, 0.0 }
 0x16c   :  { %v942_v13 = vpop.f32.mrf.mxu2 }
 0x16d   :  { %1539 = vst.msk [vmem:[%s3348_s3 + $0x128] sm:$0xf] %vm1464_vm0, %v1438_v9  ;;  %v1389_v14 = vpack.c.bf16 %v1289_v10, %v1289_v10  ;;  %v943_v15 = vadd.f32 %v2949_v26, %v942_v13  ;;  %v1201_v16 = vpop.f32.mrf.mxu3  ;;  %v1755_v10 = vld [vmem:[%s3347_s0 + $0x170] sm:$0xf]  ;;  %v2080_v13 = vld [vmem:[%s3347_s0 + $0x174] sm:$0xf0] }
 0x16e   :  { %v820_v19 = vpop.f32.mrf.mxu0 }
 0x16f   :  { %1490 = vst.msk [vmem:[%s3348_s3 + $0x64] sm:$0xf] %vm1464_vm0, %v1389_v14  ;;  %v1202_v22 = vadd.f32 %v1201_v16, %v943_v15  ;;  %v821_v23 = vadd.f32 %v2949_v26, %v820_v19  ;;  %v1079_v24 = vpop.f32.mrf.mxu1  ;;  %v1955_v14 = vld [vmem:[%s3347_s0 + $0x300] sm:$0xf]  ;;  %v2130_v15 = vld [vmem:[%s3347_s0 + $0x304] sm:$0xf0] }
 0x170   :  { %v2079_v16 = vld [vmem:[%s3347_s0 + $0x174] sm:$0xf] }
 0x171   :  { %v1339_v25 = vmax.f32 %v1202_v22, 0.0  ;;  %v1080_v27 = vadd.f32 %v1079_v24, %v821_v23  ;;  %859 = vmatmul.bf16.gmra.mxu0 %v1740_v17  ;;  %984 = vmatmul.bf16.gmra.mxu2 %v1940_v18  ;;  %v1757_v17 = vld [vmem:[%s3347_s0 + $0x178] sm:$0xf0] }
 0x172   :  { %1118 = vmatmul.bf16.gmra.mxu1 %v1744_v20  ;;  %1243 = vmatmul.bf16.gmra.mxu3 %v1944_v21  ;;  %v2129_v20 = vld [vmem:[%s3347_s0 + $0x304] sm:$0xf]  ;;  %v1957_v21 = vld [vmem:[%s3347_s0 + $0x308] sm:$0xf0] }
 0x173   :  { %v1439_v28 = vpack.c.bf16 %v1339_v25, %v1339_v25  ;;  %v1290_v48 = vmax.f32 %v1080_v27, 0.0  ;;  %v1756_v27 = vor.u32 %v2080_v13, %v1755_v10 }
 0x174   :  { %v945_v29 = vpop.f32.mrf.mxu2 }
 0x175   :  { %1540 = vst.msk [vmem:[%s3348_s3 + $0x12c] sm:$0xf] %vm1464_vm0, %v1439_v28  ;;  %v1390_v30 = vpack.c.bf16 %v1290_v48, %v1290_v48  ;;  %v946_v31 = vadd.f32 %v2949_v26, %v945_v29  ;;  %v1204_v32 = vpop.f32.mrf.mxu3  ;;  %v1956_v28 = vor.u32 %v2130_v15, %v1955_v14  ;;  %v1760_v29 = vor.u32 %v2079_v16, %v1757_v17 }
 0x176   :  { %v822_v33 = vpop.f32.mrf.mxu0 }
 0x177   :  { %1491 = vst.msk [vmem:[%s3348_s3 + $0x68] sm:$0xf] %vm1464_vm0, %v1390_v30  ;;  %v1205_v34 = vadd.f32 %v1204_v32, %v946_v31  ;;  %v823_v35 = vadd.f32 %v2949_v26, %v822_v33  ;;  %v1081_v36 = vpop.f32.mrf.mxu1  ;;  %v1960_v30 = vor.u32 %v2129_v20, %v1957_v21 }
 0x179   :  { %v1340_v38 = vmax.f32 %v1205_v34, 0.0  ;;  %v1082_v39 = vadd.f32 %v1081_v36, %v823_v35 }
 0x17b   :  { %v1440_v45 = vpack.c.bf16 %v1340_v38, %v1340_v38  ;;  %v1291_v46 = vmax.f32 %v1082_v39, 0.0 }
 0x17c   :  { %v947_v50 = vpop.f32.mrf.mxu2 }
 0x17d   :  { %1541 = vst.msk [vmem:[%s3348_s3 + $0x130] sm:$0xf] %vm1464_vm0, %v1440_v45  ;;  %v1391_v51 = vpack.c.bf16 %v1291_v46, %v1291_v46  ;;  %v948_v52 = vadd.f32 %v2949_v26, %v947_v50  ;;  %v1206_v53 = vpop.f32.mrf.mxu3  ;;  %v1763_v46 = vld [vmem:[%s3347_s0 + $0x180] sm:$0xf]  ;;  %v2082_v50 = vld [vmem:[%s3347_s0 + $0x184] sm:$0xf0] }
 0x17e   :  { %v825_v56 = vpop.f32.mrf.mxu0 }
 0x17f   :  { %1492 = vst.msk [vmem:[%s3348_s3 + $0x6c] sm:$0xf] %vm1464_vm0, %v1391_v51  ;;  %v1207_v59 = vadd.f32 %v1206_v53, %v948_v52  ;;  %v826_v60 = vadd.f32 %v2949_v26, %v825_v56  ;;  %v1084_v61 = vpop.f32.mrf.mxu1  ;;  %v1963_v51 = vld [vmem:[%s3347_s0 + $0x310] sm:$0xf]  ;;  %v2132_v52 = vld [vmem:[%s3347_s0 + $0x314] sm:$0xf0] }
 0x180   :  { %v2081_v53 = vld [vmem:[%s3347_s0 + $0x184] sm:$0xf] }
 0x181   :  { %v1341_v62 = vmax.f32 %v1207_v59, 0.0  ;;  %v1085_v63 = vadd.f32 %v1084_v61, %v826_v60  ;;  %864 = vmatmul.bf16.gmra.mxu0 %v1748_v54  ;;  %989 = vmatmul.bf16.gmra.mxu2 %v1948_v55  ;;  %v1765_v54 = vld [vmem:[%s3347_s0 + $0x188] sm:$0xf0] }
 0x182   :  { %1123 = vmatmul.bf16.gmra.mxu1 %v1752_v57  ;;  %1248 = vmatmul.bf16.gmra.mxu3 %v1952_v58  ;;  %v2131_v57 = vld [vmem:[%s3347_s0 + $0x314] sm:$0xf]  ;;  %v1965_v58 = vld [vmem:[%s3347_s0 + $0x318] sm:$0xf0] }
 0x183   :  { %v1441_v0 = vpack.c.bf16 %v1341_v62, %v1341_v62  ;;  %v1292_v1 = vmax.f32 %v1085_v63, 0.0  ;;  %v1764_v63 = vor.u32 %v2082_v50, %v1763_v46 }
 0x184   :  { %v950_v2 = vpop.f32.mrf.mxu2 }
 0x185   :  { %1542 = vst.msk [vmem:[%s3348_s3 + $0x134] sm:$0xf] %vm1464_vm0, %v1441_v0  ;;  %v1392_v3 = vpack.c.bf16 %v1292_v1, %v1292_v1  ;;  %v951_v4 = vadd.f32 %v2949_v26, %v950_v2  ;;  %v1209_v5 = vpop.f32.mrf.mxu3  ;;  %v1964_v0 = vor.u32 %v2132_v52, %v1963_v51  ;;  %v1768_v2 = vor.u32 %v2081_v53, %v1765_v54 }
 0x186   :  { %v827_v6 = vpop.f32.mrf.mxu0 }
 0x187   :  { %1493 = vst.msk [vmem:[%s3348_s3 + $0x70] sm:$0xf] %vm1464_vm0, %v1392_v3  ;;  %v1210_v7 = vadd.f32 %v1209_v5, %v951_v4  ;;  %v828_v8 = vadd.f32 %v2949_v26, %v827_v6  ;;  %v1086_v9 = vpop.f32.mrf.mxu1  ;;  %v1968_v3 = vor.u32 %v2131_v57, %v1965_v58 }
 0x189   :  { %v1342_v11 = vmax.f32 %v1210_v7, 0.0  ;;  %v1087_v12 = vadd.f32 %v1086_v9, %v828_v8 }
 0x18b   :  { %v1442_v18 = vpack.c.bf16 %v1342_v11, %v1342_v11  ;;  %v1293_v19 = vmax.f32 %v1087_v12, 0.0 }
 0x18c   :  { %v952_v22 = vpop.f32.mrf.mxu2 }
 0x18d   :  { %1543 = vst.msk [vmem:[%s3348_s3 + $0x138] sm:$0xf] %vm1464_vm0, %v1442_v18  ;;  %v1393_v23 = vpack.c.bf16 %v1293_v19, %v1293_v19  ;;  %v953_v24 = vadd.f32 %v2949_v26, %v952_v22  ;;  %v1211_v25 = vpop.f32.mrf.mxu3 }
 0x18e   :  { %v830_v48 = vpop.f32.mrf.mxu0 }
 0x18f   :  { %1494 = vst.msk [vmem:[%s3348_s3 + $0x74] sm:$0xf] %vm1464_vm0, %v1393_v23  ;;  %v1212_v31 = vadd.f32 %v1211_v25, %v953_v24  ;;  %v831_v32 = vadd.f32 %v2949_v26, %v830_v48  ;;  %v1089_v33 = vpop.f32.mrf.mxu1 }
 0x191   :  { %v1343_v34 = vmax.f32 %v1212_v31, 0.0  ;;  %v1090_v35 = vadd.f32 %v1089_v33, %v831_v32  ;;  %869 = vmatmul.bf16.gmra.mxu0 %v1756_v27  ;;  %994 = vmatmul.bf16.gmra.mxu2 %v1956_v28 }
 0x192   :  { %1128 = vmatmul.bf16.gmra.mxu1 %v1760_v29  ;;  %1253 = vmatmul.bf16.gmra.mxu3 %v1960_v30 }
 0x193   :  { %v1443_v36 = vpack.c.bf16 %v1343_v34, %v1343_v34  ;;  %v1294_v37 = vmax.f32 %v1090_v35, 0.0 }
 0x194   :  { %v955_v38 = vpop.f32.mrf.mxu2 }
 0x195   :  { %1544 = vst.msk [vmem:[%s3348_s3 + $0x13c] sm:$0xf] %vm1464_vm0, %v1443_v36  ;;  %v1394_v39 = vpack.c.bf16 %v1294_v37, %v1294_v37  ;;  %v956_v40 = vadd.f32 %v2949_v26, %v955_v38  ;;  %v1214_v41 = vpop.f32.mrf.mxu3 }
 0x196   :  { %v832_v42 = vpop.f32.mrf.mxu0 }
 0x197   :  { %1495 = vst.msk [vmem:[%s3348_s3 + $0x78] sm:$0xf] %vm1464_vm0, %v1394_v39  ;;  %v1215_v43 = vadd.f32 %v1214_v41, %v956_v40  ;;  %v833_v44 = vadd.f32 %v2949_v26, %v832_v42  ;;  %v1091_v45 = vpop.f32.mrf.mxu1 }
 0x199   :  { %v1344_v47 = vmax.f32 %v1215_v43, 0.0  ;;  %v1092_v49 = vadd.f32 %v1091_v45, %v833_v44 }
 0x19b   :  { %v1444_v55 = vpack.c.bf16 %v1344_v47, %v1344_v47  ;;  %v1295_v56 = vmax.f32 %v1092_v49, 0.0 }
 0x19c   :  { %v957_v59 = vpop.f32.mrf.mxu2 }
 0x19d   :  { %1545 = vst.msk [vmem:[%s3348_s3 + $0x140] sm:$0xf] %vm1464_vm0, %v1444_v55  ;;  %v1395_v60 = vpack.c.bf16 %v1295_v56, %v1295_v56  ;;  %v958_v61 = vadd.f32 %v2949_v26, %v957_v59  ;;  %v1216_v62 = vpop.f32.mrf.mxu3 }
 0x19e   :  { %v835_v1 = vpop.f32.mrf.mxu0 }
 0x19f   :  { %1496 = vst.msk [vmem:[%s3348_s3 + $0x7c] sm:$0xf] %vm1464_vm0, %v1395_v60  ;;  %v1217_v4 = vadd.f32 %v1216_v62, %v958_v61  ;;  %v836_v5 = vadd.f32 %v2949_v26, %v835_v1  ;;  %v1094_v6 = vpop.f32.mrf.mxu1 }
 0x1a1   :  { %v1345_v7 = vmax.f32 %v1217_v4, 0.0  ;;  %v1095_v8 = vadd.f32 %v1094_v6, %v836_v5  ;;  %874 = vmatmul.bf16.gmra.mxu0 %v1764_v63  ;;  %999 = vmatmul.bf16.gmra.mxu2 %v1964_v0 }
 0x1a2   :  { %1133 = vmatmul.bf16.gmra.mxu1 %v1768_v2  ;;  %1258 = vmatmul.bf16.gmra.mxu3 %v1968_v3 }
 0x1a3   :  { %v1445_v9 = vpack.c.bf16 %v1345_v7, %v1345_v7  ;;  %v1296_v10 = vmax.f32 %v1095_v8, 0.0 }
 0x1a4   :  { %v960_v11 = vpop.f32.mrf.mxu2 }
 0x1a5   :  { %1546 = vst.msk [vmem:[%s3348_s3 + $0x144] sm:$0xf] %vm1464_vm0, %v1445_v9  ;;  %v1396_v12 = vpack.c.bf16 %v1296_v10, %v1296_v10  ;;  %v961_v13 = vadd.f32 %v2949_v26, %v960_v11  ;;  %v1219_v14 = vpop.f32.mrf.mxu3 }
 0x1a6   :  { %v837_v15 = vpop.f32.mrf.mxu0 }
 0x1a7   :  { %1497 = vst.msk [vmem:[%s3348_s3 + $0x80] sm:$0xf] %vm1464_vm0, %v1396_v12  ;;  %v1220_v16 = vadd.f32 %v1219_v14, %v961_v13  ;;  %v838_v17 = vadd.f32 %v2949_v26, %v837_v15  ;;  %v1096_v18 = vpop.f32.mrf.mxu1 }
 0x1a9   :  { %v1346_v19 = vmax.f32 %v1220_v16, 0.0  ;;  %v1097_v20 = vadd.f32 %v1096_v18, %v838_v17 }
 0x1ab   :  { %v1446_v21 = vpack.c.bf16 %v1346_v19, %v1346_v19  ;;  %v1297_v22 = vmax.f32 %v1097_v20, 0.0 }
 0x1ac   :  { %v962_v23 = vpop.f32.mrf.mxu2 }
 0x1ad   :  { %1547 = vst.msk [vmem:[%s3348_s3 + $0x148] sm:$0xf] %vm1464_vm0, %v1446_v21  ;;  %v1397_v24 = vpack.c.bf16 %v1297_v22, %v1297_v22  ;;  %v963_v25 = vadd.f32 %v2949_v26, %v962_v23  ;;  %v1221_v27 = vpop.f32.mrf.mxu3 }
 0x1ae   :  { %v840_v28 = vpop.f32.mrf.mxu0 }
 0x1af   :  { %1498 = vst.msk [vmem:[%s3348_s3 + $0x84] sm:$0xf] %vm1464_vm0, %v1397_v24  ;;  %v1222_v48 = vadd.f32 %v1221_v27, %v963_v25  ;;  %v841_v29 = vadd.f32 %v2949_v26, %v840_v28  ;;  %v1099_v30 = vpop.f32.mrf.mxu1 }
 0x1b1   :  { %v1347_v31 = vmax.f32 %v1222_v48, 0.0  ;;  %v1100_v32 = vadd.f32 %v1099_v30, %v841_v29 }
 0x1b3   :  { %v1447_v33 = vpack.c.bf16 %v1347_v31, %v1347_v31  ;;  %v1298_v34 = vmax.f32 %v1100_v32, 0.0 }
 0x1b4   :  { %v965_v35 = vpop.f32.mrf.mxu2 }
 0x1b5   :  { %1548 = vst.msk [vmem:[%s3348_s3 + $0x14c] sm:$0xf] %vm1464_vm0, %v1447_v33  ;;  %v1398_v36 = vpack.c.bf16 %v1298_v34, %v1298_v34  ;;  %v966_v37 = vadd.f32 %v2949_v26, %v965_v35  ;;  %v1224_v38 = vpop.f32.mrf.mxu3 }
 0x1b6   :  { %v842_v39 = vpop.f32.mrf.mxu0 }
 0x1b7   :  { %1499 = vst.msk [vmem:[%s3348_s3 + $0x88] sm:$0xf] %vm1464_vm0, %v1398_v36  ;;  %v1225_v40 = vadd.f32 %v1224_v38, %v966_v37  ;;  %v843_v41 = vadd.f32 %v2949_v26, %v842_v39  ;;  %v1101_v42 = vpop.f32.mrf.mxu1 }
 0x1b9   :  { %v1348_v43 = vmax.f32 %v1225_v40, 0.0  ;;  %v1102_v44 = vadd.f32 %v1101_v42, %v843_v41 }
 0x1bb   :  { %v1448_v45 = vpack.c.bf16 %v1348_v43, %v1348_v43  ;;  %v1299_v46 = vmax.f32 %v1102_v44, 0.0 }
 0x1bc   :  { %v967_v47 = vpop.f32.mrf.mxu2 }
 0x1bd   :  { %1549 = vst.msk [vmem:[%s3348_s3 + $0x150] sm:$0xf] %vm1464_vm0, %v1448_v45  ;;  %v1399_v49 = vpack.c.bf16 %v1299_v46, %v1299_v46  ;;  %v968_v50 = vadd.f32 %v2949_v26, %v967_v47  ;;  %v1226_v51 = vpop.f32.mrf.mxu3 }
 0x1be   :  { %v845_v52 = vpop.f32.mrf.mxu0 }
 0x1bf   :  { %1500 = vst.msk [vmem:[%s3348_s3 + $0x8c] sm:$0xf] %vm1464_vm0, %v1399_v49  ;;  %v1227_v53 = vadd.f32 %v1226_v51, %v968_v50  ;;  %v846_v54 = vadd.f32 %v2949_v26, %v845_v52  ;;  %v1104_v55 = vpop.f32.mrf.mxu1 }
 0x1c1   :  { %v1349_v56 = vmax.f32 %v1227_v53, 0.0  ;;  %v1105_v57 = vadd.f32 %v1104_v55, %v846_v54 }
 0x1c3   :  { %v1449_v58 = vpack.c.bf16 %v1349_v56, %v1349_v56  ;;  %v1300_v59 = vmax.f32 %v1105_v57, 0.0 }
 0x1c4   :  { %v970_v60 = vpop.f32.mrf.mxu2 }
 0x1c5   :  { %1550 = vst.msk [vmem:[%s3348_s3 + $0x154] sm:$0xf] %vm1464_vm0, %v1449_v58  ;;  %v1400_v61 = vpack.c.bf16 %v1300_v59, %v1300_v59  ;;  %v971_v62 = vadd.f32 %v2949_v26, %v970_v60  ;;  %v1229_v63 = vpop.f32.mrf.mxu3 }
 0x1c6   :  { %v847_v0 = vpop.f32.mrf.mxu0 }
 0x1c7   :  { %1501 = vst.msk [vmem:[%s3348_s3 + $0x90] sm:$0xf] %vm1464_vm0, %v1400_v61  ;;  %v1230_v1 = vadd.f32 %v1229_v63, %v971_v62  ;;  %v848_v2 = vadd.f32 %v2949_v26, %v847_v0  ;;  %v1106_v3 = vpop.f32.mrf.mxu1 }
 0x1c9   :  { %v1350_v4 = vmax.f32 %v1230_v1, 0.0  ;;  %v1107_v5 = vadd.f32 %v1106_v3, %v848_v2 }
 0x1cb   :  { %v1450_v6 = vpack.c.bf16 %v1350_v4, %v1350_v4  ;;  %v1301_v7 = vmax.f32 %v1107_v5, 0.0 }
 0x1cc   :  { %v972_v8 = vpop.f32.mrf.mxu2 }
 0x1cd   :  { %1551 = vst.msk [vmem:[%s3348_s3 + $0x158] sm:$0xf] %vm1464_vm0, %v1450_v6  ;;  %v1401_v9 = vpack.c.bf16 %v1301_v7, %v1301_v7  ;;  %v973_v10 = vadd.f32 %v2949_v26, %v972_v8  ;;  %v1231_v11 = vpop.f32.mrf.mxu3 }
 0x1ce   :  { %v850_v12 = vpop.f32.mrf.mxu0 }
 0x1cf   :  { %1502 = vst.msk [vmem:[%s3348_s3 + $0x94] sm:$0xf] %vm1464_vm0, %v1401_v9  ;;  %v1232_v13 = vadd.f32 %v1231_v11, %v973_v10  ;;  %v851_v14 = vadd.f32 %v2949_v26, %v850_v12  ;;  %v1109_v15 = vpop.f32.mrf.mxu1 }
 0x1d1   :  { %v1351_v16 = vmax.f32 %v1232_v13, 0.0  ;;  %v1110_v17 = vadd.f32 %v1109_v15, %v851_v14 }
 0x1d3   :  { %v1451_v18 = vpack.c.bf16 %v1351_v16, %v1351_v16  ;;  %v1302_v19 = vmax.f32 %v1110_v17, 0.0 }
 0x1d4   :  { %v975_v20 = vpop.f32.mrf.mxu2 }
 0x1d5   :  { %1552 = vst.msk [vmem:[%s3348_s3 + $0x15c] sm:$0xf] %vm1464_vm0, %v1451_v18  ;;  %v1402_v21 = vpack.c.bf16 %v1302_v19, %v1302_v19  ;;  %v976_v22 = vadd.f32 %v2949_v26, %v975_v20  ;;  %v1234_v23 = vpop.f32.mrf.mxu3 }
 0x1d6   :  { %v852_v24 = vpop.f32.mrf.mxu0 }
 0x1d7   :  { %1503 = vst.msk [vmem:[%s3348_s3 + $0x98] sm:$0xf] %vm1464_vm0, %v1402_v21  ;;  %v1235_v25 = vadd.f32 %v1234_v23, %v976_v22  ;;  %v853_v27 = vadd.f32 %v2949_v26, %v852_v24  ;;  %v1111_v28 = vpop.f32.mrf.mxu1 }
 0x1d9   :  { %v1352_v48 = vmax.f32 %v1235_v25, 0.0  ;;  %v1112_v29 = vadd.f32 %v1111_v28, %v853_v27 }
 0x1db   :  { %v1452_v30 = vpack.c.bf16 %v1352_v48, %v1352_v48  ;;  %v1303_v31 = vmax.f32 %v1112_v29, 0.0 }
 0x1dc   :  { %v977_v32 = vpop.f32.mrf.mxu2 }
 0x1dd   :  { %1553 = vst.msk [vmem:[%s3348_s3 + $0x160] sm:$0xf] %vm1464_vm0, %v1452_v30  ;;  %v1403_v33 = vpack.c.bf16 %v1303_v31, %v1303_v31  ;;  %v978_v34 = vadd.f32 %v2949_v26, %v977_v32  ;;  %v1236_v35 = vpop.f32.mrf.mxu3 }
 0x1de   :  { %v855_v36 = vpop.f32.mrf.mxu0 }
 0x1df   :  { %1504 = vst.msk [vmem:[%s3348_s3 + $0x9c] sm:$0xf] %vm1464_vm0, %v1403_v33  ;;  %v1237_v37 = vadd.f32 %v1236_v35, %v978_v34  ;;  %v856_v38 = vadd.f32 %v2949_v26, %v855_v36  ;;  %v1114_v39 = vpop.f32.mrf.mxu1 }
 0x1e1   :  { %v1353_v40 = vmax.f32 %v1237_v37, 0.0  ;;  %v1115_v41 = vadd.f32 %v1114_v39, %v856_v38 }
 0x1e3   :  { %v1453_v42 = vpack.c.bf16 %v1353_v40, %v1353_v40  ;;  %v1304_v43 = vmax.f32 %v1115_v41, 0.0 }
 0x1e4   :  { %v980_v44 = vpop.f32.mrf.mxu2 }
 0x1e5   :  { %1554 = vst.msk [vmem:[%s3348_s3 + $0x164] sm:$0xf] %vm1464_vm0, %v1453_v42  ;;  %v1404_v45 = vpack.c.bf16 %v1304_v43, %v1304_v43  ;;  %v981_v46 = vadd.f32 %v2949_v26, %v980_v44  ;;  %v1239_v47 = vpop.f32.mrf.mxu3 }
 0x1e6   :  { %v857_v49 = vpop.f32.mrf.mxu0 }
 0x1e7   :  { %1505 = vst.msk [vmem:[%s3348_s3 + $0xa0] sm:$0xf] %vm1464_vm0, %v1404_v45  ;;  %v1240_v50 = vadd.f32 %v1239_v47, %v981_v46  ;;  %v858_v51 = vadd.f32 %v2949_v26, %v857_v49  ;;  %v1116_v52 = vpop.f32.mrf.mxu1 }
 0x1e9   :  { %v1354_v53 = vmax.f32 %v1240_v50, 0.0  ;;  %v1117_v54 = vadd.f32 %v1116_v52, %v858_v51 }
 0x1eb   :  { %v1454_v55 = vpack.c.bf16 %v1354_v53, %v1354_v53  ;;  %v1305_v56 = vmax.f32 %v1117_v54, 0.0 }
 0x1ec   :  { %v982_v57 = vpop.f32.mrf.mxu2 }
 0x1ed   :  { %1555 = vst.msk [vmem:[%s3348_s3 + $0x168] sm:$0xf] %vm1464_vm0, %v1454_v55  ;;  %v1405_v58 = vpack.c.bf16 %v1305_v56, %v1305_v56  ;;  %v983_v59 = vadd.f32 %v2949_v26, %v982_v57  ;;  %v1241_v60 = vpop.f32.mrf.mxu3 }
 0x1ee   :  { %v860_v61 = vpop.f32.mrf.mxu0 }
 0x1ef   :  { %1506 = vst.msk [vmem:[%s3348_s3 + $0xa4] sm:$0xf] %vm1464_vm0, %v1405_v58  ;;  %v1242_v62 = vadd.f32 %v1241_v60, %v983_v59  ;;  %v861_v63 = vadd.f32 %v2949_v26, %v860_v61  ;;  %v1119_v0 = vpop.f32.mrf.mxu1 }
 0x1f1   :  { %v1355_v1 = vmax.f32 %v1242_v62, 0.0  ;;  %v1120_v2 = vadd.f32 %v1119_v0, %v861_v63 }
 0x1f3   :  { %v1455_v3 = vpack.c.bf16 %v1355_v1, %v1355_v1  ;;  %v1306_v4 = vmax.f32 %v1120_v2, 0.0 }
 0x1f4   :  { %v985_v5 = vpop.f32.mrf.mxu2 }
 0x1f5   :  { %1556 = vst.msk [vmem:[%s3348_s3 + $0x16c] sm:$0xf] %vm1464_vm0, %v1455_v3  ;;  %v1406_v6 = vpack.c.bf16 %v1306_v4, %v1306_v4  ;;  %v986_v7 = vadd.f32 %v2949_v26, %v985_v5  ;;  %v1244_v8 = vpop.f32.mrf.mxu3 }
 0x1f6   :  { %v862_v9 = vpop.f32.mrf.mxu0 }
 0x1f7   :  { %1507 = vst.msk [vmem:[%s3348_s3 + $0xa8] sm:$0xf] %vm1464_vm0, %v1406_v6  ;;  %v1245_v10 = vadd.f32 %v1244_v8, %v986_v7  ;;  %v863_v11 = vadd.f32 %v2949_v26, %v862_v9  ;;  %v1121_v12 = vpop.f32.mrf.mxu1 }
 0x1f9   :  { %v1356_v13 = vmax.f32 %v1245_v10, 0.0  ;;  %v1122_v14 = vadd.f32 %v1121_v12, %v863_v11 }
 0x1fb   :  { %v1456_v15 = vpack.c.bf16 %v1356_v13, %v1356_v13  ;;  %v1307_v16 = vmax.f32 %v1122_v14, 0.0 }
 0x1fc   :  { %v987_v17 = vpop.f32.mrf.mxu2 }
 0x1fd   :  { %1557 = vst.msk [vmem:[%s3348_s3 + $0x170] sm:$0xf] %vm1464_vm0, %v1456_v15  ;;  %v1407_v18 = vpack.c.bf16 %v1307_v16, %v1307_v16  ;;  %v988_v19 = vadd.f32 %v2949_v26, %v987_v17  ;;  %v1246_v20 = vpop.f32.mrf.mxu3 }
 0x1fe   :  { %v865_v21 = vpop.f32.mrf.mxu0 }
 0x1ff   :  { %1508 = vst.msk [vmem:[%s3348_s3 + $0xac] sm:$0xf] %vm1464_vm0, %v1407_v18  ;;  %v1247_v22 = vadd.f32 %v1246_v20, %v988_v19  ;;  %v866_v23 = vadd.f32 %v2949_v26, %v865_v21  ;;  %v1124_v24 = vpop.f32.mrf.mxu1 }
 0x201   :  { %v1357_v25 = vmax.f32 %v1247_v22, 0.0  ;;  %v1125_v27 = vadd.f32 %v1124_v24, %v866_v23 }
 0x203   :  { %v1457_v28 = vpack.c.bf16 %v1357_v25, %v1357_v25  ;;  %v1308_v48 = vmax.f32 %v1125_v27, 0.0 }
 0x204   :  { %v990_v29 = vpop.f32.mrf.mxu2 }
 0x205   :  { %1558 = vst.msk [vmem:[%s3348_s3 + $0x174] sm:$0xf] %vm1464_vm0, %v1457_v28  ;;  %v1408_v30 = vpack.c.bf16 %v1308_v48, %v1308_v48  ;;  %v991_v31 = vadd.f32 %v2949_v26, %v990_v29  ;;  %v1249_v32 = vpop.f32.mrf.mxu3 }
 0x206   :  { %v867_v33 = vpop.f32.mrf.mxu0 }
 0x207   :  { %1509 = vst.msk [vmem:[%s3348_s3 + $0xb0] sm:$0xf] %vm1464_vm0, %v1408_v30  ;;  %v1250_v34 = vadd.f32 %v1249_v32, %v991_v31  ;;  %v868_v35 = vadd.f32 %v2949_v26, %v867_v33  ;;  %v1126_v36 = vpop.f32.mrf.mxu1 }
 0x209   :  { %v1358_v37 = vmax.f32 %v1250_v34, 0.0  ;;  %v1127_v38 = vadd.f32 %v1126_v36, %v868_v35 }
 0x20b   :  { %v1458_v39 = vpack.c.bf16 %v1358_v37, %v1358_v37  ;;  %v1309_v40 = vmax.f32 %v1127_v38, 0.0 }
 0x20c   :  { %v992_v41 = vpop.f32.mrf.mxu2 }
 0x20d   :  { %1559 = vst.msk [vmem:[%s3348_s3 + $0x178] sm:$0xf] %vm1464_vm0, %v1458_v39  ;;  %v1409_v42 = vpack.c.bf16 %v1309_v40, %v1309_v40  ;;  %v993_v43 = vadd.f32 %v2949_v26, %v992_v41  ;;  %v1251_v44 = vpop.f32.mrf.mxu3 }
 0x20e   :  { %v870_v45 = vpop.f32.mrf.mxu0 }
 0x20f   :  { %1510 = vst.msk [vmem:[%s3348_s3 + $0xb4] sm:$0xf] %vm1464_vm0, %v1409_v42  ;;  %v1252_v46 = vadd.f32 %v1251_v44, %v993_v43  ;;  %v871_v47 = vadd.f32 %v2949_v26, %v870_v45  ;;  %v1129_v49 = vpop.f32.mrf.mxu1 }
 0x211   :  { %v1359_v50 = vmax.f32 %v1252_v46, 0.0  ;;  %v1130_v51 = vadd.f32 %v1129_v49, %v871_v47 }
 0x213   :  { %v1459_v52 = vpack.c.bf16 %v1359_v50, %v1359_v50  ;;  %v1310_v53 = vmax.f32 %v1130_v51, 0.0 }
 0x214   :  { %v995_v54 = vpop.f32.mrf.mxu2 }
 0x215   :  { %1560 = vst.msk [vmem:[%s3348_s3 + $0x17c] sm:$0xf] %vm1464_vm0, %v1459_v52  ;;  %v1410_v55 = vpack.c.bf16 %v1310_v53, %v1310_v53  ;;  %v996_v56 = vadd.f32 %v2949_v26, %v995_v54  ;;  %v1254_v57 = vpop.f32.mrf.mxu3 }
 0x216   :  { %v872_v58 = vpop.f32.mrf.mxu0 }
 0x217   :  { %1511 = vst.msk [vmem:[%s3348_s3 + $0xb8] sm:$0xf] %vm1464_vm0, %v1410_v55  ;;  %v1255_v59 = vadd.f32 %v1254_v57, %v996_v56  ;;  %v873_v60 = vadd.f32 %v2949_v26, %v872_v58  ;;  %v1131_v61 = vpop.f32.mrf.mxu1 }
 0x219   :  { %v1360_v62 = vmax.f32 %v1255_v59, 0.0  ;;  %v1132_v63 = vadd.f32 %v1131_v61, %v873_v60 }
 0x21b   :  { %v1460_v0 = vpack.c.bf16 %v1360_v62, %v1360_v62  ;;  %v1311_v1 = vmax.f32 %v1132_v63, 0.0 }
 0x21c   :  { %v997_v2 = vpop.f32.mrf.mxu2 }
 0x21d   :  { %1561 = vst.msk [vmem:[%s3348_s3 + $0x180] sm:$0xf] %vm1464_vm0, %v1460_v0  ;;  %v1411_v3 = vpack.c.bf16 %v1311_v1, %v1311_v1  ;;  %v998_v4 = vadd.f32 %v2949_v26, %v997_v2  ;;  %v1256_v5 = vpop.f32.mrf.mxu3 }
 0x21e   :  { %v875_v6 = vpop.f32.mrf.mxu0 }
 0x21f   :  { %1512 = vst.msk [vmem:[%s3348_s3 + $0xbc] sm:$0xf] %vm1464_vm0, %v1411_v3  ;;  %v1257_v7 = vadd.f32 %v1256_v5, %v998_v4  ;;  %v876_v8 = vadd.f32 %v2949_v26, %v875_v6  ;;  %v1134_v9 = vpop.f32.mrf.mxu1 }
 0x221   :  { %v1361_v10 = vmax.f32 %v1257_v7, 0.0  ;;  %v1135_v11 = vadd.f32 %v1134_v9, %v876_v8 }
 0x223   :  { %v1461_v12 = vpack.c.bf16 %v1361_v10, %v1361_v10  ;;  %v1312_v13 = vmax.f32 %v1135_v11, 0.0 }
 0x224   :  { %v1000_v14 = vpop.f32.mrf.mxu2 }
 0x225   :  { %1562 = vst.msk [vmem:[%s3348_s3 + $0x184] sm:$0xf] %vm1464_vm0, %v1461_v12  ;;  %v1412_v15 = vpack.c.bf16 %v1312_v13, %v1312_v13  ;;  %v1001_v16 = vadd.f32 %v2949_v26, %v1000_v14  ;;  %v1259_v17 = vpop.f32.mrf.mxu3 }
 0x226   :  { %v877_v18 = vpop.f32.mrf.mxu0 }
 0x227   :  { %1513 = vst.msk [vmem:[%s3348_s3 + $0xc0] sm:$0xf] %vm1464_vm0, %v1412_v15  ;;  %v1260_v19 = vadd.f32 %v1259_v17, %v1001_v16  ;;  %v878_v20 = vadd.f32 %v2949_v26, %v877_v18  ;;  %v1136_v21 = vpop.f32.mrf.mxu1 }
 0x229   :  { %v1362_v22 = vmax.f32 %v1260_v19, 0.0  ;;  %v1137_v23 = vadd.f32 %v1136_v21, %v878_v20 }
 0x22b   :  { %v1462_v24 = vpack.c.bf16 %v1362_v22, %v1362_v22  ;;  %v1313_v25 = vmax.f32 %v1137_v23, 0.0 }
 0x22c   :  { %v1002_v27 = vpop.f32.mrf.mxu2 }
 0x22d   :  { %1563 = vst.msk [vmem:[%s3348_s3 + $0x188] sm:$0xf] %vm1464_vm0, %v1462_v24  ;;  %v1413_v28 = vpack.c.bf16 %v1313_v25, %v1313_v25  ;;  %v1003_v48 = vadd.f32 %v2949_v26, %v1002_v27  ;;  %v1261_v29 = vpop.f32.mrf.mxu3 }
 0x22f   :  { %1514 = vst.msk [vmem:[%s3348_s3 + $0xc4] sm:$0xf] %vm1464_vm0, %v1413_v28  ;;  %v1262_v30 = vadd.f32 %v1261_v29, %v1003_v48 }
 0x231   :  { %v1363_v31 = vmax.f32 %v1262_v30, 0.0 }
 0x233   :  { %v1463_v32 = vpack.c.bf16 %v1363_v31, %v1363_v31 }
 0x235   :  { %1564 = vst.msk [vmem:[%s3348_s3 + $0x18c] sm:$0xf] %vm1464_vm0, %v1463_v32 }

// kernel: cnn_policy_forward.8
= control target key start
LH: loop header
LB: loop body
LE: loop exit
PB: predicated region body
PF: predicated region fallthrough
CT: control target
= control target key end

     0   :  { %s3374_s0 = inlined_call_operand.vmem [shape: bf16[512,64], index: 0, kind: input, shape index: {}]   ;;  %s3375_s1 = inlined_call_operand.vmem [shape: f32[1,64], index: 1, kind: input, shape index: {}]   ;;  %s3376_s2 = inlined_call_operand.vmem [shape: bf16[162,512], index: 2, kind: input, shape index: {}]   ;;  %s3377_s3 = inlined_call_operand.<no memory space> [shape: bf16[], index: 3, kind: input, shape index: {}]   ;;  %s3378_s4 = inlined_call_operand.vmem [shape: bf16[176,64], index: 4, kind: output, shape index: {}]  }
   0x1   :  { %v9_v0 = vstv %s3377_s3 }
   0x2   :  { %v3029_v1 = vunpack.i.l.bf16 %v9_v0 }
   0x3   :  { %v2575_v2 = vld [vmem:[%s3374_s0 + $0x38] sm:$0xff]  ;;  %v2574_v6 = vld [vmem:[%s3374_s0 + $0x30] sm:$0xff]  ;;  %v2573_v10 = vld [vmem:[%s3374_s0 + $0x28] sm:$0xff]  ;;  %vm2110_vm1 = vcmask 519168  }
   0x4   :  { %v2583_v3 = vld [vmem:[%s3374_s0 + $0x78] sm:$0xff]  ;;  %1810 = vmatpush.bf16.msra.mxu0 %v2575_v2  ;;  %v2582_v7 = vld [vmem:[%s3374_s0 + $0x70] sm:$0xff]  ;;  %v2581_v11 = vld [vmem:[%s3374_s0 + $0x68] sm:$0xff] }
   0x5   :  { %v2591_v4 = vld [vmem:[%s3374_s0 + $0xb8] sm:$0xff]  ;;  %1874 = vmatpush.bf16.msra.mxu1 %v2583_v3  ;;  %v2590_v8 = vld [vmem:[%s3374_s0 + $0xb0] sm:$0xff]  ;;  %v2589_v12 = vld [vmem:[%s3374_s0 + $0xa8] sm:$0xff] }
   0x6   :  { %v2599_v5 = vld [vmem:[%s3374_s0 + $0xf8] sm:$0xff]  ;;  %1938 = vmatpush.bf16.msra.mxu2 %v2591_v4  ;;  %v2598_v9 = vld [vmem:[%s3374_s0 + $0xf0] sm:$0xff]  ;;  %v2597_v13 = vld [vmem:[%s3374_s0 + $0xe8] sm:$0xff] }
   0x7   :  { %2002 = vmatpush.bf16.msra.mxu3 %v2599_v5  ;;  %v2572_v14 = vld [vmem:[%s3374_s0 + $0x20] sm:$0xff]  ;;  %v2962_v19 = vld [vmem:[%s3376_s2 + $0x10] sm:$0xff]  ;;  %v2961_v20 = vld [vmem:[%s3376_s2 + $0x8] sm:$0xff] }
   0x8   :  { %1811 = vmatpush.bf16.msra.mxu0 %v2574_v6  ;;  %v2580_v15 = vld [vmem:[%s3374_s0 + $0x60] sm:$0xff]  ;;  %v2963_v21 = vld [vmem:[%s3376_s2 + $0x18] sm:$0xff]  ;;  %2609 = vst [vmem:[#allocation7 + $0x10] sm:$0xff] %v2962_v19   ;;  %v2966_v23 = vld [vmem:[%s3376_s2 + $0x30] sm:$0xff] }
   0x9   :  { %1875 = vmatpush.bf16.msra.mxu1 %v2582_v7  ;;  %v2588_v16 = vld [vmem:[%s3374_s0 + $0xa0] sm:$0xff]  ;;  %v2571_v24 = vld [vmem:[%s3374_s0 + $0x18] sm:$0xff]  ;;  %2604 = vst [vmem:[#allocation7 + $0x8] sm:$0xff] %v2961_v20   ;;  %v2965_v26 = vld [vmem:[%s3376_s2 + $0x28] sm:$0xff] }
   0xa   :  { %1939 = vmatpush.bf16.msra.mxu2 %v2590_v8  ;;  %v2596_v17 = vld [vmem:[%s3374_s0 + $0xe0] sm:$0xff]  ;;  %v2579_v25 = vld [vmem:[%s3374_s0 + $0x58] sm:$0xff]  ;;  %2614 = vst [vmem:[#allocation7 + $0x18] sm:$0xff] %v2963_v21   ;;  %v2570_v30 = vld [vmem:[%s3374_s0 + $0x10] sm:$0xff] }
   0xb   :  { %2003 = vmatpush.bf16.msra.mxu3 %v2598_v9  ;;  %v20_v18 = vld [vmem:[%s3376_s2] sm:$0xff]   ;;  %v2587_v27 = vld [vmem:[%s3374_s0 + $0x98] sm:$0xff]  ;;  %2629 = vst [vmem:[#allocation7 + $0x30] sm:$0xff] %v2966_v23   ;;  %v2578_v31 = vld [vmem:[%s3374_s0 + $0x50] sm:$0xff] }
   0xc   :  { %1812 = vmatpush.bf16.msra.mxu0 %v2573_v10  ;;  %31 = vst [vmem:[#allocation7] sm:$0xff] %v20_v18   ;;  %v2964_v22 = vld [vmem:[%s3376_s2 + $0x20] sm:$0xff]  ;;  %v2595_v28 = vld [vmem:[%s3374_s0 + $0xd8] sm:$0xff]  ;;  %v2586_v33 = vld [vmem:[%s3374_s0 + $0x90] sm:$0xff] }
   0xd   :  { %1876 = vmatpush.bf16.msra.mxu1 %v2581_v11  ;;  %v2967_v29 = vld [vmem:[%s3376_s2 + $0x38] sm:$0xff]  ;;  %2619 = vst [vmem:[#allocation7 + $0x20] sm:$0xff] %v2964_v22   ;;  %v2968_v32 = vld [vmem:[%s3376_s2 + $0x40] sm:$0xff]  ;;  %v2594_v34 = vld [vmem:[%s3374_s0 + $0xd0] sm:$0xff] }
   0xe   :  { %1940 = vmatpush.bf16.msra.mxu2 %v2589_v12  ;;  %2624 = vst [vmem:[#allocation7 + $0x28] sm:$0xff] %v2965_v26   ;;  %v2970_v35 = vld [vmem:[%s3376_s2 + $0x50] sm:$0xff]  ;;  %v2569_v36 = vld [vmem:[%s3374_s0 + $0x8] sm:$0xff]  ;;  %v2971_v41 = vld [vmem:[%s3376_s2 + $0x58] sm:$0xff] }
   0xf   :  { %2004 = vmatpush.bf16.msra.mxu3 %v2597_v13  ;;  %2634 = vst [vmem:[#allocation7 + $0x38] sm:$0xff] %v2967_v29   ;;  %v2577_v37 = vld [vmem:[%s3374_s0 + $0x48] sm:$0xff]  ;;  %v2568_v42 = vld [vmem:[%s3374_s0] sm:$0xff]  ;;  %v2526_v48 = vld [vmem:[#allocation7 + $0xc] sm:$0xf0] }
  0x10   :  { %1813 = vmatpush.bf16.msra.mxu0 %v2572_v14  ;;  %2639 = vst [vmem:[#allocation7 + $0x40] sm:$0xff] %v2968_v32   ;;  %v2969_v38 = vld [vmem:[%s3376_s2 + $0x48] sm:$0xff]  ;;  %v2576_v43 = vld [vmem:[%s3374_s0 + $0x40] sm:$0xff]  ;;  %v2224_v49 = vld [vmem:[#allocation7 + $0x10] sm:$0xf0] }
  0x11   :  { %1877 = vmatpush.bf16.msra.mxu1 %v2580_v15  ;;  %2649 = vst [vmem:[#allocation7 + $0x50] sm:$0xff] %v2970_v35   ;;  %v2585_v39 = vld [vmem:[%s3374_s0 + $0x88] sm:$0xff]  ;;  %v2584_v44 = vld [vmem:[%s3374_s0 + $0x80] sm:$0xff]  ;;  %v2527_v51 = vld [vmem:[#allocation7 + $0x14] sm:$0xf0] }
  0x12   :  { %1941 = vmatpush.bf16.msra.mxu2 %v2588_v16  ;;  %v2593_v40 = vld [vmem:[%s3374_s0 + $0xc8] sm:$0xff]  ;;  %2644 = vst [vmem:[#allocation7 + $0x48] sm:$0xff] %v2969_v38   ;;  %v2592_v45 = vld [vmem:[%s3374_s0 + $0xc0] sm:$0xff]  ;;  %v2232_v53 = vld [vmem:[#allocation7 + $0x18] sm:$0xf0] }
  0x13   :  { %2005 = vmatpush.bf16.msra.mxu3 %v2596_v17  ;;  %v2222_v46 = vld [vmem:[#allocation7] sm:$0xf]  ;;  %v2524_v47 = vld [vmem:[#allocation7 + $0x4] sm:$0xf]  ;;  %2654 = vst [vmem:[#allocation7 + $0x58] sm:$0xff] %v2971_v41   ;;  %v2974_v59 = vld [vmem:[%s3376_s2 + $0x70] sm:$0xff] }
  0x14   :  { %1814 = vmatpush.bf16.msra.mxu0 %v2571_v24  ;;  %v2230_v50 = vld [vmem:[#allocation7 + $0x8] sm:$0xf]  ;;  %v2525_v52 = vld [vmem:[#allocation7 + $0xc] sm:$0xf]  ;;  %v2223_v54 = vor.u32 %v2526_v48, %v2222_v46  ;;  %v2227_v55 = vor.u32 %v2524_v47, %v2224_v49  ;;  %v2972_v58 = vld [vmem:[%s3376_s2 + $0x60] sm:$0xff]  ;;  %2669 = vst [vmem:[#allocation7 + $0x70] sm:$0xff] %v2974_v59  }
  0x15   :  { %1878 = vmatpush.bf16.msra.mxu1 %v2579_v25  ;;  %v2231_v56 = vor.u32 %v2527_v51, %v2230_v50  ;;  %v2235_v57 = vor.u32 %v2525_v52, %v2232_v53  ;;  %2659 = vst [vmem:[#allocation7 + $0x60] sm:$0xff] %v2972_v58   ;;  %v2973_v60 = vld [vmem:[%s3376_s2 + $0x68] sm:$0xff]  ;;  %v2975_v61 = vld [vmem:[%s3376_s2 + $0x78] sm:$0xff]  ;;  %v2238_v62 = vld [vmem:[#allocation7 + $0x20] sm:$0xf] }
  0x16   :  { %1942 = vmatpush.bf16.msra.mxu2 %v2587_v27  ;;  %2664 = vst [vmem:[#allocation7 + $0x68] sm:$0xff] %v2973_v60   ;;  %v2528_v63 = vld [vmem:[#allocation7 + $0x24] sm:$0xf]  ;;  %v2530_v0 = vld [vmem:[#allocation7 + $0x2c] sm:$0xf0]  ;;  %v2977_v13 = vld [vmem:[%s3376_s2 + $0x88] sm:$0xff] }
  0x17   :  { %2006 = vmatpush.bf16.msra.mxu3 %v2595_v28  ;;  %2674 = vst [vmem:[#allocation7 + $0x78] sm:$0xff] %v2975_v61   ;;  %v2240_v2 = vld [vmem:[#allocation7 + $0x30] sm:$0xf0]  ;;  %v2246_v3 = vld [vmem:[#allocation7 + $0x28] sm:$0xf]  ;;  %v2239_v7 = vor.u32 %v2530_v0, %v2238_v62  ;;  %v2976_v11 = vld [vmem:[%s3376_s2 + $0x80] sm:$0xff] }
  0x18   :  { %1815 = vmatpush.bf16.msra.mxu0 %v2570_v30  ;;  %v2531_v4 = vld [vmem:[#allocation7 + $0x34] sm:$0xf0]  ;;  %v2529_v5 = vld [vmem:[#allocation7 + $0x2c] sm:$0xf]  ;;  %v2248_v6 = vld [vmem:[#allocation7 + $0x38] sm:$0xf0]  ;;  %v2243_v8 = vor.u32 %v2528_v63, %v2240_v2 }
  0x19   :  { %1879 = vmatpush.bf16.msra.mxu1 %v2578_v31  ;;  %v2247_v9 = vor.u32 %v2531_v4, %v2246_v3  ;;  %v2251_v10 = vor.u32 %v2529_v5, %v2248_v6  ;;  %v2978_v12 = vld [vmem:[%s3376_s2 + $0x90] sm:$0xff]  ;;  %2679 = vst [vmem:[#allocation7 + $0x80] sm:$0xff] %v2976_v11   ;;  %v2979_v14 = vld [vmem:[%s3376_s2 + $0x98] sm:$0xff]  ;;  %v2254_v15 = vld [vmem:[#allocation7 + $0x40] sm:$0xf] }
  0x1a   :  { %1943 = vmatpush.bf16.msra.mxu2 %v2586_v33  ;;  %2689 = vst [vmem:[#allocation7 + $0x90] sm:$0xff] %v2978_v12   ;;  %v2534_v16 = vld [vmem:[#allocation7 + $0x4c] sm:$0xf0]  ;;  %v2532_v17 = vld [vmem:[#allocation7 + $0x44] sm:$0xf]  ;;  %v2981_v29 = vld [vmem:[%s3376_s2 + $0xa8] sm:$0xff] }
  0x1b   :  { %2007 = vmatpush.bf16.msra.mxu3 %v2594_v34  ;;  %2684 = vst [vmem:[#allocation7 + $0x88] sm:$0xff] %v2977_v13   ;;  %v2256_v18 = vld [vmem:[#allocation7 + $0x50] sm:$0xf0]  ;;  %v2262_v19 = vld [vmem:[#allocation7 + $0x48] sm:$0xf]  ;;  %v2255_v23 = vor.u32 %v2534_v16, %v2254_v15  ;;  %v2980_v27 = vld [vmem:[%s3376_s2 + $0xa0] sm:$0xff] }
  0x1c   :  { %1816 = vmatpush.bf16.msra.mxu0 %v2569_v36  ;;  %2694 = vst [vmem:[#allocation7 + $0x98] sm:$0xff] %v2979_v14   ;;  %v2535_v20 = vld [vmem:[#allocation7 + $0x54] sm:$0xf0]  ;;  %v2533_v21 = vld [vmem:[#allocation7 + $0x4c] sm:$0xf]  ;;  %v2259_v24 = vor.u32 %v2532_v17, %v2256_v18  ;;  %v2982_v28 = vld [vmem:[%s3376_s2 + $0xb0] sm:$0xff] }
  0x1d   :  { %1880 = vmatpush.bf16.msra.mxu1 %v2577_v37  ;;  %v2264_v22 = vld [vmem:[#allocation7 + $0x58] sm:$0xf0]  ;;  %v2263_v25 = vor.u32 %v2535_v20, %v2262_v19  ;;  %2699 = vst [vmem:[#allocation7 + $0xa0] sm:$0xff] %v2980_v27   ;;  %v2270_v31 = vld [vmem:[#allocation7 + $0x60] sm:$0xf]  ;;  %v2990_v60 = vld [vmem:[%s3376_s2 + $0xf0] sm:$0xff] }
  0x1e   :  { %1944 = vmatpush.bf16.msra.mxu2 %v2585_v39  ;;  %v2267_v26 = vor.u32 %v2533_v21, %v2264_v22  ;;  %2709 = vst [vmem:[#allocation7 + $0xb0] sm:$0xff] %v2982_v28   ;;  %v2983_v30 = vld [vmem:[%s3376_s2 + $0xb8] sm:$0xff]  ;;  %v2538_v32 = vld [vmem:[#allocation7 + $0x6c] sm:$0xf0]  ;;  %v2536_v33 = vld [vmem:[#allocation7 + $0x64] sm:$0xf] }
  0x1f   :  { %2008 = vmatpush.bf16.msra.mxu3 %v2593_v40  ;;  %2704 = vst [vmem:[#allocation7 + $0xa8] sm:$0xff] %v2981_v29   ;;  %v2272_v34 = vld [vmem:[#allocation7 + $0x70] sm:$0xf0]  ;;  %v2278_v35 = vld [vmem:[#allocation7 + $0x68] sm:$0xf]  ;;  %v2271_v39 = vor.u32 %v2538_v32, %v2270_v31  ;;  %v2987_v46 = vld [vmem:[%s3376_s2 + $0xd8] sm:$0xff] }
  0x20   :  { %1817 = vmatpush.bf16.msra.mxu0 %v2568_v42  ;;  %2714 = vst [vmem:[#allocation7 + $0xb8] sm:$0xff] %v2983_v30   ;;  %v2539_v36 = vld [vmem:[#allocation7 + $0x74] sm:$0xf0]  ;;  %v2537_v37 = vld [vmem:[#allocation7 + $0x6c] sm:$0xf]  ;;  %v2275_v40 = vor.u32 %v2536_v33, %v2272_v34  ;;  %v2988_v59 = vld [vmem:[%s3376_s2 + $0xe0] sm:$0xff] }
  0x21   :  { %1881 = vmatpush.bf16.msra.mxu1 %v2576_v43  ;;  %v2280_v38 = vld [vmem:[#allocation7 + $0x78] sm:$0xf0]  ;;  %v2279_v41 = vor.u32 %v2539_v36, %v2278_v35  ;;  %v2984_v43 = vld [vmem:[%s3376_s2 + $0xc0] sm:$0xff]  ;;  %v2542_v48 = vld [vmem:[#allocation7 + $0x8c] sm:$0xf0]  ;;  %2734 = vst [vmem:[#allocation7 + $0xd8] sm:$0xff] %v2987_v46  }
  0x22   :  { %1945 = vmatpush.bf16.msra.mxu2 %v2584_v44  ;;  %v2283_v42 = vor.u32 %v2537_v37, %v2280_v38  ;;  %v2986_v44 = vld [vmem:[%s3376_s2 + $0xd0] sm:$0xff]  ;;  %2719 = vst [vmem:[#allocation7 + $0xc0] sm:$0xff] %v2984_v43   ;;  %v2286_v47 = vld [vmem:[#allocation7 + $0x80] sm:$0xf]  ;;  %v2540_v49 = vld [vmem:[#allocation7 + $0x84] sm:$0xf] }
  0x23   :  { %2009 = vmatpush.bf16.msra.mxu3 %v2592_v45  ;;  %1818 = vmatmul.bf16.vlgmr.msra.gmra.mxu0 %v2223_v54  ;;  %2729 = vst [vmem:[#allocation7 + $0xd0] sm:$0xff] %v2986_v44   ;;  %v2985_v45 = vld [vmem:[%s3376_s2 + $0xc8] sm:$0xff]  ;;  %v2288_v50 = vld [vmem:[#allocation7 + $0x90] sm:$0xf0]  ;;  %v2543_v52 = vld [vmem:[#allocation7 + $0x94] sm:$0xf0]  ;;  %v1187_v44 = vlaneseq }
  0x24   :  { %1882 = vmatmul.bf16.vlgmr.msra.gmra.mxu1 %v2227_v55  ;;  %2724 = vst [vmem:[#allocation7 + $0xc8] sm:$0xff] %v2985_v45   ;;  %v2294_v51 = vld [vmem:[#allocation7 + $0x88] sm:$0xf]  ;;  %v2541_v53 = vld [vmem:[#allocation7 + $0x8c] sm:$0xf]  ;;  %v2287_v55 = vor.u32 %v2542_v48, %v2286_v47  ;;  %v2991_v62 = vld [vmem:[%s3376_s2 + $0xf8] sm:$0xff] }
  0x25   :  { %1946 = vmatmul.bf16.vlgmr.msra.gmra.mxu2 %v2231_v56  ;;  %v2296_v54 = vld [vmem:[#allocation7 + $0x98] sm:$0xf0]  ;;  %v2291_v56 = vor.u32 %v2540_v49, %v2288_v50  ;;  %2739 = vst [vmem:[#allocation7 + $0xe0] sm:$0xff] %v2988_v59   ;;  %v2989_v61 = vld [vmem:[%s3376_s2 + $0xe8] sm:$0xff]  ;;  %v2302_v63 = vld [vmem:[#allocation7 + $0xa0] sm:$0xf] }
  0x26   :  { %2010 = vmatmul.bf16.vlgmr.msra.gmra.mxu3 %v2235_v57  ;;  %v2295_v57 = vor.u32 %v2543_v52, %v2294_v51  ;;  %v2299_v58 = vor.u32 %v2541_v53, %v2296_v54  ;;  %2749 = vst [vmem:[#allocation7 + $0xf0] sm:$0xff] %v2990_v60   ;;  %v2546_v0 = vld [vmem:[#allocation7 + $0xac] sm:$0xf0]  ;;  %v2544_v2 = vld [vmem:[#allocation7 + $0xa4] sm:$0xf]  ;;  %v2993_v14 = vld [vmem:[%s3376_s2 + $0x108] sm:$0xff] }
  0x27   :  { %2744 = vst [vmem:[#allocation7 + $0xe8] sm:$0xff] %v2989_v61   ;;  %v2304_v3 = vld [vmem:[#allocation7 + $0xb0] sm:$0xf0]  ;;  %v2310_v4 = vld [vmem:[#allocation7 + $0xa8] sm:$0xf]  ;;  %v2992_v12 = vld [vmem:[%s3376_s2 + $0x100] sm:$0xff] }
  0x28   :  { %2754 = vst [vmem:[#allocation7 + $0xf8] sm:$0xff] %v2991_v62   ;;  %v2547_v5 = vld [vmem:[#allocation7 + $0xb4] sm:$0xf0]  ;;  %v2545_v6 = vld [vmem:[#allocation7 + $0xac] sm:$0xf]  ;;  %v2994_v13 = vld [vmem:[%s3376_s2 + $0x110] sm:$0xff] }
  0x29   :  { %v2995_v15 = vld [vmem:[%s3376_s2 + $0x118] sm:$0xff]  ;;  %v2318_v16 = vld [vmem:[#allocation7 + $0xc0] sm:$0xf]  ;;  %2759 = vst [vmem:[#allocation7 + $0x100] sm:$0xff] %v2992_v12   ;;  %v2548_v18 = vld [vmem:[#allocation7 + $0xc4] sm:$0xf] }
  0x2a   :  { %v2550_v17 = vld [vmem:[#allocation7 + $0xcc] sm:$0xf0]  ;;  %v2320_v19 = vld [vmem:[#allocation7 + $0xd0] sm:$0xf0]  ;;  %2769 = vst [vmem:[#allocation7 + $0x110] sm:$0xff] %v2994_v13   ;;  %v2996_v28 = vld [vmem:[%s3376_s2 + $0x120] sm:$0xff] }
  0x2b   :  { %v2326_v20 = vld [vmem:[#allocation7 + $0xc8] sm:$0xf]  ;;  %v2551_v21 = vld [vmem:[#allocation7 + $0xd4] sm:$0xf0]  ;;  %2764 = vst [vmem:[#allocation7 + $0x108] sm:$0xff] %v2993_v14   ;;  %v2998_v29 = vld [vmem:[%s3376_s2 + $0x130] sm:$0xff] }
  0x2c   :  { %v2549_v22 = vld [vmem:[#allocation7 + $0xcc] sm:$0xf]  ;;  %2774 = vst [vmem:[#allocation7 + $0x118] sm:$0xff] %v2995_v15   ;;  %v2999_v31 = vld [vmem:[%s3376_s2 + $0x138] sm:$0xff]  ;;  %v2334_v32 = vld [vmem:[#allocation7 + $0xe0] sm:$0xf] }
  0x2d   :  { %v2997_v30 = vld [vmem:[%s3376_s2 + $0x128] sm:$0xff]  ;;  %v2554_v33 = vld [vmem:[#allocation7 + $0xec] sm:$0xf0]  ;;  %2779 = vst [vmem:[#allocation7 + $0x120] sm:$0xff] %v2996_v28   ;;  %v2552_v34 = vld [vmem:[#allocation7 + $0xe4] sm:$0xf] }
  0x2e   :  { %v2336_v35 = vld [vmem:[#allocation7 + $0xf0] sm:$0xf0]  ;;  %2789 = vst [vmem:[#allocation7 + $0x130] sm:$0xff] %v2998_v29   ;;  %v2342_v36 = vld [vmem:[#allocation7 + $0xe8] sm:$0xf]  ;;  %v1188_v45 = vshrl.u32 %v1187_v44, 7 }
  0x2f   :  { %v2555_v37 = vld [vmem:[#allocation7 + $0xf4] sm:$0xf0]  ;;  %2784 = vst [vmem:[#allocation7 + $0x128] sm:$0xff] %v2997_v30   ;;  %v2553_v38 = vld [vmem:[#allocation7 + $0xec] sm:$0xf]  ;;  %v2216_v46 = vld [vmem:[%s3376_s2 + $0x140] sm:$0xff]  }
  0x30   :  { %2794 = vst [vmem:[#allocation7 + $0x138] sm:$0xff] %v2999_v31   ;;  %v1189_v47 = vadd.s32 160, %v1188_v45  ;;  %v1185_v48 = vunpack.c.l.bf16 %v2216_v46  ;;  %v1208_v49 = vunpack.c.h.bf16 %v2216_v46  ;;  %v2218_v50 = vld [vmem:[%s3376_s2 + $0x148] sm:$0xff]   ;;  %v2350_v60 = vld [vmem:[#allocation7 + $0x100] sm:$0xf] }
  0x31   :  { %v1231_v51 = vunpack.c.l.bf16 %v2218_v50  ;;  %v1254_v52 = vunpack.c.h.bf16 %v2218_v50  ;;  %v2556_v61 = vld [vmem:[#allocation7 + $0x104] sm:$0xf] }
  0x32   :  { %vm1190_vm0 = vcmp.lt.s32.totalorder %v1189_v47, 162 }
  0x33   :  { %1823 = vmatmul.bf16.gmra.mxu0 %v2239_v7  ;;  %v2312_v7 = vld [vmem:[#allocation7 + $0xb8] sm:$0xf0]  ;;  %v1191_v53 = vsel %vm1190_vm0, %v1185_v48, %v3029_v1  ;;  %v1214_v54 = vsel %vm1190_vm0, %v1208_v49, %v3029_v1  ;;  %v1260_v59 = vsel %vm1190_vm0, %v1254_v52, %v3029_v1 }
  0x34   :  { %1887 = vmatmul.bf16.gmra.mxu1 %v2243_v8  ;;  %v2303_v8 = vor.u32 %v2546_v0, %v2302_v63  ;;  %v2315_v11 = vor.u32 %v2545_v6, %v2312_v7  ;;  %v3262_v63 = vld [vmem:[%s3375_s1] ss:$0 sm:$0xff]  ;;  %v2558_v0 = vld [vmem:[#allocation7 + $0x10c] sm:$0xf0]  ;;  %v2559_v6 = vld [vmem:[#allocation7 + $0x114] sm:$0xf0] }
  0x35   :  { %1951 = vmatmul.bf16.gmra.mxu2 %v2247_v9  ;;  %v2307_v9 = vor.u32 %v2544_v2, %v2304_v3  ;;  %v2352_v2 = vld [vmem:[#allocation7 + $0x110] sm:$0xf0]  ;;  %v1262_v3 = vpack.c.bf16 0.0, %v1260_v59  ;;  %v2360_v7 = vld [vmem:[#allocation7 + $0x118] sm:$0xf0] }
  0x36   :  { %2015 = vmatmul.bf16.gmra.mxu3 %v2251_v10  ;;  %v2311_v10 = vor.u32 %v2547_v5, %v2310_v4  ;;  %v2358_v4 = vld [vmem:[#allocation7 + $0x108] sm:$0xf]  ;;  %v2557_v5 = vld [vmem:[#allocation7 + $0x10c] sm:$0xf] }
  0x37   :  { %1265 = vst [vmem:[#allocation7 + $0x14c] sm:$0xf] %v1262_v3  ;;  %v2363_v12 = vor.u32 %v2557_v5, %v2360_v7  ;;  %v2563_v28 = vld [vmem:[#allocation7 + $0x134] sm:$0xf0]  ;;  %v2561_v29 = vld [vmem:[#allocation7 + $0x12c] sm:$0xf] }
  0x38   :  { %v2376_v30 = vld [vmem:[#allocation7 + $0x138] sm:$0xf0] }
  0x43   :  { %1828 = vmatmul.bf16.gmra.mxu0 %v2255_v23  ;;  %v2328_v23 = vld [vmem:[#allocation7 + $0xd8] sm:$0xf0] }
  0x44   :  { %1892 = vmatmul.bf16.gmra.mxu1 %v2259_v24  ;;  %v2319_v24 = vor.u32 %v2550_v17, %v2318_v16  ;;  %v2331_v27 = vor.u32 %v2549_v22, %v2328_v23  ;;  %v2366_v22 = vld [vmem:[#allocation7 + $0x120] sm:$0xf]  ;;  %v2562_v23 = vld [vmem:[#allocation7 + $0x12c] sm:$0xf0] }
  0x45   :  { %1956 = vmatmul.bf16.gmra.mxu2 %v2263_v25  ;;  %v2323_v25 = vor.u32 %v2548_v18, %v2320_v19 }
  0x46   :  { %2020 = vmatmul.bf16.gmra.mxu3 %v2267_v26  ;;  %v2327_v26 = vor.u32 %v2551_v21, %v2326_v20 }
  0x53   :  { %1833 = vmatmul.bf16.gmra.mxu0 %v2271_v39  ;;  %v2344_v39 = vld [vmem:[#allocation7 + $0xf8] sm:$0xf0] }
  0x54   :  { %1897 = vmatmul.bf16.gmra.mxu1 %v2275_v40  ;;  %v2335_v40 = vor.u32 %v2554_v33, %v2334_v32  ;;  %v2347_v43 = vor.u32 %v2553_v38, %v2344_v39 }
  0x55   :  { %1961 = vmatmul.bf16.gmra.mxu2 %v2279_v41  ;;  %v2339_v41 = vor.u32 %v2552_v34, %v2336_v35  ;;  %v2367_v35 = vor.u32 %v2562_v23, %v2366_v22 }
  0x56   :  { %2025 = vmatmul.bf16.gmra.mxu3 %v2283_v42  ;;  %v2343_v42 = vor.u32 %v2555_v37, %v2342_v36 }
  0x63   :  { %1838 = vmatmul.bf16.gmra.mxu0 %v2287_v55  ;;  %v1193_v55 = vpack.c.bf16 0.0, %v1191_v53 }
  0x64   :  { %1902 = vmatmul.bf16.gmra.mxu1 %v2291_v56  ;;  %v2798_v56 = vpack.c.bf16 %v3029_v1, %v3029_v1 }
  0x65   :  { %1966 = vmatmul.bf16.gmra.mxu2 %v2295_v57  ;;  %v1237_v57 = vsel %vm1190_vm0, %v1231_v51, %v3029_v1  ;;  %1196 = vst [vmem:[#allocation7 + $0x140] sm:$0xf] %v1193_v55  ;;  %v2351_v1 = vor.u32 %v2558_v0, %v2350_v60 }
  0x66   :  { %2030 = vmatmul.bf16.gmra.mxu3 %v2299_v58  ;;  %v1216_v58 = vpack.c.bf16 0.0, %v1214_v54  ;;  %v1239_v62 = vpack.c.bf16 0.0, %v1237_v57  ;;  %2799 = vst [vmem:[#allocation7 + $0x150] sm:$0xff] %v2798_v56  }
  0x67   :  { %2804 = vst [vmem:[#allocation7 + $0x158] sm:$0xff] %v2798_v56  }
  0x68   :  { %1219 = vst [vmem:[#allocation7 + $0x144] sm:$0xf] %v1216_v58 }
  0x69   :  { %1242 = vst [vmem:[#allocation7 + $0x148] sm:$0xf] %v1239_v62 }
  0x6c   :  { %v2382_v54 = vld [vmem:[#allocation7 + $0x140] sm:$0xf] }
  0x6d   :  { %v2566_v55 = vld [vmem:[#allocation7 + $0x14c] sm:$0xf0]  ;;  %v2384_v56 = vld [vmem:[#allocation7 + $0x150] sm:$0xf0] }
  0x6e   :  { %v2567_v59 = vld [vmem:[#allocation7 + $0x154] sm:$0xf0]  ;;  %v2392_v62 = vld [vmem:[#allocation7 + $0x158] sm:$0xf0]  ;;  %v2383_v5 = vor.u32 %v2566_v55, %v2382_v54 }
  0x6f   :  { %v2564_v58 = vld [vmem:[#allocation7 + $0x144] sm:$0xf] }
  0x70   :  { %v2390_v60 = vld [vmem:[#allocation7 + $0x148] sm:$0xf] }
  0x73   :  { %1843 = vmatmul.bf16.gmra.mxu0 %v2303_v8  ;;  %v2355_v8 = vor.u32 %v2556_v61, %v2352_v2  ;;  %v2565_v61 = vld [vmem:[#allocation7 + $0x14c] sm:$0xf] }
  0x74   :  { %1907 = vmatmul.bf16.gmra.mxu1 %v2307_v9 }
  0x75   :  { %1971 = vmatmul.bf16.gmra.mxu2 %v2311_v10 }
  0x76   :  { %2035 = vmatmul.bf16.gmra.mxu3 %v2315_v11  ;;  %v2359_v11 = vor.u32 %v2559_v6, %v2358_v4  ;;  %v2387_v6 = vor.u32 %v2564_v58, %v2384_v56 }
  0x83   :  { %1848 = vmatmul.bf16.gmra.mxu0 %v2319_v24  ;;  %v2560_v24 = vld [vmem:[#allocation7 + $0x124] sm:$0xf] }
  0x84   :  { %1912 = vmatmul.bf16.gmra.mxu1 %v2323_v25 }
  0x85   :  { %1976 = vmatmul.bf16.gmra.mxu2 %v2327_v26  ;;  %v2368_v26 = vld [vmem:[#allocation7 + $0x130] sm:$0xf0] }
  0x86   :  { %2040 = vmatmul.bf16.gmra.mxu3 %v2331_v27  ;;  %v2374_v27 = vld [vmem:[#allocation7 + $0x128] sm:$0xf]  ;;  %v2371_v36 = vor.u32 %v2560_v24, %v2368_v26 }
  0x93   :  { %1853 = vmatmul.bf16.gmra.mxu0 %v2335_v40  ;;  %v2375_v40 = vor.u32 %v2563_v28, %v2374_v27 }
  0x94   :  { %1917 = vmatmul.bf16.gmra.mxu1 %v2339_v41  ;;  %v2379_v41 = vor.u32 %v2561_v29, %v2376_v30 }
  0x95   :  { %1981 = vmatmul.bf16.gmra.mxu2 %v2343_v42 }
  0x96   :  { %2045 = vmatmul.bf16.gmra.mxu3 %v2347_v43 }
  0xa0   :  { %v1819_v9 = vpop.f32.mrf.mxu0 }
  0xa1   :  { %v1883_v10 = vpop.f32.mrf.mxu1  ;;  %v1820_v13 = vadd.f32 %v3262_v63, %v1819_v9  ;;  %v2391_v9 = vor.u32 %v2567_v59, %v2390_v60 }
  0xa3   :  { %1858 = vmatmul.bf16.gmra.mxu0 %v2351_v1  ;;  %v1884_v14 = vadd.f32 %v1883_v10, %v1820_v13  ;;  %v2395_v10 = vor.u32 %v2565_v61, %v2392_v62 }
  0xa4   :  { %1922 = vmatmul.bf16.gmra.mxu1 %v2355_v8 }
  0xa5   :  { %1986 = vmatmul.bf16.gmra.mxu2 %v2359_v11 }
  0xa6   :  { %2050 = vmatmul.bf16.gmra.mxu3 %v2363_v12 }
  0xa8   :  { %v1947_v15 = vpop.f32.mrf.mxu2  ;;  %v1821_v18 = vpop.f32.mrf.mxu0 }
  0xa9   :  { %v2011_v16 = vpop.f32.mrf.mxu3  ;;  %v1948_v17 = vadd.f32 %v1947_v15, %v1884_v14  ;;  %v1885_v19 = vpop.f32.mrf.mxu1  ;;  %v1822_v21 = vadd.f32 %v3262_v63, %v1821_v18 }
  0xab   :  { %v2012_v20 = vadd.f32 %v2011_v16, %v1948_v17  ;;  %v1886_v32 = vadd.f32 %v1885_v19, %v1822_v21 }
  0xad   :  { %v2066_v25 = vmax.f32 %v2012_v20, 0.0 }
  0xaf   :  { %v2088_v31 = vpack.c.bf16 %v2066_v25, %v2066_v25 }
  0xb0   :  { %v1949_v33 = vpop.f32.mrf.mxu2  ;;  %v1824_v38 = vpop.f32.mrf.mxu0 }
  0xb1   :  { %v2013_v34 = vpop.f32.mrf.mxu3  ;;  %2111 = vst.msk [vmem:[%s3378_s4] sm:$0xf] %vm2110_vm1, %v2088_v31  ;;  %v1950_v37 = vadd.f32 %v1949_v33, %v1886_v32  ;;  %v1888_v39 = vpop.f32.mrf.mxu1  ;;  %v1825_v42 = vadd.f32 %v3262_v63, %v1824_v38 }
  0xb3   :  { %v2014_v43 = vadd.f32 %v2013_v34, %v1950_v37  ;;  %1863 = vmatmul.bf16.gmra.mxu0 %v2367_v35  ;;  %v1889_v45 = vadd.f32 %v1888_v39, %v1825_v42 }
  0xb4   :  { %1927 = vmatmul.bf16.gmra.mxu1 %v2371_v36 }
  0xb5   :  { %v2067_v44 = vmax.f32 %v2014_v43, 0.0  ;;  %1991 = vmatmul.bf16.gmra.mxu2 %v2375_v40 }
  0xb6   :  { %2055 = vmatmul.bf16.gmra.mxu3 %v2379_v41 }
  0xb7   :  { %v2089_v46 = vpack.c.bf16 %v2067_v44, %v2067_v44 }
  0xb8   :  { %v1952_v47 = vpop.f32.mrf.mxu2  ;;  %v1826_v50 = vpop.f32.mrf.mxu0 }
  0xb9   :  { %v2016_v48 = vpop.f32.mrf.mxu3  ;;  %2112 = vst.msk [vmem:[%s3378_s4 + $0x4] sm:$0xf] %vm2110_vm1, %v2089_v46  ;;  %v1953_v49 = vadd.f32 %v1952_v47, %v1889_v45  ;;  %v1890_v51 = vpop.f32.mrf.mxu1  ;;  %v1827_v53 = vadd.f32 %v3262_v63, %v1826_v50 }
  0xbb   :  { %v2017_v52 = vadd.f32 %v2016_v48, %v1953_v49  ;;  %v1891_v2 = vadd.f32 %v1890_v51, %v1827_v53 }
  0xbd   :  { %v2068_v57 = vmax.f32 %v2017_v52, 0.0 }
  0xbf   :  { %v2090_v0 = vpack.c.bf16 %v2068_v57, %v2068_v57 }
  0xc0   :  { %v1954_v3 = vpop.f32.mrf.mxu2  ;;  %v1829_v1 = vpop.f32.mrf.mxu0 }
  0xc1   :  { %v2018_v4 = vpop.f32.mrf.mxu3  ;;  %2113 = vst.msk [vmem:[%s3378_s4 + $0x8] sm:$0xf] %vm2110_vm1, %v2090_v0  ;;  %v1955_v7 = vadd.f32 %v1954_v3, %v1891_v2  ;;  %v1893_v8 = vpop.f32.mrf.mxu1  ;;  %v1830_v11 = vadd.f32 %v3262_v63, %v1829_v1 }
  0xc3   :  { %v2019_v12 = vadd.f32 %v2018_v4, %v1955_v7  ;;  %1868 = vmatmul.bf16.gmra.mxu0 %v2383_v5  ;;  %v1894_v14 = vadd.f32 %v1893_v8, %v1830_v11 }
  0xc4   :  { %1932 = vmatmul.bf16.gmra.mxu1 %v2387_v6 }
  0xc5   :  { %v2069_v13 = vmax.f32 %v2019_v12, 0.0  ;;  %1996 = vmatmul.bf16.gmra.mxu2 %v2391_v9 }
  0xc6   :  { %2060 = vmatmul.bf16.gmra.mxu3 %v2395_v10 }
  0xc7   :  { %v2091_v15 = vpack.c.bf16 %v2069_v13, %v2069_v13 }
  0xc8   :  { %v1957_v16 = vpop.f32.mrf.mxu2  ;;  %v1831_v19 = vpop.f32.mrf.mxu0 }
  0xc9   :  { %v2021_v17 = vpop.f32.mrf.mxu3  ;;  %2114 = vst.msk [vmem:[%s3378_s4 + $0xc] sm:$0xf] %vm2110_vm1, %v2091_v15  ;;  %v1958_v18 = vadd.f32 %v1957_v16, %v1894_v14  ;;  %v1895_v20 = vpop.f32.mrf.mxu1  ;;  %v1832_v22 = vadd.f32 %v3262_v63, %v1831_v19 }
  0xcb   :  { %v2022_v21 = vadd.f32 %v2021_v17, %v1958_v18  ;;  %v1896_v25 = vadd.f32 %v1895_v20, %v1832_v22 }
  0xcd   :  { %v2070_v23 = vmax.f32 %v2022_v21, 0.0 }
  0xcf   :  { %v2092_v24 = vpack.c.bf16 %v2070_v23, %v2070_v23 }
  0xd0   :  { %v1959_v26 = vpop.f32.mrf.mxu2  ;;  %v1834_v29 = vpop.f32.mrf.mxu0 }
  0xd1   :  { %v2023_v27 = vpop.f32.mrf.mxu3  ;;  %2115 = vst.msk [vmem:[%s3378_s4 + $0x10] sm:$0xf] %vm2110_vm1, %v2092_v24  ;;  %v1960_v28 = vadd.f32 %v1959_v26, %v1896_v25  ;;  %v1898_v30 = vpop.f32.mrf.mxu1  ;;  %v1835_v31 = vadd.f32 %v3262_v63, %v1834_v29 }
  0xd3   :  { %v2024_v32 = vadd.f32 %v2023_v27, %v1960_v28  ;;  %v1899_v34 = vadd.f32 %v1898_v30, %v1835_v31 }
  0xd5   :  { %v2071_v33 = vmax.f32 %v2024_v32, 0.0 }
  0xd7   :  { %v2093_v35 = vpack.c.bf16 %v2071_v33, %v2071_v33 }
  0xd8   :  { %v1962_v36 = vpop.f32.mrf.mxu2  ;;  %v1836_v39 = vpop.f32.mrf.mxu0 }
  0xd9   :  { %v2026_v37 = vpop.f32.mrf.mxu3  ;;  %2116 = vst.msk [vmem:[%s3378_s4 + $0x14] sm:$0xf] %vm2110_vm1, %v2093_v35  ;;  %v1963_v38 = vadd.f32 %v1962_v36, %v1899_v34  ;;  %v1900_v40 = vpop.f32.mrf.mxu1  ;;  %v1837_v42 = vadd.f32 %v3262_v63, %v1836_v39 }
  0xdb   :  { %v2027_v41 = vadd.f32 %v2026_v37, %v1963_v38  ;;  %v1901_v45 = vadd.f32 %v1900_v40, %v1837_v42 }
  0xdd   :  { %v2072_v43 = vmax.f32 %v2027_v41, 0.0 }
  0xdf   :  { %v2094_v44 = vpack.c.bf16 %v2072_v43, %v2072_v43 }
  0xe0   :  { %v1964_v46 = vpop.f32.mrf.mxu2  ;;  %v1839_v49 = vpop.f32.mrf.mxu0 }
  0xe1   :  { %v2028_v47 = vpop.f32.mrf.mxu3  ;;  %2117 = vst.msk [vmem:[%s3378_s4 + $0x18] sm:$0xf] %vm2110_vm1, %v2094_v44  ;;  %v1965_v48 = vadd.f32 %v1964_v46, %v1901_v45  ;;  %v1903_v50 = vpop.f32.mrf.mxu1  ;;  %v1840_v51 = vadd.f32 %v3262_v63, %v1839_v49 }
  0xe3   :  { %v2029_v52 = vadd.f32 %v2028_v47, %v1965_v48  ;;  %v1904_v54 = vadd.f32 %v1903_v50, %v1840_v51 }
  0xe5   :  { %v2073_v53 = vmax.f32 %v2029_v52, 0.0 }
  0xe7   :  { %v2095_v55 = vpack.c.bf16 %v2073_v53, %v2073_v53 }
  0xe8   :  { %v1967_v56 = vpop.f32.mrf.mxu2  ;;  %v1841_v59 = vpop.f32.mrf.mxu0 }
  0xe9   :  { %v2031_v57 = vpop.f32.mrf.mxu3  ;;  %2118 = vst.msk [vmem:[%s3378_s4 + $0x1c] sm:$0xf] %vm2110_vm1, %v2095_v55  ;;  %v1968_v58 = vadd.f32 %v1967_v56, %v1904_v54  ;;  %v1905_v60 = vpop.f32.mrf.mxu1  ;;  %v1842_v62 = vadd.f32 %v3262_v63, %v1841_v59 }
  0xeb   :  { %v2032_v61 = vadd.f32 %v2031_v57, %v1968_v58  ;;  %v1906_v3 = vadd.f32 %v1905_v60, %v1842_v62 }
  0xed   :  { %v2074_v0 = vmax.f32 %v2032_v61, 0.0 }
  0xef   :  { %v2096_v2 = vpack.c.bf16 %v2074_v0, %v2074_v0 }
  0xf0   :  { %v1969_v4 = vpop.f32.mrf.mxu2  ;;  %v1844_v7 = vpop.f32.mrf.mxu0 }
  0xf1   :  { %v2033_v5 = vpop.f32.mrf.mxu3  ;;  %2119 = vst.msk [vmem:[%s3378_s4 + $0x20] sm:$0xf] %vm2110_vm1, %v2096_v2  ;;  %v1970_v6 = vadd.f32 %v1969_v4, %v1906_v3  ;;  %v1908_v1 = vpop.f32.mrf.mxu1  ;;  %v1845_v8 = vadd.f32 %v3262_v63, %v1844_v7 }
  0xf3   :  { %v2034_v9 = vadd.f32 %v2033_v5, %v1970_v6  ;;  %v1909_v11 = vadd.f32 %v1908_v1, %v1845_v8 }
  0xf5   :  { %v2075_v10 = vmax.f32 %v2034_v9, 0.0 }
  0xf7   :  { %v2097_v12 = vpack.c.bf16 %v2075_v10, %v2075_v10 }
  0xf8   :  { %v1972_v13 = vpop.f32.mrf.mxu2  ;;  %v1846_v16 = vpop.f32.mrf.mxu0 }
  0xf9   :  { %v2036_v14 = vpop.f32.mrf.mxu3  ;;  %2120 = vst.msk [vmem:[%s3378_s4 + $0x24] sm:$0xf] %vm2110_vm1, %v2097_v12  ;;  %v1973_v15 = vadd.f32 %v1972_v13, %v1909_v11  ;;  %v1910_v17 = vpop.f32.mrf.mxu1  ;;  %v1847_v19 = vadd.f32 %v3262_v63, %v1846_v16 }
  0xfb   :  { %v2037_v18 = vadd.f32 %v2036_v14, %v1973_v15  ;;  %v1911_v22 = vadd.f32 %v1910_v17, %v1847_v19 }
  0xfd   :  { %v2076_v20 = vmax.f32 %v2037_v18, 0.0 }
  0xff   :  { %v2098_v21 = vpack.c.bf16 %v2076_v20, %v2076_v20 }
 0x100   :  { %v1974_v23 = vpop.f32.mrf.mxu2  ;;  %v1849_v26 = vpop.f32.mrf.mxu0 }
 0x101   :  { %v2038_v24 = vpop.f32.mrf.mxu3  ;;  %2121 = vst.msk [vmem:[%s3378_s4 + $0x28] sm:$0xf] %vm2110_vm1, %v2098_v21  ;;  %v1975_v25 = vadd.f32 %v1974_v23, %v1911_v22  ;;  %v1913_v27 = vpop.f32.mrf.mxu1  ;;  %v1850_v28 = vadd.f32 %v3262_v63, %v1849_v26 }
 0x103   :  { %v2039_v29 = vadd.f32 %v2038_v24, %v1975_v25  ;;  %v1914_v31 = vadd.f32 %v1913_v27, %v1850_v28 }
 0x105   :  { %v2077_v30 = vmax.f32 %v2039_v29, 0.0 }
 0x107   :  { %v2099_v32 = vpack.c.bf16 %v2077_v30, %v2077_v30 }
 0x108   :  { %v1977_v33 = vpop.f32.mrf.mxu2  ;;  %v1851_v36 = vpop.f32.mrf.mxu0 }
 0x109   :  { %v2041_v34 = vpop.f32.mrf.mxu3  ;;  %2122 = vst.msk [vmem:[%s3378_s4 + $0x2c] sm:$0xf] %vm2110_vm1, %v2099_v32  ;;  %v1978_v35 = vadd.f32 %v1977_v33, %v1914_v31  ;;  %v1915_v37 = vpop.f32.mrf.mxu1  ;;  %v1852_v39 = vadd.f32 %v3262_v63, %v1851_v36 }
 0x10b   :  { %v2042_v38 = vadd.f32 %v2041_v34, %v1978_v35  ;;  %v1916_v42 = vadd.f32 %v1915_v37, %v1852_v39 }
 0x10d   :  { %v2078_v40 = vmax.f32 %v2042_v38, 0.0 }
 0x10f   :  { %v2100_v41 = vpack.c.bf16 %v2078_v40, %v2078_v40 }
 0x110   :  { %v1979_v43 = vpop.f32.mrf.mxu2  ;;  %v1854_v46 = vpop.f32.mrf.mxu0 }
 0x111   :  { %v2043_v44 = vpop.f32.mrf.mxu3  ;;  %2123 = vst.msk [vmem:[%s3378_s4 + $0x30] sm:$0xf] %vm2110_vm1, %v2100_v41  ;;  %v1980_v45 = vadd.f32 %v1979_v43, %v1916_v42  ;;  %v1918_v47 = vpop.f32.mrf.mxu1  ;;  %v1855_v48 = vadd.f32 %v3262_v63, %v1854_v46 }
 0x113   :  { %v2044_v49 = vadd.f32 %v2043_v44, %v1980_v45  ;;  %v1919_v51 = vadd.f32 %v1918_v47, %v1855_v48 }
 0x115   :  { %v2079_v50 = vmax.f32 %v2044_v49, 0.0 }
 0x117   :  { %v2101_v52 = vpack.c.bf16 %v2079_v50, %v2079_v50 }
 0x118   :  { %v1982_v53 = vpop.f32.mrf.mxu2  ;;  %v1856_v56 = vpop.f32.mrf.mxu0 }
 0x119   :  { %v2046_v54 = vpop.f32.mrf.mxu3  ;;  %2124 = vst.msk [vmem:[%s3378_s4 + $0x34] sm:$0xf] %vm2110_vm1, %v2101_v52  ;;  %v1983_v55 = vadd.f32 %v1982_v53, %v1919_v51  ;;  %v1920_v57 = vpop.f32.mrf.mxu1  ;;  %v1857_v59 = vadd.f32 %v3262_v63, %v1856_v56 }
 0x11b   :  { %v2047_v58 = vadd.f32 %v2046_v54, %v1983_v55  ;;  %v1921_v62 = vadd.f32 %v1920_v57, %v1857_v59 }
 0x11d   :  { %v2080_v60 = vmax.f32 %v2047_v58, 0.0 }
 0x11f   :  { %v2102_v61 = vpack.c.bf16 %v2080_v60, %v2080_v60 }
 0x120   :  { %v1984_v0 = vpop.f32.mrf.mxu2  ;;  %v1859_v4 = vpop.f32.mrf.mxu0 }
 0x121   :  { %v2048_v2 = vpop.f32.mrf.mxu3  ;;  %2125 = vst.msk [vmem:[%s3378_s4 + $0x38] sm:$0xf] %vm2110_vm1, %v2102_v61  ;;  %v1985_v3 = vadd.f32 %v1984_v0, %v1921_v62  ;;  %v1923_v5 = vpop.f32.mrf.mxu1  ;;  %v1860_v6 = vadd.f32 %v3262_v63, %v1859_v4 }
 0x123   :  { %v2049_v7 = vadd.f32 %v2048_v2, %v1985_v3  ;;  %v1924_v8 = vadd.f32 %v1923_v5, %v1860_v6 }
 0x125   :  { %v2081_v1 = vmax.f32 %v2049_v7, 0.0 }
 0x127   :  { %v2103_v9 = vpack.c.bf16 %v2081_v1, %v2081_v1 }
 0x128   :  { %v1987_v10 = vpop.f32.mrf.mxu2  ;;  %v1861_v13 = vpop.f32.mrf.mxu0 }
 0x129   :  { %v2051_v11 = vpop.f32.mrf.mxu3  ;;  %2126 = vst.msk [vmem:[%s3378_s4 + $0x3c] sm:$0xf] %vm2110_vm1, %v2103_v9  ;;  %v1988_v12 = vadd.f32 %v1987_v10, %v1924_v8  ;;  %v1925_v14 = vpop.f32.mrf.mxu1  ;;  %v1862_v16 = vadd.f32 %v3262_v63, %v1861_v13 }
 0x12b   :  { %v2052_v15 = vadd.f32 %v2051_v11, %v1988_v12  ;;  %v1926_v19 = vadd.f32 %v1925_v14, %v1862_v16 }
 0x12d   :  { %v2082_v17 = vmax.f32 %v2052_v15, 0.0 }
 0x12f   :  { %v2104_v18 = vpack.c.bf16 %v2082_v17, %v2082_v17 }
 0x130   :  { %v1989_v20 = vpop.f32.mrf.mxu2  ;;  %v1864_v23 = vpop.f32.mrf.mxu0 }
 0x131   :  { %v2053_v21 = vpop.f32.mrf.mxu3  ;;  %2127 = vst.msk [vmem:[%s3378_s4 + $0x40] sm:$0xf] %vm2110_vm1, %v2104_v18  ;;  %v1990_v22 = vadd.f32 %v1989_v20, %v1926_v19  ;;  %v1928_v24 = vpop.f32.mrf.mxu1  ;;  %v1865_v25 = vadd.f32 %v3262_v63, %v1864_v23 }
 0x133   :  { %v2054_v26 = vadd.f32 %v2053_v21, %v1990_v22  ;;  %v1929_v28 = vadd.f32 %v1928_v24, %v1865_v25 }
 0x135   :  { %v2083_v27 = vmax.f32 %v2054_v26, 0.0 }
 0x137   :  { %v2105_v29 = vpack.c.bf16 %v2083_v27, %v2083_v27 }
 0x138   :  { %v1992_v30 = vpop.f32.mrf.mxu2  ;;  %v1866_v33 = vpop.f32.mrf.mxu0 }
 0x139   :  { %v2056_v31 = vpop.f32.mrf.mxu3  ;;  %2128 = vst.msk [vmem:[%s3378_s4 + $0x44] sm:$0xf] %vm2110_vm1, %v2105_v29  ;;  %v1993_v32 = vadd.f32 %v1992_v30, %v1929_v28  ;;  %v1930_v34 = vpop.f32.mrf.mxu1  ;;  %v1867_v36 = vadd.f32 %v3262_v63, %v1866_v33 }
 0x13b   :  { %v2057_v35 = vadd.f32 %v2056_v31, %v1993_v32  ;;  %v1931_v39 = vadd.f32 %v1930_v34, %v1867_v36 }
 0x13d   :  { %v2084_v37 = vmax.f32 %v2057_v35, 0.0 }
 0x13f   :  { %v2106_v38 = vpack.c.bf16 %v2084_v37, %v2084_v37 }
 0x140   :  { %v1994_v40 = vpop.f32.mrf.mxu2  ;;  %v1869_v43 = vpop.f32.mrf.mxu0 }
 0x141   :  { %v2058_v41 = vpop.f32.mrf.mxu3  ;;  %2129 = vst.msk [vmem:[%s3378_s4 + $0x48] sm:$0xf] %vm2110_vm1, %v2106_v38  ;;  %v1995_v42 = vadd.f32 %v1994_v40, %v1931_v39  ;;  %v1870_v44 = vadd.f32 %v3262_v63, %v1869_v43  ;;  %v1933_v46 = vpop.f32.mrf.mxu1 }
 0x143   :  { %v2059_v45 = vadd.f32 %v2058_v41, %v1995_v42  ;;  %v1934_v48 = vadd.f32 %v1933_v46, %v1870_v44 }
 0x145   :  { %v2085_v47 = vmax.f32 %v2059_v45, 0.0 }
 0x147   :  { %v2107_v49 = vpack.c.bf16 %v2085_v47, %v2085_v47 }
 0x148   :  { %v1997_v50 = vpop.f32.mrf.mxu2  ;;  %v1871_v53 = vpop.f32.mrf.mxu0 }
 0x149   :  { %v2061_v51 = vpop.f32.mrf.mxu3  ;;  %2130 = vst.msk [vmem:[%s3378_s4 + $0x4c] sm:$0xf] %vm2110_vm1, %v2107_v49  ;;  %v1998_v52 = vadd.f32 %v1997_v50, %v1934_v48  ;;  %v1872_v55 = vadd.f32 %v3262_v63, %v1871_v53  ;;  %v1935_v57 = vpop.f32.mrf.mxu1 }
 0x14b   :  { %v2062_v54 = vadd.f32 %v2061_v51, %v1998_v52  ;;  %v1936_v59 = vadd.f32 %v1935_v57, %v1872_v55 }
 0x14d   :  { %v2086_v56 = vmax.f32 %v2062_v54, 0.0 }
 0x14f   :  { %v2108_v58 = vpack.c.bf16 %v2086_v56, %v2086_v56 }
 0x150   :  { %v1999_v60 = vpop.f32.mrf.mxu2 }
 0x151   :  { %2131 = vst.msk [vmem:[%s3378_s4 + $0x50] sm:$0xf] %vm2110_vm1, %v2108_v58  ;;  %v2000_v61 = vadd.f32 %v1999_v60, %v1936_v59  ;;  %v2063_v62 = vpop.f32.mrf.mxu3 }
 0x153   :  { %v2064_v0 = vadd.f32 %v2063_v62, %v2000_v61 }
 0x155   :  { %v2087_v2 = vmax.f32 %v2064_v0, 0.0 }
 0x157   :  { %v2109_v3 = vpack.c.bf16 %v2087_v2, %v2087_v2 }
 0x159   :  { %2132 = vst.msk [vmem:[%s3378_s4 + $0x54] sm:$0xf] %vm2110_vm1, %v2109_v3 }

// kernel: cnn_policy_forward.9
= control target key start
LH: loop header
LB: loop body
LE: loop exit
PB: predicated region body
PF: predicated region fallthrough
CT: control target
= control target key end

     0   :  { %s3400_s0 = inlined_call_operand.vmem [shape: bf16[640,32], index: 0, kind: input, shape index: {}]   ;;  %s3401_s1 = inlined_call_operand.vmem [shape: f32[1,32], index: 1, kind: input, shape index: {}]   ;;  %s3402_s2 = inlined_call_operand.vmem [shape: bf16[98,576], index: 2, kind: input, shape index: {}]   ;;  %s3403_s3 = inlined_call_operand.<no memory space> [shape: bf16[], index: 3, kind: input, shape index: {}]   ;;  %s3404_s4 = inlined_call_operand.vmem [shape: bf16[112,32], index: 4, kind: output, shape index: {}]  }
   0x1   :  { %v9_v0 = vstv %s3403_s3 }
   0x2   :  { %v2989_v1 = vunpack.i.l.bf16 %v9_v0 }
   0x3   :  { %v2688_v2 = vld [vmem:[%s3400_s0 + $0x38] sm:$0xff]  ;;  %v112_v3 = vlaneseq  ;;  %v2687_v4 = vld [vmem:[%s3400_s0 + $0x30] sm:$0xff]  ;;  %v2305_v8 = vld [vmem:[%s3402_s2 + $0x60] sm:$0xff]   ;;  %vm2263_vm2 = vcmask 257024  }
   0x4   :  { %2936 = vmatpush.bf16.msra.mxu1 %v2688_v2  ;;  %2937 = vmatpush.bf16.msra.mxu2 %v2688_v2  ;;  %v2924_v7 = vld [vmem:[%s3402_s2 + $0x50] sm:$0xff]  ;;  %v2930_v9 = vld [vmem:[%s3402_s2 + $0xa0] sm:$0xff]  ;;  %v521_v11 = vunpack.c.l.bf16 %v2305_v8  ;;  %v2768_v12 = vunpack.c.h.bf16 %v2305_v8  ;;  %v2686_v19 = vld [vmem:[%s3400_s0 + $0x28] sm:$0xff] }
   0x5   :  { %v113_v5 = vand.u32 127, %v112_v3  ;;  %v1316_v6 = vshrl.u32 %v112_v3, 7  ;;  %2938 = vmatpush.bf16.msra.mxu3 %v2688_v2  ;;  %2015 = vmatpush.bf16.msra.mxu0 %v2688_v2  ;;  %v2325_v13 = vld [vmem:[%s3402_s2 + $0xb0] sm:$0xff]   ;;  %2760 = vst [vmem:[#allocation7 + $0x50] sm:$0xff] %v2924_v7   ;;  %v20_v17 = vld [vmem:[%s3402_s2] sm:$0xff]   ;;  %v2315_v32 = vld [vmem:[%s3402_s2 + $0x88] sm:$0xff]  }
   0x6   :  { %v937_v15 = vunpack.c.l.bf16 %v2325_v13  ;;  %v2808_v16 = vunpack.c.h.bf16 %v2325_v13  ;;  %v2285_v18 = vld [vmem:[%s3402_s2 + $0x10] sm:$0xff]   ;;  %2800 = vst [vmem:[#allocation7 + $0xa0] sm:$0xff] %v2930_v9   ;;  %v2345_v29 = vld [vmem:[%s3402_s2 + $0x100] sm:$0xf]  ;;  %v2927_v35 = vld [vmem:[%s3402_s2 + $0x78] sm:$0xff]  ;;  %v729_v36 = vunpack.c.l.bf16 %v2315_v32  ;;  %v2788_v37 = vunpack.c.h.bf16 %v2315_v32 }
   0x7   :  { %v3006_v10 = vadd.s32 512, %v113_v5  ;;  %v3011_v14 = vadd.s32 96, %v1316_v6  ;;  %v105_v20 = vunpack.c.l.bf16 %v2285_v18  ;;  %v2728_v21 = vunpack.c.h.bf16 %v2285_v18  ;;  %36 = vst [vmem:[#allocation7] sm:$0xff] %v20_v17   ;;  %v3032_v24 = vld [vmem:[%s3402_s2 + $0xec] sm:$0xff]   ;;  %v2685_v33 = vld [vmem:[%s3400_s0 + $0x20] sm:$0xff]  ;;  %v2335_v38 = vld [vmem:[%s3402_s2 + $0xd8] sm:$0xff]  }
   0x8   :  { %2939 = vmatpush.bf16.msra.mxu1 %v2687_v4  ;;  %2940 = vmatpush.bf16.msra.mxu2 %v2687_v4  ;;  %v1313_v28 = vunpack.c.h.bf16 %v3032_v24  ;;  %v1425_v31 = vunpack.c.l.bf16 %v2345_v29  ;;  %v1145_v41 = vunpack.c.l.bf16 %v2335_v38  ;;  %v2828_v42 = vunpack.c.h.bf16 %v2335_v38  ;;  %v2295_v43 = vld [vmem:[%s3402_s2 + $0x38] sm:$0xff]   ;;  %v2933_v50 = vld [vmem:[%s3402_s2 + $0xc8] sm:$0xff]  ;;  %2780 = vst [vmem:[#allocation7 + $0x78] sm:$0xff] %v2927_v35   ;;  %v2683_v57 = vld [vmem:[%s3400_s0 + $0x10] sm:$0xff] }
   0x9   :  { %vm115_vm0 = vcmp.lt.s32.totalorder %v3006_v10, 576  ;;  %2941 = vmatpush.bf16.msra.mxu3 %v2687_v4  ;;  %2016 = vmatpush.bf16.msra.mxu0 %v2687_v4  ;;  %vm1318_vm1 = vcmp.lt.s32.totalorder %v3011_v14, 98  ;;  %v313_v46 = vunpack.c.l.bf16 %v2295_v43  ;;  %v2748_v47 = vunpack.c.h.bf16 %v2295_v43  ;;  %v2684_v52 = vld [vmem:[%s3400_s0 + $0x18] sm:$0xff]  ;;  %v2921_v55 = vld [vmem:[%s3402_s2 + $0x28] sm:$0xff]  ;;  %2820 = vst [vmem:[#allocation7 + $0xc8] sm:$0xff] %v2933_v50   ;;  %v2681_v0 = vld [vmem:[%s3400_s0] sm:$0xff] }
   0xa   :  { %v532_v22 = vsel %vm115_vm0, %v521_v11, %v2989_v1  ;;  %v948_v23 = vsel %vm115_vm0, %v937_v15, %v2989_v1  ;;  %v116_v27 = vsel %vm115_vm0, %v105_v20, %v2989_v1  ;;  %v1319_v34 = vsel %vm1318_vm1, %v1313_v28, %v2989_v1  ;;  %2740 = vst [vmem:[#allocation7 + $0x28] sm:$0xff] %v2921_v55   ;;  %v2919_v58 = vld [vmem:[%s3402_s2 + $0x8] sm:$0xff]  ;;  %v2289_v59 = vld [vmem:[%s3402_s2 + $0x20] sm:$0xf]  ;;  %v2920_v61 = vld [vmem:[%s3402_s2 + $0x18] sm:$0xff] }
   0xb   :  { %v2769_v25 = vpack.c.bf16 %v2768_v12, %v532_v22  ;;  %v2809_v26 = vpack.c.bf16 %v2808_v16, %v948_v23  ;;  %v2729_v30 = vpack.c.bf16 %v2728_v21, %v116_v27  ;;  %v1326_v39 = vpack.c.bf16 0.0, %v1319_v34  ;;  %2725 = vst [vmem:[#allocation7 + $0x8] sm:$0xff] %v2919_v58   ;;  %v2682_v60 = vld [vmem:[%s3400_s0 + $0x8] sm:$0xff]  ;;  %v2290_v62 = vld [vmem:[%s3402_s2 + $0x24] sm:$0xf]  ;;  %v2712_v7 = vld [vmem:[%s3400_s0 + $0xf8] sm:$0xff] }
   0xc   :  { %2942 = vmatpush.bf16.msra.mxu1 %v2686_v19  ;;  %2943 = vmatpush.bf16.msra.mxu2 %v2686_v19  ;;  %v1431_v40 = vsel %vm1318_vm1, %v1425_v31, %v2989_v1  ;;  %v740_v45 = vsel %vm115_vm0, %v729_v36, %v2989_v1  ;;  %v1156_v51 = vsel %vm115_vm0, %v1145_v41, %v2989_v1  ;;  %v209_v63 = vunpack.c.l.bf16 %v2290_v62  ;;  %v2388_v2 = vld [vmem:[#allocation7 + $0x50] sm:$0xf]  ;;  %v2704_v12 = vld [vmem:[%s3400_s0 + $0xb8] sm:$0xff]  ;;  %v2299_v27 = vld [vmem:[%s3402_s2 + $0x48] sm:$0xf] }
   0xd   :  { %2770 = vst [vmem:[#allocation7 + $0x60] sm:$0xff] %v2769_v25   ;;  %2944 = vmatpush.bf16.msra.mxu3 %v2686_v19  ;;  %2017 = vmatpush.bf16.msra.mxu0 %v2686_v19  ;;  %v1436_v44 = vsel %vm115_vm0, %v1431_v40, %v2989_v1  ;;  %v2789_v49 = vpack.c.bf16 %v2788_v37, %v740_v45  ;;  %v2428_v4 = vld [vmem:[#allocation7 + $0xa0] sm:$0xf]  ;;  %v2696_v18 = vld [vmem:[%s3400_s0 + $0x78] sm:$0xff]  ;;  %v2711_v22 = vld [vmem:[%s3400_s0 + $0xf0] sm:$0xff] }
   0xe   :  { %2810 = vst [vmem:[#allocation7 + $0xb0] sm:$0xff] %v2809_v26   ;;  %v2839_v48 = vpack.c.bf16 %v2989_v1, %v1436_v44  ;;  %v2829_v53 = vpack.c.bf16 %v2828_v42, %v1156_v51  ;;  %v324_v54 = vsel %vm115_vm0, %v313_v46, %v2989_v1  ;;  %v220_v6 = vsel %vm115_vm0, %v209_v63, %v2989_v1  ;;  %v2348_v8 = vld [vmem:[#allocation7] sm:$0xf]  ;;  %v2720_v20 = vld [vmem:[%s3400_s0 + $0x138] sm:$0xff]  ;;  %v2703_v23 = vld [vmem:[%s3400_s0 + $0xb0] sm:$0xff] }
   0xf   :  { %2730 = vst [vmem:[#allocation7 + $0x10] sm:$0xff] %v2729_v30   ;;  %v2749_v56 = vpack.c.bf16 %v2748_v47, %v324_v54  ;;  %v222_v11 = vpack.c.bf16 0.0, %v220_v6  ;;  %v2695_v25 = vld [vmem:[%s3400_s0 + $0x70] sm:$0xff]  ;;  %v2710_v29 = vld [vmem:[%s3400_s0 + $0xe8] sm:$0xff]  ;;  %v2923_v34 = vld [vmem:[%s3402_s2 + $0x40] sm:$0xff] }
  0x10   :  { %1329 = vst [vmem:[#allocation7 + $0xf0] sm:$0xf] %v1326_v39  ;;  %2945 = vmatpush.bf16.msra.mxu1 %v2685_v33  ;;  %2946 = vmatpush.bf16.msra.mxu2 %v2685_v33  ;;  %v2922_v26 = vld [vmem:[%s3402_s2 + $0x30] sm:$0xff]  ;;  %v2702_v30 = vld [vmem:[%s3400_s0 + $0xa8] sm:$0xff]  ;;  %v2709_v37 = vld [vmem:[%s3400_s0 + $0xe0] sm:$0xff] }
  0x11   :  { %2947 = vmatpush.bf16.msra.mxu3 %v2685_v33  ;;  %2018 = vmatpush.bf16.msra.mxu0 %v2685_v33  ;;  %2840 = vst [vmem:[#allocation7 + $0x100] sm:$0xff] %v2839_v48   ;;  %v2719_v28 = vld [vmem:[%s3400_s0 + $0x130] sm:$0xff]  ;;  %v2300_v31 = vld [vmem:[%s3402_s2 + $0x4c] sm:$0xf]  ;;  %v2701_v38 = vld [vmem:[%s3400_s0 + $0xa0] sm:$0xff] }
  0x12   :  { %2790 = vst [vmem:[#allocation7 + $0x88] sm:$0xff] %v2789_v49   ;;  %v417_v32 = vunpack.c.l.bf16 %v2300_v31  ;;  %v2694_v33 = vld [vmem:[%s3400_s0 + $0x68] sm:$0xff]  ;;  %v2693_v40 = vld [vmem:[%s3400_s0 + $0x60] sm:$0xff]  ;;  %v2408_v41 = vld [vmem:[#allocation7 + $0x78] sm:$0xf] }
  0x13   :  { %2830 = vst [vmem:[#allocation7 + $0xd8] sm:$0xff] %v2829_v53   ;;  %v2718_v35 = vld [vmem:[%s3400_s0 + $0x128] sm:$0xff]  ;;  %v2717_v45 = vld [vmem:[%s3400_s0 + $0x120] sm:$0xff]  ;;  %v2708_v48 = vld [vmem:[%s3400_s0 + $0xd8] sm:$0xff] }
  0x14   :  { %2948 = vmatpush.bf16.msra.mxu1 %v2684_v52  ;;  %2949 = vmatpush.bf16.msra.mxu2 %v2684_v52  ;;  %2750 = vst [vmem:[#allocation7 + $0x38] sm:$0xff] %v2749_v56   ;;  %v2658_v3 = vld [vmem:[#allocation7 + $0x60] sm:$0xf0]  ;;  %v428_v36 = vsel %vm115_vm0, %v417_v32, %v2989_v1  ;;  %v2448_v43 = vld [vmem:[#allocation7 + $0xc8] sm:$0xf]  ;;  %v2700_v49 = vld [vmem:[%s3400_s0 + $0x98] sm:$0xff] }
  0x15   :  { %2950 = vmatpush.bf16.msra.mxu3 %v2684_v52  ;;  %2019 = vmatpush.bf16.msra.mxu0 %v2684_v52  ;;  %197 = vst [vmem:[#allocation7 + $0x20] sm:$0xf] %v2289_v59  ;;  %v2668_v5 = vld [vmem:[#allocation7 + $0xb0] sm:$0xf0]  ;;  %v2389_v16 = vor.u32 %v2658_v3, %v2388_v2  ;;  %v430_v39 = vpack.c.bf16 0.0, %v428_v36  ;;  %v2692_v52 = vld [vmem:[%s3400_s0 + $0x58] sm:$0xff] }
  0x16   :  { %2735 = vst [vmem:[#allocation7 + $0x18] sm:$0xff] %v2920_v61   ;;  %v2648_v9 = vld [vmem:[#allocation7 + $0x10] sm:$0xf0]  ;;  %v2429_v17 = vor.u32 %v2668_v5, %v2428_v4  ;;  %v2368_v46 = vld [vmem:[#allocation7 + $0x28] sm:$0xf]  ;;  %v2716_v54 = vld [vmem:[%s3400_s0 + $0x118] sm:$0xff] }
  0x17   :  { %v2468_v13 = vld [vmem:[#allocation7 + $0xf0] sm:$0xf]  ;;  %225 = vst [vmem:[#allocation7 + $0x24] sm:$0xf] %v222_v11  ;;  %v2349_v19 = vor.u32 %v2648_v9, %v2348_v8  ;;  %v2925_v58 = vld [vmem:[%s3402_s2 + $0x58] sm:$0xff]  ;;  %v2706_v61 = vld [vmem:[%s3400_s0 + $0xc8] sm:$0xff] }
  0x18   :  { %2951 = vmatpush.bf16.msra.mxu1 %v2683_v57  ;;  %2952 = vmatpush.bf16.msra.mxu2 %v2683_v57  ;;  %v2678_v15 = vld [vmem:[#allocation7 + $0x100] sm:$0xf0]  ;;  %405 = vst [vmem:[#allocation7 + $0x48] sm:$0xf] %v2299_v27  ;;  %v2707_v55 = vld [vmem:[%s3400_s0 + $0xd0] sm:$0xff]  ;;  %v2698_v62 = vld [vmem:[%s3400_s0 + $0x88] sm:$0xff] }
  0x19   :  { %2953 = vmatpush.bf16.msra.mxu3 %v2683_v57  ;;  %2020 = vmatpush.bf16.msra.mxu0 %v2683_v57  ;;  %v2469_v21 = vor.u32 %v2678_v15, %v2468_v13  ;;  %2745 = vst [vmem:[#allocation7 + $0x30] sm:$0xff] %v2922_v26   ;;  %v2663_v42 = vld [vmem:[#allocation7 + $0x88] sm:$0xf0]  ;;  %v2699_v56 = vld [vmem:[%s3400_s0 + $0x90] sm:$0xff]  ;;  %v2705_v4 = vld [vmem:[%s3400_s0 + $0xc0] sm:$0xff] }
  0x1a   :  { %2755 = vst [vmem:[#allocation7 + $0x40] sm:$0xff] %v2923_v34   ;;  %v2673_v44 = vld [vmem:[#allocation7 + $0xd8] sm:$0xf0]  ;;  %v2409_v50 = vor.u32 %v2663_v42, %v2408_v41  ;;  %v2691_v57 = vld [vmem:[%s3400_s0 + $0x50] sm:$0xff]  ;;  %v2690_v2 = vld [vmem:[%s3400_s0 + $0x48] sm:$0xff] }
  0x1b   :  { %433 = vst [vmem:[#allocation7 + $0x4c] sm:$0xf] %v430_v39  ;;  %v2653_v47 = vld [vmem:[#allocation7 + $0x38] sm:$0xf0]  ;;  %v2449_v51 = vor.u32 %v2673_v44, %v2448_v43  ;;  %v2309_v59 = vld [vmem:[%s3402_s2 + $0x70] sm:$0xf] }
  0x1c   :  { %2954 = vmatpush.bf16.msra.mxu1 %v2682_v60  ;;  %2955 = vmatpush.bf16.msra.mxu2 %v2682_v60  ;;  %v2369_v53 = vor.u32 %v2653_v47, %v2368_v46  ;;  %613 = vst [vmem:[#allocation7 + $0x70] sm:$0xf] %v2309_v59  ;;  %v2310_v63 = vld [vmem:[%s3402_s2 + $0x74] sm:$0xf]  ;;  %v2926_v3 = vld [vmem:[%s3402_s2 + $0x68] sm:$0xff]  ;;  %v2697_v6 = vld [vmem:[%s3400_s0 + $0x80] sm:$0xff] }
  0x1d   :  { %2956 = vmatpush.bf16.msra.mxu3 %v2682_v60  ;;  %2021 = vmatpush.bf16.msra.mxu0 %v2682_v60  ;;  %v2715_v60 = vld [vmem:[%s3400_s0 + $0x110] sm:$0xff]  ;;  %2765 = vst [vmem:[#allocation7 + $0x58] sm:$0xff] %v2925_v58   ;;  %v2714_v5 = vld [vmem:[%s3400_s0 + $0x108] sm:$0xff]  ;;  %v2358_v9 = vld [vmem:[#allocation7 + $0x1c] sm:$0xf0] }
  0x1e   :  { %v2647_v8 = vld [vmem:[#allocation7 + $0xc] sm:$0xf]  ;;  %2775 = vst [vmem:[#allocation7 + $0x68] sm:$0xff] %v2926_v3   ;;  %v2646_v13 = vld [vmem:[#allocation7 + $0x4] sm:$0xf]  ;;  %v1285_v3 = vunpack.c.l.bf16 %v3032_v24 }
  0x1f   :  { %v2350_v15 = vld [vmem:[#allocation7 + $0x14] sm:$0xf0]  ;;  %v2928_v26 = vld [vmem:[%s3402_s2 + $0x80] sm:$0xff]  ;;  %v2344_v10 = vld [vmem:[%s3402_s2 + $0xfc] sm:$0xf] }
  0x20   :  { %2957 = vmatpush.bf16.msra.mxu1 %v2681_v0  ;;  %2958 = vmatpush.bf16.msra.mxu2 %v2681_v0  ;;  %v2319_v27 = vld [vmem:[%s3402_s2 + $0x98] sm:$0xf]  ;;  %2785 = vst [vmem:[#allocation7 + $0x80] sm:$0xff] %v2928_v26   ;;  %v2652_v32 = vld [vmem:[#allocation7 + $0x34] sm:$0xf] }
  0x21   :  { %2959 = vmatpush.bf16.msra.mxu3 %v2681_v0  ;;  %2022 = vmatpush.bf16.msra.mxu0 %v2681_v0  ;;  %v625_v0 = vunpack.c.l.bf16 %v2310_v63  ;;  %821 = vst [vmem:[#allocation7 + $0x98] sm:$0xf] %v2319_v27  ;;  %v2370_v36 = vld [vmem:[#allocation7 + $0x3c] sm:$0xf0]  ;;  %v2330_v47 = vld [vmem:[%s3402_s2 + $0xc4] sm:$0xf] }
  0x22   :  { %v2655_v41 = vld [vmem:[#allocation7 + $0x48] sm:$0xf0]  ;;  %v2329_v46 = vld [vmem:[%s3402_s2 + $0xc0] sm:$0xf] }
  0x23   :  { %2033 = vmatmul.bf16.vlgmr.msra.gmra.mxu1 %v2389_v16  ;;  %2043 = vmatmul.bf16.vlgmr.msra.gmra.mxu2 %v2429_v17  ;;  %v2356_v16 = vld [vmem:[#allocation7 + $0x8] sm:$0xf]  ;;  %v2649_v17 = vld [vmem:[#allocation7 + $0x18] sm:$0xf0]  ;;  %1029 = vst [vmem:[#allocation7 + $0xc0] sm:$0xf] %v2329_v46 }
  0x24   :  { %2103 = vmatpush.bf16.msrb.mxu2 %v2704_v12  ;;  %2059 = vmatpush.bf16.msrb.mxu1 %v2696_v18  ;;  %v2689_v12 = vld [vmem:[%s3400_s0 + $0x40] sm:$0xff]  ;;  %v2361_v18 = vor.u32 %v2647_v8, %v2358_v9  ;;  %v2661_v9 = vld [vmem:[#allocation7 + $0x7c] sm:$0xf] }
  0x25   :  { %2147 = vmatpush.bf16.msrb.mxu3 %v2712_v7  ;;  %2023 = vmatmul.bf16.vlgmr.msra.gmra.mxu0 %v2349_v19  ;;  %v636_v7 = vsel %vm115_vm0, %v625_v0, %v2989_v1  ;;  %v2713_v19 = vld [vmem:[%s3400_s0 + $0x100] sm:$0xff]  ;;  %v2934_v0 = vld [vmem:[%s3402_s2 + $0xd0] sm:$0xff] }
  0x26   :  { %2191 = vmatpush.bf16.msrb.mxu0 %v2720_v20  ;;  %2053 = vmatmul.bf16.vlgmr.msra.gmra.mxu3 %v2469_v21  ;;  %v638_v11 = vpack.c.bf16 0.0, %v636_v7  ;;  %v2364_v20 = vld [vmem:[#allocation7 + $0x10] sm:$0xf]  ;;  %v2650_v21 = vld [vmem:[#allocation7 + $0x20] sm:$0xf0]  ;;  %2825 = vst [vmem:[#allocation7 + $0xd0] sm:$0xff] %v2934_v0  }
  0x27   :  { %v2404_v59 = vld [vmem:[#allocation7 + $0x60] sm:$0xf] }
  0x28   :  { %2104 = vmatpush.bf16.msrb.mxu2 %v2703_v23  ;;  %2060 = vmatpush.bf16.msrb.mxu1 %v2695_v25  ;;  %641 = vst [vmem:[#allocation7 + $0x74] sm:$0xf] %v638_v11  ;;  %v2357_v23 = vor.u32 %v2649_v17, %v2356_v16  ;;  %v2365_v25 = vor.u32 %v2650_v21, %v2364_v20  ;;  %v2418_v7 = vld [vmem:[#allocation7 + $0x94] sm:$0xf0]  ;;  %v2424_v16 = vld [vmem:[#allocation7 + $0x88] sm:$0xf]  ;;  %v1397_v20 = vunpack.c.l.bf16 %v2344_v10 }
  0x29   :  { %2148 = vmatpush.bf16.msrb.mxu3 %v2711_v22  ;;  %v2353_v22 = vor.u32 %v2646_v13, %v2350_v15  ;;  %v2342_v21 = vld [vmem:[%s3402_s2 + $0xf4] sm:$0xff]  }
  0x2a   :  { %2192 = vmatpush.bf16.msrb.mxu0 %v2719_v28  ;;  %v2320_v28 = vld [vmem:[%s3402_s2 + $0x9c] sm:$0xf]  ;;  %v1369_v26 = vunpack.c.h.bf16 %v2342_v21 }
  0x2c   :  { %2105 = vmatpush.bf16.msrb.mxu2 %v2702_v30  ;;  %2061 = vmatpush.bf16.msrb.mxu1 %v2694_v33  ;;  %v2929_v30 = vld [vmem:[%s3402_s2 + $0x90] sm:$0xff]  ;;  %v2378_v33 = vld [vmem:[#allocation7 + $0x44] sm:$0xf0] }
  0x2d   :  { %2149 = vmatpush.bf16.msrb.mxu3 %v2710_v29  ;;  %v833_v29 = vunpack.c.l.bf16 %v2320_v28  ;;  %2795 = vst [vmem:[#allocation7 + $0x90] sm:$0xff] %v2929_v30   ;;  %v2381_v39 = vor.u32 %v2652_v32, %v2378_v33  ;;  %v2438_v33 = vld [vmem:[#allocation7 + $0xbc] sm:$0xf0]  ;;  %v2456_v46 = vld [vmem:[#allocation7 + $0xd0] sm:$0xf] }
  0x2e   :  { %2193 = vmatpush.bf16.msrb.mxu0 %v2718_v35  ;;  %v2651_v35 = vld [vmem:[#allocation7 + $0x2c] sm:$0xf] }
  0x2f   :  { %v844_v31 = vsel %vm115_vm0, %v833_v29, %v2989_v1  ;;  %v2373_v42 = vor.u32 %v2651_v35, %v2370_v36  ;;  %v1375_v29 = vsel %vm1318_vm1, %v1369_v26, %v2989_v1 }
  0x30   :  { %2106 = vmatpush.bf16.msrb.mxu2 %v2701_v38  ;;  %2062 = vmatpush.bf16.msrb.mxu1 %v2693_v40  ;;  %v846_v34 = vpack.c.bf16 0.0, %v844_v31  ;;  %v2654_v38 = vld [vmem:[#allocation7 + $0x40] sm:$0xf0]  ;;  %v2384_v40 = vld [vmem:[#allocation7 + $0x38] sm:$0xf]  ;;  %v1382_v31 = vpack.c.bf16 0.0, %v1375_v29 }
  0x31   :  { %2150 = vmatpush.bf16.msrb.mxu3 %v2709_v37  ;;  %v2376_v37 = vld [vmem:[#allocation7 + $0x30] sm:$0xf]  ;;  %v2385_v44 = vor.u32 %v2655_v41, %v2384_v40 }
  0x32   :  { %2194 = vmatpush.bf16.msrb.mxu0 %v2717_v45  ;;  %849 = vst [vmem:[#allocation7 + $0x9c] sm:$0xf] %v846_v34  ;;  %v2377_v43 = vor.u32 %v2654_v38, %v2376_v37  ;;  %v2931_v45 = vld [vmem:[%s3402_s2 + $0xa8] sm:$0xff]  ;;  %v2666_v34 = vld [vmem:[#allocation7 + $0xa4] sm:$0xf] }
  0x33   :  { %2038 = vmatmul.bf16.gmra.mxu1 %v2409_v50  ;;  %2048 = vmatmul.bf16.gmra.mxu2 %v2449_v51  ;;  %2805 = vst [vmem:[#allocation7 + $0xa8] sm:$0xff] %v2931_v45   ;;  %v2657_v51 = vld [vmem:[#allocation7 + $0x5c] sm:$0xf] }
  0x34   :  { %2107 = vmatpush.bf16.msrb.mxu2 %v2700_v49  ;;  %2063 = vmatpush.bf16.msrb.mxu1 %v2692_v52  ;;  %v2932_v49 = vld [vmem:[%s3402_s2 + $0xb8] sm:$0xff]  ;;  %v2398_v52 = vld [vmem:[#allocation7 + $0x6c] sm:$0xf0]  ;;  %v2664_v13 = vld [vmem:[#allocation7 + $0x90] sm:$0xf0] }
  0x35   :  { %2151 = vmatpush.bf16.msrb.mxu3 %v2708_v48  ;;  %2028 = vmatmul.bf16.gmra.mxu0 %v2369_v53  ;;  %v1041_v48 = vunpack.c.l.bf16 %v2330_v47  ;;  %2815 = vst [vmem:[#allocation7 + $0xb8] sm:$0xff] %v2932_v49   ;;  %v2401_v58 = vor.u32 %v2657_v51, %v2398_v52  ;;  %v2410_v11 = vld [vmem:[#allocation7 + $0x8c] sm:$0xf0]  ;;  %v2464_v49 = vld [vmem:[#allocation7 + $0xd8] sm:$0xf] }
  0x36   :  { %2195 = vmatpush.bf16.msrb.mxu0 %v2716_v54  ;;  %v2656_v54 = vld [vmem:[#allocation7 + $0x54] sm:$0xf]  ;;  %v2413_v17 = vor.u32 %v2661_v9, %v2410_v11  ;;  %1385 = vst [vmem:[#allocation7 + $0xf8] sm:$0xf] %v1382_v31 }
  0x37   :  { %v1052_v50 = vsel %vm115_vm0, %v1041_v48, %v2989_v1 }
  0x38   :  { %2108 = vmatpush.bf16.msrb.mxu2 %v2699_v56  ;;  %2064 = vmatpush.bf16.msrb.mxu1 %v2691_v57  ;;  %v1054_v53 = vpack.c.bf16 0.0, %v1052_v50  ;;  %v2396_v56 = vld [vmem:[#allocation7 + $0x58] sm:$0xf]  ;;  %v2659_v57 = vld [vmem:[#allocation7 + $0x68] sm:$0xf0] }
  0x39   :  { %2152 = vmatpush.bf16.msrb.mxu3 %v2707_v55  ;;  %v2390_v55 = vld [vmem:[#allocation7 + $0x64] sm:$0xf0]  ;;  %v2665_v24 = vld [vmem:[#allocation7 + $0x98] sm:$0xf0] }
  0x3a   :  { %2196 = vmatpush.bf16.msrb.mxu0 %v2715_v60  ;;  %1057 = vst [vmem:[#allocation7 + $0xc4] sm:$0xf] %v1054_v53  ;;  %v2660_v60 = vld [vmem:[#allocation7 + $0x70] sm:$0xf0]  ;;  %v2667_v32 = vld [vmem:[#allocation7 + $0xac] sm:$0xf] }
  0x3b   :  { %v2405_v63 = vor.u32 %v2660_v60, %v2404_v59  ;;  %v2436_v36 = vld [vmem:[#allocation7 + $0xa8] sm:$0xf]  ;;  %v2441_v38 = vor.u32 %v2667_v32, %v2438_v33 }
  0x3c   :  { %2109 = vmatpush.bf16.msrb.mxu2 %v2698_v62  ;;  %2065 = vmatpush.bf16.msrb.mxu1 %v2690_v2  ;;  %v2397_v62 = vor.u32 %v2659_v57, %v2396_v56  ;;  %v2339_v2 = vld [vmem:[%s3402_s2 + $0xe8] sm:$0xf]  ;;  %v2430_v35 = vld [vmem:[#allocation7 + $0xb4] sm:$0xf0]  ;;  %v2669_v37 = vld [vmem:[#allocation7 + $0xb8] sm:$0xf0] }
  0x3d   :  { %2153 = vmatpush.bf16.msrb.mxu3 %v2706_v61  ;;  %v2393_v61 = vor.u32 %v2656_v54, %v2390_v55  ;;  %1273 = vst [vmem:[#allocation7 + $0xe8] sm:$0xf] %v2339_v2  ;;  %v2433_v41 = vor.u32 %v2666_v34, %v2430_v35 }
  0x3e   :  { %2197 = vmatpush.bf16.msrb.mxu0 %v2714_v5  ;;  %v1296_v5 = vsel %vm115_vm0, %v1285_v3, %v2989_v1 }
  0x3f   :  { %v1298_v8 = vpack.c.bf16 0.0, %v1296_v5  ;;  %v3300_v5 = vld [vmem:[%s3401_s1] ss:$0 sm:$0xff] }
  0x40   :  { %2110 = vmatpush.bf16.msrb.mxu2 %v2697_v6  ;;  %2066 = vmatpush.bf16.msrb.mxu1 %v2689_v12  ;;  %v2662_v6 = vld [vmem:[#allocation7 + $0x84] sm:$0xf]  ;;  %v2416_v12 = vld [vmem:[#allocation7 + $0x80] sm:$0xf] }
  0x41   :  { %2154 = vmatpush.bf16.msrb.mxu3 %v2705_v4  ;;  %v2935_v4 = vld [vmem:[%s3402_s2 + $0xe0] sm:$0xff]  ;;  %1301 = vst [vmem:[#allocation7 + $0xec] sm:$0xf] %v1298_v8  ;;  %v2421_v15 = vor.u32 %v2662_v6, %v2418_v7 }
  0x42   :  { %2198 = vmatpush.bf16.msrb.mxu0 %v2713_v19  ;;  %2835 = vst [vmem:[#allocation7 + $0xe0] sm:$0xff] %v2935_v4   ;;  %v2425_v19 = vor.u32 %v2665_v24, %v2424_v16  ;;  %v2670_v40 = vld [vmem:[#allocation7 + $0xc0] sm:$0xf0] }
  0x43   :  { %2067 = vmatmul.bf16.vlgmr.msrb.gmra.mxu1 %v2353_v22  ;;  %2111 = vmatmul.bf16.vlgmr.msrb.gmra.mxu2 %v2357_v23  ;;  %v1403_v22 = vsel %vm1318_vm1, %v1397_v20, %v2989_v1  ;;  %v2844_v23 = vpack.c.bf16 %v2989_v1, %v2989_v1 }
  0x44   :  { %2155 = vmatmul.bf16.vlgmr.msrb.gmra.mxu3 %v2361_v18  ;;  %v2417_v18 = vor.u32 %v2664_v13, %v2416_v12  ;;  %v1410_v27 = vpack.c.bf16 0.0, %v1403_v22  ;;  %v2458_v14 = vld [vmem:[#allocation7 + $0xe4] sm:$0xf0] }
  0x45   :  { %2199 = vmatmul.bf16.vlgmr.msrb.gmra.mxu0 %v2365_v25  ;;  %v1341_v25 = vunpack.c.l.bf16 %v2342_v21  ;;  %2850 = vst [vmem:[#allocation7 + $0x110] sm:$0xff] %v2844_v23  }
  0x46   :  { %1413 = vst [vmem:[#allocation7 + $0xfc] sm:$0xf] %v1410_v27 }
  0x47   :  { %v1347_v28 = vsel %vm1318_vm1, %v1341_v25, %v2989_v1  ;;  %2845 = vst [vmem:[#allocation7 + $0x108] sm:$0xff] %v2844_v23   ;;  %v2672_v1 = vld [vmem:[#allocation7 + $0xd4] sm:$0xf] }
  0x48   :  { %v1354_v30 = vpack.c.bf16 0.0, %v1347_v28  ;;  %v2461_v48 = vor.u32 %v2672_v1, %v2458_v14  ;;  %v2675_v50 = vld [vmem:[#allocation7 + $0xe8] sm:$0xf0] }
  0x49   :  { %v2450_v45 = vld [vmem:[#allocation7 + $0xdc] sm:$0xf0]  ;;  %v2674_v47 = vld [vmem:[#allocation7 + $0xe0] sm:$0xf0]  ;;  %v2465_v53 = vor.u32 %v2675_v50, %v2464_v49 }
  0x4a   :  { %1357 = vst [vmem:[#allocation7 + $0xf4] sm:$0xf] %v1354_v30  ;;  %v2457_v52 = vor.u32 %v2674_v47, %v2456_v46 }
  0x4c   :  { %v2478_v55 = vld [vmem:[#allocation7 + $0x10c] sm:$0xf0] }
  0x4d   :  { %v2677_v54 = vld [vmem:[#allocation7 + $0xfc] sm:$0xf] }
  0x4e   :  { %v2470_v57 = vld [vmem:[#allocation7 + $0x104] sm:$0xf0]  ;;  %v2679_v59 = vld [vmem:[#allocation7 + $0x108] sm:$0xf0]  ;;  %v2481_v60 = vor.u32 %v2677_v54, %v2478_v55 }
  0x51   :  { %v2676_v56 = vld [vmem:[#allocation7 + $0xf4] sm:$0xf] }
  0x53   :  { %2072 = vmatmul.bf16.gmra.mxu1 %v2373_v42  ;;  %2116 = vmatmul.bf16.gmra.mxu2 %v2377_v43  ;;  %v2437_v42 = vor.u32 %v2669_v37, %v2436_v36 }
  0x54   :  { %2160 = vmatmul.bf16.gmra.mxu3 %v2381_v39  ;;  %v2444_v39 = vld [vmem:[#allocation7 + $0xb0] sm:$0xf] }
  0x55   :  { %2204 = vmatmul.bf16.gmra.mxu0 %v2385_v44  ;;  %v2445_v43 = vor.u32 %v2670_v40, %v2444_v39  ;;  %v2671_v44 = vld [vmem:[#allocation7 + $0xcc] sm:$0xf] }
  0x56   :  { %v2453_v51 = vor.u32 %v2671_v44, %v2450_v45 }
  0x63   :  { %2077 = vmatmul.bf16.gmra.mxu1 %v2393_v61  ;;  %2121 = vmatmul.bf16.gmra.mxu2 %v2397_v62  ;;  %v2484_v61 = vld [vmem:[#allocation7 + $0x100] sm:$0xf]  ;;  %v2680_v62 = vld [vmem:[#allocation7 + $0x110] sm:$0xf0] }
  0x64   :  { %2165 = vmatmul.bf16.gmra.mxu3 %v2401_v58  ;;  %v2476_v58 = vld [vmem:[#allocation7 + $0xf8] sm:$0xf]  ;;  %v2485_v3 = vor.u32 %v2680_v62, %v2484_v61 }
  0x65   :  { %2209 = vmatmul.bf16.gmra.mxu0 %v2405_v63  ;;  %v2473_v63 = vor.u32 %v2676_v56, %v2470_v57  ;;  %v2477_v0 = vor.u32 %v2679_v59, %v2476_v58 }
  0x73   :  { %2082 = vmatmul.bf16.gmra.mxu1 %v2413_v17  ;;  %2126 = vmatmul.bf16.gmra.mxu2 %v2417_v18 }
  0x74   :  { %2170 = vmatmul.bf16.gmra.mxu3 %v2421_v15 }
  0x75   :  { %2214 = vmatmul.bf16.gmra.mxu0 %v2425_v19 }
  0x83   :  { %2087 = vmatmul.bf16.gmra.mxu1 %v2433_v41  ;;  %2131 = vmatmul.bf16.gmra.mxu2 %v2437_v42 }
  0x84   :  { %2175 = vmatmul.bf16.gmra.mxu3 %v2441_v38 }
  0x85   :  { %2219 = vmatmul.bf16.gmra.mxu0 %v2445_v43 }
  0x93   :  { %2092 = vmatmul.bf16.gmra.mxu1 %v2453_v51  ;;  %2136 = vmatmul.bf16.gmra.mxu2 %v2457_v52 }
  0x94   :  { %2180 = vmatmul.bf16.gmra.mxu3 %v2461_v48 }
  0x95   :  { %2224 = vmatmul.bf16.gmra.mxu0 %v2465_v53 }
  0xa0   :  { %v3295_v2 = vpop.f32.mrf.mxu1 }
  0xa2   :  { %v2024_v4 = vpop.f32.mrf.mxu0 }
  0xa3   :  { %2097 = vmatmul.bf16.gmra.mxu1 %v2473_v63  ;;  %2141 = vmatmul.bf16.gmra.mxu2 %v2477_v0  ;;  %v2025_v27 = vadd.f32 %v3300_v5, %v2024_v4  ;;  %v2035_v4 = vadd.f32 %v3300_v5, %v3295_v2 }
  0xa4   :  { %2185 = vmatmul.bf16.gmra.mxu3 %v2481_v60 }
  0xa5   :  { %2229 = vmatmul.bf16.gmra.mxu0 %v2485_v3 }
  0xa6   :  { %v2044_v6 = vpop.f32.mrf.mxu2 }
  0xa7   :  { %v3303_v7 = vadd.f32 %v3300_v5, %v2044_v6 }
  0xa8   :  { %v3305_v8 = vpop.f32.mrf.mxu1 }
  0xa9   :  { %v2054_v9 = vpop.f32.mrf.mxu3 }
  0xaa   :  { %v2026_v11 = vpop.f32.mrf.mxu0  ;;  %v3308_v12 = vadd.f32 %v3300_v5, %v2054_v9 }
  0xab   :  { %v2027_v35 = vadd.f32 %v3300_v5, %v2026_v11 }
  0xae   :  { %v2046_v13 = vpop.f32.mrf.mxu2 }
  0xaf   :  { %v3311_v15 = vadd.f32 %v3300_v5, %v2046_v13 }
  0xb0   :  { %v3313_v16 = vpop.f32.mrf.mxu1 }
  0xb1   :  { %v2056_v24 = vpop.f32.mrf.mxu3 }
  0xb2   :  { %v2029_v17 = vpop.f32.mrf.mxu0  ;;  %v3316_v18 = vadd.f32 %v3300_v5, %v2056_v24 }
  0xb3   :  { %v2030_v44 = vadd.f32 %v3300_v5, %v2029_v17 }
  0xb6   :  { %v2049_v19 = vpop.f32.mrf.mxu2 }
  0xb7   :  { %v3319_v10 = vadd.f32 %v3300_v5, %v2049_v19 }
  0xb8   :  { %v3321_v20 = vpop.f32.mrf.mxu1 }
  0xba   :  { %v2031_v21 = vpop.f32.mrf.mxu0 }
  0xbb   :  { %v2032_v55 = vadd.f32 %v3300_v5, %v2031_v21 }
  0xbe   :  { %v2051_v22 = vpop.f32.mrf.mxu2 }
  0xbf   :  { %v3324_v23 = vadd.f32 %v3300_v5, %v2051_v22 }
  0xc0   :  { %v2068_v25 = vpop.f32.mrf.mxu1 }
  0xc1   :  { %v2069_v29 = vadd.f32 %v2068_v25, %v2025_v27 }
  0xc2   :  { %v2200_v26 = vpop.f32.mrf.mxu0 }
  0xc6   :  { %v2112_v30 = vpop.f32.mrf.mxu2 }
  0xc7   :  { %v2156_v28 = vpop.f32.mrf.mxu3  ;;  %v2113_v31 = vadd.f32 %v2112_v30, %v2069_v29 }
  0xc8   :  { %v2070_v32 = vpop.f32.mrf.mxu1 }
  0xc9   :  { %v2157_v33 = vadd.f32 %v2156_v28, %v2113_v31  ;;  %v2071_v39 = vadd.f32 %v2070_v32, %v2027_v35 }
  0xca   :  { %v2202_v34 = vpop.f32.mrf.mxu0 }
  0xcb   :  { %v2201_v36 = vadd.f32 %v2200_v26, %v2157_v33  ;;  %v2037_v26 = vadd.f32 %v3300_v5, %v3305_v8 }
  0xcd   :  { %v2235_v38 = vmax.f32 %v2201_v36, 0.0  ;;  %v2040_v36 = vadd.f32 %v3300_v5, %v3313_v16 }
  0xce   :  { %v2114_v40 = vpop.f32.mrf.mxu2 }
  0xcf   :  { %v2158_v37 = vpop.f32.mrf.mxu3  ;;  %v2249_v41 = vpack.c.bf16 %v2235_v38, %v2235_v38  ;;  %v2115_v42 = vadd.f32 %v2114_v40, %v2071_v39 }
  0xd0   :  { %v2073_v43 = vpop.f32.mrf.mxu1 }
  0xd1   :  { %2264 = vst.msk [vmem:[%s3404_s4] sm:$0xf] %vm2263_vm2, %v2249_v41  ;;  %v2159_v1 = vadd.f32 %v2158_v37, %v2115_v42  ;;  %v2074_v48 = vadd.f32 %v2073_v43, %v2030_v44  ;;  %v2042_v44 = vadd.f32 %v3300_v5, %v3321_v20 }
  0xd2   :  { %v2205_v14 = vpop.f32.mrf.mxu0 }
  0xd3   :  { %v2203_v45 = vadd.f32 %v2202_v34, %v2159_v1 }
  0xd5   :  { %v2236_v47 = vmax.f32 %v2203_v45, 0.0 }
  0xd6   :  { %v2117_v49 = vpop.f32.mrf.mxu2 }
  0xd7   :  { %v2161_v46 = vpop.f32.mrf.mxu3  ;;  %v2250_v50 = vpack.c.bf16 %v2236_v47, %v2236_v47  ;;  %v2118_v51 = vadd.f32 %v2117_v49, %v2074_v48 }
  0xd8   :  { %v2075_v52 = vpop.f32.mrf.mxu1 }
  0xd9   :  { %2265 = vst.msk [vmem:[%s3404_s4 + $0x4] sm:$0xf] %vm2263_vm2, %v2250_v50  ;;  %v2162_v53 = vadd.f32 %v2161_v46, %v2118_v51  ;;  %v2076_v59 = vadd.f32 %v2075_v52, %v2032_v55 }
  0xda   :  { %v2207_v54 = vpop.f32.mrf.mxu0 }
  0xdb   :  { %v2206_v56 = vadd.f32 %v2205_v14, %v2162_v53 }
  0xdd   :  { %v2237_v58 = vmax.f32 %v2206_v56, 0.0 }
  0xde   :  { %v2119_v60 = vpop.f32.mrf.mxu2 }
  0xdf   :  { %v2163_v57 = vpop.f32.mrf.mxu3  ;;  %v2251_v61 = vpack.c.bf16 %v2237_v58, %v2237_v58  ;;  %v2120_v62 = vadd.f32 %v2119_v60, %v2076_v59 }
  0xe0   :  { %v2078_v63 = vpop.f32.mrf.mxu1 }
  0xe1   :  { %2266 = vst.msk [vmem:[%s3404_s4 + $0x8] sm:$0xf] %vm2263_vm2, %v2251_v61  ;;  %v2164_v0 = vadd.f32 %v2163_v57, %v2120_v62  ;;  %v2079_v13 = vadd.f32 %v2078_v63, %v2035_v4 }
  0xe2   :  { %v2210_v3 = vpop.f32.mrf.mxu0 }
  0xe3   :  { %v2208_v6 = vadd.f32 %v2207_v54, %v2164_v0 }
  0xe5   :  { %v2238_v11 = vmax.f32 %v2208_v6, 0.0 }
  0xe6   :  { %v2122_v24 = vpop.f32.mrf.mxu2 }
  0xe7   :  { %v2166_v9 = vpop.f32.mrf.mxu3  ;;  %v2252_v17 = vpack.c.bf16 %v2238_v11, %v2238_v11  ;;  %v2123_v19 = vadd.f32 %v2122_v24, %v2079_v13 }
  0xe8   :  { %v2080_v21 = vpop.f32.mrf.mxu1 }
  0xe9   :  { %2267 = vst.msk [vmem:[%s3404_s4 + $0xc] sm:$0xf] %vm2263_vm2, %v2252_v17  ;;  %v2167_v22 = vadd.f32 %v2166_v9, %v2123_v19  ;;  %v2081_v29 = vadd.f32 %v2080_v21, %v2037_v26 }
  0xea   :  { %v2212_v25 = vpop.f32.mrf.mxu0 }
  0xeb   :  { %v2211_v27 = vadd.f32 %v2210_v3, %v2167_v22 }
  0xed   :  { %v2239_v28 = vmax.f32 %v2211_v27, 0.0 }
  0xee   :  { %v2124_v30 = vpop.f32.mrf.mxu2 }
  0xef   :  { %v2168_v2 = vpop.f32.mrf.mxu3  ;;  %v2253_v31 = vpack.c.bf16 %v2239_v28, %v2239_v28  ;;  %v2125_v32 = vadd.f32 %v2124_v30, %v2081_v29 }
  0xf0   :  { %v2083_v33 = vpop.f32.mrf.mxu1 }
  0xf1   :  { %2268 = vst.msk [vmem:[%s3404_s4 + $0x10] sm:$0xf] %vm2263_vm2, %v2253_v31  ;;  %v2169_v34 = vadd.f32 %v2168_v2, %v2125_v32  ;;  %v2084_v39 = vadd.f32 %v2083_v33, %v2040_v36 }
  0xf2   :  { %v2215_v35 = vpop.f32.mrf.mxu0 }
  0xf3   :  { %v2213_v37 = vadd.f32 %v2212_v25, %v2169_v34 }
  0xf5   :  { %v2240_v38 = vmax.f32 %v2213_v37, 0.0 }
  0xf6   :  { %v2127_v40 = vpop.f32.mrf.mxu2 }
  0xf7   :  { %v2171_v8 = vpop.f32.mrf.mxu3  ;;  %v2254_v41 = vpack.c.bf16 %v2240_v38, %v2240_v38  ;;  %v2128_v42 = vadd.f32 %v2127_v40, %v2084_v39 }
  0xf8   :  { %v2085_v43 = vpop.f32.mrf.mxu1 }
  0xf9   :  { %2269 = vst.msk [vmem:[%s3404_s4 + $0x14] sm:$0xf] %vm2263_vm2, %v2254_v41  ;;  %v2172_v1 = vadd.f32 %v2171_v8, %v2128_v42  ;;  %v2086_v47 = vadd.f32 %v2085_v43, %v2042_v44 }
  0xfa   :  { %v2217_v14 = vpop.f32.mrf.mxu0 }
  0xfb   :  { %v2216_v45 = vadd.f32 %v2215_v35, %v2172_v1 }
  0xfd   :  { %v2241_v46 = vmax.f32 %v2216_v45, 0.0 }
  0xfe   :  { %v2129_v48 = vpop.f32.mrf.mxu2 }
  0xff   :  { %v2173_v16 = vpop.f32.mrf.mxu3  ;;  %v2255_v49 = vpack.c.bf16 %v2241_v46, %v2241_v46  ;;  %v2130_v50 = vadd.f32 %v2129_v48, %v2086_v47 }
 0x100   :  { %v2088_v51 = vpop.f32.mrf.mxu1 }
 0x101   :  { %2270 = vst.msk [vmem:[%s3404_s4 + $0x18] sm:$0xf] %vm2263_vm2, %v2255_v49  ;;  %v2174_v52 = vadd.f32 %v2173_v16, %v2130_v50  ;;  %v2089_v5 = vadd.f32 %v2088_v51, %v3303_v7 }
 0x102   :  { %v2220_v53 = vpop.f32.mrf.mxu0 }
 0x103   :  { %v2218_v54 = vadd.f32 %v2217_v14, %v2174_v52 }
 0x105   :  { %v2242_v56 = vmax.f32 %v2218_v54, 0.0 }
 0x106   :  { %v2132_v20 = vpop.f32.mrf.mxu2 }
 0x107   :  { %v2176_v55 = vpop.f32.mrf.mxu3  ;;  %v2256_v57 = vpack.c.bf16 %v2242_v56, %v2242_v56  ;;  %v2133_v58 = vadd.f32 %v2132_v20, %v2089_v5 }
 0x108   :  { %v2090_v59 = vpop.f32.mrf.mxu1 }
 0x109   :  { %2271 = vst.msk [vmem:[%s3404_s4 + $0x1c] sm:$0xf] %vm2263_vm2, %v2256_v57  ;;  %v2177_v60 = vadd.f32 %v2176_v55, %v2133_v58  ;;  %v2091_v3 = vadd.f32 %v2090_v59, %v3311_v15 }
 0x10a   :  { %v2222_v61 = vpop.f32.mrf.mxu0 }
 0x10b   :  { %v2221_v62 = vadd.f32 %v2220_v53, %v2177_v60 }
 0x10d   :  { %v2243_v0 = vmax.f32 %v2221_v62, 0.0 }
 0x10e   :  { %v2134_v4 = vpop.f32.mrf.mxu2 }
 0x10f   :  { %v2178_v63 = vpop.f32.mrf.mxu3  ;;  %v2257_v6 = vpack.c.bf16 %v2243_v0, %v2243_v0  ;;  %v2135_v9 = vadd.f32 %v2134_v4, %v2091_v3 }
 0x110   :  { %v2093_v7 = vpop.f32.mrf.mxu1 }
 0x111   :  { %2272 = vst.msk [vmem:[%s3404_s4 + $0x20] sm:$0xf] %vm2263_vm2, %v2257_v6  ;;  %v2179_v11 = vadd.f32 %v2178_v63, %v2135_v9  ;;  %v2094_v21 = vadd.f32 %v2093_v7, %v3319_v10 }
 0x112   :  { %v2225_v24 = vpop.f32.mrf.mxu0 }
 0x113   :  { %v2223_v13 = vadd.f32 %v2222_v61, %v2179_v11 }
 0x115   :  { %v2244_v19 = vmax.f32 %v2223_v13, 0.0 }
 0x116   :  { %v2137_v22 = vpop.f32.mrf.mxu2 }
 0x117   :  { %v2181_v17 = vpop.f32.mrf.mxu3  ;;  %v2258_v25 = vpack.c.bf16 %v2244_v19, %v2244_v19  ;;  %v2138_v26 = vadd.f32 %v2137_v22, %v2094_v21 }
 0x118   :  { %v2095_v15 = vpop.f32.mrf.mxu1 }
 0x119   :  { %2273 = vst.msk [vmem:[%s3404_s4 + $0x24] sm:$0xf] %vm2263_vm2, %v2258_v25  ;;  %v2182_v27 = vadd.f32 %v2181_v17, %v2138_v26  ;;  %v2096_v30 = vadd.f32 %v2095_v15, %v3324_v23 }
 0x11a   :  { %v2227_v31 = vpop.f32.mrf.mxu0 }
 0x11b   :  { %v2226_v2 = vadd.f32 %v2225_v24, %v2182_v27 }
 0x11d   :  { %v2245_v29 = vmax.f32 %v2226_v2, 0.0 }
 0x11e   :  { %v2139_v32 = vpop.f32.mrf.mxu2 }
 0x11f   :  { %v2183_v28 = vpop.f32.mrf.mxu3  ;;  %v2259_v33 = vpack.c.bf16 %v2245_v29, %v2245_v29  ;;  %v2140_v34 = vadd.f32 %v2139_v32, %v2096_v30 }
 0x120   :  { %v2098_v10 = vpop.f32.mrf.mxu1 }
 0x121   :  { %2274 = vst.msk [vmem:[%s3404_s4 + $0x28] sm:$0xf] %vm2263_vm2, %v2259_v33  ;;  %v2184_v35 = vadd.f32 %v2183_v28, %v2140_v34  ;;  %v2099_v8 = vadd.f32 %v2098_v10, %v3308_v12 }
 0x122   :  { %v2230_v23 = vpop.f32.mrf.mxu0 }
 0x123   :  { %v2228_v36 = vadd.f32 %v2227_v31, %v2184_v35 }
 0x125   :  { %v2246_v37 = vmax.f32 %v2228_v36, 0.0 }
 0x126   :  { %v2142_v39 = vpop.f32.mrf.mxu2 }
 0x127   :  { %v2186_v38 = vpop.f32.mrf.mxu3  ;;  %v2260_v40 = vpack.c.bf16 %v2246_v37, %v2246_v37  ;;  %v2143_v41 = vadd.f32 %v2142_v39, %v2099_v8 }
 0x128   :  { %v2100_v43 = vpop.f32.mrf.mxu1 }
 0x129   :  { %2275 = vst.msk [vmem:[%s3404_s4 + $0x2c] sm:$0xf] %vm2263_vm2, %v2260_v40  ;;  %v2187_v42 = vadd.f32 %v2186_v38, %v2143_v41  ;;  %v2101_v44 = vadd.f32 %v2100_v43, %v3316_v18 }
 0x12a   :  { %v2232_v48 = vpop.f32.mrf.mxu0 }
 0x12b   :  { %v2231_v1 = vadd.f32 %v2230_v23, %v2187_v42 }
 0x12d   :  { %v2247_v14 = vmax.f32 %v2231_v1, 0.0 }
 0x12e   :  { %v2144_v45 = vpop.f32.mrf.mxu2 }
 0x12f   :  { %v2261_v16 = vpack.c.bf16 %v2247_v14, %v2247_v14  ;;  %v2145_v46 = vadd.f32 %v2144_v45, %v2101_v44  ;;  %v2188_v12 = vpop.f32.mrf.mxu3 }
 0x131   :  { %2276 = vst.msk [vmem:[%s3404_s4 + $0x30] sm:$0xf] %vm2263_vm2, %v2261_v16  ;;  %v2189_v47 = vadd.f32 %v2188_v12, %v2145_v46 }
 0x133   :  { %v2233_v49 = vadd.f32 %v2232_v48, %v2189_v47 }
 0x135   :  { %v2248_v50 = vmax.f32 %v2233_v49, 0.0 }
 0x137   :  { %v2262_v51 = vpack.c.bf16 %v2248_v50, %v2248_v50 }
 0x139   :  { %2277 = vst.msk [vmem:[%s3404_s4 + $0x34] sm:$0xf] %vm2263_vm2, %v2262_v51 }

// kernel: cnn_policy_forward.7
= control target key start
LH: loop header
LB: loop body
LE: loop exit
PB: predicated region body
PF: predicated region fallthrough
CT: control target
= control target key end

     0   :  { %vm2436_vm0 = vcmask 261120   ;;  %s13415_s3 = inlined_call_operand.vmem [shape: bf16[1568,512], index: 3, kind: input, shape index: {}]   ;;  %s13416_s0 = inlined_call_operand.vmem [shape: bf16[2,1568], index: 0, kind: input, shape index: {}]   ;;  %s13417_s4 = inlined_call_operand.vmem [shape: f32[1,512], index: 4, kind: input, shape index: {}]   ;;  %s13418_s5 = inlined_call_operand.vmem [shape: bf16[512,768], index: 5, kind: input, shape index: {}]   ;;  %s13419_s2 = inlined_call_operand.vmem [shape: f32[2,1], index: 2, kind: input, shape index: {}]   ;;  %s13420_s7 = inlined_call_operand.vmem [shape: f32[1,768], index: 7, kind: input, shape index: {}]   ;;  %s13421_s1 = inlined_call_operand.vmem [shape: f32[2,256], index: 1, kind: input, shape index: {}]   ;;  %s13422_s6 = inlined_call_operand.vmem [shape: bf16[256,768], index: 6, kind: input, shape index: {}]   ;;  %s13423_s8 = inlined_call_operand.vmem [shape: f32[1,768], index: 8, kind: input, shape index: {}]   ;;  %s13424_s10 = inlined_call_operand.<no memory space> [shape: f32[1,1], index: 10, kind: input, shape index: {}]   ;;  %s13425_s9 = inlined_call_operand.vmem [shape: f32[1,256], index: 9, kind: input, shape index: {}]   ;;  %s13426_s12 = inlined_call_operand.vmem [shape: f32[2,256], index: 12, kind: output, shape index: {1}]   ;;  %s13427_s11 = inlined_call_operand.vmem [shape: f32[2,1], index: 11, kind: output, shape index: {0}]  }
   0x1   :  { %v5615_v0 = vld [vmem:[%s13415_s3 + $0xe0] sm:$0xf]  ;;  %v8259_v1 = vld [vmem:[%s13415_s3 + $0xec] sm:$0xf0] }
   0x2   :  { %v5743_v2 = vld [vmem:[%s13415_s3 + $0x1e0] sm:$0xf]  ;;  %v5616_v3 = vor.u32 %v8259_v1, %v5615_v0  ;;  %v8291_v4 = vld [vmem:[%s13415_s3 + $0x1ec] sm:$0xf0] }
   0x3   :  { %v5871_v5 = vld [vmem:[%s13415_s3 + $0x2e0] sm:$0xf]  ;;  %v8323_v6 = vld [vmem:[%s13415_s3 + $0x2ec] sm:$0xf0]  ;;  %v5744_v7 = vor.u32 %v8291_v4, %v5743_v2 }
   0x4   :  { %v5872_v8 = vor.u32 %v8323_v6, %v5871_v5  ;;  %v5999_v9 = vld [vmem:[%s13415_s3 + $0x3e0] sm:$0xf]  ;;  %v8355_v10 = vld [vmem:[%s13415_s3 + $0x3ec] sm:$0xf0]  ;;  %2439 = vmatpush.bf16.msra.mxu0 %v5616_v3 }
   0x5   :  { %v5599_v11 = vld [vmem:[%s13415_s3 + $0xc0] sm:$0xf]  ;;  %v6000_v12 = vor.u32 %v8355_v10, %v5999_v9  ;;  %v8255_v13 = vld [vmem:[%s13415_s3 + $0xcc] sm:$0xf0]  ;;  %2452 = vmatpush.bf16.msra.mxu1 %v5744_v7 }
   0x6   :  { %v5727_v14 = vld [vmem:[%s13415_s3 + $0x1c0] sm:$0xf]  ;;  %v8287_v15 = vld [vmem:[%s13415_s3 + $0x1cc] sm:$0xf0]  ;;  %2465 = vmatpush.bf16.msra.mxu2 %v5872_v8  ;;  %v5600_v16 = vor.u32 %v8255_v13, %v5599_v11 }
   0x7   :  { %v5728_v17 = vor.u32 %v8287_v15, %v5727_v14  ;;  %v5855_v18 = vld [vmem:[%s13415_s3 + $0x2c0] sm:$0xf]  ;;  %v8319_v19 = vld [vmem:[%s13415_s3 + $0x2cc] sm:$0xf0]  ;;  %2478 = vmatpush.bf16.msra.mxu3 %v6000_v12 }
   0x8   :  { %v5983_v20 = vld [vmem:[%s13415_s3 + $0x3c0] sm:$0xf]  ;;  %v5856_v21 = vor.u32 %v8319_v19, %v5855_v18  ;;  %v8351_v22 = vld [vmem:[%s13415_s3 + $0x3cc] sm:$0xf0]  ;;  %2440 = vmatpush.bf16.msra.mxu0 %v5600_v16 }
   0x9   :  { %v5583_v23 = vld [vmem:[%s13415_s3 + $0xa0] sm:$0xf]  ;;  %v8251_v24 = vld [vmem:[%s13415_s3 + $0xac] sm:$0xf0]  ;;  %v5984_v25 = vor.u32 %v8351_v22, %v5983_v20  ;;  %2453 = vmatpush.bf16.msra.mxu1 %v5728_v17 }
   0xa   :  { %v5711_v26 = vld [vmem:[%s13415_s3 + $0x1a0] sm:$0xf]  ;;  %v8283_v27 = vld [vmem:[%s13415_s3 + $0x1ac] sm:$0xf0]  ;;  %v5584_v29 = vor.u32 %v8251_v24, %v5583_v23  ;;  %2466 = vmatpush.bf16.msra.mxu2 %v5856_v21 }
   0xb   :  { %v5839_v28 = vld [vmem:[%s13415_s3 + $0x2a0] sm:$0xf]  ;;  %v8315_v30 = vld [vmem:[%s13415_s3 + $0x2ac] sm:$0xf0]  ;;  %v5712_v33 = vor.u32 %v8283_v27, %v5711_v26  ;;  %2479 = vmatpush.bf16.msra.mxu3 %v5984_v25 }
   0xc   :  { %v5967_v31 = vld [vmem:[%s13415_s3 + $0x3a0] sm:$0xf]  ;;  %v8347_v32 = vld [vmem:[%s13415_s3 + $0x3ac] sm:$0xf0]  ;;  %v5840_v34 = vor.u32 %v8315_v30, %v5839_v28  ;;  %2441 = vmatpush.bf16.msra.mxu0 %v5584_v29 }
   0xd   :  { %v5567_v35 = vld [vmem:[%s13415_s3 + $0x80] sm:$0xf]  ;;  %v8247_v36 = vld [vmem:[%s13415_s3 + $0x8c] sm:$0xf0]  ;;  %v5968_v38 = vor.u32 %v8347_v32, %v5967_v31  ;;  %2454 = vmatpush.bf16.msra.mxu1 %v5712_v33 }
   0xe   :  { %v5695_v37 = vld [vmem:[%s13415_s3 + $0x180] sm:$0xf]  ;;  %v8279_v39 = vld [vmem:[%s13415_s3 + $0x18c] sm:$0xf0]  ;;  %v5568_v44 = vor.u32 %v8247_v36, %v5567_v35  ;;  %2467 = vmatpush.bf16.msra.mxu2 %v5840_v34 }
   0xf   :  { %v5823_v40 = vld [vmem:[%s13415_s3 + $0x280] sm:$0xf]  ;;  %v8311_v41 = vld [vmem:[%s13415_s3 + $0x28c] sm:$0xf0]  ;;  %v5696_v45 = vor.u32 %v8279_v39, %v5695_v37  ;;  %2480 = vmatpush.bf16.msra.mxu3 %v5968_v38 }
  0x10   :  { %v5951_v42 = vld [vmem:[%s13415_s3 + $0x380] sm:$0xf]  ;;  %v8343_v43 = vld [vmem:[%s13415_s3 + $0x38c] sm:$0xf0]  ;;  %v5824_v46 = vor.u32 %v8311_v41, %v5823_v40  ;;  %2442 = vmatpush.bf16.msra.mxu0 %v5568_v44 }
  0x11   :  { %v5551_v47 = vld [vmem:[%s13415_s3 + $0x60] sm:$0xf]  ;;  %v8243_v48 = vld [vmem:[%s13415_s3 + $0x6c] sm:$0xf0]  ;;  %v5952_v50 = vor.u32 %v8343_v43, %v5951_v42  ;;  %2455 = vmatpush.bf16.msra.mxu1 %v5696_v45 }
  0x12   :  { %v5679_v49 = vld [vmem:[%s13415_s3 + $0x160] sm:$0xf]  ;;  %v8275_v51 = vld [vmem:[%s13415_s3 + $0x16c] sm:$0xf0]  ;;  %v5552_v56 = vor.u32 %v8243_v48, %v5551_v47  ;;  %2468 = vmatpush.bf16.msra.mxu2 %v5824_v46 }
  0x13   :  { %v5807_v52 = vld [vmem:[%s13415_s3 + $0x260] sm:$0xf]  ;;  %v8307_v53 = vld [vmem:[%s13415_s3 + $0x26c] sm:$0xf0]  ;;  %v5680_v57 = vor.u32 %v8275_v51, %v5679_v49  ;;  %2481 = vmatpush.bf16.msra.mxu3 %v5952_v50 }
  0x14   :  { %v5935_v54 = vld [vmem:[%s13415_s3 + $0x360] sm:$0xf]  ;;  %v8339_v55 = vld [vmem:[%s13415_s3 + $0x36c] sm:$0xf0]  ;;  %v5808_v58 = vor.u32 %v8307_v53, %v5807_v52  ;;  %2443 = vmatpush.bf16.msra.mxu0 %v5552_v56 }
  0x15   :  { %v5535_v59 = vld [vmem:[%s13415_s3 + $0x40] sm:$0xf]  ;;  %v8239_v60 = vld [vmem:[%s13415_s3 + $0x4c] sm:$0xf0]  ;;  %v5936_v62 = vor.u32 %v8339_v55, %v5935_v54  ;;  %2456 = vmatpush.bf16.msra.mxu1 %v5680_v57 }
  0x16   :  { %v5663_v61 = vld [vmem:[%s13415_s3 + $0x140] sm:$0xf]  ;;  %v8271_v63 = vld [vmem:[%s13415_s3 + $0x14c] sm:$0xf0]  ;;  %v5536_v4 = vor.u32 %v8239_v60, %v5535_v59  ;;  %2469 = vmatpush.bf16.msra.mxu2 %v5808_v58 }
  0x17   :  { %v5791_v0 = vld [vmem:[%s13415_s3 + $0x240] sm:$0xf]  ;;  %v8303_v1 = vld [vmem:[%s13415_s3 + $0x24c] sm:$0xf0]  ;;  %v5664_v5 = vor.u32 %v8271_v63, %v5663_v61  ;;  %2482 = vmatpush.bf16.msra.mxu3 %v5936_v62 }
  0x18   :  { %v5919_v2 = vld [vmem:[%s13415_s3 + $0x340] sm:$0xf]  ;;  %v8335_v3 = vld [vmem:[%s13415_s3 + $0x34c] sm:$0xf0]  ;;  %v5792_v6 = vor.u32 %v8303_v1, %v5791_v0  ;;  %2444 = vmatpush.bf16.msra.mxu0 %v5536_v4 }
  0x19   :  { %v5519_v7 = vld [vmem:[%s13415_s3 + $0x20] sm:$0xf]  ;;  %v8235_v8 = vld [vmem:[%s13415_s3 + $0x2c] sm:$0xf0]  ;;  %v5920_v10 = vor.u32 %v8335_v3, %v5919_v2  ;;  %2457 = vmatpush.bf16.msra.mxu1 %v5664_v5 }
  0x1a   :  { %v5647_v9 = vld [vmem:[%s13415_s3 + $0x120] sm:$0xf]  ;;  %v8267_v11 = vld [vmem:[%s13415_s3 + $0x12c] sm:$0xf0]  ;;  %v5520_v16 = vor.u32 %v8235_v8, %v5519_v7  ;;  %2470 = vmatpush.bf16.msra.mxu2 %v5792_v6 }
  0x1b   :  { %v5775_v12 = vld [vmem:[%s13415_s3 + $0x220] sm:$0xf]  ;;  %v8299_v13 = vld [vmem:[%s13415_s3 + $0x22c] sm:$0xf0]  ;;  %v5648_v19 = vor.u32 %v8267_v11, %v5647_v9  ;;  %2483 = vmatpush.bf16.msra.mxu3 %v5920_v10 }
  0x1c   :  { %v5903_v14 = vld [vmem:[%s13415_s3 + $0x320] sm:$0xf]  ;;  %v8331_v15 = vld [vmem:[%s13415_s3 + $0x32c] sm:$0xf0]  ;;  %v5776_v20 = vor.u32 %v8299_v13, %v5775_v12  ;;  %2445 = vmatpush.bf16.msra.mxu0 %v5520_v16 }
  0x1d   :  { %v5503_v17 = vld [vmem:[%s13415_s3] sm:$0xf]  ;;  %v8231_v18 = vld [vmem:[%s13415_s3 + $0xc] sm:$0xf0]  ;;  %v5904_v24 = vor.u32 %v8331_v15, %v5903_v14  ;;  %2458 = vmatpush.bf16.msra.mxu1 %v5648_v19 }
  0x1e   :  { %v5631_v21 = vld [vmem:[%s13415_s3 + $0x100] sm:$0xf]  ;;  %v8263_v22 = vld [vmem:[%s13415_s3 + $0x10c] sm:$0xf0]  ;;  %v5504_v31 = vor.u32 %v8231_v18, %v5503_v17  ;;  %2471 = vmatpush.bf16.msra.mxu2 %v5776_v20 }
  0x1f   :  { %v5759_v23 = vld [vmem:[%s13415_s3 + $0x200] sm:$0xf]  ;;  %v8295_v25 = vld [vmem:[%s13415_s3 + $0x20c] sm:$0xf0]  ;;  %v5632_v35 = vor.u32 %v8263_v22, %v5631_v21  ;;  %2484 = vmatpush.bf16.msra.mxu3 %v5904_v24 }
  0x20   :  { %v5887_v26 = vld [vmem:[%s13415_s3 + $0x300] sm:$0xf]  ;;  %v8327_v27 = vld [vmem:[%s13415_s3 + $0x30c] sm:$0xf0]  ;;  %v5760_v36 = vor.u32 %v8295_v25, %v5759_v23  ;;  %2446 = vmatpush.bf16.msra.mxu0 %v5504_v31 }
  0x21   :  { %v6127_v28 = vld [vmem:[%s13415_s3 + $0x4e0] sm:$0xf]  ;;  %v8387_v29 = vld [vmem:[%s13415_s3 + $0x4ec] sm:$0xf0]  ;;  %v5888_v39 = vor.u32 %v8327_v27, %v5887_v26  ;;  %2459 = vmatpush.bf16.msra.mxu1 %v5632_v35 }
  0x22   :  { %v6255_v30 = vld [vmem:[%s13415_s3 + $0x5e0] sm:$0xf]  ;;  %v8419_v32 = vld [vmem:[%s13415_s3 + $0x5ec] sm:$0xf0]  ;;  %v6128_v40 = vor.u32 %v8387_v29, %v6127_v28  ;;  %2472 = vmatpush.bf16.msra.mxu2 %v5760_v36 }
  0x23   :  { %v6383_v33 = vld [vmem:[%s13415_s3 + $0x6e0] sm:$0xf]  ;;  %v8451_v34 = vld [vmem:[%s13415_s3 + $0x6ec] sm:$0xf0]  ;;  %v6256_v41 = vor.u32 %v8419_v32, %v6255_v30  ;;  %2485 = vmatpush.bf16.msra.mxu3 %v5888_v39 }
  0x24   :  { %v6511_v37 = vld [vmem:[%s13415_s3 + $0x7e0] sm:$0xf]  ;;  %v8483_v38 = vld [vmem:[%s13415_s3 + $0x7ec] sm:$0xf0]  ;;  %v6384_v42 = vor.u32 %v8451_v34, %v6383_v33  ;;  %2491 = vmatpush.bf16.msrb.mxu0 %v6128_v40 }
  0x25   :  { %v6111_v43 = vld [vmem:[%s13415_s3 + $0x4c0] sm:$0xf]  ;;  %v8383_v44 = vld [vmem:[%s13415_s3 + $0x4cc] sm:$0xf0]  ;;  %v6512_v46 = vor.u32 %v8483_v38, %v6511_v37  ;;  %2504 = vmatpush.bf16.msrb.mxu1 %v6256_v41 }
  0x26   :  { %v6239_v45 = vld [vmem:[%s13415_s3 + $0x5c0] sm:$0xf]  ;;  %v8415_v47 = vld [vmem:[%s13415_s3 + $0x5cc] sm:$0xf0]  ;;  %v6112_v52 = vor.u32 %v8383_v44, %v6111_v43  ;;  %2517 = vmatpush.bf16.msrb.mxu2 %v6384_v42  ;;  %v44_v43 = vld [vmem:[%s13416_s0 + $0x8] sm:$0x1f] }
  0x27   :  { %v6367_v48 = vld [vmem:[%s13415_s3 + $0x6c0] sm:$0xf]  ;;  %v8447_v49 = vld [vmem:[%s13415_s3 + $0x6cc] sm:$0xf0]  ;;  %v6240_v55 = vor.u32 %v8415_v47, %v6239_v45  ;;  %2530 = vmatpush.bf16.msrb.mxu3 %v6512_v46 }
  0x28   :  { %v6495_v50 = vld [vmem:[%s13415_s3 + $0x7c0] sm:$0xf]  ;;  %v8479_v51 = vld [vmem:[%s13415_s3 + $0x7cc] sm:$0xf0]  ;;  %v6368_v56 = vor.u32 %v8447_v49, %v6367_v48  ;;  %2492 = vmatpush.bf16.msrb.mxu0 %v6112_v52 }
  0x29   :  { %v6095_v53 = vld [vmem:[%s13415_s3 + $0x4a0] sm:$0xf]  ;;  %v8379_v54 = vld [vmem:[%s13415_s3 + $0x4ac] sm:$0xf0]  ;;  %v6496_v60 = vor.u32 %v8479_v51, %v6495_v50  ;;  %2505 = vmatpush.bf16.msrb.mxu1 %v6240_v55 }
  0x2a   :  { %v6223_v57 = vld [vmem:[%s13415_s3 + $0x5a0] sm:$0xf]  ;;  %v8411_v58 = vld [vmem:[%s13415_s3 + $0x5ac] sm:$0xf0]  ;;  %v6096_v1 = vor.u32 %v8379_v54, %v6095_v53  ;;  %2518 = vmatpush.bf16.msrb.mxu2 %v6368_v56 }
  0x2b   :  { %v43_v59 = vld [vmem:[%s13416_s0] sm:$0xff]  ;;  %v8443_v62 = vld [vmem:[%s13415_s3 + $0x6ac] sm:$0xf0]  ;;  %v6224_v2 = vor.u32 %v8411_v58, %v6223_v57  ;;  %2531 = vmatpush.bf16.msrb.mxu3 %v6496_v60 }
  0x2c   :  { %v6351_v61 = vld [vmem:[%s13415_s3 + $0x6a0] sm:$0xf]  ;;  %448 = vst [vmem:[#allocation1] ss:$9 sm:$0xff] %v43_v59  ;;  %v8475_v0 = vld [vmem:[%s13415_s3 + $0x7ac] sm:$0xf0]  ;;  %2493 = vmatpush.bf16.msrb.mxu0 %v6096_v1 }
  0x2d   :  { %v6479_v63 = vld [vmem:[%s13415_s3 + $0x7a0] sm:$0xf]  ;;  %v6352_v3 = vor.u32 %v8443_v62, %v6351_v61  ;;  %v8375_v5 = vld [vmem:[%s13415_s3 + $0x48c] sm:$0xf0]  ;;  %2506 = vmatpush.bf16.msrb.mxu1 %v6224_v2 }
  0x2e   :  { %v6079_v4 = vld [vmem:[%s13415_s3 + $0x480] sm:$0xf]  ;;  %v6480_v7 = vor.u32 %v8475_v0, %v6479_v63  ;;  %v8407_v8 = vld [vmem:[%s13415_s3 + $0x58c] sm:$0xf0] }
  0x2f   :  { %v6207_v6 = vld [vmem:[%s13415_s3 + $0x580] sm:$0xf]  ;;  %v8439_v10 = vld [vmem:[%s13415_s3 + $0x68c] sm:$0xf0]  ;;  %v6080_v14 = vor.u32 %v8375_v5, %v6079_v4  ;;  %2519 = vmatpush.bf16.msrb.mxu2 %v6352_v3 }
  0x30   :  { %v6335_v9 = vld [vmem:[%s13415_s3 + $0x680] sm:$0xf]  ;;  %v8471_v12 = vld [vmem:[%s13415_s3 + $0x78c] sm:$0xf0]  ;;  %v6208_v18 = vor.u32 %v8407_v8, %v6207_v6  ;;  %2532 = vmatpush.bf16.msrb.mxu3 %v6480_v7 }
  0x31   :  { %v6463_v11 = vld [vmem:[%s13415_s3 + $0x780] sm:$0xf]  ;;  %v8371_v15 = vld [vmem:[%s13415_s3 + $0x46c] sm:$0xf0]  ;;  %v6336_v19 = vor.u32 %v8439_v10, %v6335_v9  ;;  %2494 = vmatpush.bf16.msrb.mxu0 %v6080_v14 }
  0x32   :  { %v6063_v13 = vld [vmem:[%s13415_s3 + $0x460] sm:$0xf]  ;;  %v8403_v17 = vld [vmem:[%s13415_s3 + $0x56c] sm:$0xf0]  ;;  %v6464_v23 = vor.u32 %v8471_v12, %v6463_v11  ;;  %2507 = vmatpush.bf16.msrb.mxu1 %v6208_v18 }
  0x33   :  { %v6191_v16 = vld [vmem:[%s13415_s3 + $0x560] sm:$0xf]  ;;  %v9310_v20 = vld [vmem:[#allocation1 + $0x12] sm:$0xff]  ;;  %v9323_v26 = vld [vmem:[#allocation1 + $0x9] sm:$0xff]  ;;  %v6064_v29 = vor.u32 %v8371_v15, %v6063_v13  ;;  %2520 = vmatpush.bf16.msrb.mxu2 %v6336_v19 }
  0x34   :  { %v9312_v21 = vld [vmem:[#allocation1] sm:$0xff]  ;;  %v8435_v25 = vld [vmem:[%s13415_s3 + $0x66c] sm:$0xf0]  ;;  %2473 = vmatmul.bf16.vlgmr.msra.gmra.mxu2 %v9310_v20  ;;  %2460 = vmatmul.bf16.vlgmr.msra.gmra.mxu1 %v9323_v26  ;;  %v6192_v30 = vor.u32 %v8403_v17, %v6191_v16  ;;  %v9403_v61 = vld [vmem:[#allocation1 + $0x36] sm:$0xff] }
  0x35   :  { %v9314_v22 = vld [vmem:[#allocation1 + $0x1b] sm:$0xff]  ;;  %v8467_v28 = vld [vmem:[%s13415_s3 + $0x76c] sm:$0xf0]  ;;  %2447 = vmatmul.bf16.vlgmr.msra.gmra.mxu0 %v9312_v21  ;;  %2533 = vmatpush.bf16.msrb.mxu3 %v6464_v23  ;;  %v9405_v0 = vld [vmem:[#allocation1 + $0x24] sm:$0xff] }
  0x36   :  { %v6319_v24 = vld [vmem:[%s13415_s3 + $0x660] sm:$0xf]  ;;  %2486 = vmatmul.bf16.vlgmr.msra.gmra.mxu3 %v9314_v22  ;;  %v8367_v33 = vld [vmem:[%s13415_s3 + $0x44c] sm:$0xf0]  ;;  %2495 = vmatpush.bf16.msrb.mxu0 %v6064_v29 }
  0x37   :  { %v6447_v27 = vld [vmem:[%s13415_s3 + $0x760] sm:$0xf]  ;;  %v6320_v31 = vor.u32 %v8435_v25, %v6319_v24  ;;  %v8399_v36 = vld [vmem:[%s13415_s3 + $0x54c] sm:$0xf0]  ;;  %2508 = vmatpush.bf16.msrb.mxu1 %v6192_v30 }
  0x38   :  { %v6047_v32 = vld [vmem:[%s13415_s3 + $0x440] sm:$0xf]  ;;  %v6448_v35 = vor.u32 %v8467_v28, %v6447_v27  ;;  %v8431_v38 = vld [vmem:[%s13415_s3 + $0x64c] sm:$0xf0] }
  0x39   :  { %v6175_v34 = vld [vmem:[%s13415_s3 + $0x540] sm:$0xf]  ;;  %v8463_v40 = vld [vmem:[%s13415_s3 + $0x74c] sm:$0xf0]  ;;  %v6048_v41 = vor.u32 %v8367_v33, %v6047_v32  ;;  %2521 = vmatpush.bf16.msrb.mxu2 %v6320_v31 }
  0x3a   :  { %v6303_v37 = vld [vmem:[%s13415_s3 + $0x640] sm:$0xf]  ;;  %v6176_v44 = vor.u32 %v8399_v36, %v6175_v34  ;;  %v8363_v46 = vld [vmem:[%s13415_s3 + $0x42c] sm:$0xf0]  ;;  %2534 = vmatpush.bf16.msrb.mxu3 %v6448_v35 }
  0x3b   :  { %v6431_v39 = vld [vmem:[%s13415_s3 + $0x740] sm:$0xf]  ;;  %v6304_v45 = vor.u32 %v8431_v38, %v6303_v37  ;;  %v8395_v48 = vld [vmem:[%s13415_s3 + $0x52c] sm:$0xf0]  ;;  %2496 = vmatpush.bf16.msrb.mxu0 %v6048_v41 }
  0x3c   :  { %v6031_v42 = vld [vmem:[%s13415_s3 + $0x420] sm:$0xf]  ;;  %v6432_v49 = vor.u32 %v8463_v40, %v6431_v39  ;;  %v8427_v51 = vld [vmem:[%s13415_s3 + $0x62c] sm:$0xf0]  ;;  %2509 = vmatpush.bf16.msrb.mxu1 %v6176_v44 }
  0x3d   :  { %v6159_v47 = vld [vmem:[%s13415_s3 + $0x520] sm:$0xf]  ;;  %v8459_v53 = vld [vmem:[%s13415_s3 + $0x72c] sm:$0xf0]  ;;  %v6032_v56 = vor.u32 %v8363_v46, %v6031_v42  ;;  %2522 = vmatpush.bf16.msrb.mxu2 %v6304_v45 }
  0x3e   :  { %v6287_v50 = vld [vmem:[%s13415_s3 + $0x620] sm:$0xf]  ;;  %v8359_v55 = vld [vmem:[%s13415_s3 + $0x40c] sm:$0xf0]  ;;  %v6160_v62 = vor.u32 %v8395_v48, %v6159_v47  ;;  %2535 = vmatpush.bf16.msrb.mxu3 %v6432_v49 }
  0x3f   :  { %v6415_v52 = vld [vmem:[%s13415_s3 + $0x720] sm:$0xf]  ;;  %v8391_v58 = vld [vmem:[%s13415_s3 + $0x50c] sm:$0xf0]  ;;  %v6288_v63 = vor.u32 %v8427_v51, %v6287_v50  ;;  %2497 = vmatpush.bf16.msrb.mxu0 %v6032_v56 }
  0x40   :  { %v6015_v54 = vld [vmem:[%s13415_s3 + $0x400] sm:$0xf]  ;;  %v8423_v60 = vld [vmem:[%s13415_s3 + $0x60c] sm:$0xf0]  ;;  %v6416_v3 = vor.u32 %v8459_v53, %v6415_v52  ;;  %2510 = vmatpush.bf16.msrb.mxu1 %v6160_v62 }
  0x41   :  { %v6143_v57 = vld [vmem:[%s13415_s3 + $0x500] sm:$0xf]  ;;  %v9409_v2 = vld [vmem:[#allocation1 + $0x2d] sm:$0xff]  ;;  %v6016_v9 = vor.u32 %v8359_v55, %v6015_v54  ;;  %2523 = vmatpush.bf16.msrb.mxu2 %v6288_v63 }
  0x42   :  { %v6271_v59 = vld [vmem:[%s13415_s3 + $0x600] sm:$0xf]  ;;  %v8455_v5 = vld [vmem:[%s13415_s3 + $0x70c] sm:$0xf0]  ;;  %v6144_v13 = vor.u32 %v8391_v58, %v6143_v57  ;;  %2536 = vmatpush.bf16.msrb.mxu3 %v6416_v3 }
  0x43   :  { %v9407_v1 = vld [vmem:[#allocation1 + $0x3f] sm:$0xff]  ;;  %v8515_v7 = vld [vmem:[%s13415_s3 + $0x8ec] sm:$0xf0]  ;;  %v6272_v14 = vor.u32 %v8423_v60, %v6271_v59  ;;  %2498 = vmatpush.bf16.msrb.mxu0 %v6016_v9 }
  0x44   :  { %v6399_v4 = vld [vmem:[%s13415_s3 + $0x700] sm:$0xf]  ;;  %458 = vst [vmem:[#allocation1] ss:$9 sm:$0xff] %v44_v43  ;;  %v8547_v10 = vld [vmem:[%s13415_s3 + $0x9ec] sm:$0xf0]  ;;  %2511 = vmatpush.bf16.msrb.mxu1 %v6144_v13 }
  0x45   :  { %v6639_v6 = vld [vmem:[%s13415_s3 + $0x8e0] sm:$0xf]  ;;  %v8579_v12 = vld [vmem:[%s13415_s3 + $0xaec] sm:$0xf0]  ;;  %v6400_v17 = vor.u32 %v8455_v5, %v6399_v4  ;;  %2524 = vmatpush.bf16.msrb.mxu2 %v6272_v14 }
  0x46   :  { %v6767_v8 = vld [vmem:[%s13415_s3 + $0x9e0] sm:$0xf]  ;;  %v8611_v16 = vld [vmem:[%s13415_s3 + $0xbec] sm:$0xf0]  ;;  %v6640_v18 = vor.u32 %v8515_v7, %v6639_v6  ;;  %2499 = vmatmul.bf16.vlgmr.msrb.gmra.mxu0 %v9405_v0 }
  0x47   :  { %v6895_v11 = vld [vmem:[%s13415_s3 + $0xae0] sm:$0xf]  ;;  %v6768_v19 = vor.u32 %v8547_v10, %v6767_v8  ;;  %v8511_v25 = vld [vmem:[%s13415_s3 + $0x8cc] sm:$0xf0]  ;;  %2537 = vmatpush.bf16.msrb.mxu3 %v6400_v17  ;;  %2512 = vmatmul.bf16.vlgmr.msrb.gmra.mxu1 %v9409_v2 }
  0x48   :  { %v7023_v15 = vld [vmem:[%s13415_s3 + $0xbe0] sm:$0xf]  ;;  %v6896_v23 = vor.u32 %v8579_v12, %v6895_v11  ;;  %v8543_v29 = vld [vmem:[%s13415_s3 + $0x9cc] sm:$0xf0]  ;;  %2543 = vmatpush.bf16.msra.mxu0 %v6640_v18  ;;  %2525 = vmatmul.bf16.vlgmr.msrb.gmra.mxu2 %v9403_v61 }
  0x49   :  { %v6623_v24 = vld [vmem:[%s13415_s3 + $0x8c0] sm:$0xf]  ;;  %v7024_v28 = vor.u32 %v8611_v16, %v7023_v15  ;;  %v8575_v31 = vld [vmem:[%s13415_s3 + $0xacc] sm:$0xf0]  ;;  %2556 = vmatpush.bf16.msra.mxu1 %v6768_v19 }
  0x4a   :  { %v6751_v27 = vld [vmem:[%s13415_s3 + $0x9c0] sm:$0xf]  ;;  %v8607_v33 = vld [vmem:[%s13415_s3 + $0xbcc] sm:$0xf0]  ;;  %v6624_v34 = vor.u32 %v8511_v25, %v6623_v24  ;;  %2569 = vmatpush.bf16.msra.mxu2 %v6896_v23  ;;  %2538 = vmatmul.bf16.vlgmr.msrb.gmra.mxu3 %v9407_v1 }
  0x4b   :  { %v6879_v30 = vld [vmem:[%s13415_s3 + $0xac0] sm:$0xf]  ;;  %v6752_v35 = vor.u32 %v8543_v29, %v6751_v27  ;;  %v8507_v38 = vld [vmem:[%s13415_s3 + $0x8ac] sm:$0xf0]  ;;  %2582 = vmatpush.bf16.msra.mxu3 %v7024_v28 }
  0x4c   :  { %v7007_v32 = vld [vmem:[%s13415_s3 + $0xbc0] sm:$0xf]  ;;  %v6880_v36 = vor.u32 %v8575_v31, %v6879_v30  ;;  %v8539_v41 = vld [vmem:[%s13415_s3 + $0x9ac] sm:$0xf0]  ;;  %2544 = vmatpush.bf16.msra.mxu0 %v6624_v34 }
  0x4d   :  { %v6607_v37 = vld [vmem:[%s13415_s3 + $0x8a0] sm:$0xf]  ;;  %v7008_v40 = vor.u32 %v8607_v33, %v7007_v32  ;;  %v8571_v43 = vld [vmem:[%s13415_s3 + $0xaac] sm:$0xf0]  ;;  %2557 = vmatpush.bf16.msra.mxu1 %v6752_v35 }
  0x4e   :  { %v6735_v39 = vld [vmem:[%s13415_s3 + $0x9a0] sm:$0xf]  ;;  %v8603_v45 = vld [vmem:[%s13415_s3 + $0xbac] sm:$0xf0]  ;;  %v6608_v46 = vor.u32 %v8507_v38, %v6607_v37  ;;  %2570 = vmatpush.bf16.msra.mxu2 %v6880_v36 }
  0x4f   :  { %v6863_v42 = vld [vmem:[%s13415_s3 + $0xaa0] sm:$0xf]  ;;  %v6736_v47 = vor.u32 %v8539_v41, %v6735_v39  ;;  %v8503_v50 = vld [vmem:[%s13415_s3 + $0x88c] sm:$0xf0]  ;;  %2583 = vmatpush.bf16.msra.mxu3 %v7008_v40 }
  0x50   :  { %v6991_v44 = vld [vmem:[%s13415_s3 + $0xba0] sm:$0xf]  ;;  %v6864_v48 = vor.u32 %v8571_v43, %v6863_v42  ;;  %v8535_v53 = vld [vmem:[%s13415_s3 + $0x98c] sm:$0xf0]  ;;  %2545 = vmatpush.bf16.msra.mxu0 %v6608_v46 }
  0x51   :  { %v6591_v49 = vld [vmem:[%s13415_s3 + $0x880] sm:$0xf]  ;;  %v6992_v52 = vor.u32 %v8603_v45, %v6991_v44  ;;  %v8567_v55 = vld [vmem:[%s13415_s3 + $0xa8c] sm:$0xf0]  ;;  %2558 = vmatpush.bf16.msra.mxu1 %v6736_v47 }
  0x52   :  { %v6719_v51 = vld [vmem:[%s13415_s3 + $0x980] sm:$0xf]  ;;  %v8599_v57 = vld [vmem:[%s13415_s3 + $0xb8c] sm:$0xf0]  ;;  %v6592_v58 = vor.u32 %v8503_v50, %v6591_v49  ;;  %2571 = vmatpush.bf16.msra.mxu2 %v6864_v48 }
  0x53   :  { %v6847_v54 = vld [vmem:[%s13415_s3 + $0xa80] sm:$0xf]  ;;  %v6720_v59 = vor.u32 %v8535_v53, %v6719_v51  ;;  %v8499_v63 = vld [vmem:[%s13415_s3 + $0x86c] sm:$0xf0]  ;;  %2584 = vmatpush.bf16.msra.mxu3 %v6992_v52  ;;  %v8257_v52 = vld [vmem:[%s13415_s3 + $0xe4] sm:$0xf] }
  0x54   :  { %v6975_v56 = vld [vmem:[%s13415_s3 + $0xb80] sm:$0xf]  ;;  %v6848_v60 = vor.u32 %v8567_v55, %v6847_v54  ;;  %v8531_v5 = vld [vmem:[%s13415_s3 + $0x96c] sm:$0xf0]  ;;  %2546 = vmatpush.bf16.msra.mxu0 %v6592_v58  ;;  %v5617_v54 = vld [vmem:[%s13415_s3 + $0xf0] sm:$0xf0] }
  0x55   :  { %v6575_v62 = vld [vmem:[%s13415_s3 + $0x860] sm:$0xf]  ;;  %v6976_v4 = vor.u32 %v8599_v57, %v6975_v56  ;;  %v8563_v7 = vld [vmem:[%s13415_s3 + $0xa6c] sm:$0xf0]  ;;  %2559 = vmatpush.bf16.msra.mxu1 %v6720_v59  ;;  %v8289_v55 = vld [vmem:[%s13415_s3 + $0x1e4] sm:$0xf] }
  0x56   :  { %v6703_v3 = vld [vmem:[%s13415_s3 + $0x960] sm:$0xf]  ;;  %v8595_v9 = vld [vmem:[%s13415_s3 + $0xb6c] sm:$0xf0]  ;;  %v6576_v10 = vor.u32 %v8499_v63, %v6575_v62  ;;  %2572 = vmatpush.bf16.msra.mxu2 %v6848_v60  ;;  %v5745_v56 = vld [vmem:[%s13415_s3 + $0x1f0] sm:$0xf0] }
  0x57   :  { %v6831_v6 = vld [vmem:[%s13415_s3 + $0xa60] sm:$0xf]  ;;  %v6704_v11 = vor.u32 %v8531_v5, %v6703_v3  ;;  %v8495_v14 = vld [vmem:[%s13415_s3 + $0x84c] sm:$0xf0]  ;;  %2585 = vmatpush.bf16.msra.mxu3 %v6976_v4  ;;  %v8321_v59 = vld [vmem:[%s13415_s3 + $0x2e4] sm:$0xf]  ;;  %v5620_v4 = vor.u32 %v8257_v52, %v5617_v54  ;;  %v5748_v5 = vor.u32 %v8289_v55, %v5745_v56 }
  0x58   :  { %v6959_v8 = vld [vmem:[%s13415_s3 + $0xb60] sm:$0xf]  ;;  %v6832_v12 = vor.u32 %v8563_v7, %v6831_v6  ;;  %v8527_v17 = vld [vmem:[%s13415_s3 + $0x94c] sm:$0xf0]  ;;  %2547 = vmatpush.bf16.msra.mxu0 %v6576_v10  ;;  %v5873_v60 = vld [vmem:[%s13415_s3 + $0x2f0] sm:$0xf0] }
  0x59   :  { %v6559_v13 = vld [vmem:[%s13415_s3 + $0x840] sm:$0xf]  ;;  %v6960_v16 = vor.u32 %v8595_v9, %v6959_v8  ;;  %v8559_v19 = vld [vmem:[%s13415_s3 + $0xa4c] sm:$0xf0]  ;;  %2560 = vmatpush.bf16.msra.mxu1 %v6704_v11  ;;  %v8253_v8 = vld [vmem:[%s13415_s3 + $0xc4] sm:$0xf]  ;;  %v5876_v10 = vor.u32 %v8321_v59, %v5873_v60 }
  0x5a   :  { %v6687_v15 = vld [vmem:[%s13415_s3 + $0x940] sm:$0xf]  ;;  %v8591_v24 = vld [vmem:[%s13415_s3 + $0xb4c] sm:$0xf0]  ;;  %v6560_v25 = vor.u32 %v8495_v14, %v6559_v13  ;;  %2573 = vmatpush.bf16.msra.mxu2 %v6832_v12  ;;  %v5601_v9 = vld [vmem:[%s13415_s3 + $0xd0] sm:$0xf0] }
  0x5b   :  { %v6815_v18 = vld [vmem:[%s13415_s3 + $0xa40] sm:$0xf]  ;;  %v6688_v27 = vor.u32 %v8527_v17, %v6687_v15  ;;  %v8491_v30 = vld [vmem:[%s13415_s3 + $0x82c] sm:$0xf0]  ;;  %2586 = vmatpush.bf16.msra.mxu3 %v6960_v16  ;;  %v8285_v11 = vld [vmem:[%s13415_s3 + $0x1c4] sm:$0xf] }
  0x5c   :  { %v6943_v23 = vld [vmem:[%s13415_s3 + $0xb40] sm:$0xf]  ;;  %v6816_v28 = vor.u32 %v8559_v19, %v6815_v18  ;;  %v8523_v33 = vld [vmem:[%s13415_s3 + $0x92c] sm:$0xf0]  ;;  %2548 = vmatpush.bf16.msra.mxu0 %v6560_v25  ;;  %v5729_v12 = vld [vmem:[%s13415_s3 + $0x1d0] sm:$0xf0] }
  0x5d   :  { %v6543_v29 = vld [vmem:[%s13415_s3 + $0x820] sm:$0xf]  ;;  %v6944_v32 = vor.u32 %v8591_v24, %v6943_v23  ;;  %v8555_v35 = vld [vmem:[%s13415_s3 + $0xa2c] sm:$0xf0]  ;;  %2561 = vmatpush.bf16.msra.mxu1 %v6688_v27  ;;  %v8317_v13 = vld [vmem:[%s13415_s3 + $0x2c4] sm:$0xf]  ;;  %v5604_v24 = vor.u32 %v8253_v8, %v5601_v9  ;;  %v5732_v25 = vor.u32 %v8285_v11, %v5729_v12 }
  0x5e   :  { %v6671_v31 = vld [vmem:[%s13415_s3 + $0x920] sm:$0xf]  ;;  %v8587_v37 = vld [vmem:[%s13415_s3 + $0xb2c] sm:$0xf0]  ;;  %v6544_v38 = vor.u32 %v8491_v30, %v6543_v29  ;;  %2574 = vmatpush.bf16.msra.mxu2 %v6816_v28  ;;  %v5857_v14 = vld [vmem:[%s13415_s3 + $0x2d0] sm:$0xf0] }
  0x5f   :  { %v6799_v34 = vld [vmem:[%s13415_s3 + $0xa20] sm:$0xf]  ;;  %v8487_v40 = vld [vmem:[%s13415_s3 + $0x80c] sm:$0xf0]  ;;  %v6672_v41 = vor.u32 %v8523_v33, %v6671_v31  ;;  %2587 = vmatpush.bf16.msra.mxu3 %v6944_v32  ;;  %v8353_v15 = vld [vmem:[%s13415_s3 + $0x3e4] sm:$0xf]  ;;  %v5860_v29 = vor.u32 %v8317_v13, %v5857_v14 }
  0x60   :  { %v6927_v36 = vld [vmem:[%s13415_s3 + $0xb20] sm:$0xf]  ;;  %v6800_v42 = vor.u32 %v8555_v35, %v6799_v34  ;;  %v8519_v44 = vld [vmem:[%s13415_s3 + $0x90c] sm:$0xf0]  ;;  %2549 = vmatpush.bf16.msra.mxu0 %v6544_v38  ;;  %v6001_v16 = vld [vmem:[%s13415_s3 + $0x3f0] sm:$0xf0] }
  0x61   :  { %v6527_v39 = vld [vmem:[%s13415_s3 + $0x800] sm:$0xf]  ;;  %v6928_v46 = vor.u32 %v8587_v37, %v6927_v36  ;;  %v8551_v47 = vld [vmem:[%s13415_s3 + $0xa0c] sm:$0xf0]  ;;  %2562 = vmatpush.bf16.msra.mxu1 %v6672_v41  ;;  %v8249_v27 = vld [vmem:[%s13415_s3 + $0xa4] sm:$0xf]  ;;  %v6004_v30 = vor.u32 %v8353_v15, %v6001_v16 }
  0x62   :  { %v6655_v43 = vld [vmem:[%s13415_s3 + $0x900] sm:$0xf]  ;;  %v8583_v49 = vld [vmem:[%s13415_s3 + $0xb0c] sm:$0xf0]  ;;  %v6528_v53 = vor.u32 %v8487_v40, %v6527_v39  ;;  %2575 = vmatpush.bf16.msra.mxu2 %v6800_v42  ;;  %v5585_v28 = vld [vmem:[%s13415_s3 + $0xb0] sm:$0xf0] }
  0x63   :  { %v6783_v45 = vld [vmem:[%s13415_s3 + $0xa00] sm:$0xf]  ;;  %v8619_v51 = vld [vmem:[%s13415_s3 + $0xc2c] sm:$0xf0]  ;;  %v6656_v57 = vor.u32 %v8519_v44, %v6655_v43  ;;  %2588 = vmatpush.bf16.msra.mxu3 %v6928_v46  ;;  %v8281_v31 = vld [vmem:[%s13415_s3 + $0x1a4] sm:$0xf]  ;;  %v5588_v37 = vor.u32 %v8249_v27, %v5585_v28 }
  0x64   :  { %v6911_v48 = vld [vmem:[%s13415_s3 + $0xb00] sm:$0xf]  ;;  %v6784_v58 = vor.u32 %v8551_v47, %v6783_v45  ;;  %v8615_v7 = vld [vmem:[%s13415_s3 + $0xc0c] sm:$0xf0]  ;;  %2550 = vmatpush.bf16.msra.mxu0 %v6528_v53  ;;  %v5713_v32 = vld [vmem:[%s13415_s3 + $0x1b0] sm:$0xf0] }
  0x65   :  { %v7055_v50 = vld [vmem:[%s13415_s3 + $0xc20] sm:$0xf]  ;;  %v6912_v62 = vor.u32 %v8583_v49, %v6911_v48  ;;  %2563 = vmatpush.bf16.msra.mxu1 %v6656_v57  ;;  %v9669_v17 = vld [vmem:[#allocation1 + $0x12] sm:$0xff]  ;;  %v9671_v18 = vld [vmem:[#allocation1 + $0x9] sm:$0xff]  ;;  %v5716_v38 = vor.u32 %v8281_v31, %v5713_v32 }
  0x66   :  { %v7056_v63 = vor.u32 %v8619_v51, %v7055_v50  ;;  %v7039_v3 = vld [vmem:[%s13415_s3 + $0xc00] sm:$0xf]  ;;  %2576 = vmatpush.bf16.msra.mxu2 %v6784_v58  ;;  %v8313_v33 = vld [vmem:[%s13415_s3 + $0x2a4] sm:$0xf]  ;;  %v5841_v34 = vld [vmem:[%s13415_s3 + $0x2b0] sm:$0xf0] }
  0x67   :  { %v9640_v6 = vld [vmem:[#allocation1] sm:$0xff]  ;;  %2589 = vmatpush.bf16.msra.mxu3 %v6912_v62  ;;  %v7040_v19 = vor.u32 %v8615_v7, %v7039_v3  ;;  %v5985_v36 = vld [vmem:[%s13415_s3 + $0x3d0] sm:$0xf0]  ;;  %v5844_v41 = vor.u32 %v8313_v33, %v5841_v34 }
  0x68   :  { %2601 = vmatpush.bf16.msrb.mxu0 %v7056_v63  ;;  %v9673_v23 = vld [vmem:[#allocation1 + $0x1b] sm:$0xff]  ;;  %2564 = vmatmul.bf16.vlgmr.msra.gmra.mxu1 %v9671_v18  ;;  %v8349_v35 = vld [vmem:[%s13415_s3 + $0x3c4] sm:$0xf]  ;;  %v5569_v40 = vld [vmem:[%s13415_s3 + $0x90] sm:$0xf0] }
  0x69   :  { %2608 = vmatpush.bf16.msrb.mxu1 %v5620_v4  ;;  %2551 = vmatmul.bf16.vlgmr.msra.gmra.mxu0 %v9640_v6  ;;  %v8245_v39 = vld [vmem:[%s13415_s3 + $0x84] sm:$0xf]  ;;  %v5988_v42 = vor.u32 %v8349_v35, %v5985_v36  ;;  %v5697_v44 = vld [vmem:[%s13415_s3 + $0x190] sm:$0xf0] }
  0x6a   :  { %2621 = vmatpush.bf16.msrb.mxu2 %v5748_v5  ;;  %2590 = vmatmul.bf16.vlgmr.msra.gmra.mxu3 %v9673_v23  ;;  %v8277_v43 = vld [vmem:[%s13415_s3 + $0x184] sm:$0xf]  ;;  %v5825_v46 = vld [vmem:[%s13415_s3 + $0x290] sm:$0xf0]  ;;  %v5572_v49 = vor.u32 %v8245_v39, %v5569_v40 }
  0x6b   :  { %2634 = vmatpush.bf16.msrb.mxu3 %v5876_v10  ;;  %2577 = vmatmul.bf16.vlgmr.msra.gmra.mxu2 %v9669_v17  ;;  %v8309_v45 = vld [vmem:[%s13415_s3 + $0x284] sm:$0xf]  ;;  %v5969_v48 = vld [vmem:[%s13415_s3 + $0x3b0] sm:$0xf0]  ;;  %v5700_v50 = vor.u32 %v8277_v43, %v5697_v44 }
  0x6c   :  { %2602 = vmatpush.bf16.msrb.mxu0 %v7040_v19  ;;  %v8345_v47 = vld [vmem:[%s13415_s3 + $0x3a4] sm:$0xf]  ;;  %v5553_v52 = vld [vmem:[%s13415_s3 + $0x70] sm:$0xf0]  ;;  %v5828_v53 = vor.u32 %v8309_v45, %v5825_v46 }
  0x6d   :  { %2609 = vmatpush.bf16.msrb.mxu1 %v5604_v24  ;;  %v8241_v51 = vld [vmem:[%s13415_s3 + $0x64] sm:$0xf]  ;;  %v5972_v54 = vor.u32 %v8345_v47, %v5969_v48  ;;  %v5681_v56 = vld [vmem:[%s13415_s3 + $0x170] sm:$0xf0] }
  0x6e   :  { %2622 = vmatpush.bf16.msrb.mxu2 %v5732_v25  ;;  %v8273_v55 = vld [vmem:[%s13415_s3 + $0x164] sm:$0xf]  ;;  %v5809_v58 = vld [vmem:[%s13415_s3 + $0x270] sm:$0xf0]  ;;  %v5556_v62 = vor.u32 %v8241_v51, %v5553_v52 }
  0x6f   :  { %2635 = vmatpush.bf16.msrb.mxu3 %v5860_v29  ;;  %v8305_v57 = vld [vmem:[%s13415_s3 + $0x264] sm:$0xf]  ;;  %v5953_v60 = vld [vmem:[%s13415_s3 + $0x390] sm:$0xf0]  ;;  %v5684_v63 = vor.u32 %v8273_v55, %v5681_v56 }
  0x70   :  { %2647 = vmatpush.bf16.msra.mxu0 %v6004_v30  ;;  %v8341_v59 = vld [vmem:[%s13415_s3 + $0x384] sm:$0xf]  ;;  %v5537_v4 = vld [vmem:[%s13415_s3 + $0x50] sm:$0xf0]  ;;  %v5812_v5 = vor.u32 %v8305_v57, %v5809_v58 }
  0x71   :  { %2610 = vmatpush.bf16.msrb.mxu1 %v5588_v37  ;;  %v8237_v3 = vld [vmem:[%s13415_s3 + $0x44] sm:$0xf]  ;;  %v5956_v7 = vor.u32 %v8341_v59, %v5953_v60  ;;  %v5665_v9 = vld [vmem:[%s13415_s3 + $0x150] sm:$0xf0] }
  0x72   :  { %2623 = vmatpush.bf16.msrb.mxu2 %v5716_v38  ;;  %v8269_v8 = vld [vmem:[%s13415_s3 + $0x144] sm:$0xf]  ;;  %v5793_v11 = vld [vmem:[%s13415_s3 + $0x250] sm:$0xf0]  ;;  %v5540_v15 = vor.u32 %v8237_v3, %v5537_v4 }
  0x73   :  { %2636 = vmatpush.bf16.msrb.mxu3 %v5844_v41  ;;  %v8301_v10 = vld [vmem:[%s13415_s3 + $0x244] sm:$0xf]  ;;  %v5937_v13 = vld [vmem:[%s13415_s3 + $0x370] sm:$0xf0]  ;;  %v5668_v16 = vor.u32 %v8269_v8, %v5665_v9 }
  0x74   :  { %2648 = vmatpush.bf16.msra.mxu0 %v5988_v42  ;;  %v8337_v12 = vld [vmem:[%s13415_s3 + $0x364] sm:$0xf]  ;;  %v5521_v24 = vld [vmem:[%s13415_s3 + $0x30] sm:$0xf0]  ;;  %v5796_v25 = vor.u32 %v8301_v10, %v5793_v11 }
  0x75   :  { %2611 = vmatpush.bf16.msrb.mxu1 %v5572_v49  ;;  %v9775_v14 = vld [vmem:[#allocation1 + $0x24] sm:$0xff]  ;;  %v5940_v27 = vor.u32 %v8337_v12, %v5937_v13  ;;  %v5649_v29 = vld [vmem:[%s13415_s3 + $0x130] sm:$0xf0] }
  0x76   :  { %2624 = vmatpush.bf16.msrb.mxu2 %v5700_v50  ;;  %v8233_v19 = vld [vmem:[%s13415_s3 + $0x24] sm:$0xf]  ;;  %v5777_v31 = vld [vmem:[%s13415_s3 + $0x230] sm:$0xf0] }
  0x77   :  { %2637 = vmatpush.bf16.msrb.mxu3 %v5828_v53  ;;  %v8265_v28 = vld [vmem:[%s13415_s3 + $0x124] sm:$0xf]  ;;  %v5921_v33 = vld [vmem:[%s13415_s3 + $0x350] sm:$0xf0]  ;;  %v5524_v34 = vor.u32 %v8233_v19, %v5521_v24 }
  0x78   :  { %2649 = vmatpush.bf16.msra.mxu0 %v5972_v54  ;;  %v8297_v30 = vld [vmem:[%s13415_s3 + $0x224] sm:$0xf]  ;;  %v5652_v35 = vor.u32 %v8265_v28, %v5649_v29  ;;  %v5505_v37 = vld [vmem:[%s13415_s3 + $0x10] sm:$0xf0] }
  0x79   :  { %2612 = vmatpush.bf16.msrb.mxu1 %v5556_v62  ;;  %7069 = vmatmul.msk.bf16.vlgmr.msrb.gmra.mxu0 %vm2436_vm0, %v9775_v14  ;;  %v8333_v32 = vld [vmem:[%s13415_s3 + $0x344] sm:$0xf]  ;;  %v5780_v39 = vor.u32 %v8297_v30, %v5777_v31  ;;  %v5633_v41 = vld [vmem:[%s13415_s3 + $0x110] sm:$0xf0] }
  0x7a   :  { %2625 = vmatpush.bf16.msrb.mxu2 %v5684_v63  ;;  %v8229_v36 = vld [vmem:[%s13415_s3 + $0x4] sm:$0xf]  ;;  %v5924_v40 = vor.u32 %v8333_v32, %v5921_v33  ;;  %v5761_v43 = vld [vmem:[%s13415_s3 + $0x210] sm:$0xf0] }
  0x7b   :  { %2638 = vmatpush.bf16.msrb.mxu3 %v5812_v5  ;;  %v8261_v38 = vld [vmem:[%s13415_s3 + $0x104] sm:$0xf]  ;;  %v5905_v45 = vld [vmem:[%s13415_s3 + $0x330] sm:$0xf0]  ;;  %v5508_v50 = vor.u32 %v8229_v36, %v5505_v37 }
  0x7c   :  { %2650 = vmatpush.bf16.msra.mxu0 %v5956_v7  ;;  %v8293_v42 = vld [vmem:[%s13415_s3 + $0x204] sm:$0xf]  ;;  %v6129_v47 = vld [vmem:[%s13415_s3 + $0x4f0] sm:$0xf0]  ;;  %v5636_v51 = vor.u32 %v8261_v38, %v5633_v41 }
  0x7d   :  { %2613 = vmatpush.bf16.msrb.mxu1 %v5540_v15  ;;  %v8329_v44 = vld [vmem:[%s13415_s3 + $0x324] sm:$0xf]  ;;  %v6257_v49 = vld [vmem:[%s13415_s3 + $0x5f0] sm:$0xf0]  ;;  %v5764_v54 = vor.u32 %v8293_v42, %v5761_v43 }
  0x7e   :  { %2626 = vmatpush.bf16.msrb.mxu2 %v5668_v16  ;;  %v8385_v46 = vld [vmem:[%s13415_s3 + $0x4e4] sm:$0xf]  ;;  %v6385_v53 = vld [vmem:[%s13415_s3 + $0x6f0] sm:$0xf0]  ;;  %v5908_v55 = vor.u32 %v8329_v44, %v5905_v45 }
  0x7f   :  { %2639 = vmatpush.bf16.msrb.mxu3 %v5796_v25  ;;  %v8417_v48 = vld [vmem:[%s13415_s3 + $0x5e4] sm:$0xf]  ;;  %v6132_v57 = vor.u32 %v8385_v46, %v6129_v47  ;;  %v5889_v59 = vld [vmem:[%s13415_s3 + $0x310] sm:$0xf0] }
  0x80   :  { %2651 = vmatpush.bf16.msra.mxu0 %v5940_v27  ;;  %v8449_v52 = vld [vmem:[%s13415_s3 + $0x6e4] sm:$0xf]  ;;  %v6260_v58 = vor.u32 %v8417_v48, %v6257_v49  ;;  %v6113_v62 = vld [vmem:[%s13415_s3 + $0x4d0] sm:$0xf0] }
  0x81   :  { %2614 = vmatpush.bf16.msrb.mxu1 %v5524_v34  ;;  %v8325_v56 = vld [vmem:[%s13415_s3 + $0x304] sm:$0xf]  ;;  %v6388_v63 = vor.u32 %v8449_v52, %v6385_v53  ;;  %v6241_v4 = vld [vmem:[%s13415_s3 + $0x5d0] sm:$0xf0] }
  0x82   :  { %2627 = vmatpush.bf16.msrb.mxu2 %v5652_v35  ;;  %v8381_v60 = vld [vmem:[%s13415_s3 + $0x4c4] sm:$0xf]  ;;  %v6369_v7 = vld [vmem:[%s13415_s3 + $0x6d0] sm:$0xf0]  ;;  %v5892_v10 = vor.u32 %v8325_v56, %v5889_v59 }
  0x83   :  { %2640 = vmatpush.bf16.msrb.mxu3 %v5780_v39  ;;  %v8413_v3 = vld [vmem:[%s13415_s3 + $0x5c4] sm:$0xf]  ;;  %v6513_v9 = vld [vmem:[%s13415_s3 + $0x7f0] sm:$0xf0]  ;;  %v6116_v11 = vor.u32 %v8381_v60, %v6113_v62 }
  0x84   :  { %2652 = vmatpush.bf16.msra.mxu0 %v5924_v40  ;;  %v8445_v5 = vld [vmem:[%s13415_s3 + $0x6c4] sm:$0xf]  ;;  %v6244_v12 = vor.u32 %v8413_v3, %v6241_v4  ;;  %v6097_v15 = vld [vmem:[%s13415_s3 + $0x4b0] sm:$0xf0] }
  0x85   :  { %2615 = vmatpush.bf16.msrb.mxu1 %v5508_v50  ;;  %v8481_v8 = vld [vmem:[%s13415_s3 + $0x7e4] sm:$0xf]  ;;  %v6372_v16 = vor.u32 %v8445_v5, %v6369_v7  ;;  %v6225_v25 = vld [vmem:[%s13415_s3 + $0x5b0] sm:$0xf0] }
  0x86   :  { %2628 = vmatpush.bf16.msrb.mxu2 %v5636_v51  ;;  %v8377_v13 = vld [vmem:[%s13415_s3 + $0x4a4] sm:$0xf]  ;;  %v6516_v19 = vor.u32 %v8481_v8, %v6513_v9  ;;  %v6353_v28 = vld [vmem:[%s13415_s3 + $0x6b0] sm:$0xf0] }
  0x87   :  { %2641 = vmatpush.bf16.msrb.mxu3 %v5764_v54  ;;  %v8409_v24 = vld [vmem:[%s13415_s3 + $0x5a4] sm:$0xf]  ;;  %v6497_v30 = vld [vmem:[%s13415_s3 + $0x7d0] sm:$0xf0]  ;;  %v6100_v31 = vor.u32 %v8377_v13, %v6097_v15 }
  0x88   :  { %2653 = vmatpush.bf16.msra.mxu0 %v5908_v55  ;;  %v8441_v27 = vld [vmem:[%s13415_s3 + $0x6a4] sm:$0xf]  ;;  %2616 = vmatmul.bf16.vlgmr.msrb.gmra.mxu1 %v9312_v21  ;;  %v6228_v32 = vor.u32 %v8409_v24, %v6225_v25  ;;  %v6081_v34 = vld [vmem:[%s13415_s3 + $0x490] sm:$0xf0] }
  0x89   :  { %2660 = vmatpush.bf16.msra.mxu1 %v6132_v57  ;;  %2629 = vmatmul.bf16.vlgmr.msrb.gmra.mxu2 %v9323_v26  ;;  %v8477_v29 = vld [vmem:[%s13415_s3 + $0x7c4] sm:$0xf]  ;;  %v6356_v35 = vor.u32 %v8441_v27, %v6353_v28  ;;  %v6209_v38 = vld [vmem:[%s13415_s3 + $0x590] sm:$0xf0] }
  0x8a   :  { %2673 = vmatpush.bf16.msra.mxu2 %v6260_v58  ;;  %2642 = vmatmul.bf16.vlgmr.msrb.gmra.mxu3 %v9310_v20  ;;  %v8373_v33 = vld [vmem:[%s13415_s3 + $0x484] sm:$0xf]  ;;  %v6500_v36 = vor.u32 %v8477_v29, %v6497_v30  ;;  %v6337_v40 = vld [vmem:[%s13415_s3 + $0x690] sm:$0xf0] }
  0x8b   :  { %2686 = vmatpush.bf16.msra.mxu3 %v6388_v63  ;;  %v8405_v37 = vld [vmem:[%s13415_s3 + $0x584] sm:$0xf]  ;;  %v6481_v42 = vld [vmem:[%s13415_s3 + $0x7b0] sm:$0xf0]  ;;  %v6084_v43 = vor.u32 %v8373_v33, %v6081_v34 }
  0x8c   :  { %2654 = vmatpush.bf16.msra.mxu0 %v5892_v10  ;;  %v8437_v39 = vld [vmem:[%s13415_s3 + $0x684] sm:$0xf]  ;;  %v6212_v44 = vor.u32 %v8405_v37, %v6209_v38  ;;  %v6065_v46 = vld [vmem:[%s13415_s3 + $0x470] sm:$0xf0] }
  0x8d   :  { %2661 = vmatpush.bf16.msra.mxu1 %v6116_v11  ;;  %v8473_v41 = vld [vmem:[%s13415_s3 + $0x7a4] sm:$0xf]  ;;  %v6340_v47 = vor.u32 %v8437_v39, %v6337_v40  ;;  %v6193_v50 = vld [vmem:[%s13415_s3 + $0x570] sm:$0xf0] }
  0x8e   :  { %2674 = vmatpush.bf16.msra.mxu2 %v6244_v12  ;;  %v8369_v45 = vld [vmem:[%s13415_s3 + $0x464] sm:$0xf]  ;;  %v6484_v48 = vor.u32 %v8473_v41, %v6481_v42  ;;  %v6321_v52 = vld [vmem:[%s13415_s3 + $0x670] sm:$0xf0] }
  0x8f   :  { %2687 = vmatpush.bf16.msra.mxu3 %v6372_v16  ;;  %2655 = vmatmul.bf16.vlgmr.msra.gmra.mxu0 %v9314_v22  ;;  %v8401_v49 = vld [vmem:[%s13415_s3 + $0x564] sm:$0xf]  ;;  %v6465_v54 = vld [vmem:[%s13415_s3 + $0x790] sm:$0xf0]  ;;  %v6068_v55 = vor.u32 %v8369_v45, %v6065_v46 }
  0x90   :  { %2699 = vmatpush.bf16.msrb.mxu0 %v6516_v19  ;;  %v8433_v51 = vld [vmem:[%s13415_s3 + $0x664] sm:$0xf]  ;;  %v6196_v56 = vor.u32 %v8401_v49, %v6193_v50  ;;  %v6049_v58 = vld [vmem:[%s13415_s3 + $0x450] sm:$0xf0] }
  0x91   :  { %2662 = vmatpush.bf16.msra.mxu1 %v6100_v31  ;;  %v8469_v53 = vld [vmem:[%s13415_s3 + $0x784] sm:$0xf]  ;;  %v6324_v59 = vor.u32 %v8433_v51, %v6321_v52  ;;  %v6177_v63 = vld [vmem:[%s13415_s3 + $0x550] sm:$0xf0] }
  0x92   :  { %2675 = vmatpush.bf16.msra.mxu2 %v6228_v32  ;;  %v8365_v57 = vld [vmem:[%s13415_s3 + $0x444] sm:$0xf]  ;;  %v6468_v60 = vor.u32 %v8469_v53, %v6465_v54  ;;  %v6305_v4 = vld [vmem:[%s13415_s3 + $0x650] sm:$0xf0] }
  0x93   :  { %2688 = vmatpush.bf16.msra.mxu3 %v6356_v35  ;;  %v8397_v62 = vld [vmem:[%s13415_s3 + $0x544] sm:$0xf]  ;;  %v6449_v7 = vld [vmem:[%s13415_s3 + $0x770] sm:$0xf0]  ;;  %v6052_v8 = vor.u32 %v8365_v57, %v6049_v58 }
  0x94   :  { %2700 = vmatpush.bf16.msrb.mxu0 %v6500_v36  ;;  %v8429_v3 = vld [vmem:[%s13415_s3 + $0x644] sm:$0xf]  ;;  %v6180_v9 = vor.u32 %v8397_v62, %v6177_v63  ;;  %v6033_v11 = vld [vmem:[%s13415_s3 + $0x430] sm:$0xf0] }
  0x95   :  { %2663 = vmatpush.bf16.msra.mxu1 %v6084_v43  ;;  %v8465_v5 = vld [vmem:[%s13415_s3 + $0x764] sm:$0xf]  ;;  %v6308_v12 = vor.u32 %v8429_v3, %v6305_v4  ;;  %v6161_v16 = vld [vmem:[%s13415_s3 + $0x530] sm:$0xf0] }
  0x96   :  { %2676 = vmatpush.bf16.msra.mxu2 %v6212_v44  ;;  %v8361_v10 = vld [vmem:[%s13415_s3 + $0x424] sm:$0xf]  ;;  %v6452_v13 = vor.u32 %v8465_v5, %v6449_v7  ;;  %v6289_v24 = vld [vmem:[%s13415_s3 + $0x630] sm:$0xf0] }
  0x97   :  { %2689 = vmatpush.bf16.msra.mxu3 %v6340_v47  ;;  %v8393_v15 = vld [vmem:[%s13415_s3 + $0x524] sm:$0xf]  ;;  %v6433_v27 = vld [vmem:[%s13415_s3 + $0x750] sm:$0xf0]  ;;  %v6036_v28 = vor.u32 %v8361_v10, %v6033_v11 }
  0x98   :  { %2701 = vmatpush.bf16.msrb.mxu0 %v6484_v48  ;;  %v8425_v19 = vld [vmem:[%s13415_s3 + $0x624] sm:$0xf]  ;;  %v6164_v29 = vor.u32 %v8393_v15, %v6161_v16  ;;  %v6017_v31 = vld [vmem:[%s13415_s3 + $0x410] sm:$0xf0] }
  0x99   :  { %2664 = vmatpush.bf16.msra.mxu1 %v6068_v55  ;;  %v8461_v25 = vld [vmem:[%s13415_s3 + $0x744] sm:$0xf]  ;;  %v6292_v33 = vor.u32 %v8425_v19, %v6289_v24  ;;  %v6145_v35 = vld [vmem:[%s13415_s3 + $0x510] sm:$0xf0] }
  0x9a   :  { %2677 = vmatpush.bf16.msra.mxu2 %v6196_v56  ;;  %v8357_v30 = vld [vmem:[%s13415_s3 + $0x404] sm:$0xf]  ;;  %v6436_v34 = vor.u32 %v8461_v25, %v6433_v27  ;;  %v6273_v37 = vld [vmem:[%s13415_s3 + $0x610] sm:$0xf0] }
  0x9b   :  { %2690 = vmatpush.bf16.msra.mxu3 %v6324_v59  ;;  %v8389_v32 = vld [vmem:[%s13415_s3 + $0x504] sm:$0xf]  ;;  %v6417_v39 = vld [vmem:[%s13415_s3 + $0x730] sm:$0xf0]  ;;  %v6020_v44 = vor.u32 %v8357_v30, %v6017_v31 }
  0x9c   :  { %2702 = vmatpush.bf16.msrb.mxu0 %v6468_v60  ;;  %v8421_v36 = vld [vmem:[%s13415_s3 + $0x604] sm:$0xf]  ;;  %v6641_v41 = vld [vmem:[%s13415_s3 + $0x8f0] sm:$0xf0]  ;;  %v6148_v45 = vor.u32 %v8389_v32, %v6145_v35 }
  0x9d   :  { %2665 = vmatpush.bf16.msra.mxu1 %v6052_v8  ;;  %v8457_v38 = vld [vmem:[%s13415_s3 + $0x724] sm:$0xf]  ;;  %v6769_v43 = vld [vmem:[%s13415_s3 + $0x9f0] sm:$0xf0]  ;;  %v6276_v48 = vor.u32 %v8421_v36, %v6273_v37 }
  0x9e   :  { %2678 = vmatpush.bf16.msra.mxu2 %v6180_v9  ;;  %v8513_v40 = vld [vmem:[%s13415_s3 + $0x8e4] sm:$0xf]  ;;  %v6897_v47 = vld [vmem:[%s13415_s3 + $0xaf0] sm:$0xf0]  ;;  %v6420_v49 = vor.u32 %v8457_v38, %v6417_v39 }
  0x9f   :  { %2691 = vmatpush.bf16.msra.mxu3 %v6308_v12  ;;  %v8545_v42 = vld [vmem:[%s13415_s3 + $0x9e4] sm:$0xf]  ;;  %v6644_v51 = vor.u32 %v8513_v40, %v6641_v41  ;;  %v6401_v53 = vld [vmem:[%s13415_s3 + $0x710] sm:$0xf0] }
  0xa0   :  { %2703 = vmatpush.bf16.msrb.mxu0 %v6452_v13  ;;  %v8577_v46 = vld [vmem:[%s13415_s3 + $0xae4] sm:$0xf]  ;;  %v6772_v52 = vor.u32 %v8545_v42, %v6769_v43  ;;  %v6625_v55 = vld [vmem:[%s13415_s3 + $0x8d0] sm:$0xf0] }
  0xa1   :  { %2666 = vmatpush.bf16.msra.mxu1 %v6036_v28  ;;  %v8453_v50 = vld [vmem:[%s13415_s3 + $0x704] sm:$0xf]  ;;  %v6900_v56 = vor.u32 %v8577_v46, %v6897_v47  ;;  %v6753_v58 = vld [vmem:[%s13415_s3 + $0x9d0] sm:$0xf0]  ;;  %v10141_v46 = vld [vmem:[%s13417_s4] sm:$0xf] }
  0xa2   :  { %2679 = vmatpush.bf16.msra.mxu2 %v6164_v29  ;;  %v8509_v54 = vld [vmem:[%s13415_s3 + $0x8c4] sm:$0xf]  ;;  %v6881_v60 = vld [vmem:[%s13415_s3 + $0xad0] sm:$0xf0]  ;;  %v6404_v3 = vor.u32 %v8453_v50, %v6401_v53 }
  0xa3   :  { %2692 = vmatpush.bf16.msra.mxu3 %v6292_v33  ;;  %v8541_v57 = vld [vmem:[%s13415_s3 + $0x9c4] sm:$0xf]  ;;  %v7025_v63 = vld [vmem:[%s13415_s3 + $0xbf0] sm:$0xf0]  ;;  %v6628_v4 = vor.u32 %v8509_v54, %v6625_v55  ;;  %v439_v54 = vperm.slane %v10141_v46, 0 }
  0xa4   :  { %2704 = vmatpush.bf16.msrb.mxu0 %v6436_v34  ;;  %v8573_v59 = vld [vmem:[%s13415_s3 + $0xac4] sm:$0xf]  ;;  %v6756_v5 = vor.u32 %v8541_v57, %v6753_v58  ;;  %v6609_v8 = vld [vmem:[%s13415_s3 + $0x8b0] sm:$0xf0] }
  0xa5   :  { %2667 = vmatpush.bf16.msra.mxu1 %v6020_v44  ;;  %v8609_v62 = vld [vmem:[%s13415_s3 + $0xbe4] sm:$0xf]  ;;  %v6884_v9 = vor.u32 %v8573_v59, %v6881_v60  ;;  %v6737_v12 = vld [vmem:[%s13415_s3 + $0x9b0] sm:$0xf0] }
  0xa6   :  { %2680 = vmatpush.bf16.msra.mxu2 %v6148_v45  ;;  %v8505_v7 = vld [vmem:[%s13415_s3 + $0x8a4] sm:$0xf]  ;;  %v7028_v10 = vor.u32 %v8609_v62, %v7025_v63  ;;  %v6865_v15 = vld [vmem:[%s13415_s3 + $0xab0] sm:$0xf0] }
  0xa7   :  { %2693 = vmatpush.bf16.msra.mxu3 %v6276_v48  ;;  %v8537_v11 = vld [vmem:[%s13415_s3 + $0x9a4] sm:$0xf]  ;;  %v7009_v19 = vld [vmem:[%s13415_s3 + $0xbd0] sm:$0xf0]  ;;  %v6612_v24 = vor.u32 %v8505_v7, %v6609_v8 }
  0xa8   :  { %2705 = vmatpush.bf16.msrb.mxu0 %v6420_v49  ;;  %v8569_v13 = vld [vmem:[%s13415_s3 + $0xaa4] sm:$0xf]  ;;  %2668 = vmatmul.bf16.vlgmr.msra.gmra.mxu1 %v9405_v0  ;;  %v6740_v25 = vor.u32 %v8537_v11, %v6737_v12  ;;  %v6593_v28 = vld [vmem:[%s13415_s3 + $0x890] sm:$0xf0] }
  0xa9   :  { %2712 = vmatpush.bf16.msrb.mxu1 %v6644_v51  ;;  %2681 = vmatmul.bf16.vlgmr.msra.gmra.mxu2 %v9409_v2  ;;  %v8605_v16 = vld [vmem:[%s13415_s3 + $0xbc4] sm:$0xf]  ;;  %v6868_v29 = vor.u32 %v8569_v13, %v6865_v15  ;;  %v6721_v32 = vld [vmem:[%s13415_s3 + $0x990] sm:$0xf0] }
  0xaa   :  { %2725 = vmatpush.bf16.msrb.mxu2 %v6772_v52  ;;  %2694 = vmatmul.bf16.vlgmr.msra.gmra.mxu3 %v9403_v61  ;;  %v8501_v27 = vld [vmem:[%s13415_s3 + $0x884] sm:$0xf]  ;;  %v7012_v30 = vor.u32 %v8605_v16, %v7009_v19  ;;  %v6849_v34 = vld [vmem:[%s13415_s3 + $0xa90] sm:$0xf0] }
  0xab   :  { %2738 = vmatpush.bf16.msrb.mxu3 %v6900_v56  ;;  %v8533_v31 = vld [vmem:[%s13415_s3 + $0x984] sm:$0xf]  ;;  %v6993_v36 = vld [vmem:[%s13415_s3 + $0xbb0] sm:$0xf0]  ;;  %v6596_v37 = vor.u32 %v8501_v27, %v6593_v28 }
  0xac   :  { %2706 = vmatpush.bf16.msrb.mxu0 %v6404_v3  ;;  %v8565_v33 = vld [vmem:[%s13415_s3 + $0xa84] sm:$0xf]  ;;  %v6724_v38 = vor.u32 %v8533_v31, %v6721_v32  ;;  %v6577_v40 = vld [vmem:[%s13415_s3 + $0x870] sm:$0xf0] }
  0xad   :  { %2713 = vmatpush.bf16.msrb.mxu1 %v6628_v4  ;;  %v8601_v35 = vld [vmem:[%s13415_s3 + $0xba4] sm:$0xf]  ;;  %v6852_v42 = vor.u32 %v8565_v33, %v6849_v34  ;;  %v6705_v44 = vld [vmem:[%s13415_s3 + $0x970] sm:$0xf0] }
  0xae   :  { %2726 = vmatpush.bf16.msrb.mxu2 %v6756_v5  ;;  %v8497_v39 = vld [vmem:[%s13415_s3 + $0x864] sm:$0xf]  ;;  %v6996_v43 = vor.u32 %v8601_v35, %v6993_v36  ;;  %v6833_v47 = vld [vmem:[%s13415_s3 + $0xa70] sm:$0xf0] }
  0xaf   :  { %2739 = vmatpush.bf16.msrb.mxu3 %v6884_v9  ;;  %2707 = vmatmul.bf16.vlgmr.msrb.gmra.mxu0 %v9407_v1  ;;  %v8529_v41 = vld [vmem:[%s13415_s3 + $0x964] sm:$0xf]  ;;  %v6977_v49 = vld [vmem:[%s13415_s3 + $0xb90] sm:$0xf0]  ;;  %v6580_v50 = vor.u32 %v8497_v39, %v6577_v40 }
  0xb0   :  { %2751 = vmatpush.bf16.msra.mxu0 %v7028_v10  ;;  %v8561_v45 = vld [vmem:[%s13415_s3 + $0xa64] sm:$0xf]  ;;  %v6708_v51 = vor.u32 %v8529_v41, %v6705_v44  ;;  %v6561_v53 = vld [vmem:[%s13415_s3 + $0x850] sm:$0xf0] }
  0xb1   :  { %2714 = vmatpush.bf16.msrb.mxu1 %v6612_v24  ;;  %v8597_v48 = vld [vmem:[%s13415_s3 + $0xb84] sm:$0xf]  ;;  %v6836_v55 = vor.u32 %v8561_v45, %v6833_v47  ;;  %v6689_v58 = vld [vmem:[%s13415_s3 + $0x950] sm:$0xf0]  ;;  %v2461_v10 = vpop.f32.mrf.mxu1  ;;  %v5623_v45 = vld [vmem:[%s13415_s3 + $0xe8] sm:$0xf] }
  0xb2   :  { %2727 = vmatpush.bf16.msrb.mxu2 %v6740_v25  ;;  %v8493_v52 = vld [vmem:[%s13415_s3 + $0x844] sm:$0xf]  ;;  %v6980_v56 = vor.u32 %v8597_v48, %v6977_v49  ;;  %v6817_v60 = vld [vmem:[%s13415_s3 + $0xa50] sm:$0xf0]  ;;  %v2448_v3 = vpop.f32.mrf.mxu0  ;;  %v8260_v47 = vld [vmem:[%s13415_s3 + $0xf4] sm:$0xf0] }
  0xb3   :  { %2740 = vmatpush.bf16.msrb.mxu3 %v6868_v29  ;;  %v8525_v57 = vld [vmem:[%s13415_s3 + $0x944] sm:$0xf]  ;;  %v6961_v63 = vld [vmem:[%s13415_s3 + $0xb70] sm:$0xf0]  ;;  %v6564_v4 = vor.u32 %v8493_v52, %v6561_v53  ;;  %v2449_v9 = vadd.f32 %v2448_v3, %v439_v54  ;;  %v5751_v52 = vld [vmem:[%s13415_s3 + $0x1e8] sm:$0xf] }
  0xb4   :  { %2752 = vmatpush.bf16.msra.mxu0 %v7012_v30  ;;  %v8557_v59 = vld [vmem:[%s13415_s3 + $0xa44] sm:$0xf]  ;;  %v6692_v5 = vor.u32 %v8525_v57, %v6689_v58  ;;  %v6545_v8 = vld [vmem:[%s13415_s3 + $0x830] sm:$0xf0]  ;;  %v8292_v53 = vld [vmem:[%s13415_s3 + $0x1f4] sm:$0xf0] }
  0xb5   :  { %2715 = vmatpush.bf16.msrb.mxu1 %v6596_v37  ;;  %v8593_v62 = vld [vmem:[%s13415_s3 + $0xb64] sm:$0xf]  ;;  %v6820_v11 = vor.u32 %v8557_v59, %v6817_v60  ;;  %v6673_v15 = vld [vmem:[%s13415_s3 + $0x930] sm:$0xf0]  ;;  %v2462_v27 = vadd.f32 %v2461_v10, %v2449_v9  ;;  %v5624_v59 = vor.u32 %v8260_v47, %v5623_v45  ;;  %v5752_v3 = vor.u32 %v8292_v53, %v5751_v52  ;;  %v5879_v9 = vld [vmem:[%s13415_s3 + $0x2e8] sm:$0xf] }
  0xb6   :  { %2728 = vmatpush.bf16.msrb.mxu2 %v6724_v38  ;;  %v8489_v7 = vld [vmem:[%s13415_s3 + $0x824] sm:$0xf]  ;;  %v6964_v12 = vor.u32 %v8593_v62, %v6961_v63  ;;  %v6801_v19 = vld [vmem:[%s13415_s3 + $0xa30] sm:$0xf0]  ;;  %v8324_v10 = vld [vmem:[%s13415_s3 + $0x2f4] sm:$0xf0] }
  0xb7   :  { %2741 = vmatpush.bf16.msrb.mxu3 %v6852_v42  ;;  %v8521_v13 = vld [vmem:[%s13415_s3 + $0x924] sm:$0xf]  ;;  %v6945_v25 = vld [vmem:[%s13415_s3 + $0xb50] sm:$0xf0]  ;;  %v6548_v28 = vor.u32 %v8489_v7, %v6545_v8  ;;  %v2474_v33 = vpop.f32.mrf.mxu2  ;;  %v5735_v7 = vld [vmem:[%s13415_s3 + $0x1c8] sm:$0xf] }
  0xb8   :  { %2753 = vmatpush.bf16.msra.mxu0 %v6996_v43  ;;  %v8553_v16 = vld [vmem:[%s13415_s3 + $0xa24] sm:$0xf]  ;;  %v6676_v29 = vor.u32 %v8521_v13, %v6673_v15  ;;  %v6529_v31 = vld [vmem:[%s13415_s3 + $0x810] sm:$0xf0]  ;;  %v2475_v39 = vadd.f32 %v2474_v33, %v2462_v27  ;;  %v8288_v8 = vld [vmem:[%s13415_s3 + $0x1d4] sm:$0xf0]  ;;  %v5880_v27 = vor.u32 %v8324_v10, %v5879_v9 }
  0xb9   :  { %2716 = vmatpush.bf16.msrb.mxu1 %v6580_v50  ;;  %v8589_v24 = vld [vmem:[%s13415_s3 + $0xb44] sm:$0xf]  ;;  %v6804_v34 = vor.u32 %v8553_v16, %v6801_v19  ;;  %v6657_v36 = vld [vmem:[%s13415_s3 + $0x910] sm:$0xf0]  ;;  %v2487_v40 = vpop.f32.mrf.mxu3  ;;  %v2463_v54 = vpop.f32.mrf.mxu1  ;;  %v6007_v13 = vld [vmem:[%s13415_s3 + $0x3e8] sm:$0xf] }
  0xba   :  { %2729 = vmatpush.bf16.msrb.mxu2 %v6708_v51  ;;  %v8485_v30 = vld [vmem:[%s13415_s3 + $0x804] sm:$0xf]  ;;  %v6948_v35 = vor.u32 %v8589_v24, %v6945_v25  ;;  %v6785_v38 = vld [vmem:[%s13415_s3 + $0xa10] sm:$0xf0]  ;;  %v10237_v48 = vadd.f32 %v2487_v40, %v2475_v39  ;;  %v2450_v49 = vpop.f32.mrf.mxu0  ;;  %v8356_v15 = vld [vmem:[%s13415_s3 + $0x3f4] sm:$0xf0]  ;;  %v5736_v25 = vor.u32 %v8288_v8, %v5735_v7 }
  0xbb   :  { %2742 = vmatpush.bf16.msrb.mxu3 %v6836_v55  ;;  %v8517_v32 = vld [vmem:[%s13415_s3 + $0x904] sm:$0xf]  ;;  %v6929_v42 = vld [vmem:[%s13415_s3 + $0xb30] sm:$0xf0]  ;;  %v6532_v50 = vor.u32 %v8485_v30, %v6529_v31  ;;  %v5719_v30 = vld [vmem:[%s13415_s3 + $0x1a8] sm:$0xf]  ;;  %v6008_v31 = vor.u32 %v8356_v15, %v6007_v13 }
  0xbc   :  { %2754 = vmatpush.bf16.msra.mxu0 %v6980_v56  ;;  %v8549_v37 = vld [vmem:[%s13415_s3 + $0xa04] sm:$0xf]  ;;  %v7057_v44 = vld [vmem:[%s13415_s3 + $0xc30] sm:$0xf0]  ;;  %v6660_v51 = vor.u32 %v8517_v32, %v6657_v36  ;;  %v5863_v32 = vld [vmem:[%s13415_s3 + $0x2c8] sm:$0xf] }
  0xbd   :  { %2717 = vmatpush.bf16.msrb.mxu1 %v6564_v4  ;;  %v8585_v41 = vld [vmem:[%s13415_s3 + $0xb24] sm:$0xf]  ;;  %v6788_v55 = vor.u32 %v8549_v37, %v6785_v38  ;;  %v6913_v60 = vld [vmem:[%s13415_s3 + $0xb10] sm:$0xf0]  ;;  %v5607_v4 = vld [vmem:[%s13415_s3 + $0xc8] sm:$0xf] }
  0xbe   :  { %2730 = vmatpush.bf16.msrb.mxu2 %v6692_v5  ;;  %v8617_v43 = vld [vmem:[%s13415_s3 + $0xc24] sm:$0xf]  ;;  %v6932_v56 = vor.u32 %v8585_v41, %v6929_v42  ;;  %v7041_v63 = vld [vmem:[%s13415_s3 + $0xc10] sm:$0xf0]  ;;  %v8256_v5 = vld [vmem:[%s13415_s3 + $0xd4] sm:$0xf0] }
  0xbf   :  { %2743 = vmatpush.bf16.msrb.mxu3 %v6820_v11  ;;  %v8581_v57 = vld [vmem:[%s13415_s3 + $0xb04] sm:$0xf]  ;;  %v7060_v58 = vor.u32 %v8617_v43, %v7057_v44  ;;  %v2476_v11 = vpop.f32.mrf.mxu2  ;;  %v5608_v24 = vor.u32 %v8256_v5, %v5607_v4  ;;  %v8320_v33 = vld [vmem:[%s13415_s3 + $0x2d4] sm:$0xf0]  ;;  %v5575_v37 = vld [vmem:[%s13415_s3 + $0x88] sm:$0xf] }
  0xc0   :  { %2755 = vmatpush.bf16.msra.mxu0 %v6964_v12  ;;  %v8613_v62 = vld [vmem:[%s13415_s3 + $0xc04] sm:$0xf]  ;;  %v6916_v12 = vor.u32 %v8581_v57, %v6913_v60  ;;  %v5864_v36 = vor.u32 %v8320_v33, %v5863_v32  ;;  %v8248_v38 = vld [vmem:[%s13415_s3 + $0x94] sm:$0xf0]  ;;  %v5703_v39 = vld [vmem:[%s13415_s3 + $0x188] sm:$0xf] }
  0xc1   :  { %2718 = vmatpush.bf16.msrb.mxu1 %v6548_v28  ;;  %v2489_v16 = vpop.f32.mrf.mxu3  ;;  %v7044_v19 = vor.u32 %v8613_v62, %v7041_v63  ;;  %v5591_v28 = vld [vmem:[%s13415_s3 + $0xa8] sm:$0xf]  ;;  %v8280_v41 = vld [vmem:[%s13415_s3 + $0x194] sm:$0xf0]  ;;  %v5576_v47 = vor.u32 %v8248_v38, %v5575_v37 }
  0xc2   :  { %2731 = vmatpush.bf16.msrb.mxu2 %v6676_v29  ;;  %v8252_v29 = vld [vmem:[%s13415_s3 + $0xb4] sm:$0xf0]  ;;  %v5847_v42 = vld [vmem:[%s13415_s3 + $0x2a8] sm:$0xf] }
  0xc3   :  { %2744 = vmatpush.bf16.msrb.mxu3 %v6804_v34  ;;  %v5592_v34 = vor.u32 %v8252_v29, %v5591_v28  ;;  %v8316_v43 = vld [vmem:[%s13415_s3 + $0x2b4] sm:$0xf0]  ;;  %v5975_v44 = vld [vmem:[%s13415_s3 + $0x3a8] sm:$0xf]  ;;  %v2500_v45 = vpop.f32.mrf.mxu0 }
  0xc4   :  { %2756 = vmatpush.bf16.msra.mxu0 %v6948_v35  ;;  %v2501_v49 = vadd.f32 %v2500_v45, %v10237_v48  ;;  %v5848_v52 = vor.u32 %v8316_v43, %v5847_v42  ;;  %v5559_v53 = vld [vmem:[%s13415_s3 + $0x68] sm:$0xf]  ;;  %v8244_v54 = vld [vmem:[%s13415_s3 + $0x74] sm:$0xf0] }
  0xc5   :  { %2719 = vmatpush.bf16.msrb.mxu1 %v6532_v50  ;;  %v2513_v50 = vpop.f32.mrf.mxu1  ;;  %v8276_v48 = vld [vmem:[%s13415_s3 + $0x174] sm:$0xf0]  ;;  %v5831_v57 = vld [vmem:[%s13415_s3 + $0x288] sm:$0xf]  ;;  %v5560_v63 = vor.u32 %v8244_v54, %v5559_v53 }
  0xc6   :  { %2732 = vmatpush.bf16.msrb.mxu2 %v6660_v51  ;;  %v5704_v51 = vor.u32 %v8280_v41, %v5703_v39  ;;  %v5959_v60 = vld [vmem:[%s13415_s3 + $0x388] sm:$0xf]  ;;  %v8344_v62 = vld [vmem:[%s13415_s3 + $0x394] sm:$0xf0] }
  0xc7   :  { %2745 = vmatpush.bf16.msrb.mxu3 %v6788_v55  ;;  %v5687_v55 = vld [vmem:[%s13415_s3 + $0x168] sm:$0xf]  ;;  %v8240_v8 = vld [vmem:[%s13415_s3 + $0x54] sm:$0xf0] }
  0xc8   :  { %2757 = vmatpush.bf16.msra.mxu0 %v6932_v56  ;;  %2720 = vmatmul.bf16.vlgmr.msrb.gmra.mxu1 %v9640_v6  ;;  %v8284_v6 = vld [vmem:[%s13415_s3 + $0x1b4] sm:$0xf0]  ;;  %v5688_v4 = vor.u32 %v8276_v48, %v5687_v55  ;;  %v5543_v7 = vld [vmem:[%s13415_s3 + $0x48] sm:$0xf] }
  0xc9   :  { %2770 = vmatpush.bf16.msra.mxu1 %v7060_v58  ;;  %2733 = vmatmul.bf16.vlgmr.msrb.gmra.mxu2 %v9671_v18  ;;  %v5991_v18 = vld [vmem:[%s13415_s3 + $0x3c8] sm:$0xf]  ;;  %v5720_v35 = vor.u32 %v8284_v6, %v5719_v30  ;;  %v8312_v58 = vld [vmem:[%s13415_s3 + $0x294] sm:$0xf0]  ;;  %v5544_v28 = vor.u32 %v8240_v8, %v5543_v7 }
  0xca   :  { %2777 = vmatpush.bf16.msra.mxu2 %v5624_v59  ;;  %2746 = vmatmul.bf16.vlgmr.msrb.gmra.mxu3 %v9669_v17  ;;  %v8352_v17 = vld [vmem:[%s13415_s3 + $0x3d4] sm:$0xf0]  ;;  %v2514_v59 = vadd.f32 %v2513_v50, %v2501_v49  ;;  %v5832_v5 = vor.u32 %v8312_v58, %v5831_v57  ;;  %v5671_v9 = vld [vmem:[%s13415_s3 + $0x148] sm:$0xf] }
  0xcb   :  { %2790 = vmatpush.bf16.msra.mxu3 %v5752_v3  ;;  %v5992_v40 = vor.u32 %v8352_v17, %v5991_v18  ;;  %v2526_v3 = vpop.f32.mrf.mxu2  ;;  %v8272_v13 = vld [vmem:[%s13415_s3 + $0x154] sm:$0xf0]  ;;  %v5815_v15 = vld [vmem:[%s13415_s3 + $0x268] sm:$0xf] }
  0xcc   :  { %2758 = vmatpush.bf16.msra.mxu0 %v6916_v12  ;;  %v2527_v10 = vadd.f32 %v2526_v3, %v2514_v59  ;;  %v5960_v12 = vor.u32 %v8344_v62, %v5959_v60  ;;  %v8308_v16 = vld [vmem:[%s13415_s3 + $0x274] sm:$0xf0]  ;;  %v5672_v30 = vor.u32 %v8272_v13, %v5671_v9  ;;  %v5527_v6 = vld [vmem:[%s13415_s3 + $0x28] sm:$0xf] }
  0xcd   :  { %2771 = vmatpush.bf16.msra.mxu1 %v7044_v19  ;;  %v2539_v11 = vpop.f32.mrf.mxu3  ;;  %v5943_v19 = vld [vmem:[%s13415_s3 + $0x368] sm:$0xf]  ;;  %v2515_v29 = vpop.f32.mrf.mxu1  ;;  %v8236_v32 = vld [vmem:[%s13415_s3 + $0x34] sm:$0xf0] }
  0xce   :  { %2778 = vmatpush.bf16.msra.mxu2 %v5608_v24  ;;  %v8340_v24 = vld [vmem:[%s13415_s3 + $0x374] sm:$0xf0]  ;;  %v5655_v33 = vld [vmem:[%s13415_s3 + $0x128] sm:$0xf]  ;;  %v5528_v38 = vor.u32 %v8236_v32, %v5527_v6 }
  0xcf   :  { %2791 = vmatpush.bf16.msra.mxu3 %v5736_v25  ;;  %2759 = vmatmul.bf16.vlgmr.msra.gmra.mxu0 %v9673_v23  ;;  %v8348_v23 = vld [vmem:[%s13415_s3 + $0x3b4] sm:$0xf0]  ;;  %v10382_v25 = vadd.f32 %v2539_v11, %v2527_v10  ;;  %v5944_v18 = vor.u32 %v8340_v24, %v5943_v19  ;;  %v5511_v39 = vld [vmem:[%s13415_s3 + $0x8] sm:$0xf] }
  0xd0   :  { %2803 = vmatpush.bf16.msrb.mxu0 %v5880_v27  ;;  %v5976_v56 = vor.u32 %v8348_v23, %v5975_v44  ;;  %v2502_v27 = vpop.f32.mrf.mxu0  ;;  %v8268_v17 = vld [vmem:[%s13415_s3 + $0x134] sm:$0xf0]  ;;  %v5639_v43 = vld [vmem:[%s13415_s3 + $0x108] sm:$0xf] }
  0xd1   :  { %2816 = vmatpush.bf16.msrb.mxu1 %v6008_v31  ;;  %v5816_v31 = vor.u32 %v8308_v16, %v5815_v15  ;;  %v8336_v37 = vld [vmem:[%s13415_s3 + $0x354] sm:$0xf0]  ;;  %v5656_v41 = vor.u32 %v8268_v17, %v5655_v33  ;;  %v5911_v50 = vld [vmem:[%s13415_s3 + $0x328] sm:$0xf] }
  0xd2   :  { %2779 = vmatpush.bf16.msra.mxu2 %v5592_v34  ;;  %v5799_v34 = vld [vmem:[%s13415_s3 + $0x248] sm:$0xf]  ;;  %v8264_v44 = vld [vmem:[%s13415_s3 + $0x114] sm:$0xf0] }
  0xd3   :  { %2792 = vmatpush.bf16.msra.mxu3 %v5720_v35  ;;  %v8304_v35 = vld [vmem:[%s13415_s3 + $0x254] sm:$0xf0]  ;;  %v6263_v55 = vld [vmem:[%s13415_s3 + $0x5e8] sm:$0xf]  ;;  %v5640_v48 = vor.u32 %v8264_v44, %v5639_v43 }
  0xd4   :  { %2804 = vmatpush.bf16.msrb.mxu0 %v5864_v36  ;;  %v5927_v36 = vld [vmem:[%s13415_s3 + $0x348] sm:$0xf]  ;;  %v5800_v42 = vor.u32 %v8304_v35, %v5799_v34  ;;  %v8300_v49 = vld [vmem:[%s13415_s3 + $0x234] sm:$0xf0] }
  0xd5   :  { %2817 = vmatpush.bf16.msrb.mxu1 %v5992_v40  ;;  %v2528_v40 = vpop.f32.mrf.mxu2  ;;  %v2541_v23 = vpop.f32.mrf.mxu3  ;;  %v5928_v45 = vor.u32 %v8336_v37, %v5927_v36  ;;  %v8388_v53 = vld [vmem:[%s13415_s3 + $0x4f4] sm:$0xf0]  ;;  %v5767_v58 = vld [vmem:[%s13415_s3 + $0x208] sm:$0xf] }
  0xd6   :  { %2780 = vmatpush.bf16.msra.mxu2 %v5576_v47  ;;  %v5783_v47 = vld [vmem:[%s13415_s3 + $0x228] sm:$0xf]  ;;  %v8296_v62 = vld [vmem:[%s13415_s3 + $0x214] sm:$0xf0] }
  0xd7   :  { %2793 = vmatpush.bf16.msra.mxu3 %v5704_v51  ;;  %v8332_v51 = vld [vmem:[%s13415_s3 + $0x334] sm:$0xf0]  ;;  %v5784_v57 = vor.u32 %v8300_v49, %v5783_v47  ;;  %v6247_v8 = vld [vmem:[%s13415_s3 + $0x5c8] sm:$0xf] }
  0xd8   :  { %2805 = vmatpush.bf16.msrb.mxu0 %v5848_v52  ;;  %7070 = vmatmul.msk.bf16.vlgmr.msra.gmra.mxu1 %vm2436_vm0, %v9775_v14  ;;  %v8232_v14 = vld [vmem:[%s13415_s3 + $0x14] sm:$0xf0]  ;;  %v6135_v52 = vld [vmem:[%s13415_s3 + $0x4e8] sm:$0xf]  ;;  %v5912_v59 = vor.u32 %v8332_v51, %v5911_v50 }
  0xd9   :  { %2818 = vmatpush.bf16.msrb.mxu1 %v5976_v56  ;;  %v5512_v54 = vor.u32 %v8232_v14, %v5511_v39  ;;  %v8420_v56 = vld [vmem:[%s13415_s3 + $0x5f4] sm:$0xf0]  ;;  %v6136_v60 = vor.u32 %v8388_v53, %v6135_v52  ;;  %v6391_v10 = vld [vmem:[%s13415_s3 + $0x6e8] sm:$0xf] }
  0xda   :  { %2781 = vmatpush.bf16.msra.mxu2 %v5560_v63  ;;  %v5895_v63 = vld [vmem:[%s13415_s3 + $0x308] sm:$0xf]  ;;  %v8328_v3 = vld [vmem:[%s13415_s3 + $0x314] sm:$0xf0] }
  0xdb   :  { %2794 = vmatpush.bf16.msra.mxu3 %v5688_v4  ;;  %v6264_v4 = vor.u32 %v8420_v56, %v6263_v55  ;;  %v8384_v7 = vld [vmem:[%s13415_s3 + $0x4d4] sm:$0xf0]  ;;  %v6519_v13 = vld [vmem:[%s13415_s3 + $0x7e8] sm:$0xf]  ;;  %v5896_v16 = vor.u32 %v8328_v3, %v5895_v63 }
  0xdc   :  { %2806 = vmatpush.bf16.msrb.mxu0 %v5832_v5  ;;  %v6119_v5 = vld [vmem:[%s13415_s3 + $0x4c8] sm:$0xf]  ;;  %v8416_v9 = vld [vmem:[%s13415_s3 + $0x5d4] sm:$0xf0] }
  0xdd   :  { %2819 = vmatpush.bf16.msrb.mxu1 %v5960_v12  ;;  %v8452_v11 = vld [vmem:[%s13415_s3 + $0x6f4] sm:$0xf0]  ;;  %v5768_v12 = vor.u32 %v8296_v62, %v5767_v58  ;;  %v6120_v19 = vor.u32 %v8384_v7, %v6119_v5  ;;  %v6248_v24 = vor.u32 %v8416_v9, %v6247_v8  ;;  %v6375_v32 = vld [vmem:[%s13415_s3 + $0x6c8] sm:$0xf] }
  0xde   :  { %2782 = vmatpush.bf16.msra.mxu2 %v5544_v28  ;;  %v8484_v15 = vld [vmem:[%s13415_s3 + $0x7f4] sm:$0xf0]  ;;  %v6392_v27 = vor.u32 %v8452_v11, %v6391_v10  ;;  %v6103_v28 = vld [vmem:[%s13415_s3 + $0x4a8] sm:$0xf] }
  0xdf   :  { %2795 = vmatpush.bf16.msra.mxu3 %v5672_v30  ;;  %v8380_v29 = vld [vmem:[%s13415_s3 + $0x4b4] sm:$0xf0]  ;;  %v6231_v30 = vld [vmem:[%s13415_s3 + $0x5a8] sm:$0xf] }
  0xe0   :  { %2807 = vmatpush.bf16.msrb.mxu0 %v5816_v31  ;;  %v6520_v31 = vor.u32 %v8484_v15, %v6519_v13  ;;  %v8412_v6 = vld [vmem:[%s13415_s3 + $0x5b4] sm:$0xf0]  ;;  %v6104_v34 = vor.u32 %v8380_v29, %v6103_v28  ;;  %v6087_v37 = vld [vmem:[%s13415_s3 + $0x488] sm:$0xf] }
  0xe1   :  { %2820 = vmatpush.bf16.msrb.mxu1 %v5944_v18  ;;  %v8448_v33 = vld [vmem:[%s13415_s3 + $0x6d4] sm:$0xf0]  ;;  %v6503_v18 = vld [vmem:[%s13415_s3 + $0x7c8] sm:$0xf]  ;;  %v6232_v35 = vor.u32 %v8412_v6, %v6231_v30 }
  0xe2   :  { %2783 = vmatpush.bf16.msra.mxu2 %v5528_v38  ;;  %v8480_v17 = vld [vmem:[%s13415_s3 + $0x7d4] sm:$0xf0]  ;;  %v6376_v36 = vor.u32 %v8448_v33, %v6375_v32  ;;  %v6215_v39 = vld [vmem:[%s13415_s3 + $0x588] sm:$0xf] }
  0xe3   :  { %2796 = vmatpush.bf16.msra.mxu3 %v5656_v41  ;;  %v8376_v38 = vld [vmem:[%s13415_s3 + $0x494] sm:$0xf0]  ;;  %v6504_v40 = vor.u32 %v8480_v17, %v6503_v18  ;;  %v6359_v14 = vld [vmem:[%s13415_s3 + $0x6a8] sm:$0xf] }
  0xe4   :  { %2808 = vmatpush.bf16.msrb.mxu0 %v5800_v42  ;;  %v8408_v42 = vld [vmem:[%s13415_s3 + $0x594] sm:$0xf0]  ;;  %v6088_v49 = vor.u32 %v8376_v38, %v6087_v37  ;;  %v6471_v58 = vld [vmem:[%s13415_s3 + $0x788] sm:$0xf] }
  0xe5   :  { %2821 = vmatpush.bf16.msrb.mxu1 %v5928_v45  ;;  %v8444_v43 = vld [vmem:[%s13415_s3 + $0x6b4] sm:$0xf0]  ;;  %v2565_v23 = vpop.f32.mrf.mxu1  ;;  %v6487_v45 = vld [vmem:[%s13415_s3 + $0x7a8] sm:$0xf]  ;;  %v6216_v50 = vor.u32 %v8408_v42, %v6215_v39 }
  0xe6   :  { %2784 = vmatpush.bf16.msra.mxu2 %v5512_v54  ;;  %v2552_v41 = vpop.f32.mrf.mxu0  ;;  %v8476_v47 = vld [vmem:[%s13415_s3 + $0x7b4] sm:$0xf0]  ;;  %v6360_v52 = vor.u32 %v8444_v43, %v6359_v14  ;;  %v6199_v54 = vld [vmem:[%s13415_s3 + $0x568] sm:$0xf] }
  0xe7   :  { %2797 = vmatpush.bf16.msra.mxu3 %v5640_v48  ;;  %v2553_v44 = vadd.f32 %v2552_v41, %v10382_v25  ;;  %v6071_v25 = vld [vmem:[%s13415_s3 + $0x468] sm:$0xf]  ;;  %v8372_v53 = vld [vmem:[%s13415_s3 + $0x474] sm:$0xf0]  ;;  %v6488_v55 = vor.u32 %v8476_v47, %v6487_v45 }
  0xe8   :  { %2809 = vmatpush.bf16.msrb.mxu0 %v5784_v57  ;;  %v8404_v56 = vld [vmem:[%s13415_s3 + $0x574] sm:$0xf0]  ;;  %v6343_v48 = vld [vmem:[%s13415_s3 + $0x688] sm:$0xf] }
  0xe9   :  { %2822 = vmatpush.bf16.msrb.mxu1 %v5912_v59  ;;  %2785 = vmatmul.bf16.vlgmr.msra.gmra.mxu2 %v9312_v21  ;;  %v2566_v51 = vadd.f32 %v2565_v23, %v2553_v44  ;;  %v8440_v57 = vld [vmem:[%s13415_s3 + $0x694] sm:$0xf0]  ;;  %v6200_v62 = vor.u32 %v8404_v56, %v6199_v54  ;;  %v6183_v7 = vld [vmem:[%s13415_s3 + $0x548] sm:$0xf] }
  0xea   :  { %2829 = vmatpush.bf16.msrb.mxu2 %v6136_v60  ;;  %2798 = vmatmul.bf16.vlgmr.msra.gmra.mxu3 %v9323_v26  ;;  %v8472_v59 = vld [vmem:[%s13415_s3 + $0x794] sm:$0xf0]  ;;  %v6072_v60 = vor.u32 %v8372_v53, %v6071_v25  ;;  %v6344_v3 = vor.u32 %v8440_v57, %v6343_v48  ;;  %v6327_v13 = vld [vmem:[%s13415_s3 + $0x668] sm:$0xf] }
  0xeb   :  { %2842 = vmatpush.bf16.msrb.mxu3 %v6264_v4  ;;  %v6055_v4 = vld [vmem:[%s13415_s3 + $0x448] sm:$0xf]  ;;  %v8368_v5 = vld [vmem:[%s13415_s3 + $0x454] sm:$0xf0]  ;;  %v6472_v9 = vor.u32 %v8472_v59, %v6471_v58 }
  0xec   :  { %2810 = vmatpush.bf16.msrb.mxu0 %v5768_v12  ;;  %v8400_v12 = vld [vmem:[%s13415_s3 + $0x554] sm:$0xf0]  ;;  %v6056_v28 = vor.u32 %v8368_v5, %v6055_v4  ;;  %v6167_v32 = vld [vmem:[%s13415_s3 + $0x528] sm:$0xf] }
  0xed   :  { %2823 = vmatpush.bf16.msrb.mxu1 %v5896_v16  ;;  %v2591_v11 = vpop.f32.mrf.mxu3  ;;  %v8436_v15 = vld [vmem:[%s13415_s3 + $0x674] sm:$0xf0]  ;;  %v6455_v16 = vld [vmem:[%s13415_s3 + $0x768] sm:$0xf]  ;;  %v6184_v29 = vor.u32 %v8400_v12, %v6183_v7 }
  0xee   :  { %2830 = vmatpush.bf16.msrb.mxu2 %v6120_v19  ;;  %v2578_v63 = vpop.f32.mrf.mxu2  ;;  %v2554_v10 = vpop.f32.mrf.mxu0  ;;  %v8468_v19 = vld [vmem:[%s13415_s3 + $0x774] sm:$0xf0]  ;;  %v6328_v30 = vor.u32 %v8436_v15, %v6327_v13  ;;  %v6311_v17 = vld [vmem:[%s13415_s3 + $0x648] sm:$0xf] }
  0xef   :  { %2843 = vmatpush.bf16.msrb.mxu3 %v6248_v24  ;;  %2811 = vmatmul.bf16.vlgmr.msrb.gmra.mxu0 %v9310_v20  ;;  %v2579_v8 = vadd.f32 %v2578_v63, %v2566_v51  ;;  %v2567_v24 = vpop.f32.mrf.mxu1  ;;  %v8364_v6 = vld [vmem:[%s13415_s3 + $0x434] sm:$0xf0]  ;;  %v6456_v33 = vor.u32 %v8468_v19, %v6455_v16  ;;  %v6023_v38 = vld [vmem:[%s13415_s3 + $0x408] sm:$0xf] }
  0xf0   :  { %2855 = vmatpush.bf16.msra.mxu0 %v6392_v27  ;;  %2824 = vmatmul.bf16.vlgmr.msrb.gmra.mxu1 %v9314_v22  ;;  %v8396_v18 = vld [vmem:[%s13415_s3 + $0x534] sm:$0xf0]  ;;  %v6151_v42 = vld [vmem:[%s13415_s3 + $0x508] sm:$0xf] }
  0xf1   :  { %2868 = vmatpush.bf16.msra.mxu1 %v6520_v31  ;;  %v2592_v27 = vadd.f32 %v2591_v11, %v2579_v8  ;;  %v6039_v31 = vld [vmem:[%s13415_s3 + $0x428] sm:$0xf]  ;;  %v6168_v39 = vor.u32 %v8396_v18, %v6167_v32  ;;  %v8360_v41 = vld [vmem:[%s13415_s3 + $0x414] sm:$0xf0] }
  0xf2   :  { %2831 = vmatpush.bf16.msrb.mxu2 %v6104_v34  ;;  %v8432_v34 = vld [vmem:[%s13415_s3 + $0x654] sm:$0xf0]  ;;  %v6040_v37 = vor.u32 %v8364_v6, %v6039_v31  ;;  %v6295_v23 = vld [vmem:[%s13415_s3 + $0x628] sm:$0xf]  ;;  %v6024_v54 = vor.u32 %v8360_v41, %v6023_v38  ;;  %v440_v41 = vperm.slane %v10141_v46, 1 }
  0xf3   :  { %2844 = vmatpush.bf16.msrb.mxu3 %v6232_v35  ;;  %v6439_v35 = vld [vmem:[%s13415_s3 + $0x748] sm:$0xf]  ;;  %v8392_v14 = vld [vmem:[%s13415_s3 + $0x514] sm:$0xf0] }
  0xf4   :  { %2856 = vmatpush.bf16.msra.mxu0 %v6376_v36  ;;  %v8464_v36 = vld [vmem:[%s13415_s3 + $0x754] sm:$0xf0]  ;;  %v6423_v47 = vld [vmem:[%s13415_s3 + $0x728] sm:$0xf]  ;;  %v6152_v48 = vor.u32 %v8392_v14, %v6151_v42 }
  0xf5   :  { %2869 = vmatpush.bf16.msra.mxu1 %v6504_v40  ;;  %v6312_v40 = vor.u32 %v8432_v34, %v6311_v17  ;;  %v6440_v44 = vor.u32 %v8464_v36, %v6439_v35  ;;  %v8428_v45 = vld [vmem:[%s13415_s3 + $0x634] sm:$0xf0]  ;;  %v6279_v58 = vld [vmem:[%s13415_s3 + $0x608] sm:$0xf] }
  0xf6   :  { %2832 = vmatpush.bf16.msrb.mxu2 %v6088_v49  ;;  %v2580_v43 = vpop.f32.mrf.mxu2  ;;  %v2593_v49 = vpop.f32.mrf.mxu3  ;;  %v8460_v51 = vld [vmem:[%s13415_s3 + $0x734] sm:$0xf0]  ;;  %v6296_v57 = vor.u32 %v8428_v45, %v6295_v23  ;;  %v6407_v63 = vld [vmem:[%s13415_s3 + $0x708] sm:$0xf] }
  0xf7   :  { %2845 = vmatpush.bf16.msrb.mxu3 %v6216_v50  ;;  %v2604_v50 = vpop.f32.mrf.mxu0  ;;  %v8516_v25 = vld [vmem:[%s13415_s3 + $0x8f4] sm:$0xf0]  ;;  %v6424_v59 = vor.u32 %v8460_v51, %v6423_v47  ;;  %v6631_v5 = vld [vmem:[%s13415_s3 + $0x8c8] sm:$0xf] }
  0xf8   :  { %2857 = vmatpush.bf16.msra.mxu0 %v6360_v52  ;;  %v6647_v52 = vld [vmem:[%s13415_s3 + $0x8e8] sm:$0xf]  ;;  %v10637_v53 = vadd.f32 %v2604_v50, %v2592_v27  ;;  %v8548_v56 = vld [vmem:[%s13415_s3 + $0x9f4] sm:$0xf0] }
  0xf9   :  { %2870 = vmatpush.bf16.msra.mxu1 %v6488_v55  ;;  %v6775_v55 = vld [vmem:[%s13415_s3 + $0x9e8] sm:$0xf]  ;;  %v8512_v7 = vld [vmem:[%s13415_s3 + $0x8d4] sm:$0xf0] }
  0xfa   :  { %2833 = vmatpush.bf16.msrb.mxu2 %v6072_v60  ;;  %v6648_v60 = vor.u32 %v8516_v25, %v6647_v52  ;;  %v6776_v4 = vor.u32 %v8548_v56, %v6775_v55  ;;  %v6759_v8 = vld [vmem:[%s13415_s3 + $0x9c8] sm:$0xf]  ;;  %v8580_v11 = vld [vmem:[%s13415_s3 + $0xaf4] sm:$0xf0]  ;;  %v6632_v19 = vor.u32 %v8512_v7, %v6631_v5 }
  0xfb   :  { %2846 = vmatpush.bf16.msrb.mxu3 %v6200_v62  ;;  %v8424_v62 = vld [vmem:[%s13415_s3 + $0x614] sm:$0xf0]  ;;  %v6903_v10 = vld [vmem:[%s13415_s3 + $0xae8] sm:$0xf] }
  0xfc   :  { %2858 = vmatpush.bf16.msra.mxu0 %v6344_v3  ;;  %v8456_v3 = vld [vmem:[%s13415_s3 + $0x714] sm:$0xf0]  ;;  %v6280_v12 = vor.u32 %v8424_v62, %v6279_v58  ;;  %v7031_v13 = vld [vmem:[%s13415_s3 + $0xbe8] sm:$0xf]  ;;  %v6904_v27 = vor.u32 %v8580_v11, %v6903_v10 }
  0xfd   :  { %2871 = vmatpush.bf16.msra.mxu1 %v6472_v9  ;;  %v8544_v9 = vld [vmem:[%s13415_s3 + $0x9d4] sm:$0xf0]  ;;  %v6408_v16 = vor.u32 %v8456_v3, %v6407_v63  ;;  %v7015_v17 = vld [vmem:[%s13415_s3 + $0xbc8] sm:$0xf] }
  0xfe   :  { %2834 = vmatpush.bf16.msrb.mxu2 %v6056_v28  ;;  %v8612_v15 = vld [vmem:[%s13415_s3 + $0xbf4] sm:$0xf0]  ;;  %v6760_v24 = vor.u32 %v8544_v9, %v6759_v8  ;;  %v6615_v28 = vld [vmem:[%s13415_s3 + $0x8a8] sm:$0xf] }
  0xff   :  { %2847 = vmatpush.bf16.msrb.mxu3 %v6184_v29  ;;  %v8508_v29 = vld [vmem:[%s13415_s3 + $0x8b4] sm:$0xf0]  ;;  %v2606_v31 = vpop.f32.mrf.mxu0  ;;  %v7032_v6 = vor.u32 %v8612_v15, %v7031_v13  ;;  %v6599_v36 = vld [vmem:[%s13415_s3 + $0x888] sm:$0xf] }
 0x100   :  { %2859 = vmatpush.bf16.msra.mxu0 %v6328_v30  ;;  %v6743_v30 = vld [vmem:[%s13415_s3 + $0x9a8] sm:$0xf]  ;;  %v8540_v32 = vld [vmem:[%s13415_s3 + $0x9b4] sm:$0xf0]  ;;  %v6616_v35 = vor.u32 %v8508_v29, %v6615_v28 }
 0x101   :  { %2872 = vmatpush.bf16.msra.mxu1 %v6456_v33  ;;  %v6887_v33 = vld [vmem:[%s13415_s3 + $0xac8] sm:$0xf]  ;;  %v8576_v18 = vld [vmem:[%s13415_s3 + $0xad4] sm:$0xf0] }
 0x102   :  { %2835 = vmatpush.bf16.msrb.mxu2 %v6040_v37  ;;  %v8608_v34 = vld [vmem:[%s13415_s3 + $0xbd4] sm:$0xf0]  ;;  %v6744_v37 = vor.u32 %v8540_v32, %v6743_v30  ;;  %v6888_v38 = vor.u32 %v8576_v18, %v6887_v33  ;;  %v6871_v43 = vld [vmem:[%s13415_s3 + $0xaa8] sm:$0xf] }
 0x103   :  { %2848 = vmatpush.bf16.msrb.mxu3 %v6168_v39  ;;  %v8504_v39 = vld [vmem:[%s13415_s3 + $0x894] sm:$0xf0]  ;;  %v7016_v42 = vor.u32 %v8608_v34, %v7015_v17  ;;  %v6999_v46 = vld [vmem:[%s13415_s3 + $0xba8] sm:$0xf] }
 0x104   :  { %2860 = vmatpush.bf16.msra.mxu0 %v6312_v40  ;;  %v6727_v40 = vld [vmem:[%s13415_s3 + $0x988] sm:$0xf]  ;;  %v8536_v14 = vld [vmem:[%s13415_s3 + $0x994] sm:$0xf0]  ;;  %v6600_v47 = vor.u32 %v8504_v39, %v6599_v36 }
 0x105   :  { %2873 = vmatpush.bf16.msra.mxu1 %v6440_v44  ;;  %v8572_v44 = vld [vmem:[%s13415_s3 + $0xab4] sm:$0xf0]  ;;  %v2617_v45 = vpop.f32.mrf.mxu1  ;;  %v6728_v49 = vor.u32 %v8536_v14, %v6727_v40  ;;  %v6583_v51 = vld [vmem:[%s13415_s3 + $0x868] sm:$0xf] }
 0x106   :  { %2836 = vmatpush.bf16.msrb.mxu2 %v6024_v54  ;;  %v8604_v23 = vld [vmem:[%s13415_s3 + $0xbb4] sm:$0xf0]  ;;  %v6872_v50 = vor.u32 %v8572_v44, %v6871_v43  ;;  %v6711_v25 = vld [vmem:[%s13415_s3 + $0x968] sm:$0xf]  ;;  %v2618_v54 = vadd.f32 %v2617_v45, %v440_v41 }
 0x107   :  { %2849 = vmatpush.bf16.msrb.mxu3 %v6152_v48  ;;  %v8500_v52 = vld [vmem:[%s13415_s3 + $0x874] sm:$0xf0]  ;;  %v7000_v55 = vor.u32 %v8604_v23, %v6999_v46  ;;  %v6855_v48 = vld [vmem:[%s13415_s3 + $0xa88] sm:$0xf] }
 0x108   :  { %2861 = vmatpush.bf16.msra.mxu0 %v6296_v57  ;;  %v8532_v56 = vld [vmem:[%s13415_s3 + $0x974] sm:$0xf0]  ;;  %v6983_v58 = vld [vmem:[%s13415_s3 + $0xb88] sm:$0xf]  ;;  %v6584_v62 = vor.u32 %v8500_v52, %v6583_v51  ;;  %v8258_v52 = vld [vmem:[%s13415_s3 + $0xec] sm:$0xf] }
 0x109   :  { %2874 = vmatpush.bf16.msra.mxu1 %v6424_v59  ;;  %2837 = vmatmul.bf16.vlgmr.msrb.gmra.mxu2 %v9405_v0  ;;  %v8568_v57 = vld [vmem:[%s13415_s3 + $0xa94] sm:$0xf0]  ;;  %v6712_v3 = vor.u32 %v8532_v56, %v6711_v25  ;;  %v6567_v5 = vld [vmem:[%s13415_s3 + $0x848] sm:$0xf]  ;;  %v5625_v25 = vld [vmem:[%s13415_s3 + $0xf8] sm:$0xf0] }
 0x10a   :  { %2881 = vmatpush.bf16.msra.mxu2 %v6648_v60  ;;  %2850 = vmatmul.bf16.vlgmr.msrb.gmra.mxu3 %v9409_v2  ;;  %v8600_v59 = vld [vmem:[%s13415_s3 + $0xb94] sm:$0xf0]  ;;  %v6695_v8 = vld [vmem:[%s13415_s3 + $0x948] sm:$0xf] }
 0x10b   :  { %2894 = vmatpush.bf16.msra.mxu3 %v6776_v4  ;;  %v6856_v4 = vor.u32 %v8568_v57, %v6855_v48  ;;  %v8496_v7 = vld [vmem:[%s13415_s3 + $0x854] sm:$0xf0]  ;;  %v6984_v11 = vor.u32 %v8600_v59, %v6983_v58  ;;  %v6839_v13 = vld [vmem:[%s13415_s3 + $0xa68] sm:$0xf] }
 0x10c   :  { %2862 = vmatpush.bf16.msra.mxu0 %v6280_v12  ;;  %v2656_v60 = vpop.f32.mrf.mxu0  ;;  %v2630_v63 = vpop.f32.mrf.mxu2  ;;  %v8528_v12 = vld [vmem:[%s13415_s3 + $0x954] sm:$0xf0]  ;;  %v6568_v28 = vor.u32 %v8496_v7, %v6567_v5  ;;  %v6551_v31 = vld [vmem:[%s13415_s3 + $0x828] sm:$0xf]  ;;  %v5609_v7 = vld [vmem:[%s13415_s3 + $0xd8] sm:$0xf0] }
 0x10d   :  { %2875 = vmatpush.bf16.msra.mxu1 %v6408_v16  ;;  %v2631_v9 = vadd.f32 %v2630_v63, %v2618_v54  ;;  %v2643_v10 = vpop.f32.mrf.mxu3  ;;  %v8564_v15 = vld [vmem:[%s13415_s3 + $0xa74] sm:$0xf0]  ;;  %v6967_v16 = vld [vmem:[%s13415_s3 + $0xb68] sm:$0xf]  ;;  %v6696_v29 = vor.u32 %v8528_v12, %v6695_v8  ;;  %v8322_v12 = vld [vmem:[%s13415_s3 + $0x2ec] sm:$0xf] }
 0x10e   :  { %2882 = vmatpush.bf16.msra.mxu2 %v6632_v19  ;;  %v8596_v19 = vld [vmem:[%s13415_s3 + $0xb74] sm:$0xf0]  ;;  %v6840_v30 = vor.u32 %v8564_v15, %v6839_v13  ;;  %v6679_v32 = vld [vmem:[%s13415_s3 + $0x928] sm:$0xf]  ;;  %v5881_v15 = vld [vmem:[%s13415_s3 + $0x2f8] sm:$0xf0] }
 0x10f   :  { %2895 = vmatpush.bf16.msra.mxu3 %v6760_v24  ;;  %2863 = vmatmul.bf16.vlgmr.msra.gmra.mxu0 %v9403_v61  ;;  %v2644_v24 = vadd.f32 %v2643_v10, %v2631_v9  ;;  %v6968_v18 = vor.u32 %v8596_v19, %v6967_v16  ;;  %v8524_v17 = vld [vmem:[%s13415_s3 + $0x934] sm:$0xf0]  ;;  %v6823_v34 = vld [vmem:[%s13415_s3 + $0xa48] sm:$0xf]  ;;  %v8290_v10 = vld [vmem:[%s13415_s3 + $0x1ec] sm:$0xf] }
 0x110   :  { %2907 = vmatpush.bf16.msrb.mxu0 %v6904_v27  ;;  %2876 = vmatmul.bf16.vlgmr.msra.gmra.mxu1 %v9407_v1  ;;  %v2619_v27 = vpop.f32.mrf.mxu1  ;;  %v6951_v36 = vld [vmem:[%s13415_s3 + $0xb48] sm:$0xf]  ;;  %v8488_v43 = vld [vmem:[%s13415_s3 + $0x814] sm:$0xf0]  ;;  %v8354_v16 = vld [vmem:[%s13415_s3 + $0x3ec] sm:$0xf] }
 0x111   :  { %2920 = vmatpush.bf16.msrb.mxu1 %v7032_v6  ;;  %v8492_v6 = vld [vmem:[%s13415_s3 + $0x834] sm:$0xf0]  ;;  %v10791_v33 = vadd.f32 %v2656_v60, %v2644_v24  ;;  %v6535_v40 = vld [vmem:[%s13415_s3 + $0x808] sm:$0xf]  ;;  %v6009_v19 = vld [vmem:[%s13415_s3 + $0x3f8] sm:$0xf0] }
 0x112   :  { %2883 = vmatpush.bf16.msra.mxu2 %v6616_v35  ;;  %v8560_v35 = vld [vmem:[%s13415_s3 + $0xa54] sm:$0xf0]  ;;  %v6552_v39 = vor.u32 %v8492_v6, %v6551_v31  ;;  %v6663_v44 = vld [vmem:[%s13415_s3 + $0x908] sm:$0xf]  ;;  %v6536_v54 = vor.u32 %v8488_v43, %v6535_v40  ;;  %v5593_v31 = vld [vmem:[%s13415_s3 + $0xb8] sm:$0xf0] }
 0x113   :  { %2896 = vmatpush.bf16.msra.mxu3 %v6744_v37  ;;  %v8592_v37 = vld [vmem:[%s13415_s3 + $0xb54] sm:$0xf0]  ;;  %v6824_v14 = vor.u32 %v8560_v35, %v6823_v34  ;;  %v6791_v58 = vld [vmem:[%s13415_s3 + $0xa08] sm:$0xf]  ;;  %v10892_v6 = vld [vmem:[#allocation1] sm:$0xff] }
 0x114   :  { %2908 = vmatpush.bf16.msrb.mxu0 %v6888_v38  ;;  %v2658_v38 = vpop.f32.mrf.mxu0  ;;  %v2632_v41 = vpop.f32.mrf.mxu2  ;;  %v8520_v46 = vld [vmem:[%s13415_s3 + $0x914] sm:$0xf0]  ;;  %v6952_v45 = vor.u32 %v8592_v37, %v6951_v36  ;;  %v6919_v63 = vld [vmem:[%s13415_s3 + $0xb08] sm:$0xf]  ;;  %v8286_v34 = vld [vmem:[%s13415_s3 + $0x1cc] sm:$0xf] }
 0x115   :  { %2921 = vmatpush.bf16.msrb.mxu1 %v7016_v42  ;;  %v6680_v42 = vor.u32 %v8524_v17, %v6679_v32  ;;  %v2645_v23 = vpop.f32.mrf.mxu3  ;;  %v8588_v51 = vld [vmem:[%s13415_s3 + $0xb34] sm:$0xf0]  ;;  %v6664_v48 = vor.u32 %v8520_v46, %v6663_v44  ;;  %v7047_v8 = vld [vmem:[%s13415_s3 + $0xc08] sm:$0xf]  ;;  %v6012_v17 = vor.u32 %v8354_v16, %v6009_v19  ;;  %v5737_v35 = vld [vmem:[%s13415_s3 + $0x1d8] sm:$0xf0] }
 0x116   :  { %2884 = vmatpush.bf16.msra.mxu2 %v6600_v47  ;;  %v6807_v47 = vld [vmem:[%s13415_s3 + $0xa28] sm:$0xf]  ;;  %v8620_v56 = vld [vmem:[%s13415_s3 + $0xc34] sm:$0xf0]  ;;  %v8318_v36 = vld [vmem:[%s13415_s3 + $0x2cc] sm:$0xf]  ;;  %v5740_v41 = vor.u32 %v8286_v34, %v5737_v35 }
 0x117   :  { %2897 = vmatpush.bf16.msra.mxu3 %v6728_v49  ;;  %v8556_v49 = vld [vmem:[%s13415_s3 + $0xa34] sm:$0xf0]  ;;  %v10895_v32 = vld [vmem:[#allocation1 + $0x9] sm:$0xff]  ;;  %v5865_v37 = vld [vmem:[%s13415_s3 + $0x2d8] sm:$0xf0] }
 0x118   :  { %2909 = vmatpush.bf16.msrb.mxu0 %v6872_v50  ;;  %v6935_v50 = vld [vmem:[%s13415_s3 + $0xb28] sm:$0xf]  ;;  %v6808_v57 = vor.u32 %v8556_v49, %v6807_v47  ;;  %v8552_v59 = vld [vmem:[%s13415_s3 + $0xa14] sm:$0xf0]  ;;  %v8350_v38 = vld [vmem:[%s13415_s3 + $0x3cc] sm:$0xf]  ;;  %v5868_v43 = vor.u32 %v8318_v36, %v5865_v37 }
 0x119   :  { %2922 = vmatpush.bf16.msrb.mxu1 %v7000_v55  ;;  %v7063_v55 = vld [vmem:[%s13415_s3 + $0xc28] sm:$0xf]  ;;  %v6936_v60 = vor.u32 %v8588_v51, %v6935_v50  ;;  %v8616_v9 = vld [vmem:[%s13415_s3 + $0xc14] sm:$0xf0]  ;;  %v6792_v13 = vor.u32 %v8552_v59, %v6791_v58  ;;  %v8282_v46 = vld [vmem:[%s13415_s3 + $0x1ac] sm:$0xf] }
 0x11a   :  { %2885 = vmatpush.bf16.msra.mxu2 %v6584_v62  ;;  %v5628_v62 = vor.u32 %v8258_v52, %v5625_v25  ;;  %v7064_v5 = vor.u32 %v8620_v56, %v7063_v55  ;;  %v5721_v23 = vld [vmem:[%s13415_s3 + $0x1b8] sm:$0xf0]  ;;  %v10931_v47 = vld [vmem:[#allocation1 + $0x12] sm:$0xff]  ;;  %v8346_v51 = vld [vmem:[%s13415_s3 + $0x3ac] sm:$0xf] }
 0x11b   :  { %2898 = vmatpush.bf16.msra.mxu3 %v6712_v3  ;;  %v8584_v3 = vld [vmem:[%s13415_s3 + $0xb14] sm:$0xf0]  ;;  %v5849_v49 = vld [vmem:[%s13415_s3 + $0x2b8] sm:$0xf0]  ;;  %v5724_v56 = vor.u32 %v8282_v46, %v5721_v23  ;;  %v8274_v16 = vld [vmem:[%s13415_s3 + $0x16c] sm:$0xf] }
 0x11c   :  { %2910 = vmatpush.bf16.msrb.mxu0 %v6856_v4  ;;  %v8254_v4 = vld [vmem:[%s13415_s3 + $0xcc] sm:$0xf]  ;;  %v6920_v24 = vor.u32 %v8584_v3, %v6919_v63  ;;  %v10937_v50 = vld [vmem:[#allocation1 + $0x1b] sm:$0xff] }
 0x11d   :  { %2923 = vmatpush.bf16.msrb.mxu1 %v6984_v11  ;;  %v5753_v11 = vld [vmem:[%s13415_s3 + $0x1f8] sm:$0xf0]  ;;  %v5612_v27 = vor.u32 %v8254_v4, %v5609_v7  ;;  %v8234_v35 = vld [vmem:[%s13415_s3 + $0x2c] sm:$0xf] }
 0x11e   :  { %2886 = vmatpush.bf16.msra.mxu2 %v6568_v28  ;;  %v7048_v28 = vor.u32 %v8616_v9, %v7047_v8  ;;  %v5977_v52 = vld [vmem:[%s13415_s3 + $0x3b8] sm:$0xf0]  ;;  %v8334_v23 = vld [vmem:[%s13415_s3 + $0x34c] sm:$0xf] }
 0x11f   :  { %2899 = vmatpush.bf16.msra.mxu3 %v6696_v29  ;;  %v5756_v29 = vor.u32 %v8290_v10, %v5753_v11  ;;  %v5980_v59 = vor.u32 %v8346_v51, %v5977_v52  ;;  %v5833_v63 = vld [vmem:[%s13415_s3 + $0x298] sm:$0xf0]  ;;  %v8238_v10 = vld [vmem:[%s13415_s3 + $0x4c] sm:$0xf] }
 0x120   :  { %2911 = vmatpush.bf16.msrb.mxu0 %v6840_v30  ;;  %v8250_v30 = vld [vmem:[%s13415_s3 + $0xac] sm:$0xf]  ;;  %v5961_v7 = vld [vmem:[%s13415_s3 + $0x398] sm:$0xf0] }
 0x121   :  { %2924 = vmatpush.bf16.msrb.mxu1 %v6968_v18  ;;  %v5884_v18 = vor.u32 %v8322_v12, %v5881_v15  ;;  %v5596_v40 = vor.u32 %v8250_v30, %v5593_v31  ;;  %v5545_v11 = vld [vmem:[%s13415_s3 + $0x58] sm:$0xf0]  ;;  %v8230_v52 = vld [vmem:[%s13415_s3 + $0xc] sm:$0xf] }
 0x122   :  { %2887 = vmatpush.bf16.msra.mxu2 %v6552_v39  ;;  %v5993_v39 = vld [vmem:[%s13415_s3 + $0x3d8] sm:$0xf0]  ;;  %v5548_v31 = vor.u32 %v8238_v10, %v5545_v11 }
 0x123   :  { %2900 = vmatpush.bf16.msra.mxu3 %v6680_v42  ;;  %v8246_v42 = vld [vmem:[%s13415_s3 + $0x8c] sm:$0xf]  ;;  %v5996_v44 = vor.u32 %v8350_v38, %v5993_v39  ;;  %v5689_v19 = vld [vmem:[%s13415_s3 + $0x178] sm:$0xf0]  ;;  %v11003_v38 = vld [vmem:[#allocation1 + $0x24] sm:$0xff] }
 0x124   :  { %2912 = vmatpush.bf16.msrb.mxu0 %v6824_v14  ;;  %v5577_v14 = vld [vmem:[%s13415_s3 + $0x98] sm:$0xf0]  ;;  %v5692_v34 = vor.u32 %v8274_v16, %v5689_v19  ;;  %v8326_v16 = vld [vmem:[%s13415_s3 + $0x30c] sm:$0xf] }
 0x125   :  { %2925 = vmatpush.bf16.msrb.mxu1 %v6952_v45  ;;  %v8314_v45 = vld [vmem:[%s13415_s3 + $0x2ac] sm:$0xf]  ;;  %v2669_v25 = vpop.f32.mrf.mxu1  ;;  %v5529_v36 = vld [vmem:[%s13415_s3 + $0x38] sm:$0xf0] }
 0x126   :  { %2888 = vmatpush.bf16.msra.mxu2 %v6536_v54  ;;  %v5580_v54 = vor.u32 %v8246_v42, %v5577_v14  ;;  %v2670_v55 = vadd.f32 %v2669_v25, %v10791_v33  ;;  %v5852_v58 = vor.u32 %v8314_v45, %v5849_v49  ;;  %v5705_v33 = vld [vmem:[%s13415_s3 + $0x198] sm:$0xf0]  ;;  %v8302_v14 = vld [vmem:[%s13415_s3 + $0x24c] sm:$0xf]  ;;  %v5532_v46 = vor.u32 %v8234_v35, %v5529_v36 }
 0x127   :  { %2901 = vmatpush.bf16.msra.mxu3 %v6664_v48  ;;  %v8242_v48 = vld [vmem:[%s13415_s3 + $0x6c] sm:$0xf]  ;;  %v5929_v45 = vld [vmem:[%s13415_s3 + $0x358] sm:$0xf0] }
 0x128   :  { %2913 = vmatpush.bf16.msrb.mxu0 %v6808_v57  ;;  %v5561_v57 = vld [vmem:[%s13415_s3 + $0x78] sm:$0xf0]  ;;  %v8418_v19 = vld [vmem:[%s13415_s3 + $0x5ec] sm:$0xf] }
 0x129   :  { %2926 = vmatpush.bf16.msrb.mxu1 %v6936_v60  ;;  %2889 = vmatmul.bf16.vlgmr.msra.gmra.mxu2 %v10892_v6  ;;  %v8278_v60 = vld [vmem:[%s13415_s3 + $0x18c] sm:$0xf]  ;;  %v5564_v4 = vor.u32 %v8242_v48, %v5561_v57  ;;  %v5513_v25 = vld [vmem:[%s13415_s3 + $0x18] sm:$0xf0] }
 0x12a   :  { %2939 = vmatpush.bf16.msrb.mxu2 %v7064_v5  ;;  %2902 = vmatmul.bf16.vlgmr.msra.gmra.mxu3 %v10895_v32  ;;  %v8342_v5 = vld [vmem:[%s13415_s3 + $0x38c] sm:$0xf]  ;;  %v5708_v9 = vor.u32 %v8278_v60, %v5705_v33  ;;  %v5657_v48 = vld [vmem:[%s13415_s3 + $0x138] sm:$0xf0] }
 0x12b   :  { %2946 = vmatpush.bf16.msrb.mxu3 %v5628_v62  ;;  %v8310_v62 = vld [vmem:[%s13415_s3 + $0x28c] sm:$0xf]  ;;  %v5785_v33 = vld [vmem:[%s13415_s3 + $0x238] sm:$0xf0] }
 0x12c   :  { %2914 = vmatpush.bf16.msrb.mxu0 %v6792_v13  ;;  %v2708_v3 = vpop.f32.mrf.mxu0  ;;  %v2682_v8 = vpop.f32.mrf.mxu2  ;;  %v5836_v15 = vor.u32 %v8310_v62, %v5833_v63  ;;  %v8386_v57 = vld [vmem:[%s13415_s3 + $0x4ec] sm:$0xf]  ;;  %v5516_v62 = vor.u32 %v8230_v52, %v5513_v25  ;;  %v5769_v11 = vld [vmem:[%s13415_s3 + $0x218] sm:$0xf0] }
 0x12d   :  { %2927 = vmatpush.bf16.msrb.mxu1 %v6920_v24  ;;  %v2683_v12 = vadd.f32 %v2682_v8, %v2670_v55  ;;  %v2695_v13 = vpop.f32.mrf.mxu3  ;;  %v5964_v24 = vor.u32 %v8342_v5, %v5961_v7  ;;  %v2671_v30 = vpop.f32.mrf.mxu1  ;;  %v8298_v60 = vld [vmem:[%s13415_s3 + $0x22c] sm:$0xf]  ;;  %v5641_v8 = vld [vmem:[%s13415_s3 + $0x118] sm:$0xf0] }
 0x12e   :  { %2940 = vmatpush.bf16.msrb.mxu2 %v7048_v28  ;;  %v5817_v28 = vld [vmem:[%s13415_s3 + $0x278] sm:$0xf0]  ;;  %v8330_v63 = vld [vmem:[%s13415_s3 + $0x32c] sm:$0xf]  ;;  %v5788_v10 = vor.u32 %v8298_v60, %v5785_v33 }
 0x12f   :  { %2947 = vmatpush.bf16.msrb.mxu3 %v5612_v27  ;;  %2915 = vmatmul.bf16.vlgmr.msrb.gmra.mxu0 %v10931_v47  ;;  %v8306_v27 = vld [vmem:[%s13415_s3 + $0x26c] sm:$0xf]  ;;  %v6089_v52 = vld [vmem:[%s13415_s3 + $0x498] sm:$0xf0] }
 0x130   :  { %2959 = vmatpush.bf16.msra.mxu0 %v5756_v29  ;;  %2928 = vmatmul.bf16.vlgmr.msrb.gmra.mxu1 %v10937_v50  ;;  %v2696_v29 = vadd.f32 %v2695_v13, %v2683_v12  ;;  %v5820_v39 = vor.u32 %v8306_v27, %v5817_v28  ;;  %v8262_v7 = vld [vmem:[%s13415_s3 + $0x10c] sm:$0xf]  ;;  %v6121_v13 = vld [vmem:[%s13415_s3 + $0x4d8] sm:$0xf0] }
 0x131   :  { %2972 = vmatpush.bf16.msra.mxu1 %v5884_v18  ;;  %v8338_v18 = vld [vmem:[%s13415_s3 + $0x36c] sm:$0xf]  ;;  %v5897_v27 = vld [vmem:[%s13415_s3 + $0x318] sm:$0xf0]  ;;  %v5644_v30 = vor.u32 %v8262_v7, %v5641_v8 }
 0x132   :  { %2985 = vmatpush.bf16.msra.mxu2 %v6012_v17  ;;  %v5945_v17 = vld [vmem:[%s13415_s3 + $0x378] sm:$0xf0]  ;;  %v11001_v37 = vadd.f32 %v2708_v3, %v2696_v29  ;;  %v8382_v12 = vld [vmem:[%s13415_s3 + $0x4cc] sm:$0xf] }
 0x133   :  { %2948 = vmatpush.bf16.msrb.mxu3 %v5596_v40  ;;  %v8270_v40 = vld [vmem:[%s13415_s3 + $0x14c] sm:$0xf]  ;;  %v5948_v42 = vor.u32 %v8338_v18, %v5945_v17  ;;  %v5913_v3 = vld [vmem:[%s13415_s3 + $0x338] sm:$0xf0] }
 0x134   :  { %2960 = vmatpush.bf16.msra.mxu0 %v5740_v41  ;;  %v5673_v41 = vld [vmem:[%s13415_s3 + $0x158] sm:$0xf0]  ;;  %v2684_v49 = vpop.f32.mrf.mxu2  ;;  %v8450_v28 = vld [vmem:[%s13415_s3 + $0x6ec] sm:$0xf] }
 0x135   :  { %2973 = vmatpush.bf16.msra.mxu1 %v5868_v43  ;;  %v5801_v43 = vld [vmem:[%s13415_s3 + $0x258] sm:$0xf0]  ;;  %v5676_v51 = vor.u32 %v8270_v40, %v5673_v41  ;;  %v2697_v55 = vpop.f32.mrf.mxu3  ;;  %v8482_v18 = vld [vmem:[%s13415_s3 + $0x7ec] sm:$0xf]  ;;  %v5900_v40 = vor.u32 %v8326_v16, %v5897_v27 }
 0x136   :  { %2986 = vmatpush.bf16.msra.mxu2 %v5996_v44  ;;  %v2710_v44 = vpop.f32.mrf.mxu0  ;;  %v6393_v29 = vld [vmem:[%s13415_s3 + $0x6f8] sm:$0xf0]  ;;  %v8378_v36 = vld [vmem:[%s13415_s3 + $0x4ac] sm:$0xf] }
 0x137   :  { %2949 = vmatpush.bf16.msrb.mxu3 %v5580_v54  ;;  %v8266_v54 = vld [vmem:[%s13415_s3 + $0x12c] sm:$0xf]  ;;  %v6521_v17 = vld [vmem:[%s13415_s3 + $0x7f8] sm:$0xf0]  ;;  %v6396_v41 = vor.u32 %v8450_v28, %v6393_v29 }
 0x138   :  { %2961 = vmatpush.bf16.msra.mxu0 %v5724_v56  ;;  %v5804_v56 = vor.u32 %v8302_v14, %v5801_v43  ;;  %v6249_v14 = vld [vmem:[%s13415_s3 + $0x5d8] sm:$0xf0]  ;;  %v6524_v43 = vor.u32 %v8482_v18, %v6521_v17  ;;  %v8446_v44 = vld [vmem:[%s13415_s3 + $0x6cc] sm:$0xf] }
 0x139   :  { %2974 = vmatpush.bf16.msra.mxu1 %v5852_v58  ;;  %7071 = vmatmul.msk.bf16.vlgmr.msrb.gmra.mxu2 %vm2436_vm0, %v11003_v38  ;;  %v6137_v58 = vld [vmem:[%s13415_s3 + $0x4f8] sm:$0xf0]  ;;  %v8474_v33 = vld [vmem:[%s13415_s3 + $0x7ac] sm:$0xf] }
 0x13a   :  { %2987 = vmatpush.bf16.msra.mxu2 %v5980_v59  ;;  %v5932_v59 = vor.u32 %v8334_v23, %v5929_v45  ;;  %v6140_v5 = vor.u32 %v8386_v57, %v6137_v58  ;;  %v8478_v45 = vld [vmem:[%s13415_s3 + $0x7cc] sm:$0xf]  ;;  %v6233_v55 = vld [vmem:[%s13415_s3 + $0x5b8] sm:$0xf0] }
 0x13b   :  { %2950 = vmatpush.bf16.msrb.mxu3 %v5564_v4  ;;  %v5660_v4 = vor.u32 %v8266_v54, %v5657_v48  ;;  %v8410_v54 = vld [vmem:[%s13415_s3 + $0x5ac] sm:$0xf]  ;;  %v6361_v58 = vld [vmem:[%s13415_s3 + $0x6b8] sm:$0xf0] }
 0x13c   :  { %2962 = vmatpush.bf16.msra.mxu0 %v5708_v9  ;;  %v8294_v9 = vld [vmem:[%s13415_s3 + $0x20c] sm:$0xf]  ;;  %v6201_v28 = vld [vmem:[%s13415_s3 + $0x578] sm:$0xf0] }
 0x13d   :  { %2975 = vmatpush.bf16.msra.mxu1 %v5836_v15  ;;  %v5916_v15 = vor.u32 %v8330_v63, %v5913_v3  ;;  %v8442_v57 = vld [vmem:[%s13415_s3 + $0x6ac] sm:$0xf]  ;;  %v6236_v63 = vor.u32 %v8410_v54, %v6233_v55  ;;  %v6329_v17 = vld [vmem:[%s13415_s3 + $0x678] sm:$0xf0] }
 0x13e   :  { %2988 = vmatpush.bf16.msra.mxu2 %v5964_v24  ;;  %v6265_v24 = vld [vmem:[%s13415_s3 + $0x5f8] sm:$0xf0]  ;;  %v6364_v3 = vor.u32 %v8442_v57, %v6361_v58  ;;  %v8438_v7 = vld [vmem:[%s13415_s3 + $0x68c] sm:$0xf] }
 0x13f   :  { %2951 = vmatpush.bf16.msrb.mxu3 %v5548_v31  ;;  %v6124_v31 = vor.u32 %v8382_v12, %v6121_v13  ;;  %v6268_v35 = vor.u32 %v8418_v19, %v6265_v24  ;;  %v8366_v13 = vld [vmem:[%s13415_s3 + $0x44c] sm:$0xf]  ;;  %v6169_v58 = vld [vmem:[%s13415_s3 + $0x538] sm:$0xf0] }
 0x140   :  { %2963 = vmatpush.bf16.msra.mxu0 %v5692_v34  ;;  %v5772_v34 = vor.u32 %v8294_v9, %v5769_v11  ;;  %v8470_v9 = vld [vmem:[%s13415_s3 + $0x78c] sm:$0xf] }
 0x141   :  { %2976 = vmatpush.bf16.msra.mxu1 %v5820_v39  ;;  %v6105_v39 = vld [vmem:[%s13415_s3 + $0x4b8] sm:$0xf0]  ;;  %v8402_v27 = vld [vmem:[%s13415_s3 + $0x56c] sm:$0xf] }
 0x142   :  { %2989 = vmatpush.bf16.msra.mxu2 %v5948_v42  ;;  %v8414_v42 = vld [vmem:[%s13415_s3 + $0x5cc] sm:$0xf]  ;;  %v6108_v23 = vor.u32 %v8378_v36, %v6105_v39  ;;  %v6457_v36 = vld [vmem:[%s13415_s3 + $0x778] sm:$0xf0] }
 0x143   :  { %2952 = vmatpush.bf16.msrb.mxu3 %v5532_v46  ;;  %v6377_v46 = vld [vmem:[%s13415_s3 + $0x6d8] sm:$0xf0]  ;;  %v6252_v49 = vor.u32 %v8414_v42, %v6249_v14  ;;  %v8434_v18 = vld [vmem:[%s13415_s3 + $0x66c] sm:$0xf] }
 0x144   :  { %2964 = vmatpush.bf16.msra.mxu0 %v5676_v51  ;;  %v8374_v51 = vld [vmem:[%s13415_s3 + $0x48c] sm:$0xf]  ;;  %v6380_v25 = vor.u32 %v8446_v44, %v6377_v46  ;;  %v6041_v42 = vld [vmem:[%s13415_s3 + $0x438] sm:$0xf0]  ;;  %v6332_v14 = vor.u32 %v8434_v18, %v6329_v17 }
 0x145   :  { %2977 = vmatpush.bf16.msra.mxu1 %v5804_v56  ;;  %v2721_v48 = vpop.f32.mrf.mxu1  ;;  %v6092_v60 = vor.u32 %v8374_v51, %v6089_v52  ;;  %v6185_v44 = vld [vmem:[%s13415_s3 + $0x558] sm:$0xf0]  ;;  %v8462_v51 = vld [vmem:[%s13415_s3 + $0x74c] sm:$0xf] }
 0x146   :  { %2990 = vmatpush.bf16.msra.mxu2 %v5932_v59  ;;  %v2722_v59 = vadd.f32 %v2721_v48, %v11001_v37  ;;  %v6073_v37 = vld [vmem:[%s13415_s3 + $0x478] sm:$0xf0]  ;;  %v8358_v55 = vld [vmem:[%s13415_s3 + $0x40c] sm:$0xf] }
 0x147   :  { %2953 = vmatpush.bf16.msrb.mxu3 %v5516_v62  ;;  %v6489_v62 = vld [vmem:[%s13415_s3 + $0x7b8] sm:$0xf0]  ;;  %v8394_v48 = vld [vmem:[%s13415_s3 + $0x52c] sm:$0xf] }
 0x148   :  { %2965 = vmatpush.bf16.msra.mxu0 %v5660_v4  ;;  %v8406_v4 = vld [vmem:[%s13415_s3 + $0x58c] sm:$0xf]  ;;  %v6441_v52 = vld [vmem:[%s13415_s3 + $0x758] sm:$0xf0] }
 0x149   :  { %2978 = vmatpush.bf16.msra.mxu1 %v5788_v10  ;;  %v6473_v10 = vld [vmem:[%s13415_s3 + $0x798] sm:$0xf0]  ;;  %v8610_v17 = vld [vmem:[%s13415_s3 + $0xbec] sm:$0xf] }
 0x14a   :  { %2991 = vmatpush.bf16.msra.mxu2 %v5916_v15  ;;  %2954 = vmatmul.bf16.vlgmr.msrb.gmra.mxu3 %v9312_v21  ;;  %v6505_v21 = vld [vmem:[%s13415_s3 + $0x7d8] sm:$0xf0] }
 0x14b   :  { %2998 = vmatpush.bf16.msra.mxu3 %v6140_v5  ;;  %v6508_v56 = vor.u32 %v8478_v45, %v6505_v21  ;;  %v6492_v5 = vor.u32 %v8474_v33, %v6489_v62  ;;  %v6057_v15 = vld [vmem:[%s13415_s3 + $0x458] sm:$0xf0]  ;;  %v8430_v45 = vld [vmem:[%s13415_s3 + $0x64c] sm:$0xf] }
 0x14c   :  { %2966 = vmatpush.bf16.msra.mxu0 %v5644_v30  ;;  %v2760_v11 = vpop.f32.mrf.mxu0  ;;  %v2734_v16 = vpop.f32.mrf.mxu2  ;;  %v6476_v30 = vor.u32 %v8470_v9, %v6473_v10  ;;  %v6313_v21 = vld [vmem:[%s13415_s3 + $0x658] sm:$0xf0]  ;;  %v8422_v10 = vld [vmem:[%s13415_s3 + $0x60c] sm:$0xf] }
 0x14d   :  { %2979 = vmatpush.bf16.msra.mxu1 %v5772_v34  ;;  %v2747_v24 = vpop.f32.mrf.mxu3  ;;  %v2735_v29 = vadd.f32 %v2734_v16, %v2722_v59  ;;  %v6060_v34 = vor.u32 %v8366_v13, %v6057_v15  ;;  %v6316_v57 = vor.u32 %v8430_v45, %v6313_v21  ;;  %v8514_v59 = vld [vmem:[%s13415_s3 + $0x8ec] sm:$0xf]  ;;  %v6153_v9 = vld [vmem:[%s13415_s3 + $0x518] sm:$0xf0] }
 0x14e   :  { %2992 = vmatpush.bf16.msra.mxu2 %v5900_v40  ;;  %v6204_v40 = vor.u32 %v8402_v27, %v6201_v28  ;;  %v8510_v13 = vld [vmem:[%s13415_s3 + $0x8cc] sm:$0xf]  ;;  %v6633_v15 = vld [vmem:[%s13415_s3 + $0x8d8] sm:$0xf0] }
 0x14f   :  { %2999 = vmatpush.bf16.msra.mxu3 %v6124_v31  ;;  %2967 = vmatmul.bf16.vlgmr.msra.gmra.mxu0 %v9323_v26  ;;  %v8370_v26 = vld [vmem:[%s13415_s3 + $0x46c] sm:$0xf]  ;;  %v2723_v31 = vpop.f32.mrf.mxu1  ;;  %v2748_v39 = vadd.f32 %v2747_v24, %v2735_v29  ;;  %v6777_v27 = vld [vmem:[%s13415_s3 + $0x9f8] sm:$0xf0]  ;;  %v6636_v18 = vor.u32 %v8510_v13, %v6633_v15 }
 0x150   :  { %3011 = vmatpush.bf16.msrb.mxu0 %v6268_v35  ;;  %2980 = vmatmul.bf16.vlgmr.msra.gmra.mxu1 %v9310_v20  ;;  %v6217_v20 = vld [vmem:[%s13415_s3 + $0x598] sm:$0xf0]  ;;  %v6076_v8 = vor.u32 %v8370_v26, %v6073_v37  ;;  %v8466_v35 = vld [vmem:[%s13415_s3 + $0x76c] sm:$0xf] }
 0x151   :  { %3024 = vmatpush.bf16.msrb.mxu1 %v6396_v41  ;;  %2993 = vmatmul.bf16.vlgmr.msra.gmra.mxu2 %v9314_v22  ;;  %v6345_v22 = vld [vmem:[%s13415_s3 + $0x698] sm:$0xf0]  ;;  %v6220_v12 = vor.u32 %v8406_v4, %v6217_v20  ;;  %v8362_v41 = vld [vmem:[%s13415_s3 + $0x42c] sm:$0xf]  ;;  %v11210_v46 = vadd.f32 %v2760_v11, %v2748_v39 }
 0x152   :  { %3037 = vmatpush.bf16.msrb.mxu2 %v6524_v43  ;;  %v6348_v19 = vor.u32 %v8438_v7, %v6345_v22  ;;  %v8398_v43 = vld [vmem:[%s13415_s3 + $0x54c] sm:$0xf]  ;;  %v6297_v37 = vld [vmem:[%s13415_s3 + $0x638] sm:$0xf0]  ;;  %v6172_v7 = vor.u32 %v8394_v48, %v6169_v58 }
 0x153   :  { %3000 = vmatpush.bf16.msra.mxu3 %v6108_v23  ;;  %v6460_v23 = vor.u32 %v8466_v35, %v6457_v36  ;;  %v6188_v54 = vor.u32 %v8398_v43, %v6185_v44  ;;  %v8426_v26 = vld [vmem:[%s13415_s3 + $0x62c] sm:$0xf]  ;;  %v6425_v20 = vld [vmem:[%s13415_s3 + $0x738] sm:$0xf0] }
 0x154   :  { %3012 = vmatpush.bf16.msrb.mxu0 %v6252_v49  ;;  %v6044_v49 = vor.u32 %v8362_v41, %v6041_v42  ;;  %v2736_v62 = vpop.f32.mrf.mxu2  ;;  %v8458_v4 = vld [vmem:[%s13415_s3 + $0x72c] sm:$0xf]  ;;  %v6300_v11 = vor.u32 %v8426_v26, %v6297_v37  ;;  %v6409_v28 = vld [vmem:[%s13415_s3 + $0x718] sm:$0xf0] }
 0x155   :  { %3025 = vmatpush.bf16.msrb.mxu1 %v6380_v25  ;;  %v2762_v25 = vpop.f32.mrf.mxu0  ;;  %v2749_v33 = vpop.f32.mrf.mxu3  ;;  %v6428_v16 = vor.u32 %v8458_v4, %v6425_v20  ;;  %v8546_v24 = vld [vmem:[%s13415_s3 + $0x9ec] sm:$0xf]  ;;  %v6761_v43 = vld [vmem:[%s13415_s3 + $0x9d8] sm:$0xf0] }
 0x156   :  { %3038 = vmatpush.bf16.msrb.mxu2 %v6508_v56  ;;  %v6025_v56 = vld [vmem:[%s13415_s3 + $0x418] sm:$0xf0]  ;;  %v8578_v29 = vld [vmem:[%s13415_s3 + $0xaec] sm:$0xf]  ;;  %v6780_v36 = vor.u32 %v8546_v24, %v6777_v27 }
 0x157   :  { %3001 = vmatpush.bf16.msra.mxu3 %v6092_v60  ;;  %v6649_v60 = vld [vmem:[%s13415_s3 + $0x8f8] sm:$0xf0]  ;;  %v8506_v39 = vld [vmem:[%s13415_s3 + $0x8ac] sm:$0xf] }
 0x158   :  { %3013 = vmatpush.bf16.msrb.mxu0 %v6236_v63  ;;  %v6444_v63 = vor.u32 %v8462_v51, %v6441_v52  ;;  %v6652_v22 = vor.u32 %v8514_v59, %v6649_v60  ;;  %v6889_v45 = vld [vmem:[%s13415_s3 + $0xad8] sm:$0xf0]  ;;  %v8606_v21 = vld [vmem:[%s13415_s3 + $0xbcc] sm:$0xf] }
 0x159   :  { %3026 = vmatpush.bf16.msrb.mxu1 %v6364_v3  ;;  %v6028_v3 = vor.u32 %v8358_v55, %v6025_v56  ;;  %v8502_v25 = vld [vmem:[%s13415_s3 + $0x88c] sm:$0xf]  ;;  %v6745_v48 = vld [vmem:[%s13415_s3 + $0x9b8] sm:$0xf0] }
 0x15a   :  { %3039 = vmatpush.bf16.msrb.mxu2 %v6492_v5  ;;  %v11254_v5 = vpop.f32.mrf.mxu1  ;;  %v8538_v56 = vld [vmem:[%s13415_s3 + $0x9ac] sm:$0xf]  ;;  %v6873_v59 = vld [vmem:[%s13415_s3 + $0xab8] sm:$0xf0] }
 0x15b   :  { %3002 = vmatpush.bf16.msra.mxu3 %v6076_v8  ;;  %v8390_v8 = vld [vmem:[%s13415_s3 + $0x50c] sm:$0xf]  ;;  %v7001_v62 = vld [vmem:[%s13415_s3 + $0xbb8] sm:$0xf0] }
 0x15c   :  { %3014 = vmatpush.bf16.msrb.mxu0 %v6220_v12  ;;  %v6281_v12 = vld [vmem:[%s13415_s3 + $0x618] sm:$0xf0]  ;;  %v6156_v31 = vor.u32 %v8390_v8, %v6153_v9  ;;  %v8570_v58 = vld [vmem:[%s13415_s3 + $0xaac] sm:$0xf] }
 0x15d   :  { %3027 = vmatpush.bf16.msrb.mxu1 %v6348_v19  ;;  %v8454_v19 = vld [vmem:[%s13415_s3 + $0x70c] sm:$0xf]  ;;  %v6284_v35 = vor.u32 %v8422_v10, %v6281_v12  ;;  %v6585_v26 = vld [vmem:[%s13415_s3 + $0x878] sm:$0xf0]  ;;  %v6876_v37 = vor.u32 %v8570_v58, %v6873_v59 }
 0x15e   :  { %3040 = vmatpush.bf16.msrb.mxu2 %v6476_v30  ;;  %v6905_v30 = vld [vmem:[%s13415_s3 + $0xaf8] sm:$0xf0]  ;;  %v6412_v41 = vor.u32 %v8454_v19, %v6409_v28  ;;  %v8602_v33 = vld [vmem:[%s13415_s3 + $0xbac] sm:$0xf] }
 0x15f   :  { %3003 = vmatpush.bf16.msra.mxu3 %v6060_v34  ;;  %v7033_v34 = vld [vmem:[%s13415_s3 + $0xbf8] sm:$0xf0]  ;;  %v6908_v42 = vor.u32 %v8578_v29, %v6905_v30  ;;  %v8566_v4 = vld [vmem:[%s13415_s3 + $0xa8c] sm:$0xf] }
 0x160   :  { %3015 = vmatpush.bf16.msrb.mxu0 %v6204_v40  ;;  %v6617_v40 = vld [vmem:[%s13415_s3 + $0x8b8] sm:$0xf0]  ;;  %v7036_v44 = vor.u32 %v8610_v17, %v7033_v34  ;;  %v8494_v10 = vld [vmem:[%s13415_s3 + $0x84c] sm:$0xf] }
 0x161   :  { %3028 = vmatpush.bf16.msrb.mxu1 %v6332_v14  ;;  %v8542_v14 = vld [vmem:[%s13415_s3 + $0x9cc] sm:$0xf]  ;;  %v6857_v20 = vld [vmem:[%s13415_s3 + $0xa98] sm:$0xf0] }
 0x162   :  { %3041 = vmatpush.bf16.msrb.mxu2 %v6460_v23  ;;  %v8574_v23 = vld [vmem:[%s13415_s3 + $0xacc] sm:$0xf]  ;;  %v2775_v51 = vpop.f32.mrf.mxu1  ;;  %v6764_v52 = vor.u32 %v8542_v14, %v6761_v43  ;;  %v6985_v8 = vld [vmem:[%s13415_s3 + $0xb98] sm:$0xf0]  ;;  %v6860_v13 = vor.u32 %v8566_v4, %v6857_v20 }
 0x163   :  { %3004 = vmatpush.bf16.msra.mxu3 %v6044_v49  ;;  %v7017_v49 = vld [vmem:[%s13415_s3 + $0xbd8] sm:$0xf0]  ;;  %v6892_v55 = vor.u32 %v8574_v23, %v6889_v45  ;;  %v8530_v15 = vld [vmem:[%s13415_s3 + $0x96c] sm:$0xf] }
 0x164   :  { %3016 = vmatpush.bf16.msrb.mxu0 %v6188_v54  ;;  %v6601_v54 = vld [vmem:[%s13415_s3 + $0x898] sm:$0xf0]  ;;  %v8562_v28 = vld [vmem:[%s13415_s3 + $0xa6c] sm:$0xf] }
 0x165   :  { %3029 = vmatpush.bf16.msrb.mxu1 %v6316_v57  ;;  %v7020_v57 = vor.u32 %v8606_v21, %v7017_v49  ;;  %v6604_v60 = vor.u32 %v8502_v25, %v6601_v54  ;;  %v6841_v29 = vld [vmem:[%s13415_s3 + $0xa78] sm:$0xf0]  ;;  %v8558_v14 = vld [vmem:[%s13415_s3 + $0xa4c] sm:$0xf] }
 0x166   :  { %3042 = vmatpush.bf16.msrb.mxu2 %v6444_v63  ;;  %v6748_v63 = vor.u32 %v8538_v56, %v6745_v48  ;;  %v6969_v17 = vld [vmem:[%s13415_s3 + $0xb78] sm:$0xf0]  ;;  %v8590_v23 = vld [vmem:[%s13415_s3 + $0xb4c] sm:$0xf] }
 0x167   :  { %3005 = vmatpush.bf16.msra.mxu3 %v6028_v3  ;;  %v8534_v3 = vld [vmem:[%s13415_s3 + $0x98c] sm:$0xf]  ;;  %v6825_v43 = vld [vmem:[%s13415_s3 + $0xa58] sm:$0xf0] }
 0x168   :  { %3017 = vmatpush.bf16.msrb.mxu0 %v6172_v7  ;;  %v6953_v45 = vld [vmem:[%s13415_s3 + $0xb58] sm:$0xf0]  ;;  %v8486_v21 = vld [vmem:[%s13415_s3 + $0x80c] sm:$0xf]  ;;  %v6828_v25 = vor.u32 %v8558_v14, %v6825_v43  ;;  %v8756_v14 = vld [vmem:[%s13418_s5 + $0x434] sm:$0xf0] }
 0x169   :  { %3030 = vmatpush.bf16.msrb.mxu1 %v6300_v11  ;;  %v6569_v11 = vld [vmem:[%s13415_s3 + $0x858] sm:$0xf0]  ;;  %v8522_v51 = vld [vmem:[%s13415_s3 + $0x92c] sm:$0xf]  ;;  %v6956_v58 = vor.u32 %v8590_v23, %v6953_v45  ;;  %v7195_v23 = vld [vmem:[%s13418_s5 + $0xf0] sm:$0xf] }
 0x16a   :  { %3043 = vmatpush.bf16.msrb.mxu2 %v6428_v16  ;;  %3006 = vmatmul.bf16.vlgmr.msra.gmra.mxu3 %v9405_v0  ;;  %v6620_v0 = vor.u32 %v8506_v39, %v6617_v40  ;;  %v6713_v16 = vld [vmem:[%s13415_s3 + $0x978] sm:$0xf0]  ;;  %v6844_v39 = vor.u32 %v8562_v28, %v6841_v29  ;;  %v8526_v40 = vld [vmem:[%s13415_s3 + $0x94c] sm:$0xf]  ;;  %v7627_v28 = vld [vmem:[%s13418_s5 + $0x450] sm:$0xf] }
 0x16b   :  { %3050 = vmatpush.bf16.msrb.mxu3 %v6652_v22  ;;  %v8598_v22 = vld [vmem:[%s13415_s3 + $0xb8c] sm:$0xf]  ;;  %v6716_v34 = vor.u32 %v8530_v15, %v6713_v16  ;;  %v6537_v49 = vld [vmem:[%s13415_s3 + $0x818] sm:$0xf0]  ;;  %v7435_v15 = vld [vmem:[%s13418_s5 + $0x2d0] sm:$0xf] }
 0x16c   :  { %3018 = vmatpush.bf16.msrb.mxu0 %v6156_v31  ;;  %v11380_v12 = vpop.f32.mrf.mxu0  ;;  %v11388_v19 = vpop.f32.mrf.mxu2  ;;  %v6988_v27 = vor.u32 %v8598_v22, %v6985_v8  ;;  %v6572_v31 = vor.u32 %v8494_v10, %v6569_v11  ;;  %v6681_v54 = vld [vmem:[%s13415_s3 + $0x938] sm:$0xf0]  ;;  %v8554_v59 = vld [vmem:[%s13415_s3 + $0xa2c] sm:$0xf]  ;;  %v7243_v10 = vld [vmem:[%s13418_s5 + $0x150] sm:$0xf] }
 0x16d   :  { %3031 = vmatpush.bf16.msrb.mxu1 %v6284_v35  ;;  %v11390_v24 = vpop.f32.mrf.mxu1  ;;  %v11398_v30 = vpop.f32.mrf.mxu3  ;;  %v8490_v35 = vld [vmem:[%s13415_s3 + $0x82c] sm:$0xf]  ;;  %v7065_v56 = vld [vmem:[%s13415_s3 + $0xc38] sm:$0xf0]  ;;  %v8666_v11 = vld [vmem:[%s13418_s5 + $0x164] sm:$0xf0] }
 0x16e   :  { %3044 = vmatpush.bf16.msrb.mxu2 %v6412_v41  ;;  %v6697_v41 = vld [vmem:[%s13415_s3 + $0x958] sm:$0xf0]  ;;  %v8714_v16 = vld [vmem:[%s13418_s5 + $0x2e4] sm:$0xf0] }
 0x16f   :  { %3051 = vmatpush.bf16.msrb.mxu3 %v6636_v18  ;;  %3019 = vmatmul.bf16.vlgmr.msrb.gmra.mxu0 %v9409_v2  ;;  %v8498_v2 = vld [vmem:[%s13415_s3 + $0x86c] sm:$0xf]  ;;  %v6793_v20 = vld [vmem:[%s13415_s3 + $0xa18] sm:$0xf0]  ;;  %v8762_v29 = vld [vmem:[%s13418_s5 + $0x464] sm:$0xf0] }
 0x170   :  { %3063 = vmatpush.bf16.msra.mxu0 %v6780_v36  ;;  %3032 = vmatmul.bf16.vlgmr.msrb.gmra.mxu1 %v9403_v61  ;;  %v6729_v61 = vld [vmem:[%s13415_s3 + $0x998] sm:$0xf0]  ;;  %v6588_v7 = vor.u32 %v8498_v2, %v6585_v26  ;;  %v8594_v18 = vld [vmem:[%s13415_s3 + $0xb6c] sm:$0xf]  ;;  %v6684_v26 = vor.u32 %v8522_v51, %v6681_v54  ;;  %v8654_v45 = vld [vmem:[%s13418_s5 + $0x104] sm:$0xf0] }
 0x171   :  { %3076 = vmatpush.bf16.msra.mxu1 %v6908_v42  ;;  %3045 = vmatmul.bf16.vlgmr.msrb.gmra.mxu2 %v9407_v1  ;;  %v7004_v1 = vor.u32 %v8602_v33, %v7001_v62  ;;  %v6732_v9 = vor.u32 %v8534_v3, %v6729_v61  ;;  %v6553_v36 = vld [vmem:[%s13415_s3 + $0x838] sm:$0xf0]  ;;  %v6972_v42 = vor.u32 %v8594_v18, %v6969_v17  ;;  %v8550_v61 = vld [vmem:[%s13415_s3 + $0xa0c] sm:$0xf]  ;;  %v7579_v51 = vld [vmem:[%s13418_s5 + $0x3f0] sm:$0xf] }
 0x172   :  { %3089 = vmatpush.bf16.msra.mxu2 %v7036_v44  ;;  %v6556_v44 = vor.u32 %v8490_v35, %v6553_v36  ;;  %v6540_v62 = vor.u32 %v8486_v21, %v6537_v49  ;;  %v6937_v2 = vld [vmem:[%s13415_s3 + $0xb38] sm:$0xf0]  ;;  %v6796_v18 = vor.u32 %v8550_v61, %v6793_v20  ;;  %v7244_v17 = vor.u32 %v8666_v11, %v7243_v10  ;;  %v7219_v36 = vld [vmem:[%s13418_s5 + $0x120] sm:$0xf]  ;;  %v8702_v21 = vld [vmem:[%s13418_s5 + $0x284] sm:$0xf0] }
 0x173   :  { %3052 = vmatpush.bf16.msrb.mxu3 %v6620_v0  ;;  %v6700_v0 = vor.u32 %v8526_v40, %v6697_v41  ;;  %v6665_v3 = vld [vmem:[%s13415_s3 + $0x918] sm:$0xf0]  ;;  %v7436_v35 = vor.u32 %v8714_v16, %v7435_v15  ;;  %v7411_v40 = vld [vmem:[%s13418_s5 + $0x2a0] sm:$0xf]  ;;  %v8708_v41 = vld [vmem:[%s13418_s5 + $0x2b4] sm:$0xf0] }
 0x174   :  { %3064 = vmatpush.bf16.msra.mxu0 %v6764_v52  ;;  %v2814_v52 = vpop.f32.mrf.mxu0  ;;  %v2788_v48 = vpop.f32.mrf.mxu2  ;;  %v7049_v22 = vld [vmem:[%s13415_s3 + $0xc18] sm:$0xf0]  ;;  %v7171_v54 = vld [vmem:[%s13418_s5 + $0xc0] sm:$0xf]  ;;  %v7531_v20 = vld [vmem:[%s13418_s5 + $0x390] sm:$0xf] }
 0x175   :  { %3077 = vmatpush.bf16.msra.mxu1 %v6892_v55  ;;  %v8618_v55 = vld [vmem:[%s13415_s3 + $0xc2c] sm:$0xf]  ;;  %v2801_v33 = vpop.f32.mrf.mxu3  ;;  %v7196_v52 = vor.u32 %v8654_v45, %v7195_v23  ;;  %v7555_v48 = vld [vmem:[%s13418_s5 + $0x3c0] sm:$0xf]  ;;  %v8636_v10 = vld [vmem:[%s13418_s5 + $0x74] sm:$0xf0] }
 0x176   :  { %3090 = vmatpush.bf16.msra.mxu2 %v7020_v57  ;;  %v2827_v57 = vpop.f32.mrf.mxu1  ;;  %v8642_v33 = vld [vmem:[%s13418_s5 + $0xa4] sm:$0xf0]  ;;  %v7507_v16 = vld [vmem:[%s13418_s5 + $0x360] sm:$0xf]  ;;  %v8672_v45 = vld [vmem:[%s13418_s5 + $0x194] sm:$0xf0] }
 0x177   :  { %3053 = vmatpush.bf16.msrb.mxu3 %v6604_v60  ;;  %v6809_v60 = vld [vmem:[%s13415_s3 + $0xa38] sm:$0xf0]  ;;  %v8744_v57 = vld [vmem:[%s13418_s5 + $0x3d4] sm:$0xf0]  ;;  %v7267_v23 = vld [vmem:[%s13418_s5 + $0x180] sm:$0xf] }
 0x178   :  { %3065 = vmatpush.bf16.msra.mxu0 %v6748_v63  ;;  %v8586_v63 = vld [vmem:[%s13415_s3 + $0xb2c] sm:$0xf]  ;;  %v6812_v4 = vor.u32 %v8554_v59, %v6809_v60  ;;  %v7147_v60 = vld [vmem:[%s13418_s5 + $0x90] sm:$0xf]  ;;  %v7556_v61 = vor.u32 %v8744_v57, %v7555_v48 }
 0x179   :  { %3078 = vmatpush.bf16.msra.mxu1 %v6876_v37  ;;  %v8518_v37 = vld [vmem:[%s13415_s3 + $0x90c] sm:$0xf]  ;;  %v6940_v8 = vor.u32 %v8586_v63, %v6937_v2  ;;  %v11571_v63 = vld [vmem:[%s13417_s4] sm:$0xf] }
 0x17a   :  { %3091 = vmatpush.bf16.msra.mxu2 %v7004_v1  ;;  %v7068_v1 = vor.u32 %v8618_v55, %v7065_v56  ;;  %v7363_v55 = vld [vmem:[%s13418_s5 + $0x240] sm:$0xf]  ;;  %v441_v2 = vperm.slane %v11571_v63, 2 }
 0x17b   :  { %3054 = vmatpush.bf16.msrb.mxu3 %v6588_v7  ;;  %v8614_v7 = vld [vmem:[%s13415_s3 + $0xc0c] sm:$0xf] }
 0x17c   :  { %3066 = vmatpush.bf16.msra.mxu0 %v6732_v9  ;;  %v8582_v9 = vld [vmem:[%s13415_s3 + $0xb0c] sm:$0xf]  ;;  %v2787_v11 = vadd.f32 %v11388_v19, %v441_v2  ;;  %v7413_v2 = vld [vmem:[%s13418_s5 + $0x2b8] sm:$0xf0] }
 0x17d   :  { %3079 = vmatpush.bf16.msra.mxu1 %v6860_v13  ;;  %v6921_v13 = vld [vmem:[%s13415_s3 + $0xb18] sm:$0xf0] }
 0x17e   :  { %3092 = vmatpush.bf16.msra.mxu2 %v6988_v27  ;;  %v6668_v27 = vor.u32 %v8518_v37, %v6665_v3  ;;  %v7339_v37 = vld [vmem:[%s13418_s5 + $0x210] sm:$0xf]  ;;  %v8690_v3 = vld [vmem:[%s13418_s5 + $0x224] sm:$0xf0] }
 0x17f   :  { %3055 = vmatpush.bf16.msrb.mxu3 %v6572_v31  ;;  %v7052_v31 = vor.u32 %v8614_v7, %v7049_v22  ;;  %v8738_v7 = vld [vmem:[%s13418_s5 + $0x3a4] sm:$0xf0]  ;;  %v7148_v22 = vor.u32 %v8642_v33, %v7147_v60  ;;  %v7221_v60 = vld [vmem:[%s13418_s5 + $0x138] sm:$0xf0] }
 0x180   :  { %3067 = vmatpush.bf16.msra.mxu0 %v6716_v34  ;;  %v6924_v34 = vor.u32 %v8582_v9, %v6921_v13  ;;  %v7123_v9 = vld [vmem:[%s13418_s5 + $0x60] sm:$0xf]  ;;  %v7532_v15 = vor.u32 %v8738_v7, %v7531_v20 }
 0x181   :  { %3080 = vmatpush.bf16.msra.mxu1 %v6844_v39  ;;  %v8660_v39 = vld [vmem:[%s13418_s5 + $0x134] sm:$0xf0]  ;;  %v7315_v13 = vld [vmem:[%s13418_s5 + $0x1e0] sm:$0xf]  ;;  %v7124_v19 = vor.u32 %v8636_v10, %v7123_v9  ;;  %v8651_v9 = vld [vmem:[%s13418_s5 + $0xf4] sm:$0xf] }
 0x182   :  { %3093 = vmatpush.bf16.msra.mxu2 %v6972_v42  ;;  %v7628_v42 = vor.u32 %v8762_v29, %v7627_v28  ;;  %v7220_v43 = vor.u32 %v8660_v39, %v7219_v36  ;;  %v7099_v29 = vld [vmem:[%s13418_s5 + $0x30] sm:$0xf]  ;;  %v7197_v10 = vld [vmem:[%s13418_s5 + $0x108] sm:$0xf0] }
 0x183   :  { %3056 = vmatpush.bf16.msrb.mxu3 %v6556_v44  ;;  %v7412_v44 = vor.u32 %v8708_v41, %v7411_v40  ;;  %v7483_v41 = vld [vmem:[%s13418_s5 + $0x330] sm:$0xf] }
 0x184   :  { %3068 = vmatpush.bf16.msra.mxu0 %v6700_v0  ;;  %v7387_v0 = vld [vmem:[%s13418_s5 + $0x270] sm:$0xf] }
 0x185   :  { %3081 = vmatpush.bf16.msra.mxu1 %v6828_v25  ;;  %v7388_v25 = vor.u32 %v8702_v21, %v7387_v0  ;;  %v2774_v0 = vadd.f32 %v11254_v5, %v11210_v46  ;;  %v7437_v46 = vld [vmem:[%s13418_s5 + $0x2e8] sm:$0xf0]  ;;  %v7459_v5 = vld [vmem:[%s13418_s5 + $0x300] sm:$0xf] }
 0x186   :  { %3094 = vmatpush.bf16.msra.mxu2 %v6956_v58 }
 0x187   :  { %3057 = vmatpush.bf16.msrb.mxu3 %v6540_v62  ;;  %v3116_v48 = vmax.f32 %v2774_v0, 0.0 }
 0x188   :  { %3069 = vmatpush.bf16.msra.mxu0 %v6684_v26 }
 0x189   :  { %3082 = vmatpush.bf16.msra.mxu1 %v6812_v4  ;;  %v11693_v7 = vpack.c.bf16 %v3116_v48, %v3116_v48  ;;  %v7101_v48 = vld [vmem:[%s13418_s5 + $0x48] sm:$0xf0] }
 0x18a   :  { %3095 = vmatpush.bf16.msra.mxu2 %v6940_v8  ;;  %3058 = vmatmul.bf16.vlgmr.msrb.gmra.mxu3 %v10892_v6  ;;  %v7603_v6 = vld [vmem:[%s13418_s5 + $0x420] sm:$0xf]  ;;  %v7340_v8 = vor.u32 %v8690_v3, %v7339_v37  ;;  %v8753_v37 = vld [vmem:[%s13418_s5 + $0x424] sm:$0xf]  ;;  %v7605_v3 = vld [vmem:[%s13418_s5 + $0x438] sm:$0xf0] }
 0x18b   :  { %3108 = vmatpush.bf16.msra.mxu3 %v7068_v1  ;;  %v7604_v49 = vor.u32 %v8756_v14, %v7603_v6  ;;  %v7075_v14 = vld [vmem:[%s13418_s5] sm:$0xf] }
 0x18c   :  { %3070 = vmatpush.bf16.msra.mxu0 %v6668_v27  ;;  %v11566_v62 = vpop.f32.mrf.mxu0  ;;  %v11574_v26 = vpop.f32.mrf.mxu2  ;;  %v8732_v27 = vld [vmem:[%s13418_s5 + $0x374] sm:$0xf0] }
 0x18d   :  { %3083 = vmatpush.bf16.msra.mxu1 %v6796_v18  ;;  %v11582_v1 = vpop.f32.mrf.mxu1  ;;  %v11584_v4 = vpop.f32.mrf.mxu3  ;;  %v7508_v36 = vor.u32 %v8732_v27, %v7507_v16  ;;  %v7200_v16 = vor.u32 %v8651_v9, %v7197_v10  ;;  %v7077_v9 = vld [vmem:[%s13418_s5 + $0x18] sm:$0xf0]  ;;  %v8669_v10 = vld [vmem:[%s13418_s5 + $0x184] sm:$0xf] }
 0x18e   :  { %3096 = vmatpush.bf16.msra.mxu2 %v6924_v34  ;;  %v7291_v34 = vld [vmem:[%s13418_s5 + $0x1b0] sm:$0xf] }
 0x18f   :  { %3109 = vmatpush.bf16.msra.mxu3 %v7052_v31  ;;  %3071 = vmatmul.bf16.vlgmr.msra.gmra.mxu0 %v10895_v32  ;;  %v8750_v32 = vld [vmem:[%s13418_s5 + $0x404] sm:$0xf0] }
 0x190   :  { %4301 = vmatpush.bf16.msrb.mxu0 %v7244_v17  ;;  %3084 = vmatmul.bf16.vlgmr.msra.gmra.mxu1 %v10931_v47  ;;  %v8648_v47 = vld [vmem:[%s13418_s5 + $0xd4] sm:$0xf0]  ;;  %v7580_v56 = vor.u32 %v8750_v32, %v7579_v51  ;;  %v8630_v31 = vld [vmem:[%s13418_s5 + $0x44] sm:$0xf0]  ;;  %v2800_v17 = vadd.f32 %v11398_v30, %v2787_v11  ;;  %v7245_v51 = vld [vmem:[%s13418_s5 + $0x168] sm:$0xf0] }
 0x191   :  { %4314 = vmatpush.bf16.msrb.mxu1 %v7436_v35  ;;  %3097 = vmatmul.bf16.vlgmr.msra.gmra.mxu2 %v10937_v50  ;;  %v8696_v50 = vld [vmem:[%s13418_s5 + $0x254] sm:$0xf0]  ;;  %v7172_v58 = vor.u32 %v8648_v47, %v7171_v54  ;;  %v8678_v35 = vld [vmem:[%s13418_s5 + $0x1c4] sm:$0xf0]  ;;  %v7100_v6 = vor.u32 %v8630_v31, %v7099_v29  ;;  %v8711_v32 = vld [vmem:[%s13418_s5 + $0x2d4] sm:$0xf] }
 0x192   :  { %4327 = vmatpush.bf16.msrb.mxu2 %v7628_v42  ;;  %v7364_v59 = vor.u32 %v8696_v50, %v7363_v55  ;;  %v8726_v30 = vld [vmem:[%s13418_s5 + $0x344] sm:$0xf0]  ;;  %v2813_v21 = vadd.f32 %v11380_v12, %v2800_v17  ;;  %v8720_v12 = vld [vmem:[%s13418_s5 + $0x314] sm:$0xf0]  ;;  %v8759_v54 = vld [vmem:[%s13418_s5 + $0x454] sm:$0xf]  ;;  %v7268_v50 = vor.u32 %v8672_v45, %v7267_v23 }
 0x193   :  { %v7629_v47 = vld [vmem:[%s13418_s5 + $0x468] sm:$0xf0]  ;;  %v3115_v55 = vmax.f32 %v10637_v53, 0.0  ;;  %v7460_v33 = vor.u32 %v8720_v12, %v7459_v5  ;;  %v8705_v53 = vld [vmem:[%s13418_s5 + $0x2a4] sm:$0xf] }
 0x194   :  { %4302 = vmatpush.bf16.msrb.mxu0 %v7220_v43  ;;  %v2866_v18 = vpop.f32.mrf.mxu0  ;;  %v2840_v39 = vpop.f32.mrf.mxu2  ;;  %v7292_v43 = vor.u32 %v8678_v35, %v7291_v34  ;;  %v2826_v57 = vadd.f32 %v11390_v24, %v2813_v21  ;;  %v7632_v24 = vor.u32 %v8759_v54, %v7629_v47  ;;  %v8699_v11 = vld [vmem:[%s13418_s5 + $0x274] sm:$0xf]  ;;  %v7173_v29 = vld [vmem:[%s13418_s5 + $0xd8] sm:$0xf0]  ;;  %v8693_v31 = vld [vmem:[%s13418_s5 + $0x244] sm:$0xf] }
 0x195   :  { %4315 = vmatpush.bf16.msrb.mxu1 %v7412_v44  ;;  %v2879_v40 = vpop.f32.mrf.mxu1  ;;  %v2853_v42 = vpop.f32.mrf.mxu3  ;;  %v8624_v44 = vld [vmem:[%s13418_s5 + $0x14] sm:$0xf0]  ;;  %v7365_v18 = vld [vmem:[%s13418_s5 + $0x258] sm:$0xf0]  ;;  %v8741_v17 = vld [vmem:[%s13418_s5 + $0x3c4] sm:$0xf] }
 0x196   :  { %4328 = vmatpush.bf16.msrb.mxu2 %v7604_v49  ;;  %v8663_v49 = vld [vmem:[%s13418_s5 + $0x154] sm:$0xf]  ;;  %v7557_v34 = vld [vmem:[%s13418_s5 + $0x3d8] sm:$0xf0]  ;;  %v7368_v39 = vor.u32 %v8693_v31, %v7365_v18  ;;  %v7341_v42 = vld [vmem:[%s13418_s5 + $0x228] sm:$0xf0] }
 0x197   :  { %v8639_v40 = vld [vmem:[%s13418_s5 + $0x94] sm:$0xf]  ;;  %v3120_v5 = vld [vmem:[%s13419_s2] sm:$0x3]  ;;  %v7509_v54 = vld [vmem:[%s13418_s5 + $0x378] sm:$0xf0] }
 0x198   :  { %4303 = vmatpush.bf16.msrb.mxu0 %v7196_v52  ;;  %v7484_v52 = vor.u32 %v8726_v30, %v7483_v41  ;;  %v7149_v41 = vld [vmem:[%s13418_s5 + $0xa8] sm:$0xf0]  ;;  %v8687_v30 = vld [vmem:[%s13418_s5 + $0x214] sm:$0xf]  ;;  %v8940_v47 = vmov 0  }
 0x199   :  { %4316 = vmatpush.bf16.msrb.mxu1 %v7388_v25  ;;  %v7076_v25 = vor.u32 %v8624_v44, %v7075_v14  ;;  %v7533_v44 = vld [vmem:[%s13418_s5 + $0x3a8] sm:$0xf0]  ;;  %v7152_v0 = vor.u32 %v8639_v40, %v7149_v41  ;;  %8911 = vset.pattern.permute.xlu0 %v8940_v47  ;;  %v8709_v40 = vld [vmem:[%s13418_s5 + $0x2bc] sm:$0xf0] }
 0x19a   :  { %4329 = vmatpush.bf16.msrb.mxu2 %v7580_v56  ;;  %7072 = vmatmul.msk.bf16.vlgmr.msra.gmra.mxu3 %vm2436_vm0, %v11003_v38  ;;  %v8684_v38 = vld [vmem:[%s13418_s5 + $0x1f4] sm:$0xf0]  ;;  %v7248_v56 = vor.u32 %v8663_v49, %v7245_v51  ;;  %v7344_v49 = vor.u32 %v8687_v30, %v7341_v42  ;;  %v8633_v51 = vld [vmem:[%s13418_s5 + $0x64] sm:$0xf]  ;;  %v7795_v47 = vld [vmem:[%s13418_s5 + $0x5a0] sm:$0xf] }
 0x19b   :  { %v7316_v28 = vor.u32 %v8684_v38, %v7315_v13  ;;  %v7608_v13 = vor.u32 %v8753_v37, %v7605_v3  ;;  %v8747_v38 = vld [vmem:[%s13418_s5 + $0x3f4] sm:$0xf]  ;;  %3123 = vperm.xlu0 %8911, %v3120_v5   ;;  %v8757_v5 = vld [vmem:[%s13418_s5 + $0x43c] sm:$0xf0] }
 0x19c   :  { %4304 = vmatpush.bf16.msrb.mxu0 %v7172_v58  ;;  %v7440_v58 = vor.u32 %v8711_v32, %v7437_v46  ;;  %v7125_v32 = vld [vmem:[%s13418_s5 + $0x78] sm:$0xf0] }
 0x19d   :  { %4317 = vmatpush.bf16.msrb.mxu1 %v7364_v59  ;;  %v8657_v59 = vld [vmem:[%s13418_s5 + $0x124] sm:$0xf]  ;;  %v7317_v46 = vld [vmem:[%s13418_s5 + $0x1f8] sm:$0xf0] }
 0x19e   :  { %4330 = vmatpush.bf16.msrb.mxu2 %v7556_v61  ;;  %v11691_v61 = vpack.c.bf16 %v3115_v55, %v3115_v55  ;;  %v7224_v20 = vor.u32 %v8657_v59, %v7221_v60  ;;  %v7128_v55 = vor.u32 %v8633_v51, %v7125_v32 }
 0x1a0   :  { %4305 = vmatpush.bf16.msrb.mxu0 %v7148_v22  ;;  %v2839_v22 = vadd.f32 %v11574_v26, %v2826_v57  ;;  %v7389_v26 = vld [vmem:[%s13418_s5 + $0x288] sm:$0xf0]  ;;  %v8675_v57 = vld [vmem:[%s13418_s5 + $0x1b4] sm:$0xf] }
 0x1a1   :  { %4318 = vmatpush.bf16.msrb.mxu1 %v7340_v8  ;;  %v7416_v8 = vor.u32 %v8705_v53, %v7413_v2  ;;  %v7485_v53 = vld [vmem:[%s13418_s5 + $0x348] sm:$0xf0] }
 0x1a2   :  { %4331 = vmatpush.bf16.msrb.mxu2 %v7532_v15  ;;  %v7581_v15 = vld [vmem:[%s13418_s5 + $0x408] sm:$0xf0]  ;;  %v2852_v27 = vadd.f32 %v11584_v4, %v2839_v22 }
 0x1a3   :  { %v7584_v4 = vor.u32 %v8747_v38, %v7581_v15  ;;  %v7443_v38 = vld [vmem:[%s13418_s5 + $0x2d8] sm:$0xf] }
 0x1a4   :  { %4306 = vmatpush.bf16.msrb.mxu0 %v7124_v19  ;;  %v7392_v19 = vor.u32 %v8699_v11, %v7389_v26  ;;  %v7269_v11 = vld [vmem:[%s13418_s5 + $0x198] sm:$0xf0]  ;;  %v7251_v26 = vld [vmem:[%s13418_s5 + $0x158] sm:$0xf] }
 0x1a5   :  { %4319 = vmatpush.bf16.msrb.mxu1 %v7316_v28  ;;  %v8645_v28 = vld [vmem:[%s13418_s5 + $0xc4] sm:$0xf]  ;;  %v7272_v31 = vor.u32 %v8669_v10, %v7269_v11 }
 0x1a6   :  { %4332 = vmatpush.bf16.msrb.mxu2 %v7508_v36  ;;  %v7176_v35 = vor.u32 %v8645_v28, %v7173_v29  ;;  %v2865_v36 = vadd.f32 %v11566_v62, %v2852_v27  ;;  %v7560_v62 = vor.u32 %v8741_v17, %v7557_v34  ;;  %v8715_v27 = vld [vmem:[%s13418_s5 + $0x2ec] sm:$0xf0]  ;;  %v7461_v28 = vld [vmem:[%s13418_s5 + $0x318] sm:$0xf0]  ;;  %v7227_v17 = vld [vmem:[%s13418_s5 + $0x128] sm:$0xf] }
 0x1a7   :  { %v8661_v34 = vld [vmem:[%s13418_s5 + $0x13c] sm:$0xf0] }
 0x1a8   :  { %4307 = vmatpush.bf16.msrb.mxu0 %v7100_v6  ;;  %v2878_v21 = vadd.f32 %v11582_v1, %v2865_v36  ;;  %v7228_v42 = vor.u32 %v8661_v34, %v7227_v17 }
 0x1a9   :  { %4320 = vmatpush.bf16.msrb.mxu1 %v7292_v43  ;;  %v8735_v43 = vld [vmem:[%s13418_s5 + $0x394] sm:$0xf] }
 0x1aa   :  { %4333 = vmatpush.bf16.msrb.mxu2 %v7484_v52  ;;  %v8681_v52 = vld [vmem:[%s13418_s5 + $0x1e4] sm:$0xf]  ;;  %v7536_v1 = vor.u32 %v8735_v43, %v7533_v44  ;;  %v8655_v44 = vld [vmem:[%s13418_s5 + $0x10c] sm:$0xf0] }
 0x1ac   :  { %4308 = vmatpush.bf16.msrb.mxu0 %v7076_v25  ;;  %v2916_v6 = vpop.f32.mrf.mxu0  ;;  %v2890_v23 = vpop.f32.mrf.mxu2  ;;  %v8729_v25 = vld [vmem:[%s13418_s5 + $0x364] sm:$0xf] }
 0x1ad   :  { %4321 = vmatpush.bf16.msrb.mxu1 %v7268_v50  ;;  %v11748_v14 = vpop.f32.mrf.mxu1  ;;  %v2903_v45 = vpop.f32.mrf.mxu3  ;;  %v2891_v12 = vadd.f32 %v2890_v23, %v2878_v21  ;;  %v7320_v50 = vor.u32 %v8681_v52, %v7317_v46  ;;  %v7512_v59 = vor.u32 %v8729_v25, %v7509_v54  ;;  %v7819_v23 = vld [vmem:[%s13418_s5 + $0x5d0] sm:$0xf]  ;;  %v7395_v21 = vld [vmem:[%s13418_s5 + $0x278] sm:$0xf]  ;;  %v8649_v54 = vld [vmem:[%s13418_s5 + $0xdc] sm:$0xf0] }
 0x1ae   :  { %4334 = vmatpush.bf16.msrb.mxu2 %v7460_v33  ;;  %v8723_v33 = vld [vmem:[%s13418_s5 + $0x334] sm:$0xf] }
 0x1af   :  { %4309 = vmatmul.bf16.vlgmr.msrb.gmra.mxu0 %v11691_v61  ;;  %v2904_v60 = vadd.f32 %v2903_v45, %v2891_v12  ;;  %v7488_v15 = vor.u32 %v8723_v33, %v7485_v53  ;;  %v8810_v45 = vld [vmem:[%s13418_s5 + $0x5e4] sm:$0xf0]  ;;  %v8751_v33 = vld [vmem:[%s13418_s5 + $0x40c] sm:$0xf0]  ;;  %v7155_v53 = vld [vmem:[%s13418_s5 + $0x98] sm:$0xf] }
 0x1b0   :  { %4353 = vmatpush.bf16.msra.mxu0 %v7248_v56  ;;  %4322 = vmatmul.bf16.vlgmr.msrb.gmra.mxu1 %v11693_v7  ;;  %v8627_v56 = vld [vmem:[%s13418_s5 + $0x34] sm:$0xf]  ;;  %v7820_v51 = vor.u32 %v8810_v45, %v7819_v23  ;;  %v7179_v12 = vld [vmem:[%s13418_s5 + $0xc8] sm:$0xf] }
 0x1b1   :  { %4366 = vmatpush.bf16.msra.mxu1 %v7440_v58  ;;  %v7293_v58 = vld [vmem:[%s13418_s5 + $0x1c8] sm:$0xf0]  ;;  %v7104_v3 = vor.u32 %v8627_v56, %v7101_v48  ;;  %v8697_v56 = vld [vmem:[%s13418_s5 + $0x25c] sm:$0xf0] }
 0x1b2   :  { %4379 = vmatpush.bf16.msra.mxu2 %v7632_v24  ;;  %4340 = vmatpush.bf16.msrb.mxu3 %v7820_v51  ;;  %v8625_v51 = vld [vmem:[%s13418_s5 + $0x1c] sm:$0xf0] }
 0x1b4   :  { %4354 = vmatpush.bf16.msra.mxu0 %v7224_v20  ;;  %v2918_v2 = vpop.f32.mrf.mxu0  ;;  %v2892_v37 = vpop.f32.mrf.mxu2  ;;  %v8621_v20 = vld [vmem:[%s13418_s5 + $0x4] sm:$0xf] }
 0x1b5   :  { %4367 = vmatpush.bf16.msra.mxu1 %v7416_v8  ;;  %v2931_v24 = vpop.f32.mrf.mxu1  ;;  %v2905_v22 = vpop.f32.mrf.mxu3  ;;  %v7296_v8 = vor.u32 %v8675_v57, %v7293_v58  ;;  %v7080_v29 = vor.u32 %v8621_v20, %v7077_v9  ;;  %v7771_v37 = vld [vmem:[%s13418_s5 + $0x570] sm:$0xf]  ;;  %v7347_v20 = vld [vmem:[%s13418_s5 + $0x218] sm:$0xf] }
 0x1b6   :  { %4380 = vmatpush.bf16.msra.mxu2 %v7608_v13  ;;  %v8667_v13 = vld [vmem:[%s13418_s5 + $0x16c] sm:$0xf0] }
 0x1b7   :  { %v7252_v18 = vor.u32 %v8667_v13, %v7251_v26  ;;  %v8643_v24 = vld [vmem:[%s13418_s5 + $0xac] sm:$0xf0]  ;;  %v7563_v26 = vld [vmem:[%s13418_s5 + $0x3c8] sm:$0xf]  ;;  %v8745_v13 = vld [vmem:[%s13418_s5 + $0x3dc] sm:$0xf0] }
 0x1b8   :  { %4355 = vmatpush.bf16.msra.mxu0 %v7200_v16  ;;  %v2917_v16 = vadd.f32 %v2916_v6, %v2904_v60  ;;  %v8763_v6 = vld [vmem:[%s13418_s5 + $0x46c] sm:$0xf0]  ;;  %v7587_v60 = vld [vmem:[%s13418_s5 + $0x3f8] sm:$0xf]  ;;  %v7156_v11 = vor.u32 %v8643_v24, %v7155_v53  ;;  %v7564_v17 = vor.u32 %v8745_v13, %v7563_v26  ;;  %v7467_v13 = vld [vmem:[%s13418_s5 + $0x308] sm:$0xf] }
 0x1b9   :  { %4368 = vmatpush.bf16.msra.mxu1 %v7392_v19  ;;  %v8717_v19 = vld [vmem:[%s13418_s5 + $0x304] sm:$0xf]  ;;  %v8691_v22 = vld [vmem:[%s13418_s5 + $0x22c] sm:$0xf0]  ;;  %v7588_v9 = vor.u32 %v8751_v33, %v7587_v60 }
 0x1ba   :  { %4381 = vmatpush.bf16.msra.mxu2 %v7584_v4  ;;  %v7444_v4 = vor.u32 %v8715_v27, %v7443_v38  ;;  %v2930_v36 = vadd.f32 %v11748_v14, %v2917_v16  ;;  %v7203_v14 = vld [vmem:[%s13418_s5 + $0xf8] sm:$0xf]  ;;  %v7131_v38 = vld [vmem:[%s13418_s5 + $0x68] sm:$0xf]  ;;  %v7348_v27 = vor.u32 %v8691_v22, %v7347_v20  ;;  %v8727_v60 = vld [vmem:[%s13418_s5 + $0x34c] sm:$0xf0] }
 0x1bb   :  { %v7204_v46 = vor.u32 %v8655_v44, %v7203_v14  ;;  %v7515_v44 = vld [vmem:[%s13418_s5 + $0x368] sm:$0xf] }
 0x1bc   :  { %4356 = vmatpush.bf16.msra.mxu0 %v7176_v35  ;;  %v7464_v35 = vor.u32 %v8717_v19, %v7461_v28  ;;  %v2942_v41 = vpop.f32.mrf.mxu2  ;;  %v8637_v19 = vld [vmem:[%s13418_s5 + $0x7c] sm:$0xf0]  ;;  %v8774_v20 = vld [vmem:[%s13418_s5 + $0x4c4] sm:$0xf0] }
 0x1bd   :  { %4369 = vmatpush.bf16.msra.mxu1 %v7368_v39  ;;  %v7419_v39 = vld [vmem:[%s13418_s5 + $0x2a8] sm:$0xf]  ;;  %v2943_v30 = vadd.f32 %v2942_v41, %v2930_v36  ;;  %v7747_v28 = vld [vmem:[%s13418_s5 + $0x540] sm:$0xf]  ;;  %v7132_v34 = vor.u32 %v8637_v19, %v7131_v38  ;;  %v8739_v36 = vld [vmem:[%s13418_s5 + $0x3ac] sm:$0xf0] }
 0x1be   :  { %4382 = vmatpush.bf16.msra.mxu2 %v7560_v62  ;;  %v7635_v62 = vld [vmem:[%s13418_s5 + $0x458] sm:$0xf]  ;;  %v7420_v43 = vor.u32 %v8709_v40, %v7419_v39  ;;  %v8631_v41 = vld [vmem:[%s13418_s5 + $0x4c] sm:$0xf0]  ;;  %v8721_v38 = vld [vmem:[%s13418_s5 + $0x31c] sm:$0xf0] }
 0x1bf   :  { %v7636_v32 = vor.u32 %v8763_v6, %v7635_v62  ;;  %v7107_v39 = vld [vmem:[%s13418_s5 + $0x38] sm:$0xf]  ;;  %v8679_v6 = vld [vmem:[%s13418_s5 + $0x1cc] sm:$0xf0] }
 0x1c0   :  { %4357 = vmatpush.bf16.msra.mxu0 %v7152_v0  ;;  %v3117_v0 = vmax.f32 %v2943_v30, 0.0  ;;  %v7723_v30 = vld [vmem:[%s13418_s5 + $0x510] sm:$0xf]  ;;  %v7299_v62 = vld [vmem:[%s13418_s5 + $0x1b8] sm:$0xf] }
 0x1c1   :  { %4370 = vmatpush.bf16.msra.mxu1 %v7344_v49  ;;  %v8703_v49 = vld [vmem:[%s13418_s5 + $0x28c] sm:$0xf0] }
 0x1c2   :  { %4383 = vmatpush.bf16.msra.mxu2 %v7536_v1  ;;  %v11865_v52 = vpack.c.bf16 %v3117_v0, %v3117_v0  ;;  %v7611_v1 = vld [vmem:[%s13418_s5 + $0x428] sm:$0xf]  ;;  %v7396_v25 = vor.u32 %v8703_v49, %v7395_v21  ;;  %v7108_v0 = vor.u32 %v8631_v41, %v7107_v39  ;;  %v8733_v21 = vld [vmem:[%s13418_s5 + $0x37c] sm:$0xf0]  ;;  %v8700_v39 = vld [vmem:[%s13418_s5 + $0x27c] sm:$0xf] }
 0x1c3   :  { %v7612_v57 = vor.u32 %v8757_v5, %v7611_v1  ;;  %v7083_v49 = vld [vmem:[%s13418_s5 + $0x8] sm:$0xf]  ;;  %v7300_v1 = vor.u32 %v8679_v6, %v7299_v62  ;;  %v7821_v41 = vld [vmem:[%s13418_s5 + $0x5e8] sm:$0xf0] }
 0x1c4   :  { %4358 = vmatpush.bf16.msra.mxu0 %v7128_v55  ;;  %v8804_v55 = vld [vmem:[%s13418_s5 + $0x5b4] sm:$0xf0]  ;;  %4335 = vmatmul.bf16.vlgmr.msrb.gmra.mxu2 %v11865_v52  ;;  %v2944_v58 = vpop.f32.mrf.mxu2  ;;  %v7275_v5 = vld [vmem:[%s13418_s5 + $0x188] sm:$0xf]  ;;  %v8754_v6 = vld [vmem:[%s13418_s5 + $0x42c] sm:$0xf] }
 0x1c5   :  { %4371 = vmatpush.bf16.msra.mxu1 %v7320_v50  ;;  %v7371_v50 = vld [vmem:[%s13418_s5 + $0x248] sm:$0xf]  ;;  %v7796_v48 = vor.u32 %v8804_v55, %v7795_v47  ;;  %v8664_v47 = vld [vmem:[%s13418_s5 + $0x15c] sm:$0xf]  ;;  %v7253_v55 = vld [vmem:[%s13418_s5 + $0x170] sm:$0xf0]  ;;  %v7084_v58 = vor.u32 %v8625_v51, %v7083_v49 }
 0x1c6   :  { %4384 = vmatpush.bf16.msra.mxu2 %v7512_v59  ;;  %v7180_v59 = vor.u32 %v8649_v54, %v7179_v12  ;;  %v7372_v2 = vor.u32 %v8697_v56, %v7371_v50  ;;  %v7699_v12 = vld [vmem:[%s13418_s5 + $0x4e0] sm:$0xf]  ;;  %v7516_v56 = vor.u32 %v8733_v21, %v7515_v44  ;;  %v7256_v53 = vor.u32 %v8664_v47, %v7253_v55  ;;  %v7797_v21 = vld [vmem:[%s13418_s5 + $0x5b8] sm:$0xf0]  ;;  %v8694_v49 = vld [vmem:[%s13418_s5 + $0x24c] sm:$0xf] }
 0x1c7   :  { %4341 = vmatpush.bf16.msrb.mxu3 %v7796_v48  ;;  %v8673_v54 = vld [vmem:[%s13418_s5 + $0x19c] sm:$0xf0]  ;;  %v8712_v48 = vld [vmem:[%s13418_s5 + $0x2dc] sm:$0xf]  ;;  %v7373_v51 = vld [vmem:[%s13418_s5 + $0x260] sm:$0xf0] }
 0x1c8   :  { %4359 = vmatpush.bf16.msra.mxu0 %v7104_v3  ;;  %v8798_v3 = vld [vmem:[%s13418_s5 + $0x584] sm:$0xf0]  ;;  %v7276_v33 = vor.u32 %v8673_v54, %v7275_v5  ;;  %v8748_v5 = vld [vmem:[%s13418_s5 + $0x3fc] sm:$0xf]  ;;  %v7376_v54 = vor.u32 %v8694_v49, %v7373_v51  ;;  %v7157_v47 = vld [vmem:[%s13418_s5 + $0xb0] sm:$0xf0] }
 0x1c9   :  { %4372 = vmatpush.bf16.msra.mxu1 %v7296_v8  ;;  %v7772_v8 = vor.u32 %v8798_v3, %v7771_v37  ;;  %v8658_v37 = vld [vmem:[%s13418_s5 + $0x12c] sm:$0xf]  ;;  %v7229_v3 = vld [vmem:[%s13418_s5 + $0x140] sm:$0xf0]  ;;  %v8795_v55 = vld [vmem:[%s13418_s5 + $0x574] sm:$0xf] }
 0x1ca   :  { %4385 = vmatpush.bf16.msra.mxu2 %v7488_v15  ;;  %v7232_v19 = vor.u32 %v8658_v37, %v7229_v3  ;;  %v7277_v51 = vld [vmem:[%s13418_s5 + $0x1a0] sm:$0xf0] }
 0x1cb   :  { %4342 = vmatpush.bf16.msrb.mxu3 %v7772_v8  ;;  %v8706_v8 = vld [vmem:[%s13418_s5 + $0x2ac] sm:$0xf] }
 0x1cc   :  { %4360 = vmatpush.bf16.msra.mxu0 %v7080_v29  ;;  %v11916_v10 = vpop.f32.mrf.mxu0  ;;  %v8792_v29 = vld [vmem:[%s13418_s5 + $0x554] sm:$0xf0] }
 0x1cd   :  { %4373 = vmatpush.bf16.msra.mxu1 %v7272_v31  ;;  %v11927_v15 = vpop.f32.mrf.mxu3  ;;  %v11929_v16 = vpop.f32.mrf.mxu1  ;;  %v7323_v31 = vld [vmem:[%s13418_s5 + $0x1e8] sm:$0xf] }
 0x1ce   :  { %4386 = vmatpush.bf16.msra.mxu2 %v7464_v35  ;;  %v7539_v35 = vld [vmem:[%s13418_s5 + $0x398] sm:$0xf] }
 0x1cf   :  { %4361 = vmatmul.bf16.vlgmr.msra.gmra.mxu0 %v11691_v61 }
 0x1d0   :  { %4405 = vmatpush.bf16.msrb.mxu0 %v7252_v18  ;;  %4374 = vmatmul.bf16.vlgmr.msra.gmra.mxu1 %v11693_v7  ;;  %v8685_v18 = vld [vmem:[%s13418_s5 + $0x1fc] sm:$0xf0] }
 0x1d1   :  { %4418 = vmatpush.bf16.msrb.mxu1 %v7444_v4  ;;  %v7748_v4 = vor.u32 %v8792_v29, %v7747_v28  ;;  %v7324_v40 = vor.u32 %v8685_v18, %v7323_v31  ;;  %v7637_v28 = vld [vmem:[%s13418_s5 + $0x470] sm:$0xf0]  ;;  %v7651_v29 = vld [vmem:[%s13418_s5 + $0x480] sm:$0xf]  ;;  %v8768_v31 = vld [vmem:[%s13418_s5 + $0x494] sm:$0xf0] }
 0x1d2   :  { %4431 = vmatpush.bf16.msrb.mxu2 %v7636_v32 }
 0x1d3   :  { %4343 = vmatpush.bf16.msrb.mxu3 %v7748_v4  ;;  %v8652_v4 = vld [vmem:[%s13418_s5 + $0xfc] sm:$0xf] }
 0x1d4   :  { %4406 = vmatpush.bf16.msrb.mxu0 %v7228_v42  ;;  %v8786_v42 = vld [vmem:[%s13418_s5 + $0x524] sm:$0xf0]  ;;  %v11973_v23 = vpop.f32.mrf.mxu2  ;;  %v2970_v45 = vpop.f32.mrf.mxu0  ;;  %4387 = vmatmul.bf16.vlgmr.msra.gmra.mxu2 %v11865_v52 }
 0x1d5   :  { %4419 = vmatpush.bf16.msrb.mxu1 %v7420_v43  ;;  %v7724_v14 = vor.u32 %v8786_v42, %v7723_v30  ;;  %v7540_v43 = vor.u32 %v8739_v36, %v7539_v35  ;;  %v2957_v32 = vpop.f32.mrf.mxu3  ;;  %v8807_v35 = vld [vmem:[%s13418_s5 + $0x5d4] sm:$0xf]  ;;  %v7468_v36 = vor.u32 %v8721_v38, %v7467_v13  ;;  %v7181_v45 = vld [vmem:[%s13418_s5 + $0xe0] sm:$0xf0] }
 0x1d6   :  { %4432 = vmatpush.bf16.msrb.mxu2 %v7612_v57  ;;  %v7445_v57 = vld [vmem:[%s13418_s5 + $0x2f0] sm:$0xf0]  ;;  %v7824_v42 = vor.u32 %v8807_v35, %v7821_v41  ;;  %v8730_v41 = vld [vmem:[%s13418_s5 + $0x36c] sm:$0xf] }
 0x1d7   :  { %4344 = vmatpush.bf16.msrb.mxu3 %v7724_v14  ;;  %v7448_v24 = vor.u32 %v8712_v48, %v7445_v57  ;;  %v7613_v14 = vld [vmem:[%s13418_s5 + $0x440] sm:$0xf0]  ;;  %v8688_v48 = vld [vmem:[%s13418_s5 + $0x21c] sm:$0xf]  ;;  %v7349_v57 = vld [vmem:[%s13418_s5 + $0x230] sm:$0xf0] }
 0x1d8   :  { %4407 = vmatpush.bf16.msrb.mxu0 %v7204_v46  ;;  %v2983_v46 = vpop.f32.mrf.mxu1  ;;  %v7352_v3 = vor.u32 %v8688_v48, %v7349_v57  ;;  %v7301_v35 = vld [vmem:[%s13418_s5 + $0x1d0] sm:$0xf0] }
 0x1d9   :  { %4420 = vmatpush.bf16.msrb.mxu1 %v7396_v25  ;;  %v8780_v25 = vld [vmem:[%s13418_s5 + $0x4f4] sm:$0xf0]  ;;  %v7616_v46 = vor.u32 %v8754_v6, %v7613_v14  ;;  %v8622_v6 = vld [vmem:[%s13418_s5 + $0xc] sm:$0xf]  ;;  %v7085_v14 = vld [vmem:[%s13418_s5 + $0x20] sm:$0xf0] }
 0x1da   :  { %4433 = vmatpush.bf16.msrb.mxu2 %v7588_v9  ;;  %v7700_v50 = vor.u32 %v8780_v25, %v7699_v12  ;;  %v7421_v9 = vld [vmem:[%s13418_s5 + $0x2c0] sm:$0xf0]  ;;  %v7589_v12 = vld [vmem:[%s13418_s5 + $0x410] sm:$0xf0]  ;;  %v8640_v25 = vld [vmem:[%s13418_s5 + $0x9c] sm:$0xf] }
 0x1db   :  { %v7424_v18 = vor.u32 %v8706_v8, %v7421_v9  ;;  %v7749_v8 = vld [vmem:[%s13418_s5 + $0x558] sm:$0xf0] }
 0x1dc   :  { %4408 = vmatpush.bf16.msrb.mxu0 %v7180_v59  ;;  %v7491_v59 = vld [vmem:[%s13418_s5 + $0x338] sm:$0xf]  ;;  %4345 = vmatpush.bf16.msrb.mxu3 %v7700_v50  ;;  %v7773_v50 = vld [vmem:[%s13418_s5 + $0x588] sm:$0xf0] }
 0x1dd   :  { %4421 = vmatpush.bf16.msrb.mxu1 %v7372_v2  ;;  %v7675_v2 = vld [vmem:[%s13418_s5 + $0x4b0] sm:$0xf]  ;;  %v7492_v22 = vor.u32 %v8727_v60, %v7491_v59  ;;  %v7592_v59 = vor.u32 %v8748_v5, %v7589_v12  ;;  %v8716_v12 = vld [vmem:[%s13418_s5 + $0x2f4] sm:$0xf0] }
 0x1de   :  { %4434 = vmatpush.bf16.msrb.mxu2 %v7564_v17  ;;  %v7676_v26 = vor.u32 %v8774_v20, %v7675_v2  ;;  %v7205_v17 = vld [vmem:[%s13418_s5 + $0x110] sm:$0xf0]  ;;  %v7565_v2 = vld [vmem:[%s13418_s5 + $0x3e0] sm:$0xf0] }
 0x1df   :  { %v7208_v62 = vor.u32 %v8652_v4, %v7205_v17  ;;  %v7133_v20 = vld [vmem:[%s13418_s5 + $0x80] sm:$0xf0]  ;;  %v7725_v4 = vld [vmem:[%s13418_s5 + $0x528] sm:$0xf0] }
 0x1e0   :  { %4409 = vmatpush.bf16.msrb.mxu0 %v7156_v11  ;;  %v2996_v11 = vpop.f32.mrf.mxu2  ;;  %4346 = vmatpush.bf16.msrb.mxu3 %v7676_v26  ;;  %v7325_v26 = vld [vmem:[%s13418_s5 + $0x200] sm:$0xf0] }
 0x1e1   :  { %4422 = vmatpush.bf16.msrb.mxu1 %v7348_v27  ;;  %v8760_v27 = vld [vmem:[%s13418_s5 + $0x45c] sm:$0xf]  ;;  %v8682_v11 = vld [vmem:[%s13418_s5 + $0x1ec] sm:$0xf] }
 0x1e2   :  { %4435 = vmatpush.bf16.msrb.mxu2 %v7540_v43  ;;  %v7640_v30 = vor.u32 %v8760_v27, %v7637_v28  ;;  %v8646_v43 = vld [vmem:[%s13418_s5 + $0xcc] sm:$0xf]  ;;  %v8628_v28 = vld [vmem:[%s13418_s5 + $0x3c] sm:$0xf] }
 0x1e4   :  { %4410 = vmatpush.bf16.msrb.mxu0 %v7132_v34  ;;  %v7652_v34 = vor.u32 %v8768_v31, %v7651_v29  ;;  %v7328_v29 = vor.u32 %v8682_v11, %v7325_v26  ;;  %v7109_v31 = vld [vmem:[%s13418_s5 + $0x50] sm:$0xf0]  ;;  %v8764_v11 = vld [vmem:[%s13418_s5 + $0x474] sm:$0xf0]  ;;  %v8765_v26 = vld [vmem:[%s13418_s5 + $0x484] sm:$0xf] }
 0x1e5   :  { %4423 = vmatpush.bf16.msrb.mxu1 %v7324_v40  ;;  %v7397_v40 = vld [vmem:[%s13418_s5 + $0x290] sm:$0xf0] }
 0x1e6   :  { %4436 = vmatpush.bf16.msrb.mxu2 %v7516_v56  ;;  %v7400_v44 = vor.u32 %v8700_v39, %v7397_v40  ;;  %4347 = vmatpush.bf16.msrb.mxu3 %v7652_v34  ;;  %v442_v56 = vperm.slane %v11571_v63, 3  ;;  %v8742_v63 = vld [vmem:[%s13418_s5 + $0x3cc] sm:$0xf]  ;;  %v8676_v34 = vld [vmem:[%s13418_s5 + $0x1bc] sm:$0xf] }
 0x1e7   :  { %v7568_v38 = vor.u32 %v8742_v63, %v7565_v2  ;;  %v8710_v2 = vld [vmem:[%s13418_s5 + $0x2c4] sm:$0xf0] }
 0x1e8   :  { %4411 = vmatpush.bf16.msrb.mxu0 %v7108_v0  ;;  %v8801_v0 = vld [vmem:[%s13418_s5 + $0x5a4] sm:$0xf]  ;;  %v2956_v9 = vadd.f32 %v11927_v15, %v442_v56  ;;  %v7541_v15 = vld [vmem:[%s13418_s5 + $0x3b0] sm:$0xf0] }
 0x1e9   :  { %4424 = vmatpush.bf16.msrb.mxu1 %v7300_v1  ;;  %v7800_v32 = vor.u32 %v8801_v0, %v7797_v21  ;;  %v7184_v1 = vor.u32 %v8646_v43, %v7181_v45  ;;  %v8670_v45 = vld [vmem:[%s13418_s5 + $0x18c] sm:$0xf]  ;;  %v8777_v0 = vld [vmem:[%s13418_s5 + $0x4e4] sm:$0xf]  ;;  %v7701_v21 = vld [vmem:[%s13418_s5 + $0x4f8] sm:$0xf0] }
 0x1ea   :  { %4437 = vmatpush.bf16.msrb.mxu2 %v7492_v22  ;;  %4392 = vmatpush.bf16.msra.mxu3 %v7824_v42  ;;  %v8789_v22 = vld [vmem:[%s13418_s5 + $0x544] sm:$0xf]  ;;  %v2969_v17 = vadd.f32 %v11916_v10, %v2956_v9  ;;  %v7112_v10 = vor.u32 %v8628_v28, %v7109_v31  ;;  %v8771_v56 = vld [vmem:[%s13418_s5 + $0x4b4] sm:$0xf]  ;;  %v8704_v31 = vld [vmem:[%s13418_s5 + $0x294] sm:$0xf0] }
 0x1eb   :  { %v7752_v13 = vor.u32 %v8789_v22, %v7749_v8  ;;  %v7469_v22 = vld [vmem:[%s13418_s5 + $0x320] sm:$0xf0]  ;;  %v7643_v8 = vld [vmem:[%s13418_s5 + $0x460] sm:$0xf] }
 0x1ec   :  { %4412 = vmatpush.bf16.msrb.mxu0 %v7084_v58  ;;  %v7776_v58 = vor.u32 %v8795_v55, %v7773_v50  ;;  %v12121_v60 = vpop.f32.mrf.mxu0  ;;  %v2982_v49 = vadd.f32 %v11929_v16, %v2969_v17  ;;  %v7451_v16 = vld [vmem:[%s13418_s5 + $0x2e0] sm:$0xf]  ;;  %v7280_v55 = vor.u32 %v8670_v45, %v7277_v51  ;;  %v7619_v17 = vld [vmem:[%s13418_s5 + $0x430] sm:$0xf]  ;;  %v8644_v45 = vld [vmem:[%s13418_s5 + $0xb4] sm:$0xf0] }
 0x1ed   :  { %4425 = vmatpush.bf16.msrb.mxu1 %v7276_v33  ;;  %v7160_v33 = vor.u32 %v8640_v25, %v7157_v47  ;;  %v12134_v37 = vpop.f32.mrf.mxu1  ;;  %v7088_v25 = vor.u32 %v8622_v6, %v7085_v14  ;;  %v7493_v47 = vld [vmem:[%s13418_s5 + $0x350] sm:$0xf0]  ;;  %v7452_v57 = vor.u32 %v8716_v12, %v7451_v16  ;;  %v8752_v6 = vld [vmem:[%s13418_s5 + $0x414] sm:$0xf0] }
 0x1ee   :  { %4438 = vmatpush.bf16.msrb.mxu2 %v7468_v36  ;;  %4393 = vmatpush.bf16.msra.mxu3 %v7800_v32  ;;  %v7259_v32 = vld [vmem:[%s13418_s5 + $0x160] sm:$0xf]  ;;  %v2995_v48 = vadd.f32 %v11973_v23, %v2982_v49  ;;  %v7427_v23 = vld [vmem:[%s13418_s5 + $0x2b0] sm:$0xf] }
 0x1ef   :  { %4413 = vmatmul.bf16.vlgmr.msrb.gmra.mxu0 %v11691_v61 }
 0x1f0   :  { %4457 = vmatpush.bf16.msra.mxu0 %v7256_v53  ;;  %4426 = vmatmul.bf16.vlgmr.msrb.gmra.mxu1 %v11693_v7  ;;  %v12123_v53 = vpop.f32.mrf.mxu3 }
 0x1f1   :  { %4470 = vmatpush.bf16.msra.mxu1 %v7448_v24  ;;  %4439 = vmatmul.bf16.vlgmr.msrb.gmra.mxu2 %v11865_v52  ;;  %v8634_v24 = vld [vmem:[%s13418_s5 + $0x6c] sm:$0xf] }
 0x1f2   :  { %4483 = vmatpush.bf16.msra.mxu2 %v7640_v30  ;;  %4394 = vmatpush.bf16.msra.mxu3 %v7776_v58  ;;  %v7136_v27 = vor.u32 %v8634_v24, %v7133_v20  ;;  %v7235_v58 = vld [vmem:[%s13418_s5 + $0x130] sm:$0xf]  ;;  %v8718_v20 = vld [vmem:[%s13418_s5 + $0x30c] sm:$0xf] }
 0x1f4   :  { %4458 = vmatpush.bf16.msra.mxu0 %v7232_v19  ;;  %v8736_v19 = vld [vmem:[%s13418_s5 + $0x39c] sm:$0xf]  ;;  %v12177_v40 = vpop.f32.mrf.mxu2  ;;  %v3022_v30 = vpop.f32.mrf.mxu0 }
 0x1f5   :  { %4471 = vmatpush.bf16.msra.mxu1 %v7424_v18  ;;  %v8783_v18 = vld [vmem:[%s13418_s5 + $0x514] sm:$0xf]  ;;  %v7544_v39 = vor.u32 %v8736_v19, %v7541_v15  ;;  %v3035_v43 = vpop.f32.mrf.mxu1  ;;  %v7211_v19 = vld [vmem:[%s13418_s5 + $0x100] sm:$0xf]  ;;  %v8656_v15 = vld [vmem:[%s13418_s5 + $0x114] sm:$0xf0] }
 0x1f6   :  { %4484 = vmatpush.bf16.msra.mxu2 %v7616_v46  ;;  %4395 = vmatpush.bf16.msra.mxu3 %v7752_v13  ;;  %v7728_v36 = vor.u32 %v8783_v18, %v7725_v4  ;;  %v8668_v46 = vld [vmem:[%s13418_s5 + $0x174] sm:$0xf0]  ;;  %v7653_v13 = vld [vmem:[%s13418_s5 + $0x498] sm:$0xf0]  ;;  %v7644_v18 = vor.u32 %v8764_v11, %v7643_v8  ;;  %v7212_v4 = vor.u32 %v8656_v15, %v7211_v19  ;;  %v7379_v30 = vld [vmem:[%s13418_s5 + $0x250] sm:$0xf] }
 0x1f7   :  { %v7260_v50 = vor.u32 %v8668_v46, %v7259_v32  ;;  %v7656_v28 = vor.u32 %v8765_v26, %v7653_v13  ;;  %v7523_v11 = vld [vmem:[%s13418_s5 + $0x370] sm:$0xf]  ;;  %v8734_v26 = vld [vmem:[%s13418_s5 + $0x384] sm:$0xf0] }
 0x1f8   :  { %4459 = vmatpush.bf16.msra.mxu0 %v7208_v62  ;;  %v3009_v42 = vpop.f32.mrf.mxu3  ;;  %v7517_v62 = vld [vmem:[%s13418_s5 + $0x380] sm:$0xf0]  ;;  %v7283_v19 = vld [vmem:[%s13418_s5 + $0x190] sm:$0xf]  ;;  %v8674_v15 = vld [vmem:[%s13418_s5 + $0x1a4] sm:$0xf0] }
 0x1f9   :  { %4472 = vmatpush.bf16.msra.mxu1 %v7400_v44  ;;  %v7304_v44 = vor.u32 %v8676_v34, %v7301_v35  ;;  %v7520_v5 = vor.u32 %v8730_v41, %v7517_v62  ;;  %v8758_v34 = vld [vmem:[%s13418_s5 + $0x444] sm:$0xf0]  ;;  %v7595_v62 = vld [vmem:[%s13418_s5 + $0x400] sm:$0xf] }
 0x1fa   :  { %4485 = vmatpush.bf16.msra.mxu2 %v7592_v59  ;;  %4396 = vmatpush.bf16.msra.mxu3 %v7728_v36  ;;  %v8662_v59 = vld [vmem:[%s13418_s5 + $0x144] sm:$0xf0]  ;;  %v7596_v49 = vor.u32 %v8752_v6, %v7595_v62  ;;  %v8707_v6 = vld [vmem:[%s13418_s5 + $0x2b4] sm:$0xf] }
 0x1fb   :  { %v7236_v9 = vor.u32 %v8662_v59, %v7235_v58  ;;  %v8650_v41 = vld [vmem:[%s13418_s5 + $0xe4] sm:$0xf0]  ;;  %v7115_v59 = vld [vmem:[%s13418_s5 + $0x40] sm:$0xf] }
 0x1fc   :  { %4460 = vmatpush.bf16.msra.mxu0 %v7184_v1  ;;  %v7704_v1 = vor.u32 %v8777_v0, %v7701_v21  ;;  %v3048_v24 = vpop.f32.mrf.mxu2  ;;  %v7355_v0 = vld [vmem:[%s13418_s5 + $0x220] sm:$0xf] }
 0x1fd   :  { %4473 = vmatpush.bf16.msra.mxu1 %v7376_v54  ;;  %v8724_v54 = vld [vmem:[%s13418_s5 + $0x33c] sm:$0xf] }
 0x1fe   :  { %4486 = vmatpush.bf16.msra.mxu2 %v7568_v38  ;;  %4397 = vmatpush.bf16.msra.mxu3 %v7704_v1  ;;  %v7496_v63 = vor.u32 %v8724_v54, %v7493_v47  ;;  %v3008_v38 = vadd.f32 %v12123_v53, %v2995_v48  ;;  %v7403_v53 = vld [vmem:[%s13418_s5 + $0x280] sm:$0xf]  ;;  %v7571_v1 = vld [vmem:[%s13418_s5 + $0x3d0] sm:$0xf]  ;;  %v8638_v54 = vld [vmem:[%s13418_s5 + $0x84] sm:$0xf0] }
 0x1ff   :  { %v7404_v36 = vor.u32 %v8704_v31, %v7403_v53  ;;  %v7331_v47 = vld [vmem:[%s13418_s5 + $0x1f0] sm:$0xf]  ;;  %v7547_v48 = vld [vmem:[%s13418_s5 + $0x3a0] sm:$0xf]  ;;  %v7524_v31 = vor.u32 %v8734_v26, %v7523_v11 }
 0x200   :  { %4461 = vmatpush.bf16.msra.mxu0 %v7160_v33  ;;  %v7677_v33 = vld [vmem:[%s13418_s5 + $0x4c8] sm:$0xf0]  ;;  %v3021_v35 = vadd.f32 %v12121_v60, %v3008_v38  ;;  %v8698_v60 = vld [vmem:[%s13418_s5 + $0x264] sm:$0xf0]  ;;  %v7091_v38 = vld [vmem:[%s13418_s5 + $0x10] sm:$0xf] }
 0x201   :  { %4474 = vmatpush.bf16.msra.mxu1 %v7352_v3  ;;  %v7680_v3 = vor.u32 %v8771_v56, %v7677_v33  ;;  %v7380_v43 = vor.u32 %v8698_v60, %v7379_v30  ;;  %v8632_v33 = vld [vmem:[%s13418_s5 + $0x54] sm:$0xf0]  ;;  %v8659_v30 = vld [vmem:[%s13418_s5 + $0x134] sm:$0xf]  ;;  %v7237_v60 = vld [vmem:[%s13418_s5 + $0x148] sm:$0xf0] }
 0x202   :  { %4487 = vmatpush.bf16.msra.mxu2 %v7544_v39  ;;  %v7187_v39 = vld [vmem:[%s13418_s5 + $0xd0] sm:$0xf]  ;;  %v3034_v14 = vadd.f32 %v12134_v37, %v3021_v35  ;;  %v8692_v37 = vld [vmem:[%s13418_s5 + $0x234] sm:$0xf0] }
 0x203   :  { %4398 = vmatpush.bf16.msra.mxu3 %v7680_v3  ;;  %v7188_v42 = vor.u32 %v8650_v41, %v7187_v39  ;;  %v7356_v12 = vor.u32 %v8692_v37, %v7355_v0  ;;  %v8728_v35 = vld [vmem:[%s13418_s5 + $0x354] sm:$0xf0]  ;;  %v8799_v26 = vld [vmem:[%s13418_s5 + $0x58c] sm:$0xf0] }
 0x204   :  { %4462 = vmatpush.bf16.msra.mxu0 %v7136_v27  ;;  %v7428_v27 = vor.u32 %v8710_v2, %v7427_v23  ;;  %v3047_v16 = vadd.f32 %v12177_v40, %v3034_v14  ;;  %v8680_v23 = vld [vmem:[%s13418_s5 + $0x1d4] sm:$0xf0]  ;;  %v7429_v14 = vld [vmem:[%s13418_s5 + $0x2c8] sm:$0xf0] }
 0x205   :  { %4475 = vmatpush.bf16.msra.mxu1 %v7328_v29  ;;  %v7472_v29 = vor.u32 %v8718_v20, %v7469_v22  ;;  %v7827_v0 = vld [vmem:[%s13418_s5 + $0x5d8] sm:$0xf] }
 0x206   :  { %4488 = vmatpush.bf16.msra.mxu2 %v7520_v5  ;;  %v8746_v5 = vld [vmem:[%s13418_s5 + $0x3e4] sm:$0xf0] }
 0x207   :  { %4399 = vmatpush.bf16.msra.mxu3 %v7656_v28  ;;  %v7572_v40 = vor.u32 %v8746_v5, %v7571_v1  ;;  %v8665_v28 = vld [vmem:[%s13418_s5 + $0x164] sm:$0xf]  ;;  %v7213_v5 = vld [vmem:[%s13418_s5 + $0x118] sm:$0xf0] }
 0x208   :  { %4463 = vmatpush.bf16.msra.mxu0 %v7112_v10  ;;  %v7620_v10 = vor.u32 %v8758_v34, %v7619_v17  ;;  %v7499_v34 = vld [vmem:[%s13418_s5 + $0x340] sm:$0xf]  ;;  %v8653_v1 = vld [vmem:[%s13418_s5 + $0x104] sm:$0xf] }
 0x209   :  { %4476 = vmatpush.bf16.msra.mxu1 %v7304_v44  ;;  %v7163_v44 = vld [vmem:[%s13418_s5 + $0xa0] sm:$0xf]  ;;  %v7500_v62 = vor.u32 %v8728_v35, %v7499_v34 }
 0x20a   :  { %4489 = vmatpush.bf16.msra.mxu2 %v7496_v63  ;;  %v7164_v46 = vor.u32 %v8644_v45, %v7163_v44  ;;  %v7307_v63 = vld [vmem:[%s13418_s5 + $0x1c0] sm:$0xf]  ;;  %v7475_v44 = vld [vmem:[%s13418_s5 + $0x310] sm:$0xf]  ;;  %v8722_v45 = vld [vmem:[%s13418_s5 + $0x324] sm:$0xf0] }
 0x20b   :  { %v7308_v13 = vor.u32 %v8680_v23, %v7307_v63  ;;  %v8647_v63 = vld [vmem:[%s13418_s5 + $0xd4] sm:$0xf]  ;;  %v7189_v23 = vld [vmem:[%s13418_s5 + $0xe8] sm:$0xf0] }
 0x20c   :  { %4464 = vmatpush.bf16.msra.mxu0 %v7088_v25  ;;  %v3072_v21 = vpop.f32.mrf.mxu0  ;;  %v7139_v25 = vld [vmem:[%s13418_s5 + $0x70] sm:$0xf]  ;;  %v7192_v11 = vor.u32 %v8647_v63, %v7189_v23  ;;  %v8781_v63 = vld [vmem:[%s13418_s5 + $0x4fc] sm:$0xf0]  ;;  %v8731_v23 = vld [vmem:[%s13418_s5 + $0x374] sm:$0xf] }
 0x20d   :  { %4477 = vmatpush.bf16.msra.mxu1 %v7280_v55  ;;  %v3059_v51 = vpop.f32.mrf.mxu3  ;;  %v3085_v32 = vpop.f32.mrf.mxu1  ;;  %v8686_v55 = vld [vmem:[%s13418_s5 + $0x204] sm:$0xf0]  ;;  %v7140_v56 = vor.u32 %v8638_v54, %v7139_v25  ;;  %v8701_v25 = vld [vmem:[%s13418_s5 + $0x284] sm:$0xf]  ;;  %v7405_v54 = vld [vmem:[%s13418_s5 + $0x298] sm:$0xf0] }
 0x20e   :  { %4490 = vmatpush.bf16.msra.mxu2 %v7472_v29  ;;  %v7332_v58 = vor.u32 %v8686_v55, %v7331_v47  ;;  %v7261_v29 = vld [vmem:[%s13418_s5 + $0x178] sm:$0xf0] }
 0x20f   :  { %4465 = vmatmul.bf16.vlgmr.msra.gmra.mxu0 %v11691_v61  ;;  %v7264_v39 = vor.u32 %v8665_v28, %v7261_v29  ;;  %v8689_v28 = vld [vmem:[%s13418_s5 + $0x224] sm:$0xf]  ;;  %v7357_v29 = vld [vmem:[%s13418_s5 + $0x238] sm:$0xf0] }
 0x210   :  { %4509 = vmatpush.bf16.msrb.mxu0 %v7260_v50  ;;  %4478 = vmatmul.bf16.vlgmr.msra.gmra.mxu1 %v11693_v7  ;;  %v3060_v50 = vadd.f32 %v3059_v51, %v3047_v16  ;;  %v8761_v51 = vld [vmem:[%s13418_s5 + $0x464] sm:$0xf] }
 0x211   :  { %4522 = vmatpush.bf16.msrb.mxu1 %v7452_v57  ;;  %4491 = vmatmul.bf16.vlgmr.msra.gmra.mxu2 %v11865_v52  ;;  %v8740_v57 = vld [vmem:[%s13418_s5 + $0x3b4] sm:$0xf0] }
 0x212   :  { %4535 = vmatpush.bf16.msrb.mxu2 %v7644_v18  ;;  %v3073_v2 = vadd.f32 %v3072_v21, %v3060_v50  ;;  %v7548_v20 = vor.u32 %v8740_v57, %v7547_v48  ;;  %v8713_v18 = vld [vmem:[%s13418_s5 + $0x2e4] sm:$0xf]  ;;  %v7240_v21 = vor.u32 %v8659_v30, %v7237_v60  ;;  %v7803_v50 = vld [vmem:[%s13418_s5 + $0x5a8] sm:$0xf]  ;;  %v7216_v48 = vor.u32 %v8653_v1, %v7213_v5  ;;  %v8755_v57 = vld [vmem:[%s13418_s5 + $0x434] sm:$0xf] }
 0x213   :  { %v8743_v30 = vld [vmem:[%s13418_s5 + $0x3d4] sm:$0xf]  ;;  %v7573_v60 = vld [vmem:[%s13418_s5 + $0x3e8] sm:$0xf0]  ;;  %v8737_v1 = vld [vmem:[%s13418_s5 + $0x3a4] sm:$0xf] }
 0x214   :  { %4510 = vmatpush.bf16.msrb.mxu0 %v7236_v9  ;;  %v3098_v24 = vpop.f32.mrf.mxu2  ;;  %v3074_v3 = vpop.f32.mrf.mxu0  ;;  %v7116_v9 = vor.u32 %v8632_v33, %v7115_v59  ;;  %v3086_v53 = vadd.f32 %v3085_v32, %v3073_v2  ;;  %v7645_v32 = vld [vmem:[%s13418_s5 + $0x478] sm:$0xf0]  ;;  %v12447_v59 = vld [vmem:[%s13420_s7] sm:$0x3f]  ;;  %v7408_v33 = vor.u32 %v8701_v25, %v7405_v54  ;;  %v8695_v2 = vld [vmem:[%s13418_s5 + $0x254] sm:$0xf] }
 0x215   :  { %4523 = vmatpush.bf16.msrb.mxu1 %v7428_v27  ;;  %v3061_v22 = vpop.f32.mrf.mxu3  ;;  %v3087_v8 = vpop.f32.mrf.mxu1  ;;  %v8626_v27 = vld [vmem:[%s13418_s5 + $0x24] sm:$0xf0]  ;;  %v7648_v55 = vor.u32 %v8761_v51, %v7645_v32  ;;  %v7549_v5 = vld [vmem:[%s13418_s5 + $0x3b8] sm:$0xf0] }
 0x216   :  { %4536 = vmatpush.bf16.msrb.mxu2 %v7620_v10  ;;  %v7092_v17 = vor.u32 %v8626_v27, %v7091_v38  ;;  %v3099_v10 = vadd.f32 %v3098_v24, %v3086_v53  ;;  %v7381_v24 = vld [vmem:[%s13418_s5 + $0x268] sm:$0xf0]  ;;  %v3329_v8 = vperm.slane %v12447_v59, 0  ;;  %v7597_v38 = vld [vmem:[%s13418_s5 + $0x418] sm:$0xf0] }
 0x217   :  { %v7384_v27 = vor.u32 %v8695_v2, %v7381_v24  ;;  %v7117_v25 = vld [vmem:[%s13418_s5 + $0x58] sm:$0xf0]  ;;  %v7525_v2 = vld [vmem:[%s13418_s5 + $0x388] sm:$0xf0] }
 0x218   :  { %4511 = vmatpush.bf16.msrb.mxu0 %v7212_v4  ;;  %v7453_v4 = vld [vmem:[%s13418_s5 + $0x2f8] sm:$0xf0] }
 0x219   :  { %4524 = vmatpush.bf16.msrb.mxu1 %v7404_v36  ;;  %v7284_v36 = vor.u32 %v8674_v15, %v7283_v19  ;;  %v7456_v41 = vor.u32 %v8713_v18, %v7453_v4  ;;  %v8641_v19 = vld [vmem:[%s13418_s5 + $0xa4] sm:$0xf]  ;;  %v7165_v15 = vld [vmem:[%s13418_s5 + $0xb8] sm:$0xf0]  ;;  %v7755_v4 = vld [vmem:[%s13418_s5 + $0x548] sm:$0xf] }
 0x21a   :  { %4537 = vmatpush.bf16.msrb.mxu2 %v7596_v49  ;;  %v8811_v49 = vld [vmem:[%s13418_s5 + $0x5ec] sm:$0xf0] }
 0x21b   :  { %v7828_v47 = vor.u32 %v8811_v49, %v7827_v0  ;;  %v3119_v0 = vld [vmem:[%s13421_s1] sm:$0xf]  ;;  %v7731_v49 = vld [vmem:[%s13418_s5 + $0x518] sm:$0xf] }
 0x21c   :  { %4512 = vmatpush.bf16.msrb.mxu0 %v7188_v42  ;;  %v3100_v42 = vpop.f32.mrf.mxu2 }
 0x21d   :  { %4525 = vmatpush.bf16.msrb.mxu1 %v7380_v43  ;;  %v3111_v43 = vpop.f32.mrf.mxu3  ;;  %v8635_v42 = vld [vmem:[%s13418_s5 + $0x74] sm:$0xf] }
 0x21e   :  { %4538 = vmatpush.bf16.msrb.mxu2 %v7572_v40  ;;  %v3112_v37 = vadd.f32 %v3111_v43, %v3099_v10  ;;  %v8805_v40 = vld [vmem:[%s13418_s5 + $0x5bc] sm:$0xf0]  ;;  %v7360_v10 = vor.u32 %v8689_v28, %v7357_v29  ;;  %v8683_v43 = vld [vmem:[%s13418_s5 + $0x1f4] sm:$0xf]  ;;  %v8775_v28 = vld [vmem:[%s13418_s5 + $0x4cc] sm:$0xf0] }
 0x21f   :  { %v8725_v29 = vld [vmem:[%s13418_s5 + $0x344] sm:$0xf] }
 0x220   :  { %4513 = vmatpush.bf16.msrb.mxu0 %v7164_v46  ;;  %v7432_v46 = vor.u32 %v8707_v6, %v7429_v14  ;;  %v3118_v16 = vmax.f32 %v3112_v37, 0.0 }
 0x221   :  { %4526 = vmatpush.bf16.msrb.mxu1 %v7356_v12  ;;  %v7476_v12 = vor.u32 %v8722_v45, %v7475_v44  ;;  %v7333_v44 = vld [vmem:[%s13418_s5 + $0x208] sm:$0xf0]  ;;  %v3124_v45 = vpop.permute.xlu0 %3123 }
 0x222   :  { %4539 = vmatpush.bf16.msrb.mxu2 %v7548_v20  ;;  %v7804_v20 = vor.u32 %v8805_v40, %v7803_v50 }
 0x224   :  { %4514 = vmatpush.bf16.msrb.mxu0 %v7140_v56  ;;  %v12436_v56 = vpack.c.bf16 %v3118_v16, %v3118_v16  ;;  %v7336_v16 = vor.u32 %v8683_v43, %v7333_v44  ;;  %v8808_v44 = vld [vmem:[%s13418_s5 + $0x5dc] sm:$0xf] }
 0x225   :  { %4527 = vmatpush.bf16.msrb.mxu1 %v7332_v58  ;;  %v7621_v58 = vld [vmem:[%s13418_s5 + $0x448] sm:$0xf0]  ;;  %v3113_v3 = vpop.f32.mrf.mxu3 }
 0x226   :  { %4540 = vmatpush.bf16.msrb.mxu2 %v7524_v31  ;;  %4348 = vmatmul.bf16.vlgmr.msrb.gmra.mxu3 %v12436_v56  ;;  %v7624_v22 = vor.u32 %v8755_v57, %v7621_v58  ;;  %v7707_v57 = vld [vmem:[%s13418_s5 + $0x4e8] sm:$0xf]  ;;  %v8623_v3 = vld [vmem:[%s13418_s5 + $0x14] sm:$0xf] }
 0x227   :  { %4444 = vmatpush.bf16.msrb.mxu3 %v7828_v47  ;;  %v8677_v47 = vld [vmem:[%s13418_s5 + $0x1c4] sm:$0xf] }
 0x228   :  { %4515 = vmatpush.bf16.msrb.mxu0 %v7116_v9  ;;  %v7779_v9 = vld [vmem:[%s13418_s5 + $0x578] sm:$0xf] }
 0x229   :  { %4528 = vmatpush.bf16.msrb.mxu1 %v7308_v13  ;;  %v8749_v13 = vld [vmem:[%s13418_s5 + $0x404] sm:$0xf]  ;;  %v7780_v31 = vor.u32 %v8799_v26, %v7779_v9  ;;  %v8011_v9 = vld [vmem:[%s13422_s6 + $0x150] sm:$0xf]  ;;  %v7708_v26 = vor.u32 %v8781_v63, %v7707_v57  ;;  %v7781_v57 = vld [vmem:[%s13418_s5 + $0x590] sm:$0xf0] }
 0x22a   :  { %4541 = vmatpush.bf16.msrb.mxu2 %v7500_v62  ;;  %v7600_v18 = vor.u32 %v8749_v13, %v7597_v38  ;;  %v7141_v62 = vld [vmem:[%s13418_s5 + $0x88] sm:$0xf0]  ;;  %v7528_v13 = vor.u32 %v8731_v23, %v7525_v2  ;;  %v7683_v38 = vld [vmem:[%s13418_s5 + $0x4b8] sm:$0xf] }
 0x22b   :  { %4445 = vmatpush.bf16.msrb.mxu3 %v7804_v20  ;;  %v7144_v32 = vor.u32 %v8635_v42, %v7141_v62  ;;  %v7093_v20 = vld [vmem:[%s13418_s5 + $0x28] sm:$0xf0]  ;;  %v8900_v42 = vld [vmem:[%s13422_s6 + $0x2b4] sm:$0xf0] }
 0x22c   :  { %4516 = vmatpush.bf16.msrb.mxu0 %v7092_v17  ;;  %v4310_v53 = vpop.f32.mrf.mxu0  ;;  %v8941_v17 = vmov 269488144  }
 0x22d   :  { %4529 = vmatpush.bf16.msrb.mxu1 %v7284_v36  ;;  %v3126_v34 = vunpack.c.l.s4 %v8941_v17  ;;  %v4311_v35 = vadd.f32 %v4310_v53, %v3329_v8  ;;  %v4323_v36 = vpop.f32.mrf.mxu1  ;;  %v7285_v8 = vld [vmem:[%s13418_s5 + $0x1a8] sm:$0xf0]  ;;  %v7501_v53 = vld [vmem:[%s13418_s5 + $0x358] sm:$0xf0]  ;;  %v8852_v17 = vld [vmem:[%s13422_s6 + $0x134] sm:$0xf0] }
 0x22e   :  { %4542 = vmatpush.bf16.msrb.mxu2 %v7476_v12  ;;  %v8629_v12 = vld [vmem:[%s13418_s5 + $0x44] sm:$0xf] }
 0x22f   :  { %4517 = vmatmul.bf16.vlgmr.msrb.gmra.mxu0 %v11691_v61  ;;  %v3127_v6 = vunpack.c.0.s8 %v3126_v34  ;;  %v12506_v14 = vadd.f32 %v4323_v36, %v4311_v35  ;;  %4446 = vmatpush.bf16.msrb.mxu3 %v7780_v31  ;;  %v7659_v35 = vld [vmem:[%s13418_s5 + $0x488] sm:$0xf]  ;;  %v8769_v36 = vld [vmem:[%s13418_s5 + $0x49c] sm:$0xf0] }
 0x230   :  { %4561 = vmatpush.bf16.msra.mxu0 %v7264_v39  ;;  %4530 = vmatmul.bf16.vlgmr.msrb.gmra.mxu1 %v11693_v7  ;;  %v7168_v39 = vor.u32 %v8641_v19, %v7165_v15  ;;  %v8906_v19 = vld [vmem:[%s13422_s6 + $0x2e4] sm:$0xf0]  ;;  %v7096_v15 = vor.u32 %v8623_v3, %v7093_v20 }
 0x231   :  { %4574 = vmatpush.bf16.msra.mxu1 %v7456_v41  ;;  %4543 = vmatmul.bf16.vlgmr.msrb.gmra.mxu2 %v11865_v52  ;;  %v8793_v41 = vld [vmem:[%s13418_s5 + $0x55c] sm:$0xf0]  ;;  %v3128_v51 = vperm.slane %v3124_v45, %v3127_v6  ;;  %v7829_v45 = vld [vmem:[%s13418_s5 + $0x5f0] sm:$0xf0]  ;;  %v8882_v3 = vld [vmem:[%s13422_s6 + $0x224] sm:$0xf0] }
 0x232   :  { %4587 = vmatpush.bf16.msra.mxu2 %v7648_v55  ;;  %v7756_v37 = vor.u32 %v8793_v41, %v7755_v4  ;;  %v7309_v55 = vld [vmem:[%s13418_s5 + $0x1d8] sm:$0xf0]  ;;  %v7987_v4 = vld [vmem:[%s13422_s6 + $0x120] sm:$0xf]  ;;  %v7684_v41 = vor.u32 %v8775_v28, %v7683_v38  ;;  %v8828_v38 = vld [vmem:[%s13422_s6 + $0x74] sm:$0xf0] }
 0x233   :  { %v3130_v54 = vmul.f32 %v3128_v51, %v3119_v0  ;;  %v7312_v24 = vor.u32 %v8677_v47, %v7309_v55  ;;  %v7988_v43 = vor.u32 %v8852_v17, %v7987_v4  ;;  %v8131_v47 = vld [vmem:[%s13422_s6 + $0x240] sm:$0xf]  ;;  %v8888_v55 = vld [vmem:[%s13422_s6 + $0x254] sm:$0xf0]  ;;  %v7733_v4 = vld [vmem:[%s13418_s5 + $0x530] sm:$0xf0] }
 0x234   :  { %4562 = vmatpush.bf16.msra.mxu0 %v7240_v21  ;;  %v7576_v21 = vor.u32 %v8743_v30, %v7573_v60  ;;  %4447 = vmatpush.bf16.msrb.mxu3 %v7756_v37  ;;  %v4312_v50 = vpop.f32.mrf.mxu0  ;;  %v7504_v30 = vor.u32 %v8725_v29, %v7501_v53  ;;  %v7477_v60 = vld [vmem:[%s13418_s5 + $0x328] sm:$0xf0]  ;;  %v7963_v37 = vld [vmem:[%s13422_s6 + $0xf0] sm:$0xf]  ;;  %v8132_v63 = vor.u32 %v8888_v55, %v8131_v47  ;;  %v8784_v29 = vld [vmem:[%s13418_s5 + $0x51c] sm:$0xf] }
 0x235   :  { %4575 = vmatpush.bf16.msra.mxu1 %v7432_v46  ;;  %v8787_v46 = vld [vmem:[%s13418_s5 + $0x52c] sm:$0xf0]  ;;  %4614 = vst [vmem:[#allocation1] ss:$4 sm:$0xff] %v3130_v54  ;;  %v4325_v58 = vpop.f32.mrf.mxu1  ;;  %v3330_v50 = vperm.slane %v12447_v59, 1 }
 0x236   :  { %4588 = vmatpush.bf16.msra.mxu2 %v7624_v22  ;;  %v7732_v40 = vor.u32 %v8787_v46, %v7731_v49  ;;  %v8671_v22 = vld [vmem:[%s13418_s5 + $0x194] sm:$0xf]  ;;  %4400 = vmatmul.bf16.vlgmr.msra.gmra.mxu3 %v12436_v56  ;;  %v7660_v49 = vor.u32 %v8769_v36, %v7659_v35  ;;  %v8155_v46 = vld [vmem:[%s13422_s6 + $0x270] sm:$0xf]  ;;  %v8083_v53 = vld [vmem:[%s13422_s6 + $0x1e0] sm:$0xf] }
 0x237   :  { %v7288_v31 = vor.u32 %v8671_v22, %v7285_v8  ;;  %v7915_v58 = vld [vmem:[%s13422_s6 + $0x90] sm:$0xf]  ;;  %v8849_v17 = vld [vmem:[%s13422_s6 + $0x124] sm:$0xf]  ;;  %v8822_v36 = vld [vmem:[%s13422_s6 + $0x44] sm:$0xf0] }
 0x238   :  { %4563 = vmatpush.bf16.msra.mxu0 %v7216_v48  ;;  %v7552_v48 = vor.u32 %v8737_v1, %v7549_v5  ;;  %4448 = vmatpush.bf16.msrb.mxu3 %v7732_v40  ;;  %v8894_v1 = vld [vmem:[%s13422_s6 + $0x284] sm:$0xf0]  ;;  %v7867_v35 = vld [vmem:[%s13422_s6 + $0x30] sm:$0xf]  ;;  %v7685_v47 = vld [vmem:[%s13418_s5 + $0x4d0] sm:$0xf0] }
 0x239   :  { %4576 = vmatpush.bf16.msra.mxu1 %v7408_v33  ;;  %v7120_v33 = vor.u32 %v8629_v12, %v7117_v25  ;;  %v8840_v12 = vld [vmem:[%s13422_s6 + $0xd4] sm:$0xf0]  ;;  %v8156_v25 = vor.u32 %v8894_v1, %v8155_v46  ;;  %v8837_v55 = vld [vmem:[%s13422_s6 + $0xc4] sm:$0xf] }
 0x23a   :  { %4589 = vmatpush.bf16.msra.mxu2 %v7600_v18 }
 0x23c   :  { %4564 = vmatpush.bf16.msra.mxu0 %v7192_v11  ;;  %v8858_v11 = vld [vmem:[%s13422_s6 + $0x164] sm:$0xf0]  ;;  %4449 = vmatpush.bf16.msrb.mxu3 %v7708_v26  ;;  %v12614_v62 = vld.sshfl [vmem:[#allocation1] sm:$0xff pattern:$0x73625140] }
 0x23d   :  { %4577 = vmatpush.bf16.msra.mxu1 %v7384_v27  ;;  %v8203_v27 = vld [vmem:[%s13422_s6 + $0x2d0] sm:$0xf]  ;;  %v8012_v18 = vor.u32 %v8858_v11, %v8011_v9  ;;  %v12616_v6 = vld.sshfl [vmem:[#allocation1 + $0x8] sm:$0xff pattern:$0x73625140] }
 0x23e   :  { %4590 = vmatpush.bf16.msra.mxu2 %v7576_v21  ;;  %v8204_v34 = vor.u32 %v8906_v19, %v8203_v27  ;;  %5457 = vst [vmem:[#allocation1] ss:$4 sm:$0xff] %v3130_v54  ;;  %v8846_v21 = vld [vmem:[%s13422_s6 + $0x104] sm:$0xf0]  ;;  %v7757_v9 = vld [vmem:[%s13418_s5 + $0x560] sm:$0xf0] }
 0x23f   :  { %v7964_v5 = vor.u32 %v8846_v21, %v7963_v37  ;;  %v8855_v11 = vld [vmem:[%s13422_s6 + $0x154] sm:$0xf]  ;;  %v8013_v26 = vld [vmem:[%s13422_s6 + $0x168] sm:$0xf0] }
 0x240   :  { %4565 = vmatpush.bf16.msra.mxu0 %v7168_v39  ;;  %v8719_v39 = vld [vmem:[%s13418_s5 + $0x314] sm:$0xf]  ;;  %4450 = vmatpush.bf16.msrb.mxu3 %v7684_v41  ;;  %v8016_v27 = vor.u32 %v8855_v11, %v8013_v26  ;;  %v7965_v21 = vld [vmem:[%s13422_s6 + $0x108] sm:$0xf0]  ;;  %v12805_v11 = vpack.c.bf16 %v12616_v6, %v12616_v6  ;;  %v7971_v6 = vld [vmem:[%s13422_s6 + $0xf8] sm:$0xf] }
 0x241   :  { %4578 = vmatpush.bf16.msra.mxu1 %v7360_v10  ;;  %v8179_v10 = vld [vmem:[%s13422_s6 + $0x2a0] sm:$0xf]  ;;  %v7480_v51 = vor.u32 %v8719_v39, %v7477_v60  ;;  %v7736_v60 = vor.u32 %v8784_v29, %v7733_v4  ;;  %v8843_v37 = vld [vmem:[%s13422_s6 + $0xf4] sm:$0xf]  ;;  %v8825_v4 = vld [vmem:[%s13422_s6 + $0x64] sm:$0xf] }
 0x242   :  { %4591 = vmatpush.bf16.msra.mxu2 %v7552_v48  ;;  %v8180_v0 = vor.u32 %v8900_v42, %v8179_v10  ;;  %v8796_v48 = vld [vmem:[%s13418_s5 + $0x57c] sm:$0xf]  ;;  %v8778_v10 = vld [vmem:[%s13418_s5 + $0x4ec] sm:$0xf]  ;;  %v8059_v42 = vld [vmem:[%s13422_s6 + $0x1b0] sm:$0xf]  ;;  %v7968_v46 = vor.u32 %v8843_v37, %v7965_v21 }
 0x243   :  { %v7784_v2 = vor.u32 %v8796_v48, %v7781_v57  ;;  %v8211_v48 = vld [vmem:[%s13422_s6 + $0x2d8] sm:$0xf]  ;;  %v8907_v57 = vld [vmem:[%s13422_s6 + $0x2ec] sm:$0xf0] }
 0x244   :  { %4566 = vmatpush.bf16.msra.mxu0 %v7144_v32  ;;  %v7832_v32 = vor.u32 %v8808_v44, %v7829_v45  ;;  %4451 = vmatpush.bf16.msrb.mxu3 %v7660_v49  ;;  %v7868_v45 = vor.u32 %v8822_v36, %v7867_v35  ;;  %v8806_v35 = vld [vmem:[%s13418_s5 + $0x5c4] sm:$0xf0]  ;;  %v8163_v36 = vld [vmem:[%s13422_s6 + $0x278] sm:$0xf] }
 0x245   :  { %4579 = vmatpush.bf16.msra.mxu1 %v7336_v16  ;;  %v8802_v16 = vld [vmem:[%s13418_s5 + $0x5ac] sm:$0xf] }
 0x246   :  { %4592 = vmatpush.bf16.msra.mxu2 %v7528_v13  ;;  %v7891_v13 = vld [vmem:[%s13422_s6 + $0x60] sm:$0xf] }
 0x247   :  { %4452 = vmatmul.bf16.vlgmr.msrb.gmra.mxu3 %v12436_v56  ;;  %v4336_v49 = vpop.f32.mrf.mxu2 }
 0x248   :  { %4567 = vmatpush.bf16.msra.mxu0 %v7120_v33  ;;  %4496 = vmatpush.bf16.msra.mxu3 %v7832_v32  ;;  %v8834_v33 = vld [vmem:[%s13422_s6 + $0xa4] sm:$0xf0]  ;;  %v8816_v32 = vld [vmem:[%s13422_s6 + $0x14] sm:$0xf0]  ;;  %v12746_v1 = vadd.f32 %v4336_v49, %v12506_v14  ;;  %v8035_v14 = vld [vmem:[%s13422_s6 + $0x180] sm:$0xf] }
 0x249   :  { %4580 = vmatpush.bf16.msra.mxu1 %v7312_v24  ;;  %v8790_v24 = vld [vmem:[%s13418_s5 + $0x54c] sm:$0xf]  ;;  %v7916_v8 = vor.u32 %v8834_v33, %v7915_v58  ;;  %v8800_v49 = vld [vmem:[%s13418_s5 + $0x594] sm:$0xf0] }
 0x24a   :  { %4593 = vmatpush.bf16.msra.mxu2 %v7504_v30  ;;  %v7760_v28 = vor.u32 %v8790_v24, %v7757_v9  ;;  %v12786_v24 = vpack.c.bf16 %v12614_v62, %v12614_v62  ;;  %v8831_v62 = vld [vmem:[%s13422_s6 + $0x94] sm:$0xf] }
 0x24c   :  { %4568 = vmatpush.bf16.msra.mxu0 %v7096_v15  ;;  %v4362_v23 = vpop.f32.mrf.mxu0 }
 0x24d   :  { %4581 = vmatpush.bf16.msra.mxu1 %v7288_v31  ;;  %v4363_v20 = vadd.f32 %v4362_v23, %v3330_v50  ;;  %v4375_v22 = vpop.f32.mrf.mxu1  ;;  %v8876_v31 = vld [vmem:[%s13422_s6 + $0x1f4] sm:$0xf0]  ;;  %v7941_v50 = vld [vmem:[%s13422_s6 + $0xd8] sm:$0xf0]  ;;  %v8853_v23 = vld [vmem:[%s13422_s6 + $0x13c] sm:$0xf0] }
 0x24e   :  { %4594 = vmatpush.bf16.msra.mxu2 %v7480_v51  ;;  %v8084_v41 = vor.u32 %v8876_v31, %v8083_v53  ;;  %v7843_v51 = vld [vmem:[%s13422_s6] sm:$0xf]  ;;  %v7944_v58 = vor.u32 %v8837_v55, %v7941_v50  ;;  %v7845_v55 = vld [vmem:[%s13422_s6 + $0x18] sm:$0xf0] }
 0x24f   :  { %4569 = vmatmul.bf16.vlgmr.msra.gmra.mxu0 %v11691_v61  ;;  %v7805_v61 = vld [vmem:[%s13418_s5 + $0x5c0] sm:$0xf0]  ;;  %v12695_v19 = vadd.f32 %v4375_v22, %v4363_v20  ;;  %v8212_v20 = vor.u32 %v8907_v57, %v8211_v48  ;;  %v7835_v22 = vld [vmem:[%s13418_s5 + $0x5e0] sm:$0xf]  ;;  %v4338_v9 = vpop.f32.mrf.mxu2  ;;  %v8883_v57 = vld [vmem:[%s13422_s6 + $0x22c] sm:$0xf0] }
 0x250   :  { %5211 = vmatpush.bf16.msrb.mxu0 %v8012_v18  ;;  %4582 = vmatmul.bf16.vlgmr.msra.gmra.mxu1 %v11693_v7  ;;  %v7939_v7 = vld [vmem:[%s13422_s6 + $0xc0] sm:$0xf]  ;;  %v7808_v54 = vor.u32 %v8802_v16, %v7805_v61  ;;  %v7892_v18 = vor.u32 %v8828_v38, %v7891_v13  ;;  %v8019_v16 = vld [vmem:[%s13422_s6 + $0x158] sm:$0xf]  ;;  %v8859_v61 = vld [vmem:[%s13422_s6 + $0x16c] sm:$0xf0] }
 0x251   :  { %5224 = vmatpush.bf16.msrb.mxu1 %v8204_v34  ;;  %v7940_v40 = vor.u32 %v8840_v12, %v7939_v7  ;;  %4595 = vmatmul.bf16.vlgmr.msra.gmra.mxu2 %v11865_v52  ;;  %v8107_v52 = vld [vmem:[%s13422_s6 + $0x210] sm:$0xf]  ;;  %v7989_v34 = vld [vmem:[%s13422_s6 + $0x138] sm:$0xf0]  ;;  %v8812_v13 = vld [vmem:[%s13418_s5 + $0x5f4] sm:$0xf0] }
 0x252   :  { %4497 = vmatpush.bf16.msra.mxu3 %v7808_v54  ;;  %v8108_v15 = vor.u32 %v8882_v3, %v8107_v52  ;;  %5237 = vmatpush.bf16.msrb.mxu2 %v8016_v27  ;;  %v7992_v39 = vor.u32 %v8849_v17, %v7989_v34  ;;  %v8772_v12 = vld [vmem:[%s13418_s5 + $0x4bc] sm:$0xf]  ;;  %v7844_v54 = vor.u32 %v8816_v32, %v7843_v51  ;;  %v8766_v52 = vld [vmem:[%s13418_s5 + $0x48c] sm:$0xf]  ;;  %v7661_v3 = vld [vmem:[%s13418_s5 + $0x4a0] sm:$0xf0] }
 0x253   :  { %v8187_v38 = vld [vmem:[%s13422_s6 + $0x2a8] sm:$0xf]  ;;  %v8901_v27 = vld [vmem:[%s13422_s6 + $0x2bc] sm:$0xf0]  ;;  %v7664_v29 = vor.u32 %v8766_v52, %v7661_v3  ;;  %v7836_v53 = vor.u32 %v8812_v13, %v7835_v22  ;;  %v7893_v17 = vld [vmem:[%s13422_s6 + $0x78] sm:$0xf0] }
 0x254   :  { %5212 = vmatpush.bf16.msrb.mxu0 %v7988_v43  ;;  %v4364_v30 = vpop.f32.mrf.mxu0  ;;  %v8870_v43 = vld [vmem:[%s13422_s6 + $0x1c4] sm:$0xf0]  ;;  %v8188_v31 = vor.u32 %v8901_v27, %v8187_v38  ;;  %v8889_v32 = vld [vmem:[%s13422_s6 + $0x25c] sm:$0xf0]  ;;  %v8850_v27 = vld [vmem:[%s13422_s6 + $0x12c] sm:$0xf] }
 0x255   :  { %5225 = vmatpush.bf16.msrb.mxu1 %v8180_v0  ;;  %v4377_v44 = vpop.f32.mrf.mxu1  ;;  %v7709_v0 = vld [vmem:[%s13418_s5 + $0x500] sm:$0xf0]  ;;  %v7947_v30 = vld [vmem:[%s13422_s6 + $0xc8] sm:$0xf]  ;;  %v8877_v38 = vld [vmem:[%s13422_s6 + $0x1fc] sm:$0xf0] }
 0x256   :  { %4498 = vmatpush.bf16.msra.mxu3 %v7784_v2  ;;  %5238 = vmatpush.bf16.msrb.mxu2 %v7992_v39  ;;  %v7712_v7 = vor.u32 %v8778_v10, %v7709_v0  ;;  %v7688_v2 = vor.u32 %v8772_v12, %v7685_v47  ;;  %v8895_v39 = vld [vmem:[%s13422_s6 + $0x28c] sm:$0xf0]  ;;  %v3331_v10 = vperm.slane %v12447_v59, 2  ;;  %v7787_v44 = vld [vmem:[%s13418_s5 + $0x580] sm:$0xf] }
 0x257   :  { %v7869_v0 = vld [vmem:[%s13422_s6 + $0x48] sm:$0xf0]  ;;  %v4388_v37 = vpop.f32.mrf.mxu2  ;;  %v8139_v51 = vld [vmem:[%s13422_s6 + $0x248] sm:$0xf]  ;;  %v8813_v47 = vld [vmem:[%s13422_s6 + $0x4] sm:$0xf] }
 0x258   :  { %5213 = vmatpush.bf16.msrb.mxu0 %v7964_v5  ;;  %v8060_v5 = vor.u32 %v8870_v43, %v8059_v42  ;;  %v8164_v43 = vor.u32 %v8895_v39, %v8163_v36  ;;  %v8794_v12 = vld [vmem:[%s13418_s5 + $0x564] sm:$0xf0]  ;;  %v8871_v39 = vld [vmem:[%s13422_s6 + $0x1cc] sm:$0xf0] }
 0x259   :  { %5226 = vmatpush.bf16.msrb.mxu1 %v8156_v25  ;;  %v8864_v25 = vld [vmem:[%s13422_s6 + $0x194] sm:$0xf0]  ;;  %v8091_v9 = vld [vmem:[%s13422_s6 + $0x1e8] sm:$0xf] }
 0x25a   :  { %4499 = vmatpush.bf16.msra.mxu3 %v7760_v28  ;;  %5239 = vmatpush.bf16.msrb.mxu2 %v7968_v46  ;;  %v8036_v33 = vor.u32 %v8864_v25, %v8035_v14  ;;  %v8847_v28 = vld [vmem:[%s13422_s6 + $0x10c] sm:$0xf0]  ;;  %v7788_v14 = vor.u32 %v8800_v49, %v7787_v44  ;;  %v8140_v25 = vor.u32 %v8889_v32, %v8139_v51  ;;  %v8860_v44 = vld [vmem:[%s13422_s6 + $0x174] sm:$0xf0]  ;;  %v8043_v49 = vld [vmem:[%s13422_s6 + $0x188] sm:$0xf] }
 0x25b   :  { %v7972_v34 = vor.u32 %v8847_v28, %v7971_v6  ;;  %v7875_v6 = vld [vmem:[%s13422_s6 + $0x38] sm:$0xf]  ;;  %v8823_v28 = vld [vmem:[%s13422_s6 + $0x4c] sm:$0xf0] }
 0x25c   :  { %5214 = vmatpush.bf16.msrb.mxu0 %v7940_v40  ;;  %v8020_v40 = vor.u32 %v8859_v61, %v8019_v16  ;;  %v7923_v16 = vld [vmem:[%s13422_s6 + $0x98] sm:$0xf]  ;;  %v8835_v61 = vld [vmem:[%s13422_s6 + $0xac] sm:$0xf0]  ;;  %v7876_v36 = vor.u32 %v8823_v28, %v7875_v6  ;;  %v7813_v28 = vld [vmem:[%s13418_s5 + $0x5c8] sm:$0xf0] }
 0x25d   :  { %5227 = vmatpush.bf16.msrb.mxu1 %v8132_v63  ;;  %v7995_v63 = vld [vmem:[%s13422_s6 + $0x128] sm:$0xf]  ;;  %v7924_v48 = vor.u32 %v8835_v61, %v7923_v16  ;;  %v8838_v16 = vld [vmem:[%s13422_s6 + $0xcc] sm:$0xf]  ;;  %v7949_v61 = vld [vmem:[%s13422_s6 + $0xe0] sm:$0xf0] }
 0x25e   :  { %4500 = vmatpush.bf16.msra.mxu3 %v7736_v60  ;;  %5240 = vmatpush.bf16.msrb.mxu2 %v7944_v58  ;;  %v7996_v26 = vor.u32 %v8853_v23, %v7995_v63  ;;  %v8841_v60 = vld [vmem:[%s13422_s6 + $0xdc] sm:$0xf0]  ;;  %v7848_v58 = vor.u32 %v8813_v47, %v7845_v55  ;;  %v8021_v63 = vld [vmem:[%s13422_s6 + $0x170] sm:$0xf0]  ;;  %v7899_v23 = vld [vmem:[%s13422_s6 + $0x68] sm:$0xf] }
 0x25f   :  { %v7948_v21 = vor.u32 %v8841_v60, %v7947_v30  ;;  %v7973_v30 = vld [vmem:[%s13422_s6 + $0x110] sm:$0xf0]  ;;  %v7851_v60 = vld [vmem:[%s13422_s6 + $0x8] sm:$0xf] }
 0x260   :  { %5215 = vmatpush.bf16.msrb.mxu0 %v7916_v8  ;;  %v7917_v8 = vld [vmem:[%s13422_s6 + $0xa8] sm:$0xf0]  ;;  %v8854_v47 = vld [vmem:[%s13422_s6 + $0x144] sm:$0xf0] }
 0x261   :  { %5228 = vmatpush.bf16.msrb.mxu1 %v8108_v15  ;;  %v7920_v15 = vor.u32 %v8831_v62, %v7917_v8  ;;  %v7739_v62 = vld [vmem:[%s13418_s5 + $0x520] sm:$0xf]  ;;  %v8788_v8 = vld [vmem:[%s13418_s5 + $0x534] sm:$0xf0] }
 0x262   :  { %4501 = vmatpush.bf16.msra.mxu3 %v7712_v7  ;;  %v7763_v7 = vld [vmem:[%s13418_s5 + $0x550] sm:$0xf] }
 0x263   :  { %5241 = vmatpush.bf16.msrb.mxu2 %v7920_v15  ;;  %v7997_v15 = vld [vmem:[%s13422_s6 + $0x140] sm:$0xf0] }
 0x264   :  { %5216 = vmatpush.bf16.msrb.mxu0 %v7892_v18  ;;  %v7811_v18 = vld [vmem:[%s13418_s5 + $0x5b0] sm:$0xf] }
 0x265   :  { %5229 = vmatpush.bf16.msrb.mxu1 %v8084_v41  ;;  %v7896_v41 = vor.u32 %v8825_v4, %v7893_v17  ;;  %v7812_v42 = vor.u32 %v8806_v35, %v7811_v18  ;;  %v8092_v18 = vor.u32 %v8877_v38, %v8091_v9  ;;  %v7715_v4 = vld [vmem:[%s13418_s5 + $0x4f0] sm:$0xf]  ;;  %v8782_v17 = vld [vmem:[%s13418_s5 + $0x504] sm:$0xf0]  ;;  %v8803_v38 = vld [vmem:[%s13418_s5 + $0x5b4] sm:$0xf] }
 0x266   :  { %4502 = vmatpush.bf16.msra.mxu3 %v7688_v2  ;;  %v8829_v2 = vld [vmem:[%s13422_s6 + $0x7c] sm:$0xf0] }
 0x267   :  { %5242 = vmatpush.bf16.msrb.mxu2 %v7896_v41  ;;  %v7900_v13 = vor.u32 %v8829_v2, %v7899_v23  ;;  %v8844_v41 = vld [vmem:[%s13422_s6 + $0xfc] sm:$0xf] }
 0x268   :  { %5217 = vmatpush.bf16.msrb.mxu0 %v7868_v45  ;;  %v8819_v45 = vld [vmem:[%s13422_s6 + $0x34] sm:$0xf]  ;;  %v7837_v2 = vld [vmem:[%s13418_s5 + $0x5f8] sm:$0xf0] }
 0x269   :  { %5230 = vmatpush.bf16.msrb.mxu1 %v8060_v5  ;;  %v7872_v46 = vor.u32 %v8819_v45, %v7869_v0  ;;  %v12868_v5 = vadd.f32 %v4388_v37, %v12695_v19  ;;  %v7716_v45 = vor.u32 %v8782_v17, %v7715_v4  ;;  %v7691_v37 = vld [vmem:[%s13418_s5 + $0x4c0] sm:$0xf]  ;;  %v8842_v4 = vld [vmem:[%s13422_s6 + $0xe4] sm:$0xf0]  ;;  %v3332_v17 = vperm.slane %v12447_v59, 3 }
 0x26a   :  { %4503 = vmatpush.bf16.msra.mxu3 %v7664_v29  ;;  %v8000_v29 = vor.u32 %v8850_v27, %v7997_v15  ;;  %v8826_v27 = vld [vmem:[%s13422_s6 + $0x6c] sm:$0xf]  ;;  %v7901_v15 = vld [vmem:[%s13422_s6 + $0x80] sm:$0xf0]  ;;  %v7789_v59 = vld [vmem:[%s13418_s5 + $0x598] sm:$0xf0] }
 0x26b   :  { %5243 = vmatpush.bf16.msrb.mxu2 %v7872_v46  ;;  %v8865_v46 = vld [vmem:[%s13422_s6 + $0x19c] sm:$0xf0] }
 0x26c   :  { %5218 = vmatpush.bf16.msrb.mxu0 %v7844_v54  ;;  %v4414_v19 = vpop.f32.mrf.mxu0  ;;  %v8115_v54 = vld [vmem:[%s13422_s6 + $0x218] sm:$0xf] }
 0x26d   :  { %5231 = vmatpush.bf16.msrb.mxu1 %v8036_v33  ;;  %4504 = vmatmul.bf16.vlgmr.msra.gmra.mxu3 %v12436_v56  ;;  %v4415_v50 = vadd.f32 %v4414_v19, %v3331_v10  ;;  %v8856_v33 = vld [vmem:[%s13422_s6 + $0x15c] sm:$0xf]  ;;  %v8116_v22 = vor.u32 %v8883_v57, %v8115_v54  ;;  %v8817_v10 = vld [vmem:[%s13422_s6 + $0x1c] sm:$0xf0]  ;;  %v8003_v54 = vld [vmem:[%s13422_s6 + $0x130] sm:$0xf] }
 0x26e   :  { %4548 = vmatpush.bf16.msrb.mxu3 %v7836_v53  ;;  %v8024_v52 = vor.u32 %v8856_v33, %v8021_v63  ;;  %v7852_v32 = vor.u32 %v8817_v10, %v7851_v60  ;;  %v8219_v19 = vld [vmem:[%s13422_s6 + $0x2e0] sm:$0xf]  ;;  %v8832_v33 = vld [vmem:[%s13422_s6 + $0x9c] sm:$0xf]  ;;  %v7925_v63 = vld [vmem:[%s13422_s6 + $0xb0] sm:$0xf0]  ;;  %v8004_v23 = vor.u32 %v8854_v47, %v8003_v54 }
 0x26f   :  { %5219 = vmatmul.bf16.vlgmr.msrb.gmra.mxu0 %v12786_v24  ;;  %5244 = vmatpush.bf16.msrb.mxu2 %v7848_v58  ;;  %v8809_v58 = vld [vmem:[%s13418_s5 + $0x5e4] sm:$0xf]  ;;  %v8147_v60 = vld [vmem:[%s13422_s6 + $0x250] sm:$0xf]  ;;  %v8890_v10 = vld [vmem:[%s13422_s6 + $0x264] sm:$0xf0] }
 0x270   :  { %5263 = vmatpush.bf16.msra.mxu0 %v8020_v40  ;;  %5232 = vmatmul.bf16.vlgmr.msrb.gmra.mxu1 %v12805_v11  ;;  %v4427_v40 = vpop.f32.mrf.mxu1  ;;  %v8029_v54 = vld [vmem:[%s13422_s6 + $0x178] sm:$0xf0]  ;;  %v7907_v47 = vld [vmem:[%s13422_s6 + $0x70] sm:$0xf] }
 0x271   :  { %5276 = vmatpush.bf16.msra.mxu1 %v8212_v20  ;;  %v4428_v3 = vadd.f32 %v4427_v40, %v4415_v50  ;;  %v7764_v20 = vor.u32 %v8794_v12, %v7763_v7  ;;  %v8044_v50 = vor.u32 %v8865_v46, %v8043_v49  ;;  %v7667_v40 = vld [vmem:[%s13418_s5 + $0x490] sm:$0xf]  ;;  %v8148_v49 = vor.u32 %v8890_v10, %v8147_v60  ;;  %v7853_v46 = vld [vmem:[%s13422_s6 + $0x20] sm:$0xf0]  ;;  %v8839_v60 = vld [vmem:[%s13422_s6 + $0xd4] sm:$0xf] }
 0x272   :  { %4549 = vmatpush.bf16.msrb.mxu3 %v7812_v42  ;;  %5245 = vmatmul.bf16.vlgmr.msrb.gmra.mxu2 %v12786_v24  ;;  %v7976_v42 = vor.u32 %v8844_v41, %v7973_v30  ;;  %v7877_v41 = vld [vmem:[%s13422_s6 + $0x50] sm:$0xf0]  ;;  %v7957_v10 = vld [vmem:[%s13422_s6 + $0xe8] sm:$0xf0] }
 0x273   :  { %5289 = vmatpush.bf16.msra.mxu2 %v8024_v52  ;;  %v8195_v52 = vld [vmem:[%s13422_s6 + $0x2b0] sm:$0xf] }
 0x274   :  { %5264 = vmatpush.bf16.msra.mxu0 %v7996_v26  ;;  %v4390_v26 = vpop.f32.mrf.mxu2  ;;  %v4416_v53 = vpop.f32.mrf.mxu0 }
 0x275   :  { %5277 = vmatpush.bf16.msra.mxu1 %v8188_v31  ;;  %v7740_v31 = vor.u32 %v8788_v8, %v7739_v62  ;;  %v8848_v62 = vld [vmem:[%s13422_s6 + $0x114] sm:$0xf0]  ;;  %v7840_v26 = vor.u32 %v8809_v58, %v7837_v2  ;;  %v8785_v58 = vld [vmem:[%s13418_s5 + $0x524] sm:$0xf]  ;;  %v8878_v2 = vld [vmem:[%s13422_s6 + $0x204] sm:$0xf0] }
 0x276   :  { %4550 = vmatpush.bf16.msrb.mxu3 %v7788_v14  ;;  %v8908_v14 = vld [vmem:[%s13422_s6 + $0x2f4] sm:$0xf0] }
 0x277   :  { %5290 = vmatpush.bf16.msra.mxu2 %v8000_v29  ;;  %v8220_v57 = vor.u32 %v8908_v14, %v8219_v19  ;;  %v8171_v29 = vld [vmem:[%s13422_s6 + $0x280] sm:$0xf]  ;;  %v8896_v53 = vld [vmem:[%s13422_s6 + $0x294] sm:$0xf0] }
 0x278   :  { %5265 = vmatpush.bf16.msra.mxu0 %v7972_v34  ;;  %v8067_v34 = vld [vmem:[%s13422_s6 + $0x1b8] sm:$0xf]  ;;  %v4429_v35 = vpop.f32.mrf.mxu1 }
 0x279   :  { %5278 = vmatpush.bf16.msra.mxu1 %v8164_v43  ;;  %v8027_v43 = vld [vmem:[%s13422_s6 + $0x160] sm:$0xf]  ;;  %v8068_v0 = vor.u32 %v8871_v39, %v8067_v34  ;;  %v7816_v34 = vor.u32 %v8803_v38, %v7813_v28  ;;  %v8172_v35 = vor.u32 %v8896_v53, %v8171_v29  ;;  %v8820_v39 = vld [vmem:[%s13422_s6 + $0x3c] sm:$0xf]  ;;  %v8884_v19 = vld [vmem:[%s13422_s6 + $0x234] sm:$0xf0] }
 0x27a   :  { %4551 = vmatpush.bf16.msrb.mxu3 %v7764_v20  ;;  %v8028_v12 = vor.u32 %v8860_v44, %v8027_v43  ;;  %v7928_v20 = vor.u32 %v8832_v33, %v7925_v63  ;;  %v7931_v43 = vld [vmem:[%s13422_s6 + $0xa0] sm:$0xf]  ;;  %v8836_v44 = vld [vmem:[%s13422_s6 + $0xb4] sm:$0xf0]  ;;  %v7741_v33 = vld [vmem:[%s13418_s5 + $0x538] sm:$0xf0] }
 0x27b   :  { %5291 = vmatpush.bf16.msra.mxu2 %v7976_v42  ;;  %v7880_v42 = vor.u32 %v8820_v39, %v7877_v41  ;;  %v8099_v63 = vld [vmem:[%s13422_s6 + $0x1f0] sm:$0xf]  ;;  %v7717_v38 = vld [vmem:[%s13418_s5 + $0x508] sm:$0xf0]  ;;  %v8872_v28 = vld [vmem:[%s13422_s6 + $0x1d4] sm:$0xf0] }
 0x27c   :  { %5266 = vmatpush.bf16.msra.mxu0 %v7948_v21  ;;  %v8776_v21 = vld [vmem:[%s13418_s5 + $0x4d4] sm:$0xf0]  ;;  %v4440_v51 = vpop.f32.mrf.mxu2  ;;  %v8845_v29 = vld [vmem:[%s13422_s6 + $0x104] sm:$0xf]  ;;  %v7981_v53 = vld [vmem:[%s13422_s6 + $0x118] sm:$0xf0] }
 0x27d   :  { %5279 = vmatpush.bf16.msra.mxu1 %v8140_v25  ;;  %v12980_v7 = vadd.f32 %v4440_v51, %v4428_v3  ;;  %v7952_v25 = vor.u32 %v8838_v16, %v7949_v61  ;;  %v7692_v55 = vor.u32 %v8776_v21, %v7691_v37  ;;  %v8902_v3 = vld [vmem:[%s13422_s6 + $0x2c4] sm:$0xf0]  ;;  %v8123_v51 = vld [vmem:[%s13422_s6 + $0x220] sm:$0xf]  ;;  %v8051_v39 = vld [vmem:[%s13422_s6 + $0x190] sm:$0xf] }
 0x27e   :  { %4552 = vmatpush.bf16.msrb.mxu3 %v7740_v31  ;;  %v7904_v31 = vor.u32 %v8826_v27, %v7901_v15  ;;  %v8075_v27 = vld [vmem:[%s13422_s6 + $0x1c0] sm:$0xf] }
 0x27f   :  { %5292 = vmatpush.bf16.msra.mxu2 %v7952_v25  ;;  %v8857_v25 = vld [vmem:[%s13422_s6 + $0x164] sm:$0xf] }
 0x280   :  { %5267 = vmatpush.bf16.msra.mxu0 %v7924_v48  ;;  %v8770_v48 = vld [vmem:[%s13418_s5 + $0x4a4] sm:$0xf0] }
 0x281   :  { %5280 = vmatpush.bf16.msra.mxu1 %v8116_v22  ;;  %v7979_v22 = vld [vmem:[%s13422_s6 + $0x100] sm:$0xf]  ;;  %v7668_v8 = vor.u32 %v8770_v48, %v7667_v40 }
 0x282   :  { %4553 = vmatpush.bf16.msrb.mxu3 %v7716_v45  ;;  %v7980_v6 = vor.u32 %v8848_v62, %v7979_v22  ;;  %v8791_v45 = vld [vmem:[%s13418_s5 + $0x554] sm:$0xf]  ;;  %v8824_v22 = vld [vmem:[%s13422_s6 + $0x54] sm:$0xf0] }
 0x283   :  { %5293 = vmatpush.bf16.msra.mxu2 %v7928_v20  ;;  %v7883_v20 = vld [vmem:[%s13422_s6 + $0x40] sm:$0xf] }
 0x284   :  { %5268 = vmatpush.bf16.msra.mxu0 %v7900_v13  ;;  %v4442_v9 = vpop.f32.mrf.mxu2  ;;  %v8196_v13 = vor.u32 %v8902_v3, %v8195_v52  ;;  %v8851_v52 = vld [vmem:[%s13422_s6 + $0x134] sm:$0xf]  ;;  %v8005_v3 = vld [vmem:[%s13422_s6 + $0x148] sm:$0xf0] }
 0x285   :  { %5281 = vmatpush.bf16.msra.mxu1 %v8092_v18  ;;  %v7955_v18 = vld [vmem:[%s13422_s6 + $0xd0] sm:$0xf]  ;;  %v8008_v62 = vor.u32 %v8851_v52, %v8005_v3  ;;  %v7744_v9 = vor.u32 %v8785_v58, %v7741_v33  ;;  %v8891_v58 = vld [vmem:[%s13422_s6 + $0x274] sm:$0xf]  ;;  %v8157_v33 = vld [vmem:[%s13422_s6 + $0x288] sm:$0xf0] }
 0x286   :  { %4554 = vmatpush.bf16.msrb.mxu3 %v7692_v55  ;;  %v7956_v30 = vor.u32 %v8842_v4, %v7955_v18  ;;  %v8830_v55 = vld [vmem:[%s13422_s6 + $0x84] sm:$0xf0]  ;;  %v7984_v4 = vor.u32 %v8845_v29, %v7981_v53  ;;  %v8815_v52 = vld [vmem:[%s13422_s6 + $0x14] sm:$0xf]  ;;  %v7861_v3 = vld [vmem:[%s13422_s6 + $0x28] sm:$0xf0] }
 0x287   :  { %5294 = vmatpush.bf16.msra.mxu2 %v7904_v31  ;;  %v7859_v31 = vld [vmem:[%s13422_s6 + $0x10] sm:$0xf]  ;;  %v8818_v18 = vld [vmem:[%s13422_s6 + $0x24] sm:$0xf0]  ;;  %v8085_v29 = vld [vmem:[%s13422_s6 + $0x1f8] sm:$0xf0] }
 0x288   :  { %5269 = vmatpush.bf16.msra.mxu0 %v7876_v36  ;;  %v8797_v36 = vld [vmem:[%s13418_s5 + $0x584] sm:$0xf] }
 0x289   :  { %5282 = vmatpush.bf16.msra.mxu1 %v8068_v0  ;;  %v7765_v0 = vld [vmem:[%s13418_s5 + $0x568] sm:$0xf0]  ;;  %v7792_v21 = vor.u32 %v8797_v36, %v7789_v59  ;;  %v7693_v36 = vld [vmem:[%s13418_s5 + $0x4d8] sm:$0xf0]  ;;  %v8866_v59 = vld [vmem:[%s13422_s6 + $0x1a4] sm:$0xf0] }
 0x28a   :  { %4555 = vmatpush.bf16.msrb.mxu3 %v7668_v8  ;;  %v7768_v48 = vor.u32 %v8791_v45, %v7765_v0  ;;  %v8052_v45 = vor.u32 %v8866_v59, %v8051_v39  ;;  %v8767_v0 = vld [vmem:[%s13418_s5 + $0x494] sm:$0xf] }
 0x28b   :  { %5295 = vmatpush.bf16.msra.mxu2 %v7880_v42 }
 0x28c   :  { %5270 = vmatpush.bf16.msra.mxu0 %v7852_v32  ;;  %v4466_v37 = vpop.f32.mrf.mxu0  ;;  %v8814_v32 = vld [vmem:[%s13422_s6 + $0xc] sm:$0xf] }
 0x28d   :  { %5283 = vmatpush.bf16.msra.mxu1 %v8044_v50  ;;  %4556 = vmatmul.bf16.vlgmr.msrb.gmra.mxu3 %v12436_v56  ;;  %v4467_v16 = vadd.f32 %v4466_v37, %v3332_v17  ;;  %v4479_v61 = vpop.f32.mrf.mxu1  ;;  %v7856_v14 = vor.u32 %v8814_v32, %v7853_v46  ;;  %v8032_v50 = vor.u32 %v8857_v25, %v8029_v54  ;;  %v7669_v37 = vld [vmem:[%s13418_s5 + $0x4a8] sm:$0xf0]  ;;  %v8897_v25 = vld [vmem:[%s13422_s6 + $0x2a4] sm:$0xf]  ;;  %v8181_v54 = vld [vmem:[%s13422_s6 + $0x2b8] sm:$0xf0] }
 0x28e   :  { %4600 = vmatpush.bf16.msra.mxu3 %v7840_v26  ;;  %v8100_v26 = vor.u32 %v8878_v2, %v8099_v63  ;;  %v8205_v32 = vld [vmem:[%s13422_s6 + $0x2e8] sm:$0xf0]  ;;  %v8160_v2 = vor.u32 %v8891_v58, %v8157_v33 }
 0x28f   :  { %5271 = vmatmul.bf16.vlgmr.msra.gmra.mxu0 %v12786_v24  ;;  %v4480_v40 = vadd.f32 %v4479_v61, %v4467_v16  ;;  %5296 = vmatpush.bf16.msra.mxu2 %v7856_v14  ;;  %v7672_v16 = vor.u32 %v8767_v0, %v7669_v37  ;;  %v7909_v14 = vld [vmem:[%s13422_s6 + $0x88] sm:$0xf0]  ;;  %v8892_v37 = vld [vmem:[%s13422_s6 + $0x27c] sm:$0xf] }
 0x290   :  { %5315 = vmatpush.bf16.msrb.mxu0 %v8028_v12  ;;  %5284 = vmatmul.bf16.vlgmr.msra.gmra.mxu1 %v12805_v11  ;;  %v7932_v12 = vor.u32 %v8836_v44, %v7931_v43  ;;  %v7960_v43 = vor.u32 %v8839_v60, %v7957_v10 }
 0x291   :  { %5328 = vmatpush.bf16.msrb.mxu1 %v8220_v57  ;;  %v8124_v57 = vor.u32 %v8884_v19, %v8123_v51  ;;  %v8903_v51 = vld [vmem:[%s13422_s6 + $0x2d4] sm:$0xf] }
 0x292   :  { %4601 = vmatpush.bf16.msra.mxu3 %v7816_v34  ;;  %5297 = vmatmul.bf16.vlgmr.msra.gmra.mxu2 %v12786_v24  ;;  %v8076_v34 = vor.u32 %v8872_v28, %v8075_v27  ;;  %v8827_v19 = vld [vmem:[%s13422_s6 + $0x74] sm:$0xf]  ;;  %v8873_v28 = vld [vmem:[%s13422_s6 + $0x1e4] sm:$0xf] }
 0x293   :  { %5341 = vmatpush.bf16.msrb.mxu2 %v8032_v50  ;;  %v8821_v50 = vld [vmem:[%s13422_s6 + $0x44] sm:$0xf] }
 0x294   :  { %5316 = vmatpush.bf16.msrb.mxu0 %v8004_v23  ;;  %v7908_v23 = vor.u32 %v8830_v55, %v7907_v47  ;;  %v4468_v8 = vpop.f32.mrf.mxu0  ;;  %v4492_v41 = vpop.f32.mrf.mxu2  ;;  %v7912_v47 = vor.u32 %v8827_v19, %v7909_v14  ;;  %v8184_v55 = vor.u32 %v8897_v25, %v8181_v54  ;;  %v8880_v54 = vld [vmem:[%s13422_s6 + $0x21c] sm:$0xf] }
 0x295   :  { %5329 = vmatpush.bf16.msrb.mxu1 %v8196_v13  ;;  %v8779_v13 = vld [vmem:[%s13418_s5 + $0x4f4] sm:$0xf]  ;;  %v4481_v15 = vpop.f32.mrf.mxu1  ;;  %v13173_v42 = vadd.f32 %v4492_v41, %v4480_v40  ;;  %v7885_v40 = vld [vmem:[%s13422_s6 + $0x58] sm:$0xf0]  ;;  %v7864_v8 = vor.u32 %v8815_v52, %v7861_v3 }
 0x296   :  { %4602 = vmatpush.bf16.msra.mxu3 %v7792_v21  ;;  %v7720_v17 = vor.u32 %v8779_v13, %v7717_v38  ;;  %v8833_v21 = vld [vmem:[%s13422_s6 + $0xa4] sm:$0xf]  ;;  %v7888_v63 = vor.u32 %v8821_v50, %v7885_v40  ;;  %v8879_v13 = vld [vmem:[%s13422_s6 + $0x214] sm:$0xf]  ;;  %v8109_v38 = vld [vmem:[%s13422_s6 + $0x228] sm:$0xf0] }
 0x297   :  { %5342 = vmatpush.bf16.msrb.mxu2 %v8008_v62  ;;  %v8885_v62 = vld [vmem:[%s13422_s6 + $0x244] sm:$0xf]  ;;  %v8112_v15 = vor.u32 %v8879_v13, %v8109_v38  ;;  %v8904_v41 = vld [vmem:[%s13422_s6 + $0x2dc] sm:$0xf]  ;;  %v8899_v38 = vld [vmem:[%s13422_s6 + $0x2b4] sm:$0xf] }
 0x298   :  { %5317 = vmatpush.bf16.msrb.mxu0 %v7980_v6  ;;  %v7884_v6 = vor.u32 %v8824_v22, %v7883_v20 }
 0x299   :  { %5330 = vmatpush.bf16.msrb.mxu1 %v8172_v35  ;;  %v8773_v35 = vld [vmem:[%s13418_s5 + $0x4c4] sm:$0xf] }
 0x29a   :  { %4603 = vmatpush.bf16.msra.mxu3 %v7768_v48  ;;  %v7696_v44 = vor.u32 %v8773_v35, %v7693_v36  ;;  %v13216_v48 = vld [vmem:[%s13420_s7] sm:$0x3f]  ;;  %v8037_v36 = vld [vmem:[%s13422_s6 + $0x198] sm:$0xf0] }
 0x29b   :  { %5343 = vmatpush.bf16.msrb.mxu2 %v7984_v4 }
 0x29c   :  { %5318 = vmatpush.bf16.msrb.mxu0 %v7956_v30  ;;  %v7860_v30 = vor.u32 %v8818_v18, %v7859_v31  ;;  %v4494_v61 = vpop.f32.mrf.mxu2  ;;  %v8088_v18 = vor.u32 %v8873_v28, %v8085_v29  ;;  %v8893_v29 = vld [vmem:[%s13422_s6 + $0x284] sm:$0xf] }
 0x29d   :  { %5331 = vmatpush.bf16.msrb.mxu1 %v8148_v49  ;;  %v7933_v49 = vld [vmem:[%s13422_s6 + $0xb8] sm:$0xf0]  ;;  %v8886_v61 = vld [vmem:[%s13422_s6 + $0x24c] sm:$0xf] }
 0x29e   :  { %4604 = vmatpush.bf16.msra.mxu3 %v7744_v9  ;;  %v7936_v46 = vor.u32 %v8833_v21, %v7933_v49  ;;  %v8165_v21 = vld [vmem:[%s13422_s6 + $0x290] sm:$0xf0] }
 0x29f   :  { %5344 = vmatpush.bf16.msrb.mxu2 %v7960_v43  ;;  %v8898_v43 = vld [vmem:[%s13422_s6 + $0x2ac] sm:$0xf] }
 0x2a0   :  { %5319 = vmatpush.bf16.msrb.mxu0 %v7932_v12  ;;  %v8208_v12 = vor.u32 %v8903_v51, %v8205_v32  ;;  %v3334_v51 = vperm.slane %v13216_v48, 5  ;;  %v8168_v32 = vor.u32 %v8892_v37, %v8165_v21  ;;  %v8869_v37 = vld [vmem:[%s13422_s6 + $0x1c4] sm:$0xf]  ;;  %v8077_v21 = vld [vmem:[%s13422_s6 + $0x1d8] sm:$0xf0] }
 0x2a1   :  { %5332 = vmatpush.bf16.msrb.mxu1 %v8124_v57  ;;  %v3333_v57 = vperm.slane %v13216_v48, 4  ;;  %v8874_v48 = vld [vmem:[%s13422_s6 + $0x1ec] sm:$0xf] }
 0x2a2   :  { %4605 = vmatpush.bf16.msra.mxu3 %v7720_v17  ;;  %v8061_v17 = vld [vmem:[%s13422_s6 + $0x1c8] sm:$0xf0] }
 0x2a3   :  { %5345 = vmatpush.bf16.msrb.mxu2 %v7936_v46 }
 0x2a4   :  { %5320 = vmatpush.bf16.msrb.mxu0 %v7908_v23 }
 0x2a5   :  { %5333 = vmatpush.bf16.msrb.mxu1 %v8100_v26 }
 0x2a6   :  { %4606 = vmatpush.bf16.msra.mxu3 %v7696_v44  ;;  %v8189_v44 = vld [vmem:[%s13422_s6 + $0x2c0] sm:$0xf0] }
 0x2a7   :  { %5346 = vmatpush.bf16.msrb.mxu2 %v7912_v47  ;;  %v8117_v47 = vld [vmem:[%s13422_s6 + $0x230] sm:$0xf0] }
 0x2a8   :  { %5321 = vmatpush.bf16.msrb.mxu0 %v7884_v6 }
 0x2a9   :  { %5334 = vmatpush.bf16.msrb.mxu1 %v8076_v34  ;;  %v4349_v53 = vpop.f32.mrf.mxu3 }
 0x2aa   :  { %4607 = vmatpush.bf16.msra.mxu3 %v7672_v16  ;;  %v13252_v31 = vadd.f32 %v4349_v53, %v12746_v1  ;;  %v8861_v1 = vld [vmem:[%s13422_s6 + $0x184] sm:$0xf]  ;;  %v8173_v53 = vld [vmem:[%s13422_s6 + $0x298] sm:$0xf0] }
 0x2ab   :  { %5347 = vmatpush.bf16.msrb.mxu2 %v7888_v63  ;;  %v8040_v59 = vor.u32 %v8861_v1, %v8037_v36 }
 0x2ac   :  { %5322 = vmatpush.bf16.msrb.mxu0 %v7860_v30  ;;  %v4518_v23 = vpop.f32.mrf.mxu0  ;;  %v8213_v30 = vld [vmem:[%s13422_s6 + $0x2f0] sm:$0xf0] }
 0x2ad   :  { %5335 = vmatpush.bf16.msrb.mxu1 %v8052_v45  ;;  %4608 = vmatmul.bf16.vlgmr.msra.gmra.mxu3 %v12436_v56  ;;  %v4519_v20 = vadd.f32 %v4518_v23, %v3333_v57  ;;  %v4531_v22 = vpop.f32.mrf.mxu1  ;;  %v8133_v56 = vld [vmem:[%s13422_s6 + $0x258] sm:$0xf0]  ;;  %v8216_v10 = vor.u32 %v8904_v41, %v8213_v30  ;;  %v8192_v45 = vor.u32 %v8898_v43, %v8189_v44  ;;  %v8093_v57 = vld [vmem:[%s13422_s6 + $0x200] sm:$0xf0]  ;;  %v8875_v43 = vld [vmem:[%s13422_s6 + $0x1f4] sm:$0xf] }
 0x2ae   :  { %5250 = vmatpush.bf16.msrb.mxu3 %v8208_v12  ;;  %v8136_v26 = vor.u32 %v8885_v62, %v8133_v56  ;;  %v8141_v12 = vld [vmem:[%s13422_s6 + $0x260] sm:$0xf0]  ;;  %v8096_v58 = vor.u32 %v8874_v48, %v8093_v57  ;;  %v8868_v23 = vld [vmem:[%s13422_s6 + $0x1bc] sm:$0xf]  ;;  %v8101_v44 = vld [vmem:[%s13422_s6 + $0x208] sm:$0xf0] }
 0x2af   :  { %5323 = vmatmul.bf16.vlgmr.msrb.gmra.mxu0 %v12786_v24  ;;  %v4532_v9 = vadd.f32 %v4531_v22, %v4519_v20  ;;  %5348 = vmatpush.bf16.msrb.mxu2 %v7864_v8  ;;  %v8862_v22 = vld [vmem:[%s13422_s6 + $0x18c] sm:$0xf]  ;;  %v8045_v62 = vld [vmem:[%s13422_s6 + $0x1a0] sm:$0xf0]  ;;  %v8221_v8 = vld [vmem:[%s13422_s6 + $0x2f8] sm:$0xf0] }
 0x2b0   :  { %5336 = vmatmul.bf16.vlgmr.msrb.gmra.mxu1 %v12805_v11  ;;  %v8905_v56 = vld [vmem:[%s13422_s6 + $0x2e4] sm:$0xf] }
 0x2b1   :  { %v4351_v39 = vpop.f32.mrf.mxu3  ;;  %v8224_v13 = vor.u32 %v8905_v56, %v8221_v8  ;;  %v8881_v30 = vld [vmem:[%s13422_s6 + $0x224] sm:$0xf] }
 0x2b2   :  { %5251 = vmatpush.bf16.msrb.mxu3 %v8184_v55  ;;  %5349 = vmatmul.bf16.vlgmr.msrb.gmra.mxu2 %v12786_v24  ;;  %v8867_v24 = vld [vmem:[%s13422_s6 + $0x1b4] sm:$0xf]  ;;  %v8120_v55 = vor.u32 %v8880_v54, %v8117_v47 }
 0x2b3   :  { %v8064_v35 = vor.u32 %v8867_v24, %v8061_v17  ;;  %v8887_v17 = vld [vmem:[%s13422_s6 + $0x254] sm:$0xf] }
 0x2b4   :  { %v4520_v27 = vpop.f32.mrf.mxu0  ;;  %v4544_v4 = vpop.f32.mrf.mxu2 }
 0x2b5   :  { %v4533_v6 = vpop.f32.mrf.mxu1  ;;  %v13260_v34 = vadd.f32 %v4544_v4, %v4532_v9  ;;  %v8197_v27 = vld [vmem:[%s13422_s6 + $0x2c8] sm:$0xf0]  ;;  %v8176_v4 = vor.u32 %v8893_v29, %v8173_v53 }
 0x2b6   :  { %5252 = vmatpush.bf16.msrb.mxu3 %v8160_v2  ;;  %v8069_v2 = vld [vmem:[%s13422_s6 + $0x1d0] sm:$0xf0]  ;;  %v8200_v6 = vor.u32 %v8899_v38, %v8197_v27 }
 0x2b7   :  { %v8072_v20 = vor.u32 %v8868_v23, %v8069_v2 }
 0x2b9   :  { %v4401_v0 = vpop.f32.mrf.mxu3 }
 0x2ba   :  { %5253 = vmatpush.bf16.msrb.mxu3 %v8136_v26  ;;  %v13287_v49 = vadd.f32 %v4401_v0, %v12868_v5  ;;  %v8144_v5 = vor.u32 %v8886_v61, %v8141_v12 }
 0x2bc   :  { %v4546_v60 = vpop.f32.mrf.mxu2 }
 0x2be   :  { %5254 = vmatpush.bf16.msrb.mxu3 %v8112_v15  ;;  %v13341_v15 = vld [vmem:[%s13423_s8] sm:$0x3f] }
 0x2bf   :  { %v4719_v28 = vperm.slane %v13341_v15, 0 }
 0x2c1   :  { %v4403_v25 = vpop.f32.mrf.mxu3 }
 0x2c2   :  { %5255 = vmatpush.bf16.msrb.mxu3 %v8088_v18 }
 0x2c6   :  { %5256 = vmatpush.bf16.msrb.mxu3 %v8064_v35  ;;  %v8149_v35 = vld [vmem:[%s13422_s6 + $0x268] sm:$0xf0] }
 0x2c7   :  { %v8152_v39 = vor.u32 %v8887_v17, %v8149_v35 }
 0x2ca   :  { %5257 = vmatpush.bf16.msrb.mxu3 %v8040_v59  ;;  %v4453_v63 = vpop.f32.mrf.mxu3  ;;  %v8125_v59 = vld [vmem:[%s13422_s6 + $0x238] sm:$0xf0] }
 0x2cb   :  { %v13318_v3 = vadd.f32 %v4453_v63, %v12980_v7  ;;  %v8048_v7 = vor.u32 %v8862_v22, %v8045_v62  ;;  %v8128_v60 = vor.u32 %v8881_v30, %v8125_v59 }
 0x2cc   :  { %v4570_v46 = vpop.f32.mrf.mxu0 }
 0x2cd   :  { %5258 = vmatmul.bf16.vlgmr.msrb.gmra.mxu3 %v12805_v11  ;;  %v4583_v16 = vpop.f32.mrf.mxu1  ;;  %v4571_v19 = vadd.f32 %v4570_v46, %v3334_v51  ;;  %v8863_v46 = vld [vmem:[%s13422_s6 + $0x194] sm:$0xf] }
 0x2ce   :  { %5302 = vmatpush.bf16.msra.mxu3 %v8216_v10 }
 0x2cf   :  { %v4584_v14 = vadd.f32 %v4583_v16, %v4571_v19  ;;  %v8053_v16 = vld [vmem:[%s13422_s6 + $0x1a8] sm:$0xf0] }
 0x2d0   :  { %v8056_v12 = vor.u32 %v8863_v46, %v8053_v16 }
 0x2d2   :  { %5303 = vmatpush.bf16.msra.mxu3 %v8192_v45  ;;  %v4455_v26 = vpop.f32.mrf.mxu3  ;;  %v8104_v45 = vor.u32 %v8875_v43, %v8101_v44 }
 0x2d4   :  { %v4572_v50 = vpop.f32.mrf.mxu0  ;;  %v4596_v33 = vpop.f32.mrf.mxu2 }
 0x2d5   :  { %v4585_v40 = vpop.f32.mrf.mxu1  ;;  %v13315_v52 = vadd.f32 %v4596_v33, %v4584_v14 }
 0x2d6   :  { %5304 = vmatpush.bf16.msra.mxu3 %v8168_v32  ;;  %v8080_v32 = vor.u32 %v8869_v37, %v8077_v21  ;;  %v5458_v21 = vld.sshfl [vmem:[#allocation1] sm:$0xff pattern:$0x73625140] }
 0x2da   :  { %5305 = vmatpush.bf16.msra.mxu3 %v8144_v5 }
 0x2dc   :  { %v4598_v9 = vpop.f32.mrf.mxu2 }
 0x2de   :  { %5306 = vmatpush.bf16.msra.mxu3 %v8120_v55 }
 0x2e2   :  { %5307 = vmatpush.bf16.msra.mxu3 %v8096_v58 }
 0x2e6   :  { %5308 = vmatpush.bf16.msra.mxu3 %v8072_v20 }
 0x2ea   :  { %5309 = vmatpush.bf16.msra.mxu3 %v8048_v7 }
 0x2ec   :  { %v5220_v18 = vpop.f32.mrf.mxu0 }
 0x2ed   :  { %5310 = vmatmul.bf16.vlgmr.msra.gmra.mxu3 %v12805_v11  ;;  %v5221_v24 = vadd.f32 %v5220_v18, %v4719_v28  ;;  %v5233_v1 = vpop.f32.mrf.mxu1 }
 0x2ee   :  { %5354 = vmatpush.bf16.msrb.mxu3 %v8224_v13 }
 0x2ef   :  { %v5234_v36 = vadd.f32 %v5233_v1, %v5221_v24 }
 0x2f0   :  { %v4505_v0 = vpop.f32.mrf.mxu3 }
 0x2f1   :  { %v5367_v41 = vadd.f32 %v5234_v36, %v13252_v31  ;;  %v13377_v51 = vadd.f32 %v4505_v0, %v13173_v42  ;;  %v4721_v42 = vperm.slane %v13341_v15, 2 }
 0x2f2   :  { %5355 = vmatpush.bf16.msrb.mxu3 %v8200_v6 }
 0x2f3   :  { %v8225_v61 = vmul.f32 -1.442695, %v5367_v41 }
 0x2f4   :  { %v5222_v10 = vpop.f32.mrf.mxu0 }
 0x2f5   :  { %v5235_v31 = vpop.f32.mrf.mxu1  ;;  %8913 = vpow2.f32 %v8225_v61  ;;  %v5246_v20 = vpop.f32.mrf.mxu2 }
 0x2f6   :  { %5356 = vmatpush.bf16.msrb.mxu3 %v8176_v4 }
 0x2f8   :  { %v4507_v19 = vpop.f32.mrf.mxu3 }
 0x2fa   :  { %5357 = vmatpush.bf16.msrb.mxu3 %v8152_v39 }
 0x2fb   :  { %v8914_v14 = vpop.eup %8913 }
 0x2fc   :  { %v5375_v25 = vadd.f32 1.0, %v8914_v14 }
 0x2fd   :  { %v5248_v9 = vpop.f32.mrf.mxu2 }
 0x2fe   :  { %5358 = vmatpush.bf16.msrb.mxu3 %v8128_v60  ;;  %8915 = vrcp.f32 %v5375_v25  ;;  %v5388_v38 = vand.u32 2147483648, %v5375_v25  ;;  %vm5382_vm2 = vweird.f32 %v5375_v25  ;;  %v5386_v27 = vand.u32 2147483647, %v5375_v25 }
 0x2ff   :  { %v4724_v9 = vperm.slane %v13341_v15, 5 }
 0x300   :  { %v5389_v18 = vor.u32 1.1754944e-38, %v5388_v38  ;;  %vm5387_vm4 = vcmp.eq.f32.partialorder %v5386_v27, 8.507059e+37 }
 0x302   :  { %5359 = vmatpush.bf16.msrb.mxu3 %v8104_v45 }
 0x304   :  { %v8916_v58 = vpop.eup %8915 }
 0x305   :  { %vm5383_vm1 = vweird.f32 %v8916_v58 }
 0x306   :  { %5360 = vmatpush.bf16.msrb.mxu3 %v8080_v32  ;;  %vm5384_vm3 = vmor %vm5382_vm2, %vm5383_vm1  ;;  %vm5469_vm1 = vcmask 1041408   ;;  %vm5491_vm2 = vcmask 1024  }
 0x30a   :  { %5361 = vmatpush.bf16.msrb.mxu3 %v8056_v12 }
 0x30c   :  { %v5272_v5 = vpop.f32.mrf.mxu0 }
 0x30d   :  { %5362 = vmatmul.bf16.vlgmr.msrb.gmra.mxu3 %v12805_v11  ;;  %v5273_v54 = vadd.f32 %v5272_v5, %v4721_v42  ;;  %v5285_v47 = vpop.f32.mrf.mxu1  ;;  %v5378_v11 = vmul.f32 %v8916_v58, %v5375_v25  ;;  %v4720_v42 = vperm.slane %v13341_v15, 1 }
 0x30f   :  { %v5286_v55 = vadd.f32 %v5285_v47, %v5273_v54  ;;  %v5379_v22 = vsub.f32 1.0, %v5378_v11  ;;  %v5247_v14 = vadd.f32 %v5246_v20, %v4720_v42 }
 0x310   :  { %v4557_v33 = vpop.f32.mrf.mxu3 }
 0x311   :  { %v5407_v50 = vadd.f32 %v5286_v55, %v13318_v3  ;;  %v4558_v63 = vadd.f32 %v4557_v33, %v13260_v34  ;;  %v5380_v56 = vmul.f32 %v8916_v58, %v5379_v22  ;;  %v4723_v3 = vperm.slane %v13341_v15, 4 }
 0x312   :  { %v4722_v55 = vperm.slane %v13341_v15, 3 }
 0x313   :  { %v8227_v40 = vmul.f32 -1.442695, %v5407_v50  ;;  %v5381_v26 = vadd.f32 %v8916_v58, %v5380_v56  ;;  %v18_v56 = vstv %s13424_s10 }
 0x314   :  { %v5274_v48 = vpop.f32.mrf.mxu0  ;;  %19 = vst [vmem:[#allocation2] sm:$0x1] %v18_v56 }
 0x315   :  { %8917 = vpow2.f32 %v8227_v40  ;;  %v5287_v57 = vpop.f32.mrf.mxu1  ;;  %v5385_v29 = vsel %vm5384_vm3, %v8916_v58, %v5381_v26  ;;  %v5298_v17 = vpop.f32.mrf.mxu2 }
 0x316   :  { %v5390_v24 = vsel %vm5387_vm4, %v5389_v18, %v5385_v29  ;;  %v5299_v40 = vadd.f32 %v5298_v17, %v4722_v55 }
 0x318   :  { %v4559_v62 = vpop.f32.mrf.mxu3 }
 0x31b   :  { %v8918_v23 = vpop.eup %8917 }
 0x31c   :  { %v5415_v2 = vadd.f32 1.0, %v8918_v23 }
 0x31d   :  { %v5300_v31 = vpop.f32.mrf.mxu2 }
 0x31e   :  { %8919 = vrcp.f32 %v5415_v2  ;;  %v5428_v36 = vand.u32 2147483648, %v5415_v2  ;;  %vm5422_vm6 = vweird.f32 %v5415_v2  ;;  %v5426_v39 = vand.u32 2147483647, %v5415_v2 }
 0x320   :  { %v5429_v60 = vor.u32 1.1754944e-38, %v5428_v36  ;;  %vm5427_vm8 = vcmp.eq.f32.partialorder %v5426_v39, 8.507059e+37 }
 0x324   :  { %v8920_v8 = vpop.eup %8919 }
 0x325   :  { %v5418_v7 = vmul.f32 %v8920_v8, %v5415_v2  ;;  %vm5423_vm5 = vweird.f32 %v8920_v8 }
 0x326   :  { %vm5424_vm7 = vmor %vm5422_vm6, %vm5423_vm5 }
 0x327   :  { %v5419_v13 = vsub.f32 1.0, %v5418_v7 }
 0x329   :  { %v5420_v6 = vmul.f32 %v8920_v8, %v5419_v13 }
 0x32b   :  { %v5421_v35 = vadd.f32 %v8920_v8, %v5420_v6 }
 0x32c   :  { %v5324_v34 = vpop.f32.mrf.mxu0 }
 0x32d   :  { %v5325_v28 = vadd.f32 %v5324_v34, %v4723_v3  ;;  %v5337_v53 = vpop.f32.mrf.mxu1  ;;  %v5425_v59 = vsel %vm5424_vm7, %v8920_v8, %v5421_v35 }
 0x32e   :  { %v5430_v43 = vsel %vm5427_vm8, %v5429_v60, %v5425_v59 }
 0x32f   :  { %v5338_v4 = vadd.f32 %v5337_v53, %v5325_v28  ;;  %v5453_v0 = vsub.f32 1.0, %v5430_v43  ;;  %v5462_v46 = vmul.f32 %v5458_v21, %v5430_v43 }
 0x330   :  { %v4609_v44 = vpop.f32.mrf.mxu3 }
 0x331   :  { %v5447_v1 = vmul.f32 %v5390_v24, %v5338_v4  ;;  %v13391_v45 = vadd.f32 %v4609_v44, %v13315_v52 }
 0x333   :  { %v5449_v41 = vadd.f32 %v5447_v1, %v4558_v63 }
 0x334   :  { %v5326_v30 = vpop.f32.mrf.mxu0 }
 0x335   :  { %8921 = vtanh.f32 %v5449_v41  ;;  %v5339_v10 = vpop.f32.mrf.mxu1  ;;  %v5350_v12 = vpop.f32.mrf.mxu2  ;;  %v5473_v41 = vld [vmem:[%s13425_s9] sm:$0x3] }
 0x336   :  { %v5351_v27 = vadd.f32 %v5350_v12, %v4724_v9  ;;  %v5475_v59 = vperm.slane %v5473_v41, 0  ;;  %v5459_v10 = vld.sshfl [vmem:[#allocation1 + $0x8] sm:$0xff pattern:$0x73625140]  ;;  %v5476_v31 = vperm.slane %v5473_v41, 1 }
 0x338   :  { %v4611_v61 = vpop.f32.mrf.mxu3 }
 0x33b   :  { %v8922_v37 = vpop.eup %8921 }
 0x33c   :  { %v5455_v32 = vmul.f32 %v8922_v37, %v5453_v0 }
 0x33d   :  { %v5352_v19 = vpop.f32.mrf.mxu2 }
 0x33e   :  { %v13393_v16 = vadd.f32 %v5462_v46, %v5455_v32  ;;  %v8912_v19 = vld [vmem:[#allocation2] ss:$0 sm:$0xff] }
 0x350   :  { %v5259_v5 = vpop.f32.mrf.mxu3 }
 0x351   :  { %v5260_v25 = vadd.f32 %v5259_v5, %v5247_v14 }
 0x353   :  { %v5368_v54 = vadd.f32 %v5260_v25, %v13287_v49 }
 0x355   :  { %v8226_v52 = vmul.f32 -1.442695, %v5368_v54 }
 0x357   :  { %8923 = vpow2.f32 %v8226_v52 }
 0x358   :  { %v5261_v47 = vpop.f32.mrf.mxu3 }
 0x35d   :  { %v8924_v50 = vpop.eup %8923 }
 0x35e   :  { %v5376_v48 = vadd.f32 1.0, %v8924_v50 }
 0x360   :  { %8925 = vrcp.f32 %v5376_v48  ;;  %v5403_v26 = vand.u32 2147483648, %v5376_v48  ;;  %vm5397_vm10 = vweird.f32 %v5376_v48  ;;  %v5401_v13 = vand.u32 2147483647, %v5376_v48 }
 0x362   :  { %v5404_v28 = vor.u32 1.1754944e-38, %v5403_v26  ;;  %vm5402_vm12 = vcmp.eq.f32.partialorder %v5401_v13, 8.507059e+37 }
 0x366   :  { %v8926_v23 = vpop.eup %8925 }
 0x367   :  { %v5393_v2 = vmul.f32 %v8926_v23, %v5376_v48  ;;  %vm5398_vm9 = vweird.f32 %v8926_v23 }
 0x368   :  { %vm5399_vm11 = vmor %vm5397_vm10, %vm5398_vm9 }
 0x369   :  { %v5394_v22 = vsub.f32 1.0, %v5393_v2 }
 0x36b   :  { %v5395_v62 = vmul.f32 %v8926_v23, %v5394_v22 }
 0x370   :  { %v5311_v57 = vpop.f32.mrf.mxu3 }
 0x371   :  { %v5312_v58 = vadd.f32 %v5311_v57, %v5299_v40 }
 0x373   :  { %v5408_v33 = vadd.f32 %v5312_v58, %v13377_v51  ;;  %v5396_v51 = vadd.f32 %v8926_v23, %v5395_v62 }
 0x375   :  { %v8228_v63 = vmul.f32 -1.442695, %v5408_v33  ;;  %v5400_v34 = vsel %vm5399_vm11, %v8926_v23, %v5396_v51 }
 0x376   :  { %v5405_v53 = vsel %vm5402_vm12, %v5404_v28, %v5400_v34 }
 0x377   :  { %8927 = vpow2.f32 %v8228_v63 }
 0x378   :  { %v5313_v11 = vpop.f32.mrf.mxu3 }
 0x37d   :  { %v8928_v20 = vpop.eup %8927 }
 0x37e   :  { %v5416_v49 = vadd.f32 1.0, %v8928_v20 }
 0x380   :  { %8929 = vrcp.f32 %v5416_v49  ;;  %v5443_v24 = vand.u32 2147483648, %v5416_v49  ;;  %vm5437_vm14 = vweird.f32 %v5416_v49  ;;  %v5441_v15 = vand.u32 2147483647, %v5416_v49 }
 0x382   :  { %v5444_v1 = vor.u32 1.1754944e-38, %v5443_v24  ;;  %vm5442_vm0 = vcmp.eq.f32.partialorder %v5441_v15, 8.507059e+37 }
 0x386   :  { %v8930_v8 = vpop.eup %8929 }
 0x387   :  { %v5433_v7 = vmul.f32 %v8930_v8, %v5416_v49  ;;  %vm5438_vm13 = vweird.f32 %v8930_v8 }
 0x388   :  { %vm5439_vm15 = vmor %vm5437_vm14, %vm5438_vm13 }
 0x389   :  { %v5434_v3 = vsub.f32 1.0, %v5433_v7 }
 0x38b   :  { %v5435_v38 = vmul.f32 %v8930_v8, %v5434_v3 }
 0x38d   :  { %v5436_v18 = vadd.f32 %v8930_v8, %v5435_v38 }
 0x38f   :  { %v5440_v35 = vsel %vm5439_vm15, %v8930_v8, %v5436_v18 }
 0x390   :  { %v5363_v6 = vpop.f32.mrf.mxu3  ;;  %v5445_v39 = vsel %vm5442_vm0, %v5444_v1, %v5440_v35 }
 0x391   :  { %v5364_v29 = vadd.f32 %v5363_v6, %v5351_v27  ;;  %v5454_v30 = vsub.f32 1.0, %v5445_v39  ;;  %v5463_v44 = vmul.f32 %v5459_v10, %v5445_v39 }
 0x393   :  { %v5448_v4 = vmul.f32 %v5405_v53, %v5364_v29 }
 0x395   :  { %v5450_v17 = vadd.f32 %v5448_v4, %v13391_v45  ;;  %v5479_v45 = vmul.f32 %v5475_v59, %v13393_v16 }
 0x397   :  { %8931 = vtanh.f32 %v5450_v17  ;;  %v5481_v32 = vsel %vm5469_vm1, %v5479_v45, 0.0 }
 0x398   :  { %v5365_v36 = vpop.f32.mrf.mxu3 }
 0x39d   :  { %v8932_v60 = vpop.eup %8931 }
 0x39e   :  { %v5456_v43 = vmul.f32 %v8932_v60, %v5454_v30 }
 0x3a0   :  { %v5465_v0 = vadd.f32 %v5463_v44, %v5456_v43 }
 0x3a2   :  { %v5468_v37 = vrot.slane %v5465_v0, 6  ;;  %v5480_v21 = vmul.f32 %v5476_v31, %v5465_v0 }
 0x3a4   :  { %v5482_v46 = vsel %vm5469_vm1, %v5480_v21, 0.0  ;;  %v5470_v61 = vsel %vm5469_vm1, %v13393_v16, %v5468_v37 }
 0x3a5   :  { %v5483_v12 = vadd.f32 %v5482_v46, %v5481_v32  ;;  %5472 = vst [vmem:[%s13426_s12] sm:$0xf] %v5470_v61 }
 0x3a7   :  { %5484 = vadd.xlane.f32.xlu0 %v5483_v12 }
 0x41a   :  { %v5485_v42 = vpop.xlane.xlu0 %5484 }
 0x41b   :  { %v5490_v14 = vadd.f32 %v8912_v19, %v5485_v42 }
 0x41d   :  { %5492 = vst.msk [vmem:[%s13427_s11] sm:$0x3] %vm5491_vm2, %v5490_v14 }

</bundles_post_ra>
